<compile_context>
chip_gen: v7x
topology: tpu7x:2x2x1
jax: 0.10.0
libtpu: 0.0.40
codegen_flags: <defaults>
</compile_context>

<pallas_src>
import functools

import jax
import jax.numpy as jnp
from jax.experimental import pallas as pl
from jax.experimental.pallas import tpu as pltpu


LANE = 128          # TPU vreg lane width
CHAN_UNIT = 32      # channel padding unit: 4 parity planes * 32 = 128 lanes


def _round_up(x, m):
    return (x + m - 1) // m * m


def _vmem_capacity_bytes():
    """Per-generation VMEM capacity (v5e/v6e 128 MiB, v7x 64 MiB); conservative
    fallback if the query is unavailable."""
    cap = 64 << 20
    try:
        info = pltpu.get_tpu_info()
        cap = int(getattr(info, "vmem_capacity_bytes", cap))
    except Exception:
        pass
    return cap


def _pick_divisor_block(total, *, unit, fits, want_steps=2):
    """Largest divisor b of `total` with (b % unit == 0 or b == total) that
    satisfies fits(b); prefers sizes leaving >= want_steps grid steps so a
    'parallel' grid axis can be sharded across v7x's two TensorCores."""
    cands = [d for d in range(1, total + 1)
             if total % d == 0 and (d % unit == 0 or d == total)]
    ok = [d for d in cands if fits(d)] or [min(cands)]
    pref = [d for d in ok if total // d >= want_steps]
    return max(pref) if pref else max(ok)


# ----------------------------------------------------------------------------
# Kernel 1: channel-expand (1 -> 3) + per-channel (x - mean) * istd.
# Tiled over N and the lane axis (blocks are multiples of 128 lanes and the
# grid has >= 2 parallel steps); mean/istd are SMEM scalars.
# ----------------------------------------------------------------------------
def _normalize_kernel(x_ref, mean_ref, istd_ref, o_ref):
    x = x_ref[...]                                   # (nb, hw_blk) f32
    for c in range(3):                               # static unroll over RGB
        o_ref[:, c, :] = (x - mean_ref[c]) * istd_ref[c]


def normalize_expand(x_flat, mean_vec, istd_vec):
    """(N, H*W) grayscale -> (N, 3, H*W) with out[:, c] = (x - mean[c]) * istd[c]."""
    n, hw = x_flat.shape
    budget = _vmem_capacity_bytes() // 4

    def fits_n(nb):
        return nb * hw * 4 * 4 * 2 <= budget          # (in + 3ch out) f32, 2x buffered

    nb = _pick_divisor_block(n, unit=8, fits=fits_n, want_steps=2)

    def fits_hw(hb):
        return nb * hb * 4 * 4 * 2 <= budget

    hw_blk = _pick_divisor_block(
        hw, unit=LANE, fits=fits_hw, want_steps=2 if n // nb < 2 else 1)

    return pl.pallas_call(
        _normalize_kernel,
        out_shape=jax.ShapeDtypeStruct((n, 3, hw), jnp.float32),
        grid=(n // nb, hw // hw_blk),
        in_specs=[
            pl.BlockSpec((nb, hw_blk), lambda i, j: (i, j)),
            pl.BlockSpec(memory_space=pltpu.MemorySpace.SMEM),
            pl.BlockSpec(memory_space=pltpu.MemorySpace.SMEM),
        ],
        out_specs=pl.BlockSpec((nb, 3, hw_blk), lambda i, j: (i, 0, j)),
        compiler_params=pltpu.CompilerParams(
            dimension_semantics=("parallel", "parallel")),
    )(x_flat, mean_vec, istd_vec)


# ----------------------------------------------------------------------------
# Kernel 2: fused (pack + normalize) + 3x3 / stride-2 / pad-1 conv + bias + ReLU.
#
# The kernel receives the un-inflated parity-split activation
#     x_par[n, rp*2+cp, i, j(, c)] = x[n, 2i+rp, 2j+cp(, c)]
# and builds the zero-padded, parity-folded conv input
#     pk[n, i, j, p*cinp + c] = x_pad[n, 2i+ph, 2j+pw, c],   p = ph*2 + pw
# in a VMEM scratch (it never exists in HBM).  The 3x3/s2 conv is then 4
# merged-tap MXU dots, one per spatial offset group (kh//2, kw//2), each over
# the full K = 4*cinp contraction; taps absent from a group have zero weight
# rows.  The 4 dots accumulate into a local f32 value; bias + ReLU are fused in
# the epilogue and each output ref is stored exactly once.
# ----------------------------------------------------------------------------
def _conv3x3s2_kernel(*refs, nb, ho, wo, cinp, coutp, expand_gray, emit_bf16):
    if expand_gray:
        x_ref, w_ref, b_ref, scale_ref, shift_ref = refs[:5]
        rest = refs[5:]
    else:
        x_ref, w_ref, b_ref = refs[:3]
        scale_ref = shift_ref = None
        rest = refs[3:]
    if emit_bf16:
        feat_ref, nxt_ref, pk_ref = rest
    else:
        feat_ref, pk_ref = rest
        nxt_ref = None

    k4 = 4 * cinp
    m = nb * ho * wo

    # (1) zero halo.  Re-zeroed every grid step: cheap, and megacore-safe (a TC
    # sharding the "parallel" axis may never execute step 0, so a
    # program_id==0 init of persistent scratch would be wrong).
    pk_ref[...] = jnp.zeros(pk_ref.shape, pk_ref.dtype)

    # (2) parity placement (+ grayscale -> cinp-channel normalize for stage 1).
    # The scratch is f32 so all offset stores are plain 32-bit masked stores;
    # activations are cast to bf16 only at the MXU input.
    for ph in range(2):
        for pw in range(2):
            p = ph * 2 + pw
            src = (1 - ph) * 2 + (1 - pw)            # raw parity feeding plane (ph, pw)
            if expand_gray:
                gray = x_ref[:, src]                                 # (nb, ho, wo) f32
                val = gray[..., None] * scale_ref[0] - shift_ref[0]  # -> (nb, ho, wo, cinp)
            else:
                val = x_ref[:, src].astype(jnp.float32)              # (nb, ho, wo, cinp)
            pk_ref[:, pl.ds(1 - ph, ho), pl.ds(1 - pw, wo),
                   pl.ds(p * cinp, cinp)] = val

    # (3) 4 merged-tap dots, f32 accumulation in a local value (no o_ref RMW).
    acc = jnp.zeros((m, coutp), jnp.float32)
    for g_idx, (oh, ow) in enumerate(((0, 0), (0, 1), (1, 0), (1, 1))):
        a = pk_ref[:, pl.ds(oh, ho), pl.ds(ow, wo), :].reshape(m, k4)
        acc = acc + jnp.dot(a.astype(jnp.bfloat16), w_ref[g_idx],
                            preferred_element_type=jnp.float32)

    # (4) epilogue: bias + ReLU, exactly one store per output tensor.
    acc = jnp.maximum(acc + b_ref[...], 0.0)
    feat_ref[...] = acc
    if emit_bf16:
        nxt_ref[...] = acc.astype(jnp.bfloat16)


def conv3x3_s2_relu(x_par, w_grp, b_row, *, ho, wo, cinp,
                    expand_gray, scale_row=None, shift_row=None,
                    emit_bf16=False):
    """x_par: parity-split activation
         expand_gray=True :  (N, 4, ho, wo)        f32 raw grayscale (stage 1)
         expand_gray=False:  (N, 4, ho, wo, cinp)  bf16 activations   (stage 2)
       w_grp: (4, 4*cinp, coutp) bf16 merged-tap group weights
       b_row: (1, coutp) f32
       Returns flattened NHWC conv+bias+ReLU outputs:
         (feat_f32,) or (feat_f32, feat_bf16) of shape (N*ho*wo, coutp)."""
    n = x_par.shape[0]
    coutp = w_grp.shape[-1]
    hh, wh = ho + 1, wo + 1
    k4 = 4 * cinp
    assert w_grp.shape == (4, k4, coutp)
    assert (ho * wo) % 8 == 0

    in_ch = 1 if expand_gray else cinp
    in_itm = 4 if expand_gray else 2
    cap = _vmem_capacity_bytes()
    budget = cap // 2                                 # headroom for compiler scratch

    def need(nb):
        m = nb * ho * wo
        b = 2 * nb * 4 * ho * wo * in_ch * in_itm     # x_par block, double buffered
        b += 2 * 4 * k4 * coutp * 2                   # group weights (bf16)
        b += 2 * (k4 + 3 * coutp) * 4                 # bias / scale / shift rows
        b += 2 * m * coutp * 4                        # f32 feature output block
        if emit_bf16:
            b += 2 * m * coutp * 2                    # bf16 inter-stage output block
        b += nb * hh * wh * k4 * 4                    # f32 packed scratch (single copy)
        b += m * coutp * 4                            # local accumulator
        return b

    def fits(nb):
        # VMEM budget + keep the accumulator around <=32 vregs so it stays resident.
        return need(nb) <= budget and nb * ho * wo * coutp * 4 <= (128 << 10)

    nb = _pick_divisor_block(n, unit=1, fits=fits, want_steps=2)
    m_blk = nb * ho * wo
    vmem_limit = int(min(cap * 3 // 4, max(need(nb) + (8 << 20), 32 << 20)))

    in_specs = [
        pl.BlockSpec((nb, 4, ho, wo), lambda i: (i, 0, 0, 0)) if expand_gray
        else pl.BlockSpec((nb, 4, ho, wo, cinp), lambda i: (i, 0, 0, 0, 0)),
        pl.BlockSpec((4, k4, coutp), lambda i: (0, 0, 0)),
        pl.BlockSpec((1, coutp), lambda i: (0, 0)),
    ]
    args = [x_par, w_grp, b_row]
    if expand_gray:
        in_specs += [pl.BlockSpec((1, cinp), lambda i: (0, 0)),
                     pl.BlockSpec((1, cinp), lambda i: (0, 0))]
        args += [scale_row, shift_row]

    out_shapes = [jax.ShapeDtypeStruct((n * ho * wo, coutp), jnp.float32)]
    out_specs = [pl.BlockSpec((m_blk, coutp), lambda i: (i, 0))]
    if emit_bf16:
        out_shapes.append(jax.ShapeDtypeStruct((n * ho * wo, coutp), jnp.bfloat16))
        out_specs.append(pl.BlockSpec((m_blk, coutp), lambda i: (i, 0)))

    kernel = functools.partial(
        _conv3x3s2_kernel, nb=nb, ho=ho, wo=wo, cinp=cinp, coutp=coutp,
        expand_gray=expand_gray, emit_bf16=emit_bf16)

    res = pl.pallas_call(
        kernel,
        out_shape=tuple(out_shapes),
        grid=(n // nb,),
        in_specs=in_specs,
        out_specs=tuple(out_specs),
        scratch_shapes=[pltpu.VMEM((nb, hh, wh, k4), jnp.float32)],
        compiler_params=pltpu.CompilerParams(
            dimension_semantics=("parallel",),
            vmem_limit_bytes=vmem_limit),
    )(*args)
    if not isinstance(res, (tuple, list)):
        res = (res,)
    return tuple(res)


# ----------------------------------------------------------------------------
# Host-side (XLA) prep: un-inflated parity-split relayout and weight packing.
# ----------------------------------------------------------------------------
def _parity_split(x):
    """(N, H, W, ...) -> (N, 4, H//2, W//2, ...); plane rp*2+cp = x[:, rp::2, cp::2].
    A pure, size-preserving relayout: the only XLA-side data movement left
    between kernels."""
    n, h, w = x.shape[:3]
    tail = x.shape[3:]
    y = x.reshape((n, h // 2, 2, w // 2, 2) + tail)
    perm = (0, 2, 4, 1, 3) + tuple(range(5, 5 + len(tail)))
    return jnp.transpose(y, perm).reshape((n, 4, h // 2, w // 2) + tail)


def _prep_conv_params(w_oihw, b, cin_pad, cout_pad):
    """Torch (O, I, 3, 3) conv weight -> merged-tap group weights.

    Group g = (kh//2)*2 + (kw//2) is one (4*cin_pad, cout_pad) matrix whose
    parity-plane block p = (kh%2)*2 + (kw%2) holds w[:, :, kh, kw] for the taps
    belonging to the group and zeros elsewhere, so the kernel does a single
    full-K MXU dot per spatial offset group (4 dots instead of 9 taps).
    Padded channels stay exactly zero (zero weight rows + zero bias => ReLU 0)."""
    cout, cin = w_oihw.shape[0], w_oihw.shape[1]
    wt = jnp.transpose(w_oihw, (2, 3, 1, 0))                       # (3,3,Cin,Cout) HWIO
    wt = jnp.pad(wt, ((0, 0), (0, 0), (0, cin_pad - cin), (0, cout_pad - cout)))
    wg = jnp.zeros((2, 2, 4, cin_pad, cout_pad), wt.dtype)
    for kh in range(3):
        for kw in range(3):
            wg = wg.at[kh // 2, kw // 2, (kh % 2) * 2 + (kw % 2)].set(wt[kh, kw])
    wg = wg.reshape(4, 4 * cin_pad, cout_pad).astype(jnp.bfloat16)
    bias = jnp.pad(b, (0, cout_pad - cout)).reshape(1, cout_pad).astype(jnp.float32)
    return wg, bias


@jax.jit
def smp_encoder_forward(x, mean, istd, w1, b1, w2, b2):
    """x: (B, 1, D, H, W) float32 in [0, 255].  Returns the smp-style pyramid
    [xn, f1, f2] in NCHW with depth folded into the batch (N = B*D)."""
    B, C, Dd, H, W = x.shape
    assert C == 1 and H % 4 == 0 and W % 4 == 0
    n = B * Dd
    c1, c2 = w1.shape[0], w2.shape[0]

    # permute(0,1,3,4,2) + expand(1->3) + (x - mean)/std; image (b, d) = x[b, 0, d]
    x2d = x[:, 0].reshape(n, H, W)
    mean3 = mean.reshape(3)
    istd3 = istd.reshape(3)

    # pyramid level 0 (exact f32 normalize)
    xn = normalize_expand(x2d.reshape(n, H * W), mean3, istd3).reshape(n, 3, H, W)

    # ---- stage 1: grayscale -> (normalize + expand + pack in-kernel) conv ----
    cinp1 = CHAN_UNIT                                 # 3 real channels -> 32 (4*32 = 128 lanes)
    coutp1 = _round_up(c1, CHAN_UNIT)
    w1g, b1r = _prep_conv_params(w1, b1, cinp1, coutp1)
    scale1 = jnp.zeros((1, cinp1), jnp.float32).at[0, :3].set(istd3)
    shift1 = jnp.zeros((1, cinp1), jnp.float32).at[0, :3].set(mean3 * istd3)
    h1, w1o = H // 2, W // 2
    f1_f32, f1_bf16 = conv3x3_s2_relu(
        _parity_split(x2d), w1g, b1r, ho=h1, wo=w1o, cinp=cinp1,
        expand_gray=True, scale_row=scale1, shift_row=shift1, emit_bf16=True)
    f1 = jnp.transpose(f1_f32.reshape(n, h1, w1o, coutp1)[..., :c1], (0, 3, 1, 2))

    # ---- stage 2: conv on the bf16 inter-stage tensor (pack in-kernel) ----
    cinp2 = coutp1
    coutp2 = _round_up(c2, CHAN_UNIT)
    w2g, b2r = _prep_conv_params(w2, b2, cinp2, coutp2)
    h2o, w2o = h1 // 2, w1o // 2
    (f2_f32,) = conv3x3_s2_relu(
        _parity_split(f1_bf16.reshape(n, h1, w1o, cinp2)), w2g, b2r,
        ho=h2o, wo=w2o, cinp=cinp2, expand_gray=False)
    f2 = jnp.transpose(f2_f32.reshape(n, h2o, w2o, coutp2)[..., :c2], (0, 3, 1, 2))

    return [xn, f1, f2]


def _reference_forward(x, mean, istd, w1, b1, w2, b2):
    """Pure-JAX f32 reference with the exact module semantics."""
    B, _, Dd, H, W = x.shape
    n = B * Dd
    x2d = x[:, 0].reshape(n, 1, H, W)
    xn = (jnp.broadcast_to(x2d, (n, 3, H, W)) - mean.reshape(1, 3, 1, 1)) \
        * istd.reshape(1, 3, 1, 1)

    def conv(z, w, b):
        y = jax.lax.conv_general_dilated(
            z, w, window_strides=(2, 2), padding=((1, 1), (1, 1)),
            dimension_numbers=("NCHW", "OIHW", "NCHW"))
        return jnp.maximum(y + b.reshape(1, -1, 1, 1), 0.0)

    f1 = conv(xn, w1, b1)
    f2 = conv(f1, w2, b2)
    return [xn, f1, f2]


if __name__ == "__main__":
    key = jax.random.PRNGKey(0)
    k_x, k_w1, k_b1, k_w2, k_b2 = jax.random.split(key, 5)

    B, D, H, W = 2, 4, 16, 16
    C1, C2 = 16, 32

    x = jax.random.uniform(k_x, (B, 1, D, H, W), jnp.float32, 0.0, 255.0)

    # registered buffers of the module: ImageNet mean/std scaled by 255
    mean = jnp.array([0.485, 0.456, 0.406], jnp.float32) * 255.0
    std = jnp.array([0.229, 0.224, 0.225], jnp.float32) * 255.0
    istd = 1.0 / std

    # TODO(synk): deterministic synthetic 2-stage encoder stands in for
    # get_encoder_smp(model_name=...) with pretrained weights.
    w1 = jax.random.normal(k_w1, (C1, 3, 3, 3), jnp.float32) / jnp.sqrt(27.0)
    b1 = jax.random.normal(k_b1, (C1,), jnp.float32) * 0.1
    w2 = jax.random.normal(k_w2, (C2, C1, 3, 3), jnp.float32) / jnp.sqrt(C1 * 9.0)
    b2 = jax.random.normal(k_b2, (C2,), jnp.float32) * 0.1

    feats = smp_encoder_forward(x, mean, istd, w1, b1, w2, b2)
    feats = jax.block_until_ready(feats)

    N = B * D
    assert feats[0].shape == (N, 3, H, W)
    assert feats[1].shape == (N, C1, H // 2, W // 2)
    assert feats[2].shape == (N, C2, H // 4, W // 4)

    # correctness vs a pure-JAX f32 reference (conv MXU inputs are bf16, so the
    # tolerance is loose but far below any structural-error signal)
    refs = _reference_forward(x, mean, istd, w1, b1, w2, b2)
    for got, ref in zip(feats, refs):
        err = jnp.max(jnp.abs(got - ref)) / (jnp.max(jnp.abs(ref)) + 1e-6)
        assert float(err) < 8e-2, float(err)

    print("KERNEL_OK")
</pallas_src>

<mosaic_0001>
module attributes {stable_mosaic.version = 11 : i64} {
  func.func @_conv3x3s2_kernel(%arg0: i32, %arg1: memref<4x4x8x8xf32, #tpu.memory_space<vmem>>, %arg2: memref<4x128x32xbf16, #tpu.memory_space<vmem>>, %arg3: memref<1x32xf32, #tpu.memory_space<vmem>>, %arg4: memref<1x32xf32, #tpu.memory_space<vmem>>, %arg5: memref<1x32xf32, #tpu.memory_space<vmem>>, %arg6: memref<256x32xf32, #tpu.memory_space<vmem>>, %arg7: memref<256x32xbf16, #tpu.memory_space<vmem>>, %arg8: memref<4x9x9x128xf32, #tpu.memory_space<vmem>>) attributes {dimension_semantics = [#tpu.dimension_semantics<parallel>], iteration_bounds = array<i64: 2>, scalar_prefetch = 0 : i64, scratch_operands = 1 : i64, tpu.core_type = #tpu.core_type<tc>, window_params = [{transform_indices = @transform_0, window_bounds = array<i64: 4, 4, 8, 8>}, {pipeline_mode = #tpu.pipeline_mode<synchronous>, transform_indices = @transform_1, window_bounds = array<i64: 4, 128, 32>}, {pipeline_mode = #tpu.pipeline_mode<synchronous>, transform_indices = @transform_2, window_bounds = array<i64: 1, 32>}, {pipeline_mode = #tpu.pipeline_mode<synchronous>, transform_indices = @transform_3, window_bounds = array<i64: 1, 32>}, {pipeline_mode = #tpu.pipeline_mode<synchronous>, transform_indices = @transform_4, window_bounds = array<i64: 1, 32>}, {transform_indices = @transform_5, window_bounds = array<i64: 256, 32>}, {transform_indices = @transform_6, window_bounds = array<i64: 256, 32>}]} {
    %cst = arith.constant 0.000000e+00 : f32
    %0 = vector.broadcast %cst : f32 to vector<4x9x9x128xf32>
    %c0 = arith.constant 0 : index
    %c0_0 = arith.constant 0 : index
    %c0_1 = arith.constant 0 : index
    %c0_2 = arith.constant 0 : index
    %1 = vector.load %arg8[%c0, %c0_0, %c0_1, %c0_2] : memref<4x9x9x128xf32, #tpu.memory_space<vmem>>, vector<4x9x9x128xf32>
    tpu.vector_store %arg8[%c0, %c0_0, %c0_1, %c0_2], %0 {strides = array<i32>} : memref<4x9x9x128xf32, #tpu.memory_space<vmem>>, vector<4x9x9x128xf32>,
    %c0_3 = arith.constant 0 : index
    %c3 = arith.constant 3 : index
    %c0_4 = arith.constant 0 : index
    %c0_5 = arith.constant 0 : index
    %2 = vector.load %arg1[%c0_3, %c3, %c0_4, %c0_5] : memref<4x4x8x8xf32, #tpu.memory_space<vmem>>, vector<4x1x8x8xf32>
    %3 = vector.shape_cast %2 : vector<4x1x8x8xf32> to vector<4x8x8xf32>
    %4 = vector.shape_cast %3 : vector<4x8x8xf32> to vector<4x8x8x1xf32>
    %c0_6 = arith.constant 0 : index
    %c0_7 = arith.constant 0 : index
    %5 = vector.load %arg4[%c0_6, %c0_7] : memref<1x32xf32, #tpu.memory_space<vmem>>, vector<1x32xf32>
    %6 = vector.shape_cast %5 : vector<1x32xf32> to vector<32xf32>
    %7 = vector.shape_cast %6 : vector<32xf32> to vector<1x1x1x32xf32>
    %8 = vector.broadcast %4 : vector<4x8x8x1xf32> to vector<4x8x8x32xf32>
    %9 = vector.broadcast %7 : vector<1x1x1x32xf32> to vector<4x8x8x32xf32>
    %10 = arith.mulf %8, %9 : vector<4x8x8x32xf32>
    %c0_8 = arith.constant 0 : index
    %c0_9 = arith.constant 0 : index
    %11 = vector.load %arg5[%c0_8, %c0_9] : memref<1x32xf32, #tpu.memory_space<vmem>>, vector<1x32xf32>
    %12 = vector.shape_cast %11 : vector<1x32xf32> to vector<32xf32>
    %13 = vector.shape_cast %12 : vector<32xf32> to vector<1x1x1x32xf32>
    %14 = vector.broadcast %13 : vector<1x1x1x32xf32> to vector<4x8x8x32xf32>
    %15 = arith.subf %10, %14 : vector<4x8x8x32xf32>
    %c0_10 = arith.constant 0 : index
    %c1 = arith.constant 1 : index
    %c1_11 = arith.constant 1 : index
    %c0_12 = arith.constant 0 : index
    %16 = vector.load %arg8[%c0_10, %c1, %c1_11, %c0_12] : memref<4x9x9x128xf32, #tpu.memory_space<vmem>>, vector<4x8x8x32xf32>
    tpu.vector_store %arg8[%c0_10, %c1, %c1_11, %c0_12], %15 {strides = array<i32>} : memref<4x9x9x128xf32, #tpu.memory_space<vmem>>, vector<4x8x8x32xf32>,
    %c0_13 = arith.constant 0 : index
    %c2 = arith.constant 2 : index
    %c0_14 = arith.constant 0 : index
    %c0_15 = arith.constant 0 : index
    %17 = vector.load %arg1[%c0_13, %c2, %c0_14, %c0_15] : memref<4x4x8x8xf32, #tpu.memory_space<vmem>>, vector<4x1x8x8xf32>
    %18 = vector.shape_cast %17 : vector<4x1x8x8xf32> to vector<4x8x8xf32>
    %19 = vector.shape_cast %18 : vector<4x8x8xf32> to vector<4x8x8x1xf32>
    %c0_16 = arith.constant 0 : index
    %c0_17 = arith.constant 0 : index
    %20 = vector.load %arg4[%c0_16, %c0_17] : memref<1x32xf32, #tpu.memory_space<vmem>>, vector<1x32xf32>
    %21 = vector.shape_cast %20 : vector<1x32xf32> to vector<32xf32>
    %22 = vector.shape_cast %21 : vector<32xf32> to vector<1x1x1x32xf32>
    %23 = vector.broadcast %19 : vector<4x8x8x1xf32> to vector<4x8x8x32xf32>
    %24 = vector.broadcast %22 : vector<1x1x1x32xf32> to vector<4x8x8x32xf32>
    %25 = arith.mulf %23, %24 : vector<4x8x8x32xf32>
    %c0_18 = arith.constant 0 : index
    %c0_19 = arith.constant 0 : index
    %26 = vector.load %arg5[%c0_18, %c0_19] : memref<1x32xf32, #tpu.memory_space<vmem>>, vector<1x32xf32>
    %27 = vector.shape_cast %26 : vector<1x32xf32> to vector<32xf32>
    %28 = vector.shape_cast %27 : vector<32xf32> to vector<1x1x1x32xf32>
    %29 = vector.broadcast %28 : vector<1x1x1x32xf32> to vector<4x8x8x32xf32>
    %30 = arith.subf %25, %29 : vector<4x8x8x32xf32>
    %c0_20 = arith.constant 0 : index
    %c1_21 = arith.constant 1 : index
    %c0_22 = arith.constant 0 : index
    %c32 = arith.constant 32 : index
    %31 = vector.load %arg8[%c0_20, %c1_21, %c0_22, %c32] : memref<4x9x9x128xf32, #tpu.memory_space<vmem>>, vector<4x8x8x32xf32>
    tpu.vector_store %arg8[%c0_20, %c1_21, %c0_22, %c32], %30 {strides = array<i32>} : memref<4x9x9x128xf32, #tpu.memory_space<vmem>>, vector<4x8x8x32xf32>,
    %c0_23 = arith.constant 0 : index
    %c1_24 = arith.constant 1 : index
    %c0_25 = arith.constant 0 : index
    %c0_26 = arith.constant 0 : index
    %32 = vector.load %arg1[%c0_23, %c1_24, %c0_25, %c0_26] : memref<4x4x8x8xf32, #tpu.memory_space<vmem>>, vector<4x1x8x8xf32>
    %33 = vector.shape_cast %32 : vector<4x1x8x8xf32> to vector<4x8x8xf32>
    %34 = vector.shape_cast %33 : vector<4x8x8xf32> to vector<4x8x8x1xf32>
    %c0_27 = arith.constant 0 : index
    %c0_28 = arith.constant 0 : index
    %35 = vector.load %arg4[%c0_27, %c0_28] : memref<1x32xf32, #tpu.memory_space<vmem>>, vector<1x32xf32>
    %36 = vector.shape_cast %35 : vector<1x32xf32> to vector<32xf32>
    %37 = vector.shape_cast %36 : vector<32xf32> to vector<1x1x1x32xf32>
    %38 = vector.broadcast %34 : vector<4x8x8x1xf32> to vector<4x8x8x32xf32>
    %39 = vector.broadcast %37 : vector<1x1x1x32xf32> to vector<4x8x8x32xf32>
    %40 = arith.mulf %38, %39 : vector<4x8x8x32xf32>
    %c0_29 = arith.constant 0 : index
    %c0_30 = arith.constant 0 : index
    %41 = vector.load %arg5[%c0_29, %c0_30] : memref<1x32xf32, #tpu.memory_space<vmem>>, vector<1x32xf32>
    %42 = vector.shape_cast %41 : vector<1x32xf32> to vector<32xf32>
    %43 = vector.shape_cast %42 : vector<32xf32> to vector<1x1x1x32xf32>
    %44 = vector.broadcast %43 : vector<1x1x1x32xf32> to vector<4x8x8x32xf32>
    %45 = arith.subf %40, %44 : vector<4x8x8x32xf32>
    %c0_31 = arith.constant 0 : index
    %c0_32 = arith.constant 0 : index
    %c1_33 = arith.constant 1 : index
    %c64 = arith.constant 64 : index
    %46 = vector.load %arg8[%c0_31, %c0_32, %c1_33, %c64] : memref<4x9x9x128xf32, #tpu.memory_space<vmem>>, vector<4x8x8x32xf32>
    tpu.vector_store %arg8[%c0_31, %c0_32, %c1_33, %c64], %45 {strides = array<i32>} : memref<4x9x9x128xf32, #tpu.memory_space<vmem>>, vector<4x8x8x32xf32>,
    %c0_34 = arith.constant 0 : index
    %c0_35 = arith.constant 0 : index
    %c0_36 = arith.constant 0 : index
    %c0_37 = arith.constant 0 : index
    %47 = vector.load %arg1[%c0_34, %c0_35, %c0_36, %c0_37] : memref<4x4x8x8xf32, #tpu.memory_space<vmem>>, vector<4x1x8x8xf32>
    %48 = vector.shape_cast %47 : vector<4x1x8x8xf32> to vector<4x8x8xf32>
    %49 = vector.shape_cast %48 : vector<4x8x8xf32> to vector<4x8x8x1xf32>
    %c0_38 = arith.constant 0 : index
    %c0_39 = arith.constant 0 : index
    %50 = vector.load %arg4[%c0_38, %c0_39] : memref<1x32xf32, #tpu.memory_space<vmem>>, vector<1x32xf32>
    %51 = vector.shape_cast %50 : vector<1x32xf32> to vector<32xf32>
    %52 = vector.shape_cast %51 : vector<32xf32> to vector<1x1x1x32xf32>
    %53 = vector.broadcast %49 : vector<4x8x8x1xf32> to vector<4x8x8x32xf32>
    %54 = vector.broadcast %52 : vector<1x1x1x32xf32> to vector<4x8x8x32xf32>
    %55 = arith.mulf %53, %54 : vector<4x8x8x32xf32>
    %c0_40 = arith.constant 0 : index
    %c0_41 = arith.constant 0 : index
    %56 = vector.load %arg5[%c0_40, %c0_41] : memref<1x32xf32, #tpu.memory_space<vmem>>, vector<1x32xf32>
    %57 = vector.shape_cast %56 : vector<1x32xf32> to vector<32xf32>
    %58 = vector.shape_cast %57 : vector<32xf32> to vector<1x1x1x32xf32>
    %59 = vector.broadcast %58 : vector<1x1x1x32xf32> to vector<4x8x8x32xf32>
    %60 = arith.subf %55, %59 : vector<4x8x8x32xf32>
    %c0_42 = arith.constant 0 : index
    %c0_43 = arith.constant 0 : index
    %c0_44 = arith.constant 0 : index
    %c96 = arith.constant 96 : index
    %61 = vector.load %arg8[%c0_42, %c0_43, %c0_44, %c96] : memref<4x9x9x128xf32, #tpu.memory_space<vmem>>, vector<4x8x8x32xf32>
    tpu.vector_store %arg8[%c0_42, %c0_43, %c0_44, %c96], %60 {strides = array<i32>} : memref<4x9x9x128xf32, #tpu.memory_space<vmem>>, vector<4x8x8x32xf32>,
    %cst_45 = arith.constant 0.000000e+00 : f32
    %62 = vector.broadcast %cst_45 : f32 to vector<256x32xf32>
    %c0_46 = arith.constant 0 : index
    %c0_47 = arith.constant 0 : index
    %c0_48 = arith.constant 0 : index
    %c0_49 = arith.constant 0 : index
    %63 = vector.load %arg8[%c0_46, %c0_47, %c0_48, %c0_49] : memref<4x9x9x128xf32, #tpu.memory_space<vmem>>, vector<4x8x8x128xf32>
    %64 = vector.shape_cast %63 : vector<4x8x8x128xf32> to vector<256x128xf32>
    %65 = arith.truncf %64 : vector<256x128xf32> to vector<256x128xbf16>
    %c0_50 = arith.constant 0 : index
    %c0_51 = arith.constant 0 : index
    %c0_52 = arith.constant 0 : index
    %66 = vector.load %arg2[%c0_50, %c0_51, %c0_52] : memref<4x128x32xbf16, #tpu.memory_space<vmem>>, vector<1x128x32xbf16>
    %67 = vector.shape_cast %66 : vector<1x128x32xbf16> to vector<128x32xbf16>
    %cst_53 = arith.constant dense<0.000000e+00> : vector<256x32xf32>
    %68 = tpu.matmul %65, %67, %cst_53 {dimension_numbers = #tpu.dot_dimension_numbers<[1], [0], [0], [1], [0, 0, 1, 1], [], []>} : vector<256x128xbf16>, vector<128x32xbf16>, vector<256x32xf32> -> vector<256x32xf32>
    %69 = arith.addf %62, %68 : vector<256x32xf32>
    %c0_54 = arith.constant 0 : index
    %c0_55 = arith.constant 0 : index
    %c1_56 = arith.constant 1 : index
    %c0_57 = arith.constant 0 : index
    %70 = vector.load %arg8[%c0_54, %c0_55, %c1_56, %c0_57] : memref<4x9x9x128xf32, #tpu.memory_space<vmem>>, vector<4x8x8x128xf32>
    %71 = vector.shape_cast %70 : vector<4x8x8x128xf32> to vector<256x128xf32>
    %72 = arith.truncf %71 : vector<256x128xf32> to vector<256x128xbf16>
    %c1_58 = arith.constant 1 : index
    %c0_59 = arith.constant 0 : index
    %c0_60 = arith.constant 0 : index
    %73 = vector.load %arg2[%c1_58, %c0_59, %c0_60] : memref<4x128x32xbf16, #tpu.memory_space<vmem>>, vector<1x128x32xbf16>
    %74 = vector.shape_cast %73 : vector<1x128x32xbf16> to vector<128x32xbf16>
    %cst_61 = arith.constant dense<0.000000e+00> : vector<256x32xf32>
    %75 = tpu.matmul %72, %74, %cst_61 {dimension_numbers = #tpu.dot_dimension_numbers<[1], [0], [0], [1], [0, 0, 1, 1], [], []>} : vector<256x128xbf16>, vector<128x32xbf16>, vector<256x32xf32> -> vector<256x32xf32>
    %76 = arith.addf %69, %75 : vector<256x32xf32>
    %c0_62 = arith.constant 0 : index
    %c1_63 = arith.constant 1 : index
    %c0_64 = arith.constant 0 : index
    %c0_65 = arith.constant 0 : index
    %77 = vector.load %arg8[%c0_62, %c1_63, %c0_64, %c0_65] : memref<4x9x9x128xf32, #tpu.memory_space<vmem>>, vector<4x8x8x128xf32>
    %78 = vector.shape_cast %77 : vector<4x8x8x128xf32> to vector<256x128xf32>
    %79 = arith.truncf %78 : vector<256x128xf32> to vector<256x128xbf16>
    %c2_66 = arith.constant 2 : index
    %c0_67 = arith.constant 0 : index
    %c0_68 = arith.constant 0 : index
    %80 = vector.load %arg2[%c2_66, %c0_67, %c0_68] : memref<4x128x32xbf16, #tpu.memory_space<vmem>>, vector<1x128x32xbf16>
    %81 = vector.shape_cast %80 : vector<1x128x32xbf16> to vector<128x32xbf16>
    %cst_69 = arith.constant dense<0.000000e+00> : vector<256x32xf32>
    %82 = tpu.matmul %79, %81, %cst_69 {dimension_numbers = #tpu.dot_dimension_numbers<[1], [0], [0], [1], [0, 0, 1, 1], [], []>} : vector<256x128xbf16>, vector<128x32xbf16>, vector<256x32xf32> -> vector<256x32xf32>
    %83 = arith.addf %76, %82 : vector<256x32xf32>
    %c0_70 = arith.constant 0 : index
    %c1_71 = arith.constant 1 : index
    %c1_72 = arith.constant 1 : index
    %c0_73 = arith.constant 0 : index
    %84 = vector.load %arg8[%c0_70, %c1_71, %c1_72, %c0_73] : memref<4x9x9x128xf32, #tpu.memory_space<vmem>>, vector<4x8x8x128xf32>
    %85 = vector.shape_cast %84 : vector<4x8x8x128xf32> to vector<256x128xf32>
    %86 = arith.truncf %85 : vector<256x128xf32> to vector<256x128xbf16>
    %c3_74 = arith.constant 3 : index
    %c0_75 = arith.constant 0 : index
    %c0_76 = arith.constant 0 : index
    %87 = vector.load %arg2[%c3_74, %c0_75, %c0_76] : memref<4x128x32xbf16, #tpu.memory_space<vmem>>, vector<1x128x32xbf16>
    %88 = vector.shape_cast %87 : vector<1x128x32xbf16> to vector<128x32xbf16>
    %cst_77 = arith.constant dense<0.000000e+00> : vector<256x32xf32>
    %89 = tpu.matmul %86, %88, %cst_77 {dimension_numbers = #tpu.dot_dimension_numbers<[1], [0], [0], [1], [0, 0, 1, 1], [], []>} : vector<256x128xbf16>, vector<128x32xbf16>, vector<256x32xf32> -> vector<256x32xf32>
    %90 = arith.addf %83, %89 : vector<256x32xf32>
    %c0_78 = arith.constant 0 : index
    %c0_79 = arith.constant 0 : index
    %91 = vector.load %arg3[%c0_78, %c0_79] : memref<1x32xf32, #tpu.memory_space<vmem>>, vector<1x32xf32>
    %92 = vector.broadcast %91 : vector<1x32xf32> to vector<256x32xf32>
    %93 = arith.addf %90, %92 : vector<256x32xf32>
    %cst_80 = arith.constant 0.000000e+00 : f32
    %94 = vector.broadcast %cst_80 : f32 to vector<256x32xf32>
    %95 = arith.maximumf %93, %94 : vector<256x32xf32>
    %c0_81 = arith.constant 0 : index
    %c0_82 = arith.constant 0 : index
    %96 = vector.load %arg6[%c0_81, %c0_82] : memref<256x32xf32, #tpu.memory_space<vmem>>, vector<256x32xf32>
    tpu.vector_store %arg6[%c0_81, %c0_82], %95 {strides = array<i32>} : memref<256x32xf32, #tpu.memory_space<vmem>>, vector<256x32xf32>,
    %97 = arith.truncf %95 : vector<256x32xf32> to vector<256x32xbf16>
    %c0_83 = arith.constant 0 : index
    %c0_84 = arith.constant 0 : index
    %98 = vector.load %arg7[%c0_83, %c0_84] : memref<256x32xbf16, #tpu.memory_space<vmem>>, vector<256x32xbf16>
    tpu.vector_store %arg7[%c0_83, %c0_84], %97 {strides = array<i32>} : memref<256x32xbf16, #tpu.memory_space<vmem>>, vector<256x32xbf16>,
    return
  }
  func.func @transform_0(%arg0: i32) -> (i32, i32, i32, i32) {
    %c0_i32 = arith.constant 0 : i32
    %c0_i32_0 = arith.constant 0 : i32
    %c0_i32_1 = arith.constant 0 : i32
    %c0_i32_2 = arith.constant 0 : i32
    return %arg0, %c0_i32, %c0_i32_0, %c0_i32_1 : i32, i32, i32, i32
  }
  func.func @transform_1(%arg0: i32) -> (i32, i32, i32) {
    %c0_i32 = arith.constant 0 : i32
    %c0_i32_0 = arith.constant 0 : i32
    %c0_i32_1 = arith.constant 0 : i32
    %c0_i32_2 = arith.constant 0 : i32
    return %c0_i32, %c0_i32_0, %c0_i32_1 : i32, i32, i32
  }
  func.func @transform_2(%arg0: i32) -> (i32, i32) {
    %c0_i32 = arith.constant 0 : i32
    %c0_i32_0 = arith.constant 0 : i32
    %c0_i32_1 = arith.constant 0 : i32
    return %c0_i32, %c0_i32_0 : i32, i32
  }
  func.func @transform_3(%arg0: i32) -> (i32, i32) {
    %c0_i32 = arith.constant 0 : i32
    %c0_i32_0 = arith.constant 0 : i32
    %c0_i32_1 = arith.constant 0 : i32
    return %c0_i32, %c0_i32_0 : i32, i32
  }
  func.func @transform_4(%arg0: i32) -> (i32, i32) {
    %c0_i32 = arith.constant 0 : i32
    %c0_i32_0 = arith.constant 0 : i32
    %c0_i32_1 = arith.constant 0 : i32
    return %c0_i32, %c0_i32_0 : i32, i32
  }
  func.func @transform_5(%arg0: i32) -> (i32, i32) {
    %c0_i32 = arith.constant 0 : i32
    %c0_i32_0 = arith.constant 0 : i32
    return %arg0, %c0_i32 : i32, i32
  }
  func.func @transform_6(%arg0: i32) -> (i32, i32) {
    %c0_i32 = arith.constant 0 : i32
    %c0_i32_0 = arith.constant 0 : i32
    return %arg0, %c0_i32 : i32, i32
  }
}

module attributes {stable_mosaic.version = 11 : i64} {
  func.func @_conv3x3s2_kernel(%arg0: i32, %arg1: memref<4x4x4x4x32xbf16, #tpu.memory_space<vmem>>, %arg2: memref<4x128x32xbf16, #tpu.memory_space<vmem>>, %arg3: memref<1x32xf32, #tpu.memory_space<vmem>>, %arg4: memref<64x32xf32, #tpu.memory_space<vmem>>, %arg5: memref<4x5x5x128xf32, #tpu.memory_space<vmem>>) attributes {dimension_semantics = [#tpu.dimension_semantics<parallel>], iteration_bounds = array<i64: 2>, scalar_prefetch = 0 : i64, scratch_operands = 1 : i64, tpu.core_type = #tpu.core_type<tc>, window_params = [{transform_indices = @transform_0, window_bounds = array<i64: 4, 4, 4, 4, 32>}, {pipeline_mode = #tpu.pipeline_mode<synchronous>, transform_indices = @transform_1, window_bounds = array<i64: 4, 128, 32>}, {pipeline_mode = #tpu.pipeline_mode<synchronous>, transform_indices = @transform_2, window_bounds = array<i64: 1, 32>}, {transform_indices = @transform_3, window_bounds = array<i64: 64, 32>}]} {
    %cst = arith.constant 0.000000e+00 : f32
    %0 = vector.broadcast %cst : f32 to vector<4x5x5x128xf32>
    %c0 = arith.constant 0 : index
    %c0_0 = arith.constant 0 : index
    %c0_1 = arith.constant 0 : index
    %c0_2 = arith.constant 0 : index
    %1 = vector.load %arg5[%c0, %c0_0, %c0_1, %c0_2] : memref<4x5x5x128xf32, #tpu.memory_space<vmem>>, vector<4x5x5x128xf32>
    tpu.vector_store %arg5[%c0, %c0_0, %c0_1, %c0_2], %0 {strides = array<i32>} : memref<4x5x5x128xf32, #tpu.memory_space<vmem>>, vector<4x5x5x128xf32>,
    %c0_3 = arith.constant 0 : index
    %c3 = arith.constant 3 : index
    %c0_4 = arith.constant 0 : index
    %c0_5 = arith.constant 0 : index
    %c0_6 = arith.constant 0 : index
    %2 = vector.load %arg1[%c0_3, %c3, %c0_4, %c0_5, %c0_6] : memref<4x4x4x4x32xbf16, #tpu.memory_space<vmem>>, vector<4x1x4x4x32xbf16>
    %3 = vector.shape_cast %2 : vector<4x1x4x4x32xbf16> to vector<4x4x4x32xbf16>
    %4 = arith.extf %3 : vector<4x4x4x32xbf16> to vector<4x4x4x32xf32>
    %c0_7 = arith.constant 0 : index
    %c1 = arith.constant 1 : index
    %c1_8 = arith.constant 1 : index
    %c0_9 = arith.constant 0 : index
    %5 = vector.load %arg5[%c0_7, %c1, %c1_8, %c0_9] : memref<4x5x5x128xf32, #tpu.memory_space<vmem>>, vector<4x4x4x32xf32>
    tpu.vector_store %arg5[%c0_7, %c1, %c1_8, %c0_9], %4 {strides = array<i32>} : memref<4x5x5x128xf32, #tpu.memory_space<vmem>>, vector<4x4x4x32xf32>,
    %c0_10 = arith.constant 0 : index
    %c2 = arith.constant 2 : index
    %c0_11 = arith.constant 0 : index
    %c0_12 = arith.constant 0 : index
    %c0_13 = arith.constant 0 : index
    %6 = vector.load %arg1[%c0_10, %c2, %c0_11, %c0_12, %c0_13] : memref<4x4x4x4x32xbf16, #tpu.memory_space<vmem>>, vector<4x1x4x4x32xbf16>
    %7 = vector.shape_cast %6 : vector<4x1x4x4x32xbf16> to vector<4x4x4x32xbf16>
    %8 = arith.extf %7 : vector<4x4x4x32xbf16> to vector<4x4x4x32xf32>
    %c0_14 = arith.constant 0 : index
    %c1_15 = arith.constant 1 : index
    %c0_16 = arith.constant 0 : index
    %c32 = arith.constant 32 : index
    %9 = vector.load %arg5[%c0_14, %c1_15, %c0_16, %c32] : memref<4x5x5x128xf32, #tpu.memory_space<vmem>>, vector<4x4x4x32xf32>
    tpu.vector_store %arg5[%c0_14, %c1_15, %c0_16, %c32], %8 {strides = array<i32>} : memref<4x5x5x128xf32, #tpu.memory_space<vmem>>, vector<4x4x4x32xf32>,
    %c0_17 = arith.constant 0 : index
    %c1_18 = arith.constant 1 : index
    %c0_19 = arith.constant 0 : index
    %c0_20 = arith.constant 0 : index
    %c0_21 = arith.constant 0 : index
    %10 = vector.load %arg1[%c0_17, %c1_18, %c0_19, %c0_20, %c0_21] : memref<4x4x4x4x32xbf16, #tpu.memory_space<vmem>>, vector<4x1x4x4x32xbf16>
    %11 = vector.shape_cast %10 : vector<4x1x4x4x32xbf16> to vector<4x4x4x32xbf16>
    %12 = arith.extf %11 : vector<4x4x4x32xbf16> to vector<4x4x4x32xf32>
    %c0_22 = arith.constant 0 : index
    %c0_23 = arith.constant 0 : index
    %c1_24 = arith.constant 1 : index
    %c64 = arith.constant 64 : index
    %13 = vector.load %arg5[%c0_22, %c0_23, %c1_24, %c64] : memref<4x5x5x128xf32, #tpu.memory_space<vmem>>, vector<4x4x4x32xf32>
    tpu.vector_store %arg5[%c0_22, %c0_23, %c1_24, %c64], %12 {strides = array<i32>} : memref<4x5x5x128xf32, #tpu.memory_space<vmem>>, vector<4x4x4x32xf32>,
    %c0_25 = arith.constant 0 : index
    %c0_26 = arith.constant 0 : index
    %c0_27 = arith.constant 0 : index
    %c0_28 = arith.constant 0 : index
    %c0_29 = arith.constant 0 : index
    %14 = vector.load %arg1[%c0_25, %c0_26, %c0_27, %c0_28, %c0_29] : memref<4x4x4x4x32xbf16, #tpu.memory_space<vmem>>, vector<4x1x4x4x32xbf16>
    %15 = vector.shape_cast %14 : vector<4x1x4x4x32xbf16> to vector<4x4x4x32xbf16>
    %16 = arith.extf %15 : vector<4x4x4x32xbf16> to vector<4x4x4x32xf32>
    %c0_30 = arith.constant 0 : index
    %c0_31 = arith.constant 0 : index
    %c0_32 = arith.constant 0 : index
    %c96 = arith.constant 96 : index
    %17 = vector.load %arg5[%c0_30, %c0_31, %c0_32, %c96] : memref<4x5x5x128xf32, #tpu.memory_space<vmem>>, vector<4x4x4x32xf32>
    tpu.vector_store %arg5[%c0_30, %c0_31, %c0_32, %c96], %16 {strides = array<i32>} : memref<4x5x5x128xf32, #tpu.memory_space<vmem>>, vector<4x4x4x32xf32>,
    %cst_33 = arith.constant 0.000000e+00 : f32
    %18 = vector.broadcast %cst_33 : f32 to vector<64x32xf32>
    %c0_34 = arith.constant 0 : index
    %c0_35 = arith.constant 0 : index
    %c0_36 = arith.constant 0 : index
    %c0_37 = arith.constant 0 : index
    %19 = vector.load %arg5[%c0_34, %c0_35, %c0_36, %c0_37] : memref<4x5x5x128xf32, #tpu.memory_space<vmem>>, vector<4x4x4x128xf32>
    %20 = vector.shape_cast %19 : vector<4x4x4x128xf32> to vector<64x128xf32>
    %21 = arith.truncf %20 : vector<64x128xf32> to vector<64x128xbf16>
    %c0_38 = arith.constant 0 : index
    %c0_39 = arith.constant 0 : index
    %c0_40 = arith.constant 0 : index
    %22 = vector.load %arg2[%c0_38, %c0_39, %c0_40] : memref<4x128x32xbf16, #tpu.memory_space<vmem>>, vector<1x128x32xbf16>
    %23 = vector.shape_cast %22 : vector<1x128x32xbf16> to vector<128x32xbf16>
    %cst_41 = arith.constant dense<0.000000e+00> : vector<64x32xf32>
    %24 = tpu.matmul %21, %23, %cst_41 {dimension_numbers = #tpu.dot_dimension_numbers<[1], [0], [0], [1], [0, 0, 1, 1], [], []>} : vector<64x128xbf16>, vector<128x32xbf16>, vector<64x32xf32> -> vector<64x32xf32>
    %25 = arith.addf %18, %24 : vector<64x32xf32>
    %c0_42 = arith.constant 0 : index
    %c0_43 = arith.constant 0 : index
    %c1_44 = arith.constant 1 : index
    %c0_45 = arith.constant 0 : index
    %26 = vector.load %arg5[%c0_42, %c0_43, %c1_44, %c0_45] : memref<4x5x5x128xf32, #tpu.memory_space<vmem>>, vector<4x4x4x128xf32>
    %27 = vector.shape_cast %26 : vector<4x4x4x128xf32> to vector<64x128xf32>
    %28 = arith.truncf %27 : vector<64x128xf32> to vector<64x128xbf16>
    %c1_46 = arith.constant 1 : index
    %c0_47 = arith.constant 0 : index
    %c0_48 = arith.constant 0 : index
    %29 = vector.load %arg2[%c1_46, %c0_47, %c0_48] : memref<4x128x32xbf16, #tpu.memory_space<vmem>>, vector<1x128x32xbf16>
    %30 = vector.shape_cast %29 : vector<1x128x32xbf16> to vector<128x32xbf16>
    %cst_49 = arith.constant dense<0.000000e+00> : vector<64x32xf32>
    %31 = tpu.matmul %28, %30, %cst_49 {dimension_numbers = #tpu.dot_dimension_numbers<[1], [0], [0], [1], [0, 0, 1, 1], [], []>} : vector<64x128xbf16>, vector<128x32xbf16>, vector<64x32xf32> -> vector<64x32xf32>
    %32 = arith.addf %25, %31 : vector<64x32xf32>
    %c0_50 = arith.constant 0 : index
    %c1_51 = arith.constant 1 : index
    %c0_52 = arith.constant 0 : index
    %c0_53 = arith.constant 0 : index
    %33 = vector.load %arg5[%c0_50, %c1_51, %c0_52, %c0_53] : memref<4x5x5x128xf32, #tpu.memory_space<vmem>>, vector<4x4x4x128xf32>
    %34 = vector.shape_cast %33 : vector<4x4x4x128xf32> to vector<64x128xf32>
    %35 = arith.truncf %34 : vector<64x128xf32> to vector<64x128xbf16>
    %c2_54 = arith.constant 2 : index
    %c0_55 = arith.constant 0 : index
    %c0_56 = arith.constant 0 : index
    %36 = vector.load %arg2[%c2_54, %c0_55, %c0_56] : memref<4x128x32xbf16, #tpu.memory_space<vmem>>, vector<1x128x32xbf16>
    %37 = vector.shape_cast %36 : vector<1x128x32xbf16> to vector<128x32xbf16>
    %cst_57 = arith.constant dense<0.000000e+00> : vector<64x32xf32>
    %38 = tpu.matmul %35, %37, %cst_57 {dimension_numbers = #tpu.dot_dimension_numbers<[1], [0], [0], [1], [0, 0, 1, 1], [], []>} : vector<64x128xbf16>, vector<128x32xbf16>, vector<64x32xf32> -> vector<64x32xf32>
    %39 = arith.addf %32, %38 : vector<64x32xf32>
    %c0_58 = arith.constant 0 : index
    %c1_59 = arith.constant 1 : index
    %c1_60 = arith.constant 1 : index
    %c0_61 = arith.constant 0 : index
    %40 = vector.load %arg5[%c0_58, %c1_59, %c1_60, %c0_61] : memref<4x5x5x128xf32, #tpu.memory_space<vmem>>, vector<4x4x4x128xf32>
    %41 = vector.shape_cast %40 : vector<4x4x4x128xf32> to vector<64x128xf32>
    %42 = arith.truncf %41 : vector<64x128xf32> to vector<64x128xbf16>
    %c3_62 = arith.constant 3 : index
    %c0_63 = arith.constant 0 : index
    %c0_64 = arith.constant 0 : index
    %43 = vector.load %arg2[%c3_62, %c0_63, %c0_64] : memref<4x128x32xbf16, #tpu.memory_space<vmem>>, vector<1x128x32xbf16>
    %44 = vector.shape_cast %43 : vector<1x128x32xbf16> to vector<128x32xbf16>
    %cst_65 = arith.constant dense<0.000000e+00> : vector<64x32xf32>
    %45 = tpu.matmul %42, %44, %cst_65 {dimension_numbers = #tpu.dot_dimension_numbers<[1], [0], [0], [1], [0, 0, 1, 1], [], []>} : vector<64x128xbf16>, vector<128x32xbf16>, vector<64x32xf32> -> vector<64x32xf32>
    %46 = arith.addf %39, %45 : vector<64x32xf32>
    %c0_66 = arith.constant 0 : index
    %c0_67 = arith.constant 0 : index
    %47 = vector.load %arg3[%c0_66, %c0_67] : memref<1x32xf32, #tpu.memory_space<vmem>>, vector<1x32xf32>
    %48 = vector.broadcast %47 : vector<1x32xf32> to vector<64x32xf32>
    %49 = arith.addf %46, %48 : vector<64x32xf32>
    %cst_68 = arith.constant 0.000000e+00 : f32
    %50 = vector.broadcast %cst_68 : f32 to vector<64x32xf32>
    %51 = arith.maximumf %49, %50 : vector<64x32xf32>
    %c0_69 = arith.constant 0 : index
    %c0_70 = arith.constant 0 : index
    %52 = vector.load %arg4[%c0_69, %c0_70] : memref<64x32xf32, #tpu.memory_space<vmem>>, vector<64x32xf32>
    tpu.vector_store %arg4[%c0_69, %c0_70], %51 {strides = array<i32>} : memref<64x32xf32, #tpu.memory_space<vmem>>, vector<64x32xf32>,
    return
  }
  func.func @transform_0(%arg0: i32) -> (i32, i32, i32, i32, i32) {
    %c0_i32 = arith.constant 0 : i32
    %c0_i32_0 = arith.constant 0 : i32
    %c0_i32_1 = arith.constant 0 : i32
    %c0_i32_2 = arith.constant 0 : i32
    %c0_i32_3 = arith.constant 0 : i32
    return %arg0, %c0_i32, %c0_i32_0, %c0_i32_1, %c0_i32_2 : i32, i32, i32, i32, i32
  }
  func.func @transform_1(%arg0: i32) -> (i32, i32, i32) {
    %c0_i32 = arith.constant 0 : i32
    %c0_i32_0 = arith.constant 0 : i32
    %c0_i32_1 = arith.constant 0 : i32
    %c0_i32_2 = arith.constant 0 : i32
    return %c0_i32, %c0_i32_0, %c0_i32_1 : i32, i32, i32
  }
  func.func @transform_2(%arg0: i32) -> (i32, i32) {
    %c0_i32 = arith.constant 0 : i32
    %c0_i32_0 = arith.constant 0 : i32
    %c0_i32_1 = arith.constant 0 : i32
    return %c0_i32, %c0_i32_0 : i32, i32
  }
  func.func @transform_3(%arg0: i32) -> (i32, i32) {
    %c0_i32 = arith.constant 0 : i32
    %c0_i32_0 = arith.constant 0 : i32
    return %arg0, %c0_i32 : i32, i32
  }
}

module attributes {stable_mosaic.version = 11 : i64} {
  func.func @_normalize_kernel(%arg0: i32, %arg1: i32, %arg2: memref<8x128xf32, #tpu.memory_space<vmem>>, %arg3: memref<3xf32, #tpu.memory_space<smem>>, %arg4: memref<3xf32, #tpu.memory_space<smem>>, %arg5: memref<8x3x128xf32, #tpu.memory_space<vmem>>) attributes {dimension_semantics = [#tpu.dimension_semantics<parallel>, #tpu.dimension_semantics<parallel>], iteration_bounds = array<i64: 1, 2>, scalar_prefetch = 0 : i64, scratch_operands = 0 : i64, tpu.core_type = #tpu.core_type<tc>, window_params = [{transform_indices = @transform_0, window_bounds = array<i64: 8, 128>}, {transform_indices = @transform_1, window_bounds = array<i64: 3>}, {transform_indices = @transform_2, window_bounds = array<i64: 3>}, {transform_indices = @transform_3, window_bounds = array<i64: 8, 3, 128>}]} {
    %c0 = arith.constant 0 : index
    %c0_0 = arith.constant 0 : index
    %0 = vector.load %arg2[%c0, %c0_0] : memref<8x128xf32, #tpu.memory_space<vmem>>, vector<8x128xf32>
    %c0_1 = arith.constant 0 : index
    %1 = memref.load %arg3[%c0_1] : memref<3xf32, #tpu.memory_space<smem>>
    %2 = vector.broadcast %1 : f32 to vector<8x128xf32>
    %3 = arith.subf %0, %2 : vector<8x128xf32>
    %c0_2 = arith.constant 0 : index
    %4 = memref.load %arg4[%c0_2] : memref<3xf32, #tpu.memory_space<smem>>
    %5 = vector.broadcast %4 : f32 to vector<8x128xf32>
    %6 = arith.mulf %3, %5 : vector<8x128xf32>
    %c0_3 = arith.constant 0 : index
    %c0_4 = arith.constant 0 : index
    %c0_5 = arith.constant 0 : index
    %7 = vector.load %arg5[%c0_3, %c0_4, %c0_5] : memref<8x3x128xf32, #tpu.memory_space<vmem>>, vector<8x1x128xf32>
    %8 = vector.shape_cast %7 : vector<8x1x128xf32> to vector<8x128xf32>
    %9 = vector.shape_cast %6 : vector<8x128xf32> to vector<8x1x128xf32>
    tpu.vector_store %arg5[%c0_3, %c0_4, %c0_5], %9 {strides = array<i32>} : memref<8x3x128xf32, #tpu.memory_space<vmem>>, vector<8x1x128xf32>,
    %c1 = arith.constant 1 : index
    %10 = memref.load %arg3[%c1] : memref<3xf32, #tpu.memory_space<smem>>
    %11 = vector.broadcast %10 : f32 to vector<8x128xf32>
    %12 = arith.subf %0, %11 : vector<8x128xf32>
    %c1_6 = arith.constant 1 : index
    %13 = memref.load %arg4[%c1_6] : memref<3xf32, #tpu.memory_space<smem>>
    %14 = vector.broadcast %13 : f32 to vector<8x128xf32>
    %15 = arith.mulf %12, %14 : vector<8x128xf32>
    %c0_7 = arith.constant 0 : index
    %c1_8 = arith.constant 1 : index
    %c0_9 = arith.constant 0 : index
    %16 = vector.load %arg5[%c0_7, %c1_8, %c0_9] : memref<8x3x128xf32, #tpu.memory_space<vmem>>, vector<8x1x128xf32>
    %17 = vector.shape_cast %16 : vector<8x1x128xf32> to vector<8x128xf32>
    %18 = vector.shape_cast %15 : vector<8x128xf32> to vector<8x1x128xf32>
    tpu.vector_store %arg5[%c0_7, %c1_8, %c0_9], %18 {strides = array<i32>} : memref<8x3x128xf32, #tpu.memory_space<vmem>>, vector<8x1x128xf32>,
    %c2 = arith.constant 2 : index
    %19 = memref.load %arg3[%c2] : memref<3xf32, #tpu.memory_space<smem>>
    %20 = vector.broadcast %19 : f32 to vector<8x128xf32>
    %21 = arith.subf %0, %20 : vector<8x128xf32>
    %c2_10 = arith.constant 2 : index
    %22 = memref.load %arg4[%c2_10] : memref<3xf32, #tpu.memory_space<smem>>
    %23 = vector.broadcast %22 : f32 to vector<8x128xf32>
    %24 = arith.mulf %21, %23 : vector<8x128xf32>
    %c0_11 = arith.constant 0 : index
    %c2_12 = arith.constant 2 : index
    %c0_13 = arith.constant 0 : index
    %25 = vector.load %arg5[%c0_11, %c2_12, %c0_13] : memref<8x3x128xf32, #tpu.memory_space<vmem>>, vector<8x1x128xf32>
    %26 = vector.shape_cast %25 : vector<8x1x128xf32> to vector<8x128xf32>
    %27 = vector.shape_cast %24 : vector<8x128xf32> to vector<8x1x128xf32>
    tpu.vector_store %arg5[%c0_11, %c2_12, %c0_13], %27 {strides = array<i32>} : memref<8x3x128xf32, #tpu.memory_space<vmem>>, vector<8x1x128xf32>,
    return
  }
  func.func @transform_0(%arg0: i32, %arg1: i32) -> (i32, i32) {
    %c0_i32 = arith.constant 0 : i32
    return %arg0, %arg1 : i32, i32
  }
  func.func @transform_1(%arg0: i32, %arg1: i32) -> i32 {
    %c0_i32 = arith.constant 0 : i32
    %c0_i32_0 = arith.constant 0 : i32
    return %c0_i32 : i32
  }
  func.func @transform_2(%arg0: i32, %arg1: i32) -> i32 {
    %c0_i32 = arith.constant 0 : i32
    %c0_i32_0 = arith.constant 0 : i32
    return %c0_i32 : i32
  }
  func.func @transform_3(%arg0: i32, %arg1: i32) -> (i32, i32, i32) {
    %c0_i32 = arith.constant 0 : i32
    %c0_i32_0 = arith.constant 0 : i32
    return %arg0, %c0_i32, %arg1 : i32, i32, i32
  }
}

</mosaic_0001>

<bundles_post_ra>
// kernel: squeeze.30
= control target key start
LH: loop header
LB: loop body
LE: loop exit
PB: predicated region body
PF: predicated region fallthrough
CT: control target
= control target key end

     0   :  { %vm1282_vm0 = vcmask 1047556   ;;  %s3830_s10 = smov 4   ;;  %vm1284_vm1 = vcmask 31744   ;;  %vm1765_vm2 = vcmask 64544   ;;  %s5345_s0 = inlined_call_operand.vmem [shape: f32[2,1,4,16,16], index: 0, kind: input, shape index: {}]   ;;  %s5346_s1 = inlined_call_operand.vmem [shape: f32[8,8,2,8,2], index: 1, kind: output, shape index: {}]  }
   0x1   :  { %v3695_v0 = vld [vmem:[%s5345_s0 + $0xe] sm:$0x3]  ;;  %v3696_v1 = vld [vmem:[%s5345_s0 + $0xc] sm:$0x3]  ;;  %v3697_v2 = vld [vmem:[%s5345_s0 + $0xa] sm:$0x3] }
   0x2   :  { %1248 = vst [vmem:[#allocation1 + $0x38] sm:$0x3] %v3695_v0  ;;  %1253 = vst [vmem:[#allocation1 + $0x30] sm:$0x3] %v3696_v1  ;;  %v3698_v3 = vld [vmem:[%s5345_s0 + $0x8] sm:$0x3] }
   0x3   :  { %1258 = vst [vmem:[#allocation1 + $0x28] sm:$0x3] %v3697_v2  ;;  %v3699_v4 = vld [vmem:[%s5345_s0 + $0x6] sm:$0x3]  ;;  %v3700_v5 = vld [vmem:[%s5345_s0 + $0x4] sm:$0x3] }
   0x4   :  { %1263 = vst [vmem:[#allocation1 + $0x20] sm:$0x3] %v3698_v3  ;;  %1268 = vst [vmem:[#allocation1 + $0x18] sm:$0x3] %v3699_v4  ;;  %v3701_v6 = vld [vmem:[%s5345_s0 + $0x2] sm:$0x3] }
   0x5   :  { %1273 = vst [vmem:[#allocation1 + $0x10] sm:$0x3] %v3700_v5  ;;  %v1278_v7 = vld [vmem:[%s5345_s0] sm:$0x3]  ;;  %1277 = vst [vmem:[#allocation1 + $0x8] sm:$0x3] %v3701_v6 }
   0x6   :  { %1279 = vst [vmem:[#allocation1] sm:$0x3] %v1278_v7  ;;  %v3679_v8 = vld [vmem:[%s5345_s0 + $0x2e] sm:$0x3]  ;;  %v3680_v9 = vld [vmem:[%s5345_s0 + $0x2c] sm:$0x3] }
   0x7   :  { %v3681_v10 = vld [vmem:[%s5345_s0 + $0x2a] sm:$0x3]  ;;  %1168 = vst [vmem:[#allocation1 + $0xb8] sm:$0x3] %v3679_v8  ;;  %1173 = vst [vmem:[#allocation1 + $0xb0] sm:$0x3] %v3680_v9 }
   0x8   :  { %1178 = vst [vmem:[#allocation1 + $0xa8] sm:$0x3] %v3681_v10  ;;  %v3682_v11 = vld [vmem:[%s5345_s0 + $0x28] sm:$0x3]  ;;  %v3683_v12 = vld [vmem:[%s5345_s0 + $0x26] sm:$0x3] }
   0x9   :  { %v3684_v13 = vld [vmem:[%s5345_s0 + $0x24] sm:$0x3]  ;;  %1183 = vst [vmem:[#allocation1 + $0xa0] sm:$0x3] %v3682_v11  ;;  %1188 = vst [vmem:[#allocation1 + $0x98] sm:$0x3] %v3683_v12 }
   0xa   :  { %1193 = vst [vmem:[#allocation1 + $0x90] sm:$0x3] %v3684_v13  ;;  %v3685_v14 = vld [vmem:[%s5345_s0 + $0x22] sm:$0x3]  ;;  %v3686_v15 = vld [vmem:[%s5345_s0 + $0x20] sm:$0x3] }
   0xb   :  { %v3687_v16 = vld [vmem:[%s5345_s0 + $0x1e] sm:$0x3]  ;;  %1198 = vst [vmem:[#allocation1 + $0x88] sm:$0x3] %v3685_v14  ;;  %1203 = vst [vmem:[#allocation1 + $0x80] sm:$0x3] %v3686_v15 }
   0xc   :  { %1208 = vst [vmem:[#allocation1 + $0x78] sm:$0x3] %v3687_v16  ;;  %v3688_v17 = vld [vmem:[%s5345_s0 + $0x1c] sm:$0x3]  ;;  %v3689_v18 = vld [vmem:[%s5345_s0 + $0x1a] sm:$0x3] }
   0xd   :  { %v3690_v19 = vld [vmem:[%s5345_s0 + $0x18] sm:$0x3]  ;;  %1213 = vst [vmem:[#allocation1 + $0x70] sm:$0x3] %v3688_v17  ;;  %1218 = vst [vmem:[#allocation1 + $0x68] sm:$0x3] %v3689_v18 }
   0xe   :  { %1223 = vst [vmem:[#allocation1 + $0x60] sm:$0x3] %v3690_v19  ;;  %v3691_v20 = vld [vmem:[%s5345_s0 + $0x16] sm:$0x3]  ;;  %v3692_v21 = vld [vmem:[%s5345_s0 + $0x14] sm:$0x3] }
   0xf   :  { %v3693_v22 = vld [vmem:[%s5345_s0 + $0x12] sm:$0x3]  ;;  %1228 = vst [vmem:[#allocation1 + $0x58] sm:$0x3] %v3691_v20  ;;  %1233 = vst [vmem:[#allocation1 + $0x50] sm:$0x3] %v3692_v21 }
  0x10   :  { %1238 = vst [vmem:[#allocation1 + $0x48] sm:$0x3] %v3693_v22  ;;  %v3694_v23 = vld [vmem:[%s5345_s0 + $0x10] sm:$0x3]  ;;  %v3671_v24 = vld [vmem:[%s5345_s0 + $0x3e] sm:$0x3] }
  0x11   :  { %v3672_v25 = vld [vmem:[%s5345_s0 + $0x3c] sm:$0x3]  ;;  %v1760_v26 = vld [vmem:[#allocation1 + $0x1] ss:$8 sm:$0xf0]  }
  0x12   :  { %1243 = vst [vmem:[#allocation1 + $0x40] sm:$0x3] %v3694_v23  ;;  %1128 = vst [vmem:[#allocation1 + $0xf8] sm:$0x3] %v3671_v24  ;;  %v3673_v27 = vld [vmem:[%s5345_s0 + $0x3a] sm:$0x3] }
  0x13   :  { %1133 = vst [vmem:[#allocation1 + $0xf0] sm:$0x3] %v3672_v25  ;;  %v1758_v28 = vld [vmem:[#allocation1 + $0x1] ss:$8 sm:$0xf]  }
  0x14   :  { %1138 = vst [vmem:[#allocation1 + $0xe8] sm:$0x3] %v3673_v27  ;;  %v3674_v29 = vld [vmem:[%s5345_s0 + $0x38] sm:$0x3]  ;;  %v1762_v30 = vsel %vm1282_vm0, %v1760_v26, %v1758_v28  ;;  %v3675_v31 = vld [vmem:[%s5345_s0 + $0x36] sm:$0x3] }
  0x15   :  { %1143 = vst [vmem:[#allocation1 + $0xe0] sm:$0x3] %v3674_v29  ;;  %v3676_v32 = vld [vmem:[%s5345_s0 + $0x34] sm:$0x3]  ;;  %v3677_v33 = vld [vmem:[%s5345_s0 + $0x32] sm:$0x3]  ;;  %1763 = vrot.lane.b32.xlu0 %v1762_v30, %s3830_s10 }
  0x16   :  { %v1793_v34 = vld [vmem:[#allocation1 + $0x81] ss:$8 sm:$0xf0]   ;;  %1148 = vst [vmem:[#allocation1 + $0xd8] sm:$0x3] %v3675_v31 }
  0x17   :  { %1153 = vst [vmem:[#allocation1 + $0xd0] sm:$0x3] %v3676_v32  ;;  %1158 = vst [vmem:[#allocation1 + $0xc8] sm:$0x3] %v3677_v33  ;;  %v3678_v35 = vld [vmem:[%s5345_s0 + $0x30] sm:$0x3] }
  0x18   :  { %v1791_v36 = vld [vmem:[#allocation1 + $0x81] ss:$8 sm:$0xf]   ;;  %1163 = vst [vmem:[#allocation1 + $0xc0] sm:$0x3] %v3678_v35 }
  0x19   :  { %v3663_v37 = vld [vmem:[%s5345_s0 + $0x4e] sm:$0x3]  ;;  %v1795_v38 = vsel %vm1282_vm0, %v1793_v34, %v1791_v36  ;;  %v1776_v39 = vld [vmem:[#allocation1 + $0x41] ss:$8 sm:$0xf0]  }
  0x1a   :  { %1088 = vst [vmem:[#allocation1 + $0x138] sm:$0x3] %v3663_v37  ;;  %v3664_v40 = vld [vmem:[%s5345_s0 + $0x4c] sm:$0x3]  ;;  %1796 = vrot.lane.b32.xlu1 %v1795_v38, %s3830_s10  ;;  %v3665_v41 = vld [vmem:[%s5345_s0 + $0x4a] sm:$0x3] }
  0x1b   :  { %1093 = vst [vmem:[#allocation1 + $0x130] sm:$0x3] %v3664_v40  ;;  %v3666_v42 = vld [vmem:[%s5345_s0 + $0x48] sm:$0x3]  ;;  %v3667_v43 = vld [vmem:[%s5345_s0 + $0x46] sm:$0x3] }
  0x1c   :  { %v1774_v44 = vld [vmem:[#allocation1 + $0x41] ss:$8 sm:$0xf]   ;;  %1098 = vst [vmem:[#allocation1 + $0x128] sm:$0x3] %v3665_v41 }
  0x1d   :  { %1103 = vst [vmem:[#allocation1 + $0x120] sm:$0x3] %v3666_v42  ;;  %1108 = vst [vmem:[#allocation1 + $0x118] sm:$0x3] %v3667_v43  ;;  %v3668_v45 = vld [vmem:[%s5345_s0 + $0x44] sm:$0x3]  ;;  %v1778_v46 = vsel %vm1282_vm0, %v1776_v39, %v1774_v44 }
  0x1e   :  { %1113 = vst [vmem:[#allocation1 + $0x110] sm:$0x3] %v3668_v45  ;;  %v3669_v47 = vld [vmem:[%s5345_s0 + $0x42] sm:$0x3]  ;;  %v3670_v48 = vld [vmem:[%s5345_s0 + $0x40] sm:$0x3]  ;;  %1779 = vrot.lane.b32.xlu0 %v1778_v46, %s3830_s10 }
  0x1f   :  { %v3655_v49 = vld [vmem:[%s5345_s0 + $0x5e] sm:$0x3]  ;;  %v1810_v50 = vld [vmem:[#allocation1 + $0xc1] ss:$8 sm:$0xf0]  }
  0x20   :  { %1118 = vst [vmem:[#allocation1 + $0x108] sm:$0x3] %v3669_v47  ;;  %1123 = vst [vmem:[#allocation1 + $0x100] sm:$0x3] %v3670_v48  ;;  %v3656_v51 = vld [vmem:[%s5345_s0 + $0x5c] sm:$0x3] }
  0x21   :  { %1048 = vst [vmem:[#allocation1 + $0x178] sm:$0x3] %v3655_v49  ;;  %1053 = vst [vmem:[#allocation1 + $0x170] sm:$0x3] %v3656_v51  ;;  %v3657_v52 = vld [vmem:[%s5345_s0 + $0x5a] sm:$0x3] }
  0x22   :  { %v3658_v53 = vld [vmem:[%s5345_s0 + $0x58] sm:$0x3]  ;;  %v3659_v54 = vld [vmem:[%s5345_s0 + $0x56] sm:$0x3]  ;;  %1058 = vst [vmem:[#allocation1 + $0x168] sm:$0x3] %v3657_v52 }
  0x23   :  { %v1808_v55 = vld [vmem:[#allocation1 + $0xc1] ss:$8 sm:$0xf]   ;;  %1063 = vst [vmem:[#allocation1 + $0x160] sm:$0x3] %v3658_v53 }
  0x24   :  { %1068 = vst [vmem:[#allocation1 + $0x158] sm:$0x3] %v3659_v54  ;;  %v3660_v56 = vld [vmem:[%s5345_s0 + $0x54] sm:$0x3]  ;;  %v1812_v57 = vsel %vm1282_vm0, %v1810_v50, %v1808_v55  ;;  %v3661_v58 = vld [vmem:[%s5345_s0 + $0x52] sm:$0x3] }
  0x25   :  { %1073 = vst [vmem:[#allocation1 + $0x150] sm:$0x3] %v3660_v56  ;;  %v3662_v59 = vld [vmem:[%s5345_s0 + $0x50] sm:$0x3]  ;;  %v3647_v60 = vld [vmem:[%s5345_s0 + $0x6e] sm:$0x3]  ;;  %1813 = vrot.lane.b32.xlu1 %v1812_v57, %s3830_s10 }
  0x26   :  { %1078 = vst [vmem:[#allocation1 + $0x148] sm:$0x3] %v3661_v58  ;;  %1083 = vst [vmem:[#allocation1 + $0x140] sm:$0x3] %v3662_v59  ;;  %v3648_v61 = vld [vmem:[%s5345_s0 + $0x6c] sm:$0x3] }
  0x27   :  { %1008 = vst [vmem:[#allocation1 + $0x1b8] sm:$0x3] %v3647_v60  ;;  %v3649_v62 = vld [vmem:[%s5345_s0 + $0x6a] sm:$0x3]  ;;  %v3650_v63 = vld [vmem:[%s5345_s0 + $0x68] sm:$0x3] }
  0x28   :  { %v1827_v0 = vld [vmem:[#allocation1 + $0x101] ss:$8 sm:$0xf0]   ;;  %1013 = vst [vmem:[#allocation1 + $0x1b0] sm:$0x3] %v3648_v61 }
  0x29   :  { %1018 = vst [vmem:[#allocation1 + $0x1a8] sm:$0x3] %v3649_v62  ;;  %1023 = vst [vmem:[#allocation1 + $0x1a0] sm:$0x3] %v3650_v63  ;;  %v3651_v1 = vld [vmem:[%s5345_s0 + $0x66] sm:$0x3] }
  0x2a   :  { %1028 = vst [vmem:[#allocation1 + $0x198] sm:$0x3] %v3651_v1  ;;  %v3652_v2 = vld [vmem:[%s5345_s0 + $0x64] sm:$0x3]  ;;  %v3653_v3 = vld [vmem:[%s5345_s0 + $0x62] sm:$0x3] }
  0x2b   :  { %v3654_v4 = vld [vmem:[%s5345_s0 + $0x60] sm:$0x3]  ;;  %1033 = vst [vmem:[#allocation1 + $0x190] sm:$0x3] %v3652_v2  ;;  %1038 = vst [vmem:[#allocation1 + $0x188] sm:$0x3] %v3653_v3 }
  0x2c   :  { %v1825_v5 = vld [vmem:[#allocation1 + $0x101] ss:$8 sm:$0xf]   ;;  %1043 = vst [vmem:[#allocation1 + $0x180] sm:$0x3] %v3654_v4 }
  0x2d   :  { %v3639_v6 = vld [vmem:[%s5345_s0 + $0x7e] sm:$0x3]  ;;  %v1829_v7 = vsel %vm1282_vm0, %v1827_v0, %v1825_v5  ;;  %v3640_v8 = vld [vmem:[%s5345_s0 + $0x7c] sm:$0x3]  ;;  %v3641_v9 = vld [vmem:[%s5345_s0 + $0x7a] sm:$0x3] }
  0x2e   :  { %968 = vst [vmem:[#allocation1 + $0x1f8] sm:$0x3] %v3639_v6  ;;  %v3642_v10 = vld [vmem:[%s5345_s0 + $0x78] sm:$0x3]  ;;  %1830 = vrot.lane.b32.xlu0 %v1829_v7, %s3830_s10  ;;  %973 = vst [vmem:[#allocation1 + $0x1f0] sm:$0x3] %v3640_v8 }
  0x2f   :  { %v1844_v11 = vld [vmem:[#allocation1 + $0x141] ss:$8 sm:$0xf0]   ;;  %978 = vst [vmem:[#allocation1 + $0x1e8] sm:$0x3] %v3641_v9 }
  0x30   :  { %983 = vst [vmem:[#allocation1 + $0x1e0] sm:$0x3] %v3642_v10  ;;  %v3643_v12 = vld [vmem:[%s5345_s0 + $0x76] sm:$0x3]  ;;  %v3644_v13 = vld [vmem:[%s5345_s0 + $0x74] sm:$0x3] }
  0x31   :  { %988 = vst [vmem:[#allocation1 + $0x1d8] sm:$0x3] %v3643_v12  ;;  %v3645_v14 = vld [vmem:[%s5345_s0 + $0x72] sm:$0x3]  ;;  %v3646_v15 = vld [vmem:[%s5345_s0 + $0x70] sm:$0x3] }
  0x32   :  { %v1842_v16 = vld [vmem:[#allocation1 + $0x141] ss:$8 sm:$0xf]   ;;  %993 = vst [vmem:[#allocation1 + $0x1d0] sm:$0x3] %v3644_v13 }
  0x33   :  { %998 = vst [vmem:[#allocation1 + $0x1c8] sm:$0x3] %v3645_v14  ;;  %1003 = vst [vmem:[#allocation1 + $0x1c0] sm:$0x3] %v3646_v15  ;;  %v3631_v17 = vld [vmem:[%s5345_s0 + $0x8e] sm:$0x3]  ;;  %v1846_v18 = vsel %vm1282_vm0, %v1844_v11, %v1842_v16 }
  0x34   :  { %v1861_v19 = vld [vmem:[#allocation1 + $0x181] ss:$8 sm:$0xf0]   ;;  %928 = vst [vmem:[#allocation1 + $0x238] sm:$0x3] %v3631_v17  ;;  %1847 = vrot.lane.b32.xlu1 %v1846_v18, %s3830_s10 }
  0x35   :  { %v3632_v20 = vld [vmem:[%s5345_s0 + $0x8c] sm:$0x3]  ;;  %v3633_v21 = vld [vmem:[%s5345_s0 + $0x8a] sm:$0x3]  ;;  %v3634_v22 = vld [vmem:[%s5345_s0 + $0x88] sm:$0x3] }
  0x36   :  { %933 = vst [vmem:[#allocation1 + $0x230] sm:$0x3] %v3632_v20  ;;  %v3635_v23 = vld [vmem:[%s5345_s0 + $0x86] sm:$0x3]  ;;  %938 = vst [vmem:[#allocation1 + $0x228] sm:$0x3] %v3633_v21 }
  0x37   :  { %v1859_v24 = vld [vmem:[#allocation1 + $0x181] ss:$8 sm:$0xf]   ;;  %943 = vst [vmem:[#allocation1 + $0x220] sm:$0x3] %v3634_v22 }
  0x38   :  { %948 = vst [vmem:[#allocation1 + $0x218] sm:$0x3] %v3635_v23  ;;  %v3636_v25 = vld [vmem:[%s5345_s0 + $0x84] sm:$0x3]  ;;  %v1863_v26 = vsel %vm1282_vm0, %v1861_v19, %v1859_v24  ;;  %v3637_v27 = vld [vmem:[%s5345_s0 + $0x82] sm:$0x3] }
  0x39   :  { %953 = vst [vmem:[#allocation1 + $0x210] sm:$0x3] %v3636_v25  ;;  %v3638_v28 = vld [vmem:[%s5345_s0 + $0x80] sm:$0x3]  ;;  %v3623_v29 = vld [vmem:[%s5345_s0 + $0x9e] sm:$0x3]  ;;  %1864 = vrot.lane.b32.xlu0 %v1863_v26, %s3830_s10 }
  0x3a   :  { %v1878_v30 = vld [vmem:[#allocation1 + $0x1c1] ss:$8 sm:$0xf0]   ;;  %958 = vst [vmem:[#allocation1 + $0x208] sm:$0x3] %v3637_v27 }
  0x3b   :  { %963 = vst [vmem:[#allocation1 + $0x200] sm:$0x3] %v3638_v28  ;;  %888 = vst [vmem:[#allocation1 + $0x278] sm:$0x3] %v3623_v29  ;;  %v3624_v31 = vld [vmem:[%s5345_s0 + $0x9c] sm:$0x3] }
  0x3c   :  { %893 = vst [vmem:[#allocation1 + $0x270] sm:$0x3] %v3624_v31  ;;  %v3625_v32 = vld [vmem:[%s5345_s0 + $0x9a] sm:$0x3]  ;;  %v3626_v33 = vld [vmem:[%s5345_s0 + $0x98] sm:$0x3] }
  0x3d   :  { %v3627_v34 = vld [vmem:[%s5345_s0 + $0x96] sm:$0x3]  ;;  %v1876_v35 = vld [vmem:[#allocation1 + $0x1c1] ss:$8 sm:$0xf]  }
  0x3e   :  { %898 = vst [vmem:[#allocation1 + $0x268] sm:$0x3] %v3625_v32  ;;  %903 = vst [vmem:[#allocation1 + $0x260] sm:$0x3] %v3626_v33  ;;  %v3628_v36 = vld [vmem:[%s5345_s0 + $0x94] sm:$0x3]  ;;  %v1880_v37 = vsel %vm1282_vm0, %v1878_v30, %v1876_v35 }
  0x3f   :  { %908 = vst [vmem:[#allocation1 + $0x258] sm:$0x3] %v3627_v34  ;;  %913 = vst [vmem:[#allocation1 + $0x250] sm:$0x3] %v3628_v36  ;;  %v3629_v38 = vld [vmem:[%s5345_s0 + $0x92] sm:$0x3]  ;;  %1881 = vrot.lane.b32.xlu1 %v1880_v37, %s3830_s10 }
  0x40   :  { %v3630_v39 = vld [vmem:[%s5345_s0 + $0x90] sm:$0x3]  ;;  %v3615_v40 = vld [vmem:[%s5345_s0 + $0xae] sm:$0x3]  ;;  %918 = vst [vmem:[#allocation1 + $0x248] sm:$0x3] %v3629_v38 }
  0x41   :  { %923 = vst [vmem:[#allocation1 + $0x240] sm:$0x3] %v3630_v39  ;;  %848 = vst [vmem:[#allocation1 + $0x2b8] sm:$0x3] %v3615_v40  ;;  %v3616_v41 = vld [vmem:[%s5345_s0 + $0xac] sm:$0x3] }
  0x42   :  { %v3617_v42 = vld [vmem:[%s5345_s0 + $0xaa] sm:$0x3]  ;;  %v3618_v43 = vld [vmem:[%s5345_s0 + $0xa8] sm:$0x3]  ;;  %853 = vst [vmem:[#allocation1 + $0x2b0] sm:$0x3] %v3616_v41 }
  0x43   :  { %v1895_v44 = vld [vmem:[#allocation1 + $0x201] ss:$8 sm:$0xf0]   ;;  %858 = vst [vmem:[#allocation1 + $0x2a8] sm:$0x3] %v3617_v42 }
  0x44   :  { %863 = vst [vmem:[#allocation1 + $0x2a0] sm:$0x3] %v3618_v43  ;;  %v3619_v45 = vld [vmem:[%s5345_s0 + $0xa6] sm:$0x3]  ;;  %v3620_v46 = vld [vmem:[%s5345_s0 + $0xa4] sm:$0x3] }
  0x45   :  { %868 = vst [vmem:[#allocation1 + $0x298] sm:$0x3] %v3619_v45  ;;  %v3621_v47 = vld [vmem:[%s5345_s0 + $0xa2] sm:$0x3]  ;;  %v3622_v48 = vld [vmem:[%s5345_s0 + $0xa0] sm:$0x3] }
  0x46   :  { %v1893_v49 = vld [vmem:[#allocation1 + $0x201] ss:$8 sm:$0xf]   ;;  %873 = vst [vmem:[#allocation1 + $0x290] sm:$0x3] %v3620_v46 }
  0x47   :  { %878 = vst [vmem:[#allocation1 + $0x288] sm:$0x3] %v3621_v47  ;;  %883 = vst [vmem:[#allocation1 + $0x280] sm:$0x3] %v3622_v48  ;;  %v3607_v50 = vld [vmem:[%s5345_s0 + $0xbe] sm:$0x3]  ;;  %v1897_v51 = vsel %vm1282_vm0, %v1895_v44, %v1893_v49 }
  0x48   :  { %808 = vst [vmem:[#allocation1 + $0x2f8] sm:$0x3] %v3607_v50  ;;  %v3608_v52 = vld [vmem:[%s5345_s0 + $0xbc] sm:$0x3]  ;;  %v3609_v53 = vld [vmem:[%s5345_s0 + $0xba] sm:$0x3]  ;;  %1898 = vrot.lane.b32.xlu0 %v1897_v51, %s3830_s10 }
  0x49   :  { %v3610_v54 = vld [vmem:[%s5345_s0 + $0xb8] sm:$0x3]  ;;  %813 = vst [vmem:[#allocation1 + $0x2f0] sm:$0x3] %v3608_v52  ;;  %818 = vst [vmem:[#allocation1 + $0x2e8] sm:$0x3] %v3609_v53 }
  0x4a   :  { %v1912_v55 = vld [vmem:[#allocation1 + $0x241] ss:$8 sm:$0xf0]   ;;  %823 = vst [vmem:[#allocation1 + $0x2e0] sm:$0x3] %v3610_v54 }
  0x4b   :  { %v3611_v56 = vld [vmem:[%s5345_s0 + $0xb6] sm:$0x3]  ;;  %v3612_v57 = vld [vmem:[%s5345_s0 + $0xb4] sm:$0x3]  ;;  %v3613_v58 = vld [vmem:[%s5345_s0 + $0xb2] sm:$0x3] }
  0x4c   :  { %828 = vst [vmem:[#allocation1 + $0x2d8] sm:$0x3] %v3611_v56  ;;  %v3614_v59 = vld [vmem:[%s5345_s0 + $0xb0] sm:$0x3]  ;;  %833 = vst [vmem:[#allocation1 + $0x2d0] sm:$0x3] %v3612_v57 }
  0x4d   :  { %v1910_v60 = vld [vmem:[#allocation1 + $0x241] ss:$8 sm:$0xf]   ;;  %838 = vst [vmem:[#allocation1 + $0x2c8] sm:$0x3] %v3613_v58 }
  0x4e   :  { %843 = vst [vmem:[#allocation1 + $0x2c0] sm:$0x3] %v3614_v59  ;;  %v3599_v61 = vld [vmem:[%s5345_s0 + $0xce] sm:$0x3]  ;;  %v1914_v62 = vsel %vm1282_vm0, %v1912_v55, %v1910_v60  ;;  %v3600_v0 = vld [vmem:[%s5345_s0 + $0xcc] sm:$0x3] }
  0x4f   :  { %v1929_v63 = vld [vmem:[#allocation1 + $0x281] ss:$8 sm:$0xf0]   ;;  %768 = vst [vmem:[#allocation1 + $0x338] sm:$0x3] %v3599_v61  ;;  %1915 = vrot.lane.b32.xlu1 %v1914_v62, %s3830_s10 }
  0x50   :  { %773 = vst [vmem:[#allocation1 + $0x330] sm:$0x3] %v3600_v0  ;;  %v3601_v1 = vld [vmem:[%s5345_s0 + $0xca] sm:$0x3]  ;;  %v3602_v2 = vld [vmem:[%s5345_s0 + $0xc8] sm:$0x3] }
  0x51   :  { %v3603_v3 = vld [vmem:[%s5345_s0 + $0xc6] sm:$0x3]  ;;  %v1927_v4 = vld [vmem:[#allocation1 + $0x281] ss:$8 sm:$0xf]  }
  0x52   :  { %778 = vst [vmem:[#allocation1 + $0x328] sm:$0x3] %v3601_v1  ;;  %783 = vst [vmem:[#allocation1 + $0x320] sm:$0x3] %v3602_v2  ;;  %v3604_v5 = vld [vmem:[%s5345_s0 + $0xc4] sm:$0x3]  ;;  %v1931_v6 = vsel %vm1282_vm0, %v1929_v63, %v1927_v4 }
  0x53   :  { %788 = vst [vmem:[#allocation1 + $0x318] sm:$0x3] %v3603_v3  ;;  %793 = vst [vmem:[#allocation1 + $0x310] sm:$0x3] %v3604_v5  ;;  %v3605_v7 = vld [vmem:[%s5345_s0 + $0xc2] sm:$0x3]  ;;  %1932 = vrot.lane.b32.xlu0 %v1931_v6, %s3830_s10 }
  0x54   :  { %v3606_v8 = vld [vmem:[%s5345_s0 + $0xc0] sm:$0x3]  ;;  %v3591_v9 = vld [vmem:[%s5345_s0 + $0xde] sm:$0x3]  ;;  %798 = vst [vmem:[#allocation1 + $0x308] sm:$0x3] %v3605_v7 }
  0x55   :  { %v1946_v10 = vld [vmem:[#allocation1 + $0x2c1] ss:$8 sm:$0xf0]   ;;  %803 = vst [vmem:[#allocation1 + $0x300] sm:$0x3] %v3606_v8 }
  0x56   :  { %728 = vst [vmem:[#allocation1 + $0x378] sm:$0x3] %v3591_v9  ;;  %v3592_v11 = vld [vmem:[%s5345_s0 + $0xdc] sm:$0x3]  ;;  %v3593_v12 = vld [vmem:[%s5345_s0 + $0xda] sm:$0x3] }
  0x57   :  { %733 = vst [vmem:[#allocation1 + $0x370] sm:$0x3] %v3592_v11  ;;  %v3594_v13 = vld [vmem:[%s5345_s0 + $0xd8] sm:$0x3]  ;;  %v3595_v14 = vld [vmem:[%s5345_s0 + $0xd6] sm:$0x3] }
  0x58   :  { %v1944_v15 = vld [vmem:[#allocation1 + $0x2c1] ss:$8 sm:$0xf]   ;;  %738 = vst [vmem:[#allocation1 + $0x368] sm:$0x3] %v3593_v12 }
  0x59   :  { %743 = vst [vmem:[#allocation1 + $0x360] sm:$0x3] %v3594_v13  ;;  %748 = vst [vmem:[#allocation1 + $0x358] sm:$0x3] %v3595_v14  ;;  %v3596_v16 = vld [vmem:[%s5345_s0 + $0xd4] sm:$0x3]  ;;  %v1948_v17 = vsel %vm1282_vm0, %v1946_v10, %v1944_v15 }
  0x5a   :  { %753 = vst [vmem:[#allocation1 + $0x350] sm:$0x3] %v3596_v16  ;;  %v3597_v18 = vld [vmem:[%s5345_s0 + $0xd2] sm:$0x3]  ;;  %v3598_v19 = vld [vmem:[%s5345_s0 + $0xd0] sm:$0x3]  ;;  %1949 = vrot.lane.b32.xlu1 %v1948_v17, %s3830_s10 }
  0x5b   :  { %v3583_v20 = vld [vmem:[%s5345_s0 + $0xee] sm:$0x3]  ;;  %758 = vst [vmem:[#allocation1 + $0x348] sm:$0x3] %v3597_v18  ;;  %763 = vst [vmem:[#allocation1 + $0x340] sm:$0x3] %v3598_v19 }
  0x5c   :  { %688 = vst [vmem:[#allocation1 + $0x3b8] sm:$0x3] %v3583_v20  ;;  %v3584_v21 = vld [vmem:[%s5345_s0 + $0xec] sm:$0x3]  ;;  %v3585_v22 = vld [vmem:[%s5345_s0 + $0xea] sm:$0x3] }
  0x5d   :  { %v3586_v23 = vld [vmem:[%s5345_s0 + $0xe8] sm:$0x3]  ;;  %693 = vst [vmem:[#allocation1 + $0x3b0] sm:$0x3] %v3584_v21  ;;  %698 = vst [vmem:[#allocation1 + $0x3a8] sm:$0x3] %v3585_v22 }
  0x5e   :  { %v1963_v24 = vld [vmem:[#allocation1 + $0x301] ss:$8 sm:$0xf0]   ;;  %703 = vst [vmem:[#allocation1 + $0x3a0] sm:$0x3] %v3586_v23 }
  0x5f   :  { %v3587_v25 = vld [vmem:[%s5345_s0 + $0xe6] sm:$0x3]  ;;  %v3588_v26 = vld [vmem:[%s5345_s0 + $0xe4] sm:$0x3]  ;;  %v3589_v27 = vld [vmem:[%s5345_s0 + $0xe2] sm:$0x3] }
  0x60   :  { %708 = vst [vmem:[#allocation1 + $0x398] sm:$0x3] %v3587_v25  ;;  %v3590_v28 = vld [vmem:[%s5345_s0 + $0xe0] sm:$0x3]  ;;  %713 = vst [vmem:[#allocation1 + $0x390] sm:$0x3] %v3588_v26 }
  0x61   :  { %v1961_v29 = vld [vmem:[#allocation1 + $0x301] ss:$8 sm:$0xf]   ;;  %718 = vst [vmem:[#allocation1 + $0x388] sm:$0x3] %v3589_v27 }
  0x62   :  { %723 = vst [vmem:[#allocation1 + $0x380] sm:$0x3] %v3590_v28  ;;  %v3575_v30 = vld [vmem:[%s5345_s0 + $0xfe] sm:$0x3]  ;;  %v1965_v31 = vsel %vm1282_vm0, %v1963_v24, %v1961_v29  ;;  %v3576_v32 = vld [vmem:[%s5345_s0 + $0xfc] sm:$0x3] }
  0x63   :  { %648 = vst [vmem:[#allocation1 + $0x3f8] sm:$0x3] %v3575_v30  ;;  %v3577_v33 = vld [vmem:[%s5345_s0 + $0xfa] sm:$0x3]  ;;  %v3578_v34 = vld [vmem:[%s5345_s0 + $0xf8] sm:$0x3]  ;;  %1966 = vrot.lane.b32.xlu0 %v1965_v31, %s3830_s10 }
  0x64   :  { %v1980_v35 = vld [vmem:[#allocation1 + $0x341] ss:$8 sm:$0xf0]   ;;  %653 = vst [vmem:[#allocation1 + $0x3f0] sm:$0x3] %v3576_v32 }
  0x65   :  { %658 = vst [vmem:[#allocation1 + $0x3e8] sm:$0x3] %v3577_v33  ;;  %663 = vst [vmem:[#allocation1 + $0x3e0] sm:$0x3] %v3578_v34  ;;  %v3579_v36 = vld [vmem:[%s5345_s0 + $0xf6] sm:$0x3] }
  0x66   :  { %668 = vst [vmem:[#allocation1 + $0x3d8] sm:$0x3] %v3579_v36  ;;  %v3580_v37 = vld [vmem:[%s5345_s0 + $0xf4] sm:$0x3]  ;;  %v3581_v38 = vld [vmem:[%s5345_s0 + $0xf2] sm:$0x3] }
  0x67   :  { %v3582_v39 = vld [vmem:[%s5345_s0 + $0xf0] sm:$0x3]  ;;  %673 = vst [vmem:[#allocation1 + $0x3d0] sm:$0x3] %v3580_v37  ;;  %678 = vst [vmem:[#allocation1 + $0x3c8] sm:$0x3] %v3581_v38 }
  0x68   :  { %v1978_v40 = vld [vmem:[#allocation1 + $0x341] ss:$8 sm:$0xf]   ;;  %683 = vst [vmem:[#allocation1 + $0x3c0] sm:$0x3] %v3582_v39 }
  0x69   :  { %v3567_v41 = vld [vmem:[%s5345_s0 + $0x10e] sm:$0x3]  ;;  %v1982_v42 = vsel %vm1282_vm0, %v1980_v35, %v1978_v40  ;;  %v1997_v43 = vld [vmem:[#allocation1 + $0x381] ss:$8 sm:$0xf0]  }
  0x6a   :  { %608 = vst [vmem:[#allocation1 + $0x438] sm:$0x3] %v3567_v41  ;;  %v3568_v44 = vld [vmem:[%s5345_s0 + $0x10c] sm:$0x3]  ;;  %1983 = vrot.lane.b32.xlu1 %v1982_v42, %s3830_s10  ;;  %v3569_v45 = vld [vmem:[%s5345_s0 + $0x10a] sm:$0x3] }
  0x6b   :  { %613 = vst [vmem:[#allocation1 + $0x430] sm:$0x3] %v3568_v44  ;;  %v3570_v46 = vld [vmem:[%s5345_s0 + $0x108] sm:$0x3]  ;;  %v3571_v47 = vld [vmem:[%s5345_s0 + $0x106] sm:$0x3] }
  0x6c   :  { %v1995_v48 = vld [vmem:[#allocation1 + $0x381] ss:$8 sm:$0xf]   ;;  %618 = vst [vmem:[#allocation1 + $0x428] sm:$0x3] %v3569_v45 }
  0x6d   :  { %623 = vst [vmem:[#allocation1 + $0x420] sm:$0x3] %v3570_v46  ;;  %628 = vst [vmem:[#allocation1 + $0x418] sm:$0x3] %v3571_v47  ;;  %v3572_v49 = vld [vmem:[%s5345_s0 + $0x104] sm:$0x3]  ;;  %v1999_v50 = vsel %vm1282_vm0, %v1997_v43, %v1995_v48 }
  0x6e   :  { %633 = vst [vmem:[#allocation1 + $0x410] sm:$0x3] %v3572_v49  ;;  %v3573_v51 = vld [vmem:[%s5345_s0 + $0x102] sm:$0x3]  ;;  %v3574_v52 = vld [vmem:[%s5345_s0 + $0x100] sm:$0x3]  ;;  %2000 = vrot.lane.b32.xlu0 %v1999_v50, %s3830_s10 }
  0x6f   :  { %v3559_v53 = vld [vmem:[%s5345_s0 + $0x11e] sm:$0x3]  ;;  %v2014_v54 = vld [vmem:[#allocation1 + $0x3c1] ss:$8 sm:$0xf0]  }
  0x70   :  { %638 = vst [vmem:[#allocation1 + $0x408] sm:$0x3] %v3573_v51  ;;  %643 = vst [vmem:[#allocation1 + $0x400] sm:$0x3] %v3574_v52  ;;  %v3560_v55 = vld [vmem:[%s5345_s0 + $0x11c] sm:$0x3] }
  0x71   :  { %568 = vst [vmem:[#allocation1 + $0x478] sm:$0x3] %v3559_v53  ;;  %573 = vst [vmem:[#allocation1 + $0x470] sm:$0x3] %v3560_v55  ;;  %v3561_v56 = vld [vmem:[%s5345_s0 + $0x11a] sm:$0x3] }
  0x72   :  { %v3562_v57 = vld [vmem:[%s5345_s0 + $0x118] sm:$0x3]  ;;  %v3563_v58 = vld [vmem:[%s5345_s0 + $0x116] sm:$0x3]  ;;  %578 = vst [vmem:[#allocation1 + $0x468] sm:$0x3] %v3561_v56 }
  0x73   :  { %v2012_v59 = vld [vmem:[#allocation1 + $0x3c1] ss:$8 sm:$0xf]   ;;  %583 = vst [vmem:[#allocation1 + $0x460] sm:$0x3] %v3562_v57 }
  0x74   :  { %588 = vst [vmem:[#allocation1 + $0x458] sm:$0x3] %v3563_v58  ;;  %v3564_v60 = vld [vmem:[%s5345_s0 + $0x114] sm:$0x3]  ;;  %v2016_v61 = vsel %vm1282_vm0, %v2014_v54, %v2012_v59  ;;  %v3565_v62 = vld [vmem:[%s5345_s0 + $0x112] sm:$0x3] }
  0x75   :  { %593 = vst [vmem:[#allocation1 + $0x450] sm:$0x3] %v3564_v60  ;;  %v3566_v63 = vld [vmem:[%s5345_s0 + $0x110] sm:$0x3]  ;;  %v3551_v0 = vld [vmem:[%s5345_s0 + $0x12e] sm:$0x3]  ;;  %2017 = vrot.lane.b32.xlu1 %v2016_v61, %s3830_s10 }
  0x76   :  { %598 = vst [vmem:[#allocation1 + $0x448] sm:$0x3] %v3565_v62  ;;  %603 = vst [vmem:[#allocation1 + $0x440] sm:$0x3] %v3566_v63  ;;  %v3552_v1 = vld [vmem:[%s5345_s0 + $0x12c] sm:$0x3] }
  0x77   :  { %528 = vst [vmem:[#allocation1 + $0x4b8] sm:$0x3] %v3551_v0  ;;  %v3553_v2 = vld [vmem:[%s5345_s0 + $0x12a] sm:$0x3]  ;;  %v3554_v3 = vld [vmem:[%s5345_s0 + $0x128] sm:$0x3] }
  0x78   :  { %v2031_v4 = vld [vmem:[#allocation1 + $0x401] ss:$8 sm:$0xf0]   ;;  %533 = vst [vmem:[#allocation1 + $0x4b0] sm:$0x3] %v3552_v1 }
  0x79   :  { %538 = vst [vmem:[#allocation1 + $0x4a8] sm:$0x3] %v3553_v2  ;;  %543 = vst [vmem:[#allocation1 + $0x4a0] sm:$0x3] %v3554_v3  ;;  %v3555_v5 = vld [vmem:[%s5345_s0 + $0x126] sm:$0x3] }
  0x7a   :  { %548 = vst [vmem:[#allocation1 + $0x498] sm:$0x3] %v3555_v5  ;;  %v3556_v6 = vld [vmem:[%s5345_s0 + $0x124] sm:$0x3]  ;;  %v3557_v7 = vld [vmem:[%s5345_s0 + $0x122] sm:$0x3] }
  0x7b   :  { %v3558_v8 = vld [vmem:[%s5345_s0 + $0x120] sm:$0x3]  ;;  %553 = vst [vmem:[#allocation1 + $0x490] sm:$0x3] %v3556_v6  ;;  %558 = vst [vmem:[#allocation1 + $0x488] sm:$0x3] %v3557_v7 }
  0x7c   :  { %v2029_v9 = vld [vmem:[#allocation1 + $0x401] ss:$8 sm:$0xf]   ;;  %563 = vst [vmem:[#allocation1 + $0x480] sm:$0x3] %v3558_v8 }
  0x7d   :  { %v3543_v10 = vld [vmem:[%s5345_s0 + $0x13e] sm:$0x3]  ;;  %v2033_v11 = vsel %vm1282_vm0, %v2031_v4, %v2029_v9  ;;  %v3544_v12 = vld [vmem:[%s5345_s0 + $0x13c] sm:$0x3]  ;;  %v3545_v13 = vld [vmem:[%s5345_s0 + $0x13a] sm:$0x3] }
  0x7e   :  { %488 = vst [vmem:[#allocation1 + $0x4f8] sm:$0x3] %v3543_v10  ;;  %v3546_v14 = vld [vmem:[%s5345_s0 + $0x138] sm:$0x3]  ;;  %2034 = vrot.lane.b32.xlu0 %v2033_v11, %s3830_s10  ;;  %493 = vst [vmem:[#allocation1 + $0x4f0] sm:$0x3] %v3544_v12 }
  0x7f   :  { %v2048_v15 = vld [vmem:[#allocation1 + $0x441] ss:$8 sm:$0xf0]   ;;  %498 = vst [vmem:[#allocation1 + $0x4e8] sm:$0x3] %v3545_v13 }
  0x80   :  { %503 = vst [vmem:[#allocation1 + $0x4e0] sm:$0x3] %v3546_v14  ;;  %v3547_v16 = vld [vmem:[%s5345_s0 + $0x136] sm:$0x3]  ;;  %v3548_v17 = vld [vmem:[%s5345_s0 + $0x134] sm:$0x3] }
  0x81   :  { %508 = vst [vmem:[#allocation1 + $0x4d8] sm:$0x3] %v3547_v16  ;;  %v3549_v18 = vld [vmem:[%s5345_s0 + $0x132] sm:$0x3]  ;;  %v3550_v19 = vld [vmem:[%s5345_s0 + $0x130] sm:$0x3] }
  0x82   :  { %v2046_v20 = vld [vmem:[#allocation1 + $0x441] ss:$8 sm:$0xf]   ;;  %513 = vst [vmem:[#allocation1 + $0x4d0] sm:$0x3] %v3548_v17 }
  0x83   :  { %518 = vst [vmem:[#allocation1 + $0x4c8] sm:$0x3] %v3549_v18  ;;  %523 = vst [vmem:[#allocation1 + $0x4c0] sm:$0x3] %v3550_v19  ;;  %v3535_v21 = vld [vmem:[%s5345_s0 + $0x14e] sm:$0x3]  ;;  %v2050_v22 = vsel %vm1282_vm0, %v2048_v15, %v2046_v20 }
  0x84   :  { %v2065_v23 = vld [vmem:[#allocation1 + $0x481] ss:$8 sm:$0xf0]   ;;  %448 = vst [vmem:[#allocation1 + $0x538] sm:$0x3] %v3535_v21  ;;  %2051 = vrot.lane.b32.xlu1 %v2050_v22, %s3830_s10 }
  0x85   :  { %v3536_v24 = vld [vmem:[%s5345_s0 + $0x14c] sm:$0x3]  ;;  %v3537_v25 = vld [vmem:[%s5345_s0 + $0x14a] sm:$0x3]  ;;  %v3538_v26 = vld [vmem:[%s5345_s0 + $0x148] sm:$0x3] }
  0x86   :  { %453 = vst [vmem:[#allocation1 + $0x530] sm:$0x3] %v3536_v24  ;;  %v3539_v27 = vld [vmem:[%s5345_s0 + $0x146] sm:$0x3]  ;;  %458 = vst [vmem:[#allocation1 + $0x528] sm:$0x3] %v3537_v25 }
  0x87   :  { %v2063_v28 = vld [vmem:[#allocation1 + $0x481] ss:$8 sm:$0xf]   ;;  %463 = vst [vmem:[#allocation1 + $0x520] sm:$0x3] %v3538_v26 }
  0x88   :  { %468 = vst [vmem:[#allocation1 + $0x518] sm:$0x3] %v3539_v27  ;;  %v3540_v29 = vld [vmem:[%s5345_s0 + $0x144] sm:$0x3]  ;;  %v2067_v30 = vsel %vm1282_vm0, %v2065_v23, %v2063_v28  ;;  %v3541_v31 = vld [vmem:[%s5345_s0 + $0x142] sm:$0x3] }
  0x89   :  { %473 = vst [vmem:[#allocation1 + $0x510] sm:$0x3] %v3540_v29  ;;  %v3542_v32 = vld [vmem:[%s5345_s0 + $0x140] sm:$0x3]  ;;  %v3527_v33 = vld [vmem:[%s5345_s0 + $0x15e] sm:$0x3]  ;;  %2068 = vrot.lane.b32.xlu0 %v2067_v30, %s3830_s10 }
  0x8a   :  { %v2082_v34 = vld [vmem:[#allocation1 + $0x4c1] ss:$8 sm:$0xf0]   ;;  %478 = vst [vmem:[#allocation1 + $0x508] sm:$0x3] %v3541_v31 }
  0x8b   :  { %483 = vst [vmem:[#allocation1 + $0x500] sm:$0x3] %v3542_v32  ;;  %408 = vst [vmem:[#allocation1 + $0x578] sm:$0x3] %v3527_v33  ;;  %v3528_v35 = vld [vmem:[%s5345_s0 + $0x15c] sm:$0x3] }
  0x8c   :  { %413 = vst [vmem:[#allocation1 + $0x570] sm:$0x3] %v3528_v35  ;;  %v3529_v36 = vld [vmem:[%s5345_s0 + $0x15a] sm:$0x3]  ;;  %v3530_v37 = vld [vmem:[%s5345_s0 + $0x158] sm:$0x3] }
  0x8d   :  { %v3531_v38 = vld [vmem:[%s5345_s0 + $0x156] sm:$0x3]  ;;  %v2080_v39 = vld [vmem:[#allocation1 + $0x4c1] ss:$8 sm:$0xf]  }
  0x8e   :  { %418 = vst [vmem:[#allocation1 + $0x568] sm:$0x3] %v3529_v36  ;;  %423 = vst [vmem:[#allocation1 + $0x560] sm:$0x3] %v3530_v37  ;;  %v3532_v40 = vld [vmem:[%s5345_s0 + $0x154] sm:$0x3]  ;;  %v2084_v41 = vsel %vm1282_vm0, %v2082_v34, %v2080_v39 }
  0x8f   :  { %428 = vst [vmem:[#allocation1 + $0x558] sm:$0x3] %v3531_v38  ;;  %433 = vst [vmem:[#allocation1 + $0x550] sm:$0x3] %v3532_v40  ;;  %v3533_v42 = vld [vmem:[%s5345_s0 + $0x152] sm:$0x3]  ;;  %2085 = vrot.lane.b32.xlu1 %v2084_v41, %s3830_s10 }
  0x90   :  { %v3534_v43 = vld [vmem:[%s5345_s0 + $0x150] sm:$0x3]  ;;  %v3519_v44 = vld [vmem:[%s5345_s0 + $0x16e] sm:$0x3]  ;;  %438 = vst [vmem:[#allocation1 + $0x548] sm:$0x3] %v3533_v42 }
  0x91   :  { %443 = vst [vmem:[#allocation1 + $0x540] sm:$0x3] %v3534_v43  ;;  %368 = vst [vmem:[#allocation1 + $0x5b8] sm:$0x3] %v3519_v44  ;;  %v3520_v45 = vld [vmem:[%s5345_s0 + $0x16c] sm:$0x3] }
  0x92   :  { %v3521_v46 = vld [vmem:[%s5345_s0 + $0x16a] sm:$0x3]  ;;  %v3522_v47 = vld [vmem:[%s5345_s0 + $0x168] sm:$0x3]  ;;  %373 = vst [vmem:[#allocation1 + $0x5b0] sm:$0x3] %v3520_v45 }
  0x93   :  { %v2099_v48 = vld [vmem:[#allocation1 + $0x501] ss:$8 sm:$0xf0]   ;;  %378 = vst [vmem:[#allocation1 + $0x5a8] sm:$0x3] %v3521_v46 }
  0x94   :  { %383 = vst [vmem:[#allocation1 + $0x5a0] sm:$0x3] %v3522_v47  ;;  %v3523_v49 = vld [vmem:[%s5345_s0 + $0x166] sm:$0x3]  ;;  %v3524_v50 = vld [vmem:[%s5345_s0 + $0x164] sm:$0x3] }
  0x95   :  { %388 = vst [vmem:[#allocation1 + $0x598] sm:$0x3] %v3523_v49  ;;  %v3525_v51 = vld [vmem:[%s5345_s0 + $0x162] sm:$0x3]  ;;  %v3526_v52 = vld [vmem:[%s5345_s0 + $0x160] sm:$0x3] }
  0x96   :  { %v2097_v53 = vld [vmem:[#allocation1 + $0x501] ss:$8 sm:$0xf]   ;;  %393 = vst [vmem:[#allocation1 + $0x590] sm:$0x3] %v3524_v50 }
  0x97   :  { %398 = vst [vmem:[#allocation1 + $0x588] sm:$0x3] %v3525_v51  ;;  %403 = vst [vmem:[#allocation1 + $0x580] sm:$0x3] %v3526_v52  ;;  %v3511_v54 = vld [vmem:[%s5345_s0 + $0x17e] sm:$0x3]  ;;  %v2101_v55 = vsel %vm1282_vm0, %v2099_v48, %v2097_v53 }
  0x98   :  { %328 = vst [vmem:[#allocation1 + $0x5f8] sm:$0x3] %v3511_v54  ;;  %v3512_v56 = vld [vmem:[%s5345_s0 + $0x17c] sm:$0x3]  ;;  %v3513_v57 = vld [vmem:[%s5345_s0 + $0x17a] sm:$0x3]  ;;  %2102 = vrot.lane.b32.xlu0 %v2101_v55, %s3830_s10 }
  0x99   :  { %v3514_v58 = vld [vmem:[%s5345_s0 + $0x178] sm:$0x3]  ;;  %333 = vst [vmem:[#allocation1 + $0x5f0] sm:$0x3] %v3512_v56  ;;  %338 = vst [vmem:[#allocation1 + $0x5e8] sm:$0x3] %v3513_v57 }
  0x9a   :  { %v2116_v59 = vld [vmem:[#allocation1 + $0x541] ss:$8 sm:$0xf0]   ;;  %343 = vst [vmem:[#allocation1 + $0x5e0] sm:$0x3] %v3514_v58 }
  0x9b   :  { %v3515_v60 = vld [vmem:[%s5345_s0 + $0x176] sm:$0x3]  ;;  %v3516_v61 = vld [vmem:[%s5345_s0 + $0x174] sm:$0x3]  ;;  %v3517_v62 = vld [vmem:[%s5345_s0 + $0x172] sm:$0x3] }
  0x9c   :  { %348 = vst [vmem:[#allocation1 + $0x5d8] sm:$0x3] %v3515_v60  ;;  %v3518_v63 = vld [vmem:[%s5345_s0 + $0x170] sm:$0x3]  ;;  %353 = vst [vmem:[#allocation1 + $0x5d0] sm:$0x3] %v3516_v61 }
  0x9d   :  { %v2114_v0 = vld [vmem:[#allocation1 + $0x541] ss:$8 sm:$0xf]   ;;  %358 = vst [vmem:[#allocation1 + $0x5c8] sm:$0x3] %v3517_v62 }
  0x9e   :  { %363 = vst [vmem:[#allocation1 + $0x5c0] sm:$0x3] %v3518_v63  ;;  %v3503_v1 = vld [vmem:[%s5345_s0 + $0x18e] sm:$0x3]  ;;  %v2118_v2 = vsel %vm1282_vm0, %v2116_v59, %v2114_v0  ;;  %v3504_v4 = vld [vmem:[%s5345_s0 + $0x18c] sm:$0x3] }
  0x9f   :  { %v2133_v3 = vld [vmem:[#allocation1 + $0x581] ss:$8 sm:$0xf0]   ;;  %288 = vst [vmem:[#allocation1 + $0x638] sm:$0x3] %v3503_v1  ;;  %2119 = vrot.lane.b32.xlu1 %v2118_v2, %s3830_s10 }
  0xa0   :  { %293 = vst [vmem:[#allocation1 + $0x630] sm:$0x3] %v3504_v4  ;;  %v3505_v5 = vld [vmem:[%s5345_s0 + $0x18a] sm:$0x3]  ;;  %v3506_v6 = vld [vmem:[%s5345_s0 + $0x188] sm:$0x3] }
  0xa1   :  { %v3507_v7 = vld [vmem:[%s5345_s0 + $0x186] sm:$0x3]  ;;  %v2131_v8 = vld [vmem:[#allocation1 + $0x581] ss:$8 sm:$0xf]  }
  0xa2   :  { %298 = vst [vmem:[#allocation1 + $0x628] sm:$0x3] %v3505_v5  ;;  %303 = vst [vmem:[#allocation1 + $0x620] sm:$0x3] %v3506_v6  ;;  %v3508_v9 = vld [vmem:[%s5345_s0 + $0x184] sm:$0x3]  ;;  %v2135_v10 = vsel %vm1282_vm0, %v2133_v3, %v2131_v8 }
  0xa3   :  { %308 = vst [vmem:[#allocation1 + $0x618] sm:$0x3] %v3507_v7  ;;  %313 = vst [vmem:[#allocation1 + $0x610] sm:$0x3] %v3508_v9  ;;  %v3509_v11 = vld [vmem:[%s5345_s0 + $0x182] sm:$0x3]  ;;  %2136 = vrot.lane.b32.xlu0 %v2135_v10, %s3830_s10 }
  0xa4   :  { %v3510_v12 = vld [vmem:[%s5345_s0 + $0x180] sm:$0x3]  ;;  %v3495_v13 = vld [vmem:[%s5345_s0 + $0x19e] sm:$0x3]  ;;  %318 = vst [vmem:[#allocation1 + $0x608] sm:$0x3] %v3509_v11 }
  0xa5   :  { %v2150_v14 = vld [vmem:[#allocation1 + $0x5c1] ss:$8 sm:$0xf0]   ;;  %323 = vst [vmem:[#allocation1 + $0x600] sm:$0x3] %v3510_v12 }
  0xa6   :  { %248 = vst [vmem:[#allocation1 + $0x678] sm:$0x3] %v3495_v13  ;;  %v3496_v15 = vld [vmem:[%s5345_s0 + $0x19c] sm:$0x3]  ;;  %v3497_v16 = vld [vmem:[%s5345_s0 + $0x19a] sm:$0x3] }
  0xa7   :  { %253 = vst [vmem:[#allocation1 + $0x670] sm:$0x3] %v3496_v15  ;;  %v3498_v17 = vld [vmem:[%s5345_s0 + $0x198] sm:$0x3]  ;;  %v3499_v18 = vld [vmem:[%s5345_s0 + $0x196] sm:$0x3] }
  0xa8   :  { %v2148_v19 = vld [vmem:[#allocation1 + $0x5c1] ss:$8 sm:$0xf]   ;;  %258 = vst [vmem:[#allocation1 + $0x668] sm:$0x3] %v3497_v16 }
  0xa9   :  { %263 = vst [vmem:[#allocation1 + $0x660] sm:$0x3] %v3498_v17  ;;  %268 = vst [vmem:[#allocation1 + $0x658] sm:$0x3] %v3499_v18  ;;  %v3500_v20 = vld [vmem:[%s5345_s0 + $0x194] sm:$0x3]  ;;  %v2152_v21 = vsel %vm1282_vm0, %v2150_v14, %v2148_v19 }
  0xaa   :  { %273 = vst [vmem:[#allocation1 + $0x650] sm:$0x3] %v3500_v20  ;;  %v3501_v22 = vld [vmem:[%s5345_s0 + $0x192] sm:$0x3]  ;;  %v3502_v23 = vld [vmem:[%s5345_s0 + $0x190] sm:$0x3]  ;;  %2153 = vrot.lane.b32.xlu1 %v2152_v21, %s3830_s10 }
  0xab   :  { %v3487_v24 = vld [vmem:[%s5345_s0 + $0x1ae] sm:$0x3]  ;;  %278 = vst [vmem:[#allocation1 + $0x648] sm:$0x3] %v3501_v22  ;;  %283 = vst [vmem:[#allocation1 + $0x640] sm:$0x3] %v3502_v23 }
  0xac   :  { %208 = vst [vmem:[#allocation1 + $0x6b8] sm:$0x3] %v3487_v24  ;;  %v3488_v25 = vld [vmem:[%s5345_s0 + $0x1ac] sm:$0x3]  ;;  %v3489_v26 = vld [vmem:[%s5345_s0 + $0x1aa] sm:$0x3] }
  0xad   :  { %v3490_v27 = vld [vmem:[%s5345_s0 + $0x1a8] sm:$0x3]  ;;  %213 = vst [vmem:[#allocation1 + $0x6b0] sm:$0x3] %v3488_v25  ;;  %218 = vst [vmem:[#allocation1 + $0x6a8] sm:$0x3] %v3489_v26 }
  0xae   :  { %v2167_v28 = vld [vmem:[#allocation1 + $0x601] ss:$8 sm:$0xf0]   ;;  %223 = vst [vmem:[#allocation1 + $0x6a0] sm:$0x3] %v3490_v27 }
  0xaf   :  { %v3491_v29 = vld [vmem:[%s5345_s0 + $0x1a6] sm:$0x3]  ;;  %v3492_v30 = vld [vmem:[%s5345_s0 + $0x1a4] sm:$0x3]  ;;  %v3493_v31 = vld [vmem:[%s5345_s0 + $0x1a2] sm:$0x3] }
  0xb0   :  { %228 = vst [vmem:[#allocation1 + $0x698] sm:$0x3] %v3491_v29  ;;  %v3494_v32 = vld [vmem:[%s5345_s0 + $0x1a0] sm:$0x3]  ;;  %233 = vst [vmem:[#allocation1 + $0x690] sm:$0x3] %v3492_v30 }
  0xb1   :  { %v2165_v33 = vld [vmem:[#allocation1 + $0x601] ss:$8 sm:$0xf]   ;;  %238 = vst [vmem:[#allocation1 + $0x688] sm:$0x3] %v3493_v31 }
  0xb2   :  { %243 = vst [vmem:[#allocation1 + $0x680] sm:$0x3] %v3494_v32  ;;  %v3479_v34 = vld [vmem:[%s5345_s0 + $0x1be] sm:$0x3]  ;;  %v2169_v35 = vsel %vm1282_vm0, %v2167_v28, %v2165_v33  ;;  %v3480_v36 = vld [vmem:[%s5345_s0 + $0x1bc] sm:$0x3]  ;;  %v1764_v28 = vpop.permute.xlu0 %1763  }
  0xb3   :  { %168 = vst [vmem:[#allocation1 + $0x6f8] sm:$0x3] %v3479_v34  ;;  %v3481_v37 = vld [vmem:[%s5345_s0 + $0x1ba] sm:$0x3]  ;;  %v3482_v38 = vld [vmem:[%s5345_s0 + $0x1b8] sm:$0x3]  ;;  %2170 = vrot.lane.b32.xlu0 %v2169_v35, %s3830_s10 }
  0xb4   :  { %v2184_v39 = vld [vmem:[#allocation1 + $0x641] ss:$8 sm:$0xf0]   ;;  %173 = vst [vmem:[#allocation1 + $0x6f0] sm:$0x3] %v3480_v36 }
  0xb5   :  { %178 = vst [vmem:[#allocation1 + $0x6e8] sm:$0x3] %v3481_v37  ;;  %183 = vst [vmem:[#allocation1 + $0x6e0] sm:$0x3] %v3482_v38  ;;  %v3483_v40 = vld [vmem:[%s5345_s0 + $0x1b6] sm:$0x3]  ;;  %v1797_v37 = vpop.permute.xlu1 %1796  }
  0xb6   :  { %188 = vst [vmem:[#allocation1 + $0x6d8] sm:$0x3] %v3483_v40  ;;  %v3484_v41 = vld [vmem:[%s5345_s0 + $0x1b4] sm:$0x3]  ;;  %v3485_v42 = vld [vmem:[%s5345_s0 + $0x1b2] sm:$0x3] }
  0xb7   :  { %v3486_v43 = vld [vmem:[%s5345_s0 + $0x1b0] sm:$0x3]  ;;  %193 = vst [vmem:[#allocation1 + $0x6d0] sm:$0x3] %v3484_v41  ;;  %198 = vst [vmem:[#allocation1 + $0x6c8] sm:$0x3] %v3485_v42 }
  0xb8   :  { %v2182_v44 = vld [vmem:[#allocation1 + $0x641] ss:$8 sm:$0xf]   ;;  %203 = vst [vmem:[#allocation1 + $0x6c0] sm:$0x3] %v3486_v43 }
  0xb9   :  { %v3471_v45 = vld [vmem:[%s5345_s0 + $0x1ce] sm:$0x3]  ;;  %v2186_v46 = vsel %vm1282_vm0, %v2184_v39, %v2182_v44  ;;  %v2201_v47 = vld [vmem:[#allocation1 + $0x681] ss:$8 sm:$0xf0]  }
  0xba   :  { %128 = vst [vmem:[#allocation1 + $0x738] sm:$0x3] %v3471_v45  ;;  %v3472_v48 = vld [vmem:[%s5345_s0 + $0x1cc] sm:$0x3]  ;;  %2187 = vrot.lane.b32.xlu1 %v2186_v46, %s3830_s10  ;;  %v3473_v49 = vld [vmem:[%s5345_s0 + $0x1ca] sm:$0x3] }
  0xbb   :  { %133 = vst [vmem:[#allocation1 + $0x730] sm:$0x3] %v3472_v48  ;;  %v3474_v50 = vld [vmem:[%s5345_s0 + $0x1c8] sm:$0x3]  ;;  %v3475_v51 = vld [vmem:[%s5345_s0 + $0x1c6] sm:$0x3] }
  0xbc   :  { %v2199_v52 = vld [vmem:[#allocation1 + $0x681] ss:$8 sm:$0xf]   ;;  %138 = vst [vmem:[#allocation1 + $0x728] sm:$0x3] %v3473_v49 }
  0xbd   :  { %143 = vst [vmem:[#allocation1 + $0x720] sm:$0x3] %v3474_v50  ;;  %148 = vst [vmem:[#allocation1 + $0x718] sm:$0x3] %v3475_v51  ;;  %v3476_v53 = vld [vmem:[%s5345_s0 + $0x1c4] sm:$0x3]  ;;  %v2203_v54 = vsel %vm1282_vm0, %v2201_v47, %v2199_v52  ;;  %v1780_v47 = vpop.permute.xlu0 %1779  }
  0xbe   :  { %153 = vst [vmem:[#allocation1 + $0x710] sm:$0x3] %v3476_v53  ;;  %v3477_v55 = vld [vmem:[%s5345_s0 + $0x1c2] sm:$0x3]  ;;  %v3478_v56 = vld [vmem:[%s5345_s0 + $0x1c0] sm:$0x3]  ;;  %2204 = vrot.lane.b32.xlu0 %v2203_v54, %s3830_s10 }
  0xbf   :  { %v3463_v57 = vld [vmem:[%s5345_s0 + $0x1de] sm:$0x3]  ;;  %v2218_v58 = vld [vmem:[#allocation1 + $0x6c1] ss:$8 sm:$0xf0]  }
  0xc0   :  { %158 = vst [vmem:[#allocation1 + $0x708] sm:$0x3] %v3477_v55  ;;  %163 = vst [vmem:[#allocation1 + $0x700] sm:$0x3] %v3478_v56  ;;  %v3464_v59 = vld [vmem:[%s5345_s0 + $0x1dc] sm:$0x3] }
  0xc1   :  { %88 = vst [vmem:[#allocation1 + $0x778] sm:$0x3] %v3463_v57  ;;  %93 = vst [vmem:[#allocation1 + $0x770] sm:$0x3] %v3464_v59  ;;  %v3465_v60 = vld [vmem:[%s5345_s0 + $0x1da] sm:$0x3] }
  0xc2   :  { %v3466_v61 = vld [vmem:[%s5345_s0 + $0x1d8] sm:$0x3]  ;;  %v3467_v62 = vld [vmem:[%s5345_s0 + $0x1d6] sm:$0x3]  ;;  %98 = vst [vmem:[#allocation1 + $0x768] sm:$0x3] %v3465_v60 }
  0xc3   :  { %v2216_v63 = vld [vmem:[#allocation1 + $0x6c1] ss:$8 sm:$0xf]   ;;  %103 = vst [vmem:[#allocation1 + $0x760] sm:$0x3] %v3466_v61 }
  0xc4   :  { %108 = vst [vmem:[#allocation1 + $0x758] sm:$0x3] %v3467_v62  ;;  %v3468_v0 = vld [vmem:[%s5345_s0 + $0x1d4] sm:$0x3]  ;;  %v2220_v1 = vsel %vm1282_vm0, %v2218_v58, %v2216_v63  ;;  %v3469_v2 = vld [vmem:[%s5345_s0 + $0x1d2] sm:$0x3]  ;;  %v1814_v62 = vpop.permute.xlu1 %1813  }
  0xc5   :  { %113 = vst [vmem:[#allocation1 + $0x750] sm:$0x3] %v3468_v0  ;;  %v3470_v3 = vld [vmem:[%s5345_s0 + $0x1d0] sm:$0x3]  ;;  %v3455_v4 = vld [vmem:[%s5345_s0 + $0x1ee] sm:$0x3]  ;;  %2221 = vrot.lane.b32.xlu1 %v2220_v1, %s3830_s10 }
  0xc6   :  { %118 = vst [vmem:[#allocation1 + $0x748] sm:$0x3] %v3469_v2  ;;  %123 = vst [vmem:[#allocation1 + $0x740] sm:$0x3] %v3470_v3  ;;  %v3456_v5 = vld [vmem:[%s5345_s0 + $0x1ec] sm:$0x3] }
  0xc7   :  { %48 = vst [vmem:[#allocation1 + $0x7b8] sm:$0x3] %v3455_v4  ;;  %v3457_v6 = vld [vmem:[%s5345_s0 + $0x1ea] sm:$0x3]  ;;  %v3458_v7 = vld [vmem:[%s5345_s0 + $0x1e8] sm:$0x3] }
  0xc8   :  { %v2235_v8 = vld [vmem:[#allocation1 + $0x701] ss:$8 sm:$0xf0]   ;;  %53 = vst [vmem:[#allocation1 + $0x7b0] sm:$0x3] %v3456_v5 }
  0xc9   :  { %58 = vst [vmem:[#allocation1 + $0x7a8] sm:$0x3] %v3457_v6  ;;  %63 = vst [vmem:[#allocation1 + $0x7a0] sm:$0x3] %v3458_v7  ;;  %v3459_v9 = vld [vmem:[%s5345_s0 + $0x1e6] sm:$0x3] }
  0xca   :  { %68 = vst [vmem:[#allocation1 + $0x798] sm:$0x3] %v3459_v9  ;;  %v3460_v10 = vld [vmem:[%s5345_s0 + $0x1e4] sm:$0x3]  ;;  %v3461_v11 = vld [vmem:[%s5345_s0 + $0x1e2] sm:$0x3] }
  0xcb   :  { %v3462_v12 = vld [vmem:[%s5345_s0 + $0x1e0] sm:$0x3]  ;;  %73 = vst [vmem:[#allocation1 + $0x790] sm:$0x3] %v3460_v10  ;;  %78 = vst [vmem:[#allocation1 + $0x788] sm:$0x3] %v3461_v11 }
  0xcc   :  { %v2233_v13 = vld [vmem:[#allocation1 + $0x701] ss:$8 sm:$0xf]   ;;  %83 = vst [vmem:[#allocation1 + $0x780] sm:$0x3] %v3462_v12  ;;  %v1831_v12 = vpop.permute.xlu0 %1830  }
  0xcd   :  { %v3447_v14 = vld [vmem:[%s5345_s0 + $0x1fe] sm:$0x3]  ;;  %v2237_v15 = vsel %vm1282_vm0, %v2235_v8, %v2233_v13  ;;  %v3448_v16 = vld [vmem:[%s5345_s0 + $0x1fc] sm:$0x3]  ;;  %v3449_v17 = vld [vmem:[%s5345_s0 + $0x1fa] sm:$0x3] }
  0xce   :  { %8 = vst [vmem:[#allocation1 + $0x7f8] sm:$0x3] %v3447_v14  ;;  %v3450_v18 = vld [vmem:[%s5345_s0 + $0x1f8] sm:$0x3]  ;;  %2238 = vrot.lane.b32.xlu0 %v2237_v15, %s3830_s10  ;;  %13 = vst [vmem:[#allocation1 + $0x7f0] sm:$0x3] %v3448_v16 }
  0xcf   :  { %v2252_v19 = vld [vmem:[#allocation1 + $0x741] ss:$8 sm:$0xf0]   ;;  %18 = vst [vmem:[#allocation1 + $0x7e8] sm:$0x3] %v3449_v17 }
  0xd0   :  { %23 = vst [vmem:[#allocation1 + $0x7e0] sm:$0x3] %v3450_v18  ;;  %v3451_v20 = vld [vmem:[%s5345_s0 + $0x1f6] sm:$0x3]  ;;  %v3452_v21 = vld [vmem:[%s5345_s0 + $0x1f4] sm:$0x3] }
  0xd1   :  { %28 = vst [vmem:[#allocation1 + $0x7d8] sm:$0x3] %v3451_v20  ;;  %v3453_v22 = vld [vmem:[%s5345_s0 + $0x1f2] sm:$0x3]  ;;  %v3454_v23 = vld [vmem:[%s5345_s0 + $0x1f0] sm:$0x3] }
  0xd2   :  { %v2250_v24 = vld [vmem:[#allocation1 + $0x741] ss:$8 sm:$0xf]   ;;  %33 = vst [vmem:[#allocation1 + $0x7d0] sm:$0x3] %v3452_v21 }
  0xd3   :  { %38 = vst [vmem:[#allocation1 + $0x7c8] sm:$0x3] %v3453_v22  ;;  %43 = vst [vmem:[#allocation1 + $0x7c0] sm:$0x3] %v3454_v23  ;;  %v2254_v26 = vsel %vm1282_vm0, %v2252_v19, %v2250_v24 }
  0xd4   :  { %v1280_v25 = vld [vmem:[#allocation1] ss:$8 sm:$0xf]   ;;  %v2269_v27 = vld [vmem:[#allocation1 + $0x781] ss:$8 sm:$0xf0]   ;;  %2255 = vrot.lane.b32.xlu1 %v2254_v26, %s3830_s10 }
  0xd5   :  { %v1281_v29 = vld [vmem:[#allocation1] ss:$8 sm:$0xf0]   ;;  %v2267_v33 = vld [vmem:[#allocation1 + $0x781] ss:$8 sm:$0xf]  }
  0xd6   :  { %v1283_v30 = vsel %vm1282_vm0, %v1281_v29, %v1280_v25  ;;  %v1308_v31 = vld [vmem:[#allocation1 + $0x80] ss:$8 sm:$0xf]   ;;  %v2271_v36 = vsel %vm1282_vm0, %v2269_v27, %v2267_v33  ;;  %v1848_v25 = vpop.permute.xlu1 %1847  }
  0xd7   :  { %v1310_v32 = vld [vmem:[#allocation1 + $0x80] ss:$8 sm:$0xf0]   ;;  %1285 = vst.msk [vmem:[#allocation0] sm:$0x3] %vm1284_vm1, %v1283_v30   ;;  %2272 = vrot.lane.b32.xlu0 %v2271_v36, %s3830_s10 }
  0xd8   :  { %1287 = vst.msk [vmem:[#allocation0 + $0x6] sm:$0xc] %vm1284_vm1, %v1283_v30   ;;  %1289 = vst.msk [vmem:[#allocation0 + $0xc] sm:$0x30] %vm1284_vm1, %v1283_v30   ;;  %v1312_v34 = vsel %vm1282_vm0, %v1310_v32, %v1308_v31  ;;  %v1865_v32 = vpop.permute.xlu0 %1864  }
  0xd9   :  { %1291 = vst.msk [vmem:[#allocation0 + $0x12] sm:$0xc0] %vm1284_vm1, %v1283_v30   ;;  %v1293_v35 = vld [vmem:[#allocation1 + $0x40] ss:$8 sm:$0xf]  }
  0xda   :  { %1766 = vst.msk [vmem:[#allocation0] sm:$0x3] %vm1765_vm2, %v1764_v28   ;;  %1768 = vst.msk [vmem:[#allocation0 + $0x6] sm:$0xc] %vm1765_vm2, %v1764_v28  }
  0xdb   :  { %1770 = vst.msk [vmem:[#allocation0 + $0xc] sm:$0x30] %vm1765_vm2, %v1764_v28   ;;  %1772 = vst.msk [vmem:[#allocation0 + $0x12] sm:$0xc0] %vm1765_vm2, %v1764_v28  }
  0xdc   :  { %1315 = vst.msk [vmem:[#allocation0 + $0x40] sm:$0x3] %vm1284_vm1, %v1312_v34   ;;  %1317 = vst.msk [vmem:[#allocation0 + $0x46] sm:$0xc] %vm1284_vm1, %v1312_v34  }
  0xdd   :  { %1319 = vst.msk [vmem:[#allocation0 + $0x4c] sm:$0x30] %vm1284_vm1, %v1312_v34   ;;  %1321 = vst.msk [vmem:[#allocation0 + $0x52] sm:$0xc0] %vm1284_vm1, %v1312_v34  }
  0xde   :  { %v1295_v38 = vld [vmem:[#allocation1 + $0x40] ss:$8 sm:$0xf0]   ;;  %v2286_v40 = vld [vmem:[#allocation1 + $0x7c1] ss:$8 sm:$0xf0]  }
  0xdf   :  { %v1323_v39 = vld [vmem:[#allocation1 + $0xc0] ss:$8 sm:$0xf]   ;;  %1800 = vst.msk [vmem:[#allocation0 + $0x40] sm:$0x3] %vm1765_vm2, %v1797_v37   ;;  %v1297_v41 = vsel %vm1282_vm0, %v1295_v38, %v1293_v35 }
  0xe0   :  { %1802 = vst.msk [vmem:[#allocation0 + $0x46] sm:$0xc] %vm1765_vm2, %v1797_v37   ;;  %1804 = vst.msk [vmem:[#allocation0 + $0x4c] sm:$0x30] %vm1765_vm2, %v1797_v37  }
  0xe1   :  { %1806 = vst.msk [vmem:[#allocation0 + $0x52] sm:$0xc0] %vm1765_vm2, %v1797_v37   ;;  %v1325_v42 = vld [vmem:[#allocation1 + $0xc0] ss:$8 sm:$0xf0]  }
  0xe2   :  { %1300 = vst.msk [vmem:[#allocation0 + $0x20] sm:$0x3] %vm1284_vm1, %v1297_v41   ;;  %1302 = vst.msk [vmem:[#allocation0 + $0x26] sm:$0xc] %vm1284_vm1, %v1297_v41   ;;  %v1327_v43 = vsel %vm1282_vm0, %v1325_v42, %v1323_v39  ;;  %v2303_v59 = vld [vmem:[#allocation0] sm:$0x3] }
  0xe3   :  { %1304 = vst.msk [vmem:[#allocation0 + $0x2c] sm:$0x30] %vm1284_vm1, %v1297_v41   ;;  %1306 = vst.msk [vmem:[#allocation0 + $0x32] sm:$0xc0] %vm1284_vm1, %v1297_v41   ;;  %v2307_v60 = vld [vmem:[#allocation0 + $0x8] sm:$0x3] }
  0xe4   :  { %v1338_v44 = vld [vmem:[#allocation1 + $0x100] ss:$8 sm:$0xf]   ;;  %v2284_v46 = vld [vmem:[#allocation1 + $0x7c1] ss:$8 sm:$0xf]  }
  0xe5   :  { %v1340_v45 = vld [vmem:[#allocation1 + $0x100] ss:$8 sm:$0xf0]   ;;  %1330 = vst.msk [vmem:[#allocation0 + $0x60] sm:$0x3] %vm1284_vm1, %v1327_v43   ;;  %v2288_v50 = vsel %vm1282_vm0, %v2286_v40, %v2284_v46  ;;  %2305 = vst [vmem:[%s5346_s1] sm:$0x3] %v2303_v59 }
  0xe6   :  { %1332 = vst.msk [vmem:[#allocation0 + $0x66] sm:$0xc] %vm1284_vm1, %v1327_v43   ;;  %1334 = vst.msk [vmem:[#allocation0 + $0x6c] sm:$0x30] %vm1284_vm1, %v1327_v43   ;;  %v1342_v48 = vsel %vm1282_vm0, %v1340_v45, %v1338_v44  ;;  %2289 = vrot.lane.b32.xlu1 %v2288_v50, %s3830_s10  ;;  %v2312_v61 = vld [vmem:[#allocation0 + $0x10] sm:$0x3]  ;;  %v1882_v45 = vpop.permute.xlu1 %1881  }
  0xe7   :  { %1336 = vst.msk [vmem:[#allocation0 + $0x72] sm:$0xc0] %vm1284_vm1, %v1327_v43   ;;  %v1353_v49 = vld [vmem:[#allocation1 + $0x140] ss:$8 sm:$0xf]  }
  0xe8   :  { %1783 = vst.msk [vmem:[#allocation0 + $0x20] sm:$0x3] %vm1765_vm2, %v1780_v47   ;;  %1785 = vst.msk [vmem:[#allocation0 + $0x26] sm:$0xc] %vm1765_vm2, %v1780_v47   ;;  %v2318_v0 = vld [vmem:[#allocation0 + $0x18] sm:$0x3] }
  0xe9   :  { %1787 = vst.msk [vmem:[#allocation0 + $0x2c] sm:$0x30] %vm1765_vm2, %v1780_v47   ;;  %1789 = vst.msk [vmem:[#allocation0 + $0x32] sm:$0xc0] %vm1765_vm2, %v1780_v47   ;;  %v2348_v1 = vld [vmem:[#allocation0 + $0x40] sm:$0x3] }
  0xea   :  { %1345 = vst.msk [vmem:[#allocation0 + $0x80] sm:$0x3] %vm1284_vm1, %v1342_v48   ;;  %1347 = vst.msk [vmem:[#allocation0 + $0x86] sm:$0xc] %vm1284_vm1, %v1342_v48   ;;  %v2354_v2 = vld [vmem:[#allocation0 + $0x48] sm:$0x3] }
  0xeb   :  { %1349 = vst.msk [vmem:[#allocation0 + $0x8c] sm:$0x30] %vm1284_vm1, %v1342_v48   ;;  %1351 = vst.msk [vmem:[#allocation0 + $0x92] sm:$0xc0] %vm1284_vm1, %v1342_v48   ;;  %v2360_v3 = vld [vmem:[#allocation0 + $0x50] sm:$0x3] }
  0xec   :  { %v1355_v51 = vld [vmem:[#allocation1 + $0x140] ss:$8 sm:$0xf0]   ;;  %3702 = vst [vmem:[%s5346_s1 + $0x2] sm:$0x3] %v2307_v60 }
  0xed   :  { %v1368_v52 = vld [vmem:[#allocation1 + $0x180] ss:$8 sm:$0xf]   ;;  %v1357_v53 = vsel %vm1282_vm0, %v1355_v51, %v1353_v49  ;;  %3703 = vst [vmem:[%s5346_s1 + $0x4] sm:$0x3] %v2312_v61 }
  0xee   :  { %v1370_v54 = vld [vmem:[#allocation1 + $0x180] ss:$8 sm:$0xf0]   ;;  %1360 = vst.msk [vmem:[#allocation0 + $0xa0] sm:$0x3] %vm1284_vm1, %v1357_v53  }
  0xef   :  { %v1383_v55 = vld [vmem:[#allocation1 + $0x1c0] ss:$8 sm:$0xf]   ;;  %1362 = vst.msk [vmem:[#allocation0 + $0xa6] sm:$0xc] %vm1284_vm1, %v1357_v53   ;;  %v1372_v56 = vsel %vm1282_vm0, %v1370_v54, %v1368_v52 }
  0xf0   :  { %1364 = vst.msk [vmem:[#allocation0 + $0xac] sm:$0x30] %vm1284_vm1, %v1357_v53   ;;  %1366 = vst.msk [vmem:[#allocation0 + $0xb2] sm:$0xc0] %vm1284_vm1, %v1357_v53   ;;  %v2366_v4 = vld [vmem:[#allocation0 + $0x58] sm:$0x3] }
  0xf1   :  { %v1385_v57 = vld [vmem:[#allocation1 + $0x1c0] ss:$8 sm:$0xf0]   ;;  %1375 = vst.msk [vmem:[#allocation0 + $0xc0] sm:$0x3] %vm1284_vm1, %v1372_v56  }
  0xf2   :  { %v1398_v58 = vld [vmem:[#allocation1 + $0x200] ss:$8 sm:$0xf]   ;;  %1377 = vst.msk [vmem:[#allocation0 + $0xc6] sm:$0xc] %vm1284_vm1, %v1372_v56   ;;  %v1387_v63 = vsel %vm1282_vm0, %v1385_v57, %v1383_v55 }
  0xf3   :  { %1379 = vst.msk [vmem:[#allocation0 + $0xcc] sm:$0x30] %vm1284_vm1, %v1372_v56   ;;  %1381 = vst.msk [vmem:[#allocation0 + $0xd2] sm:$0xc0] %vm1284_vm1, %v1372_v56   ;;  %v2324_v7 = vld [vmem:[#allocation0 + $0x20] sm:$0x3] }
  0xf4   :  { %1817 = vst.msk [vmem:[#allocation0 + $0x60] sm:$0x3] %vm1765_vm2, %v1814_v62   ;;  %1819 = vst.msk [vmem:[#allocation0 + $0x66] sm:$0xc] %vm1765_vm2, %v1814_v62   ;;  %v2330_v8 = vld [vmem:[#allocation0 + $0x28] sm:$0x3] }
  0xf5   :  { %1821 = vst.msk [vmem:[#allocation0 + $0x6c] sm:$0x30] %vm1765_vm2, %v1814_v62   ;;  %1823 = vst.msk [vmem:[#allocation0 + $0x72] sm:$0xc0] %vm1765_vm2, %v1814_v62   ;;  %v2336_v9 = vld [vmem:[#allocation0 + $0x30] sm:$0x3]  ;;  %v1899_v62 = vpop.permute.xlu0 %1898  }
  0xf6   :  { %1390 = vst.msk [vmem:[#allocation0 + $0xe0] sm:$0x3] %vm1284_vm1, %v1387_v63   ;;  %1392 = vst.msk [vmem:[#allocation0 + $0xe6] sm:$0xc] %vm1284_vm1, %v1387_v63   ;;  %v2342_v11 = vld [vmem:[#allocation0 + $0x38] sm:$0x3] }
  0xf7   :  { %1394 = vst.msk [vmem:[#allocation0 + $0xec] sm:$0x30] %vm1284_vm1, %v1387_v63   ;;  %1396 = vst.msk [vmem:[#allocation0 + $0xf2] sm:$0xc0] %vm1284_vm1, %v1387_v63  }
  0xf8   :  { %3704 = vst [vmem:[%s5346_s1 + $0x6] sm:$0x3] %v2318_v0  ;;  %3709 = vst [vmem:[%s5346_s1 + $0x10] sm:$0x3] %v2348_v1 }
  0xf9   :  { %3710 = vst [vmem:[%s5346_s1 + $0x12] sm:$0x3] %v2354_v2  ;;  %3711 = vst [vmem:[%s5346_s1 + $0x14] sm:$0x3] %v2360_v3 }
  0xfa   :  { %3712 = vst [vmem:[%s5346_s1 + $0x16] sm:$0x3] %v2366_v4  ;;  %v1400_v5 = vld [vmem:[#allocation1 + $0x200] ss:$8 sm:$0xf0]  }
  0xfb   :  { %v1413_v6 = vld [vmem:[#allocation1 + $0x240] ss:$8 sm:$0xf]   ;;  %v1402_v10 = vsel %vm1282_vm0, %v1400_v5, %v1398_v58  ;;  %3705 = vst [vmem:[%s5346_s1 + $0x8] sm:$0x3] %v2324_v7 }
  0xfc   :  { %3706 = vst [vmem:[%s5346_s1 + $0xa] sm:$0x3] %v2330_v8  ;;  %3707 = vst [vmem:[%s5346_s1 + $0xc] sm:$0x3] %v2336_v9  ;;  %v2372_v20 = vld [vmem:[#allocation0 + $0x60] sm:$0x3] }
  0xfd   :  { %1405 = vst.msk [vmem:[#allocation0 + $0x100] sm:$0x3] %vm1284_vm1, %v1402_v10   ;;  %1407 = vst.msk [vmem:[#allocation0 + $0x106] sm:$0xc] %vm1284_vm1, %v1402_v10   ;;  %v2378_v21 = vld [vmem:[#allocation0 + $0x68] sm:$0x3] }
  0xfe   :  { %1409 = vst.msk [vmem:[#allocation0 + $0x10c] sm:$0x30] %vm1284_vm1, %v1402_v10   ;;  %1411 = vst.msk [vmem:[#allocation0 + $0x112] sm:$0xc0] %vm1284_vm1, %v1402_v10   ;;  %v2384_v22 = vld [vmem:[#allocation0 + $0x70] sm:$0x3] }
  0xff   :  { %v1415_v13 = vld [vmem:[#allocation1 + $0x240] ss:$8 sm:$0xf0]   ;;  %3708 = vst [vmem:[%s5346_s1 + $0xe] sm:$0x3] %v2342_v11  ;;  %v1916_v11 = vpop.permute.xlu1 %1915  }
 0x100   :  { %1834 = vst.msk [vmem:[#allocation0 + $0x80] sm:$0x3] %vm1765_vm2, %v1831_v12   ;;  %1836 = vst.msk [vmem:[#allocation0 + $0x86] sm:$0xc] %vm1765_vm2, %v1831_v12   ;;  %v1417_v14 = vsel %vm1282_vm0, %v1415_v13, %v1413_v6  ;;  %v2390_v24 = vld [vmem:[#allocation0 + $0x78] sm:$0x3] }
 0x101   :  { %1838 = vst.msk [vmem:[#allocation0 + $0x8c] sm:$0x30] %vm1765_vm2, %v1831_v12   ;;  %1840 = vst.msk [vmem:[#allocation0 + $0x92] sm:$0xc0] %vm1765_vm2, %v1831_v12  }
 0x102   :  { %v1428_v15 = vld [vmem:[#allocation1 + $0x280] ss:$8 sm:$0xf]   ;;  %1420 = vst.msk [vmem:[#allocation0 + $0x120] sm:$0x3] %vm1284_vm1, %v1417_v14  }
 0x103   :  { %v1430_v16 = vld [vmem:[#allocation1 + $0x280] ss:$8 sm:$0xf0]   ;;  %1422 = vst.msk [vmem:[#allocation0 + $0x126] sm:$0xc] %vm1284_vm1, %v1417_v14  }
 0x104   :  { %1424 = vst.msk [vmem:[#allocation0 + $0x12c] sm:$0x30] %vm1284_vm1, %v1417_v14   ;;  %1426 = vst.msk [vmem:[#allocation0 + $0x132] sm:$0xc0] %vm1284_vm1, %v1417_v14   ;;  %v1432_v17 = vsel %vm1282_vm0, %v1430_v16, %v1428_v15 }
 0x105   :  { %v1443_v18 = vld [vmem:[#allocation1 + $0x2c0] ss:$8 sm:$0xf]   ;;  %1435 = vst.msk [vmem:[#allocation0 + $0x140] sm:$0x3] %vm1284_vm1, %v1432_v17  }
 0x106   :  { %v1445_v19 = vld [vmem:[#allocation1 + $0x2c0] ss:$8 sm:$0xf0]   ;;  %1437 = vst.msk [vmem:[#allocation0 + $0x146] sm:$0xc] %vm1284_vm1, %v1432_v17  }
 0x107   :  { %1439 = vst.msk [vmem:[#allocation0 + $0x14c] sm:$0x30] %vm1284_vm1, %v1432_v17   ;;  %1441 = vst.msk [vmem:[#allocation0 + $0x152] sm:$0xc0] %vm1284_vm1, %v1432_v17   ;;  %v1447_v23 = vsel %vm1282_vm0, %v1445_v19, %v1443_v18  ;;  %v2396_v36 = vld [vmem:[#allocation0 + $0x80] sm:$0x3]  ;;  %v1933_v18 = vpop.permute.xlu0 %1932  }
 0x108   :  { %3713 = vst [vmem:[%s5346_s1 + $0x18] sm:$0x3] %v2372_v20  ;;  %3714 = vst [vmem:[%s5346_s1 + $0x1a] sm:$0x3] %v2378_v21  ;;  %v2402_v37 = vld [vmem:[#allocation0 + $0x88] sm:$0x3] }
 0x109   :  { %3715 = vst [vmem:[%s5346_s1 + $0x1c] sm:$0x3] %v2384_v22  ;;  %1450 = vst.msk [vmem:[#allocation0 + $0x160] sm:$0x3] %vm1284_vm1, %v1447_v23   ;;  %v2408_v38 = vld [vmem:[#allocation0 + $0x90] sm:$0x3] }
 0x10a   :  { %1452 = vst.msk [vmem:[#allocation0 + $0x166] sm:$0xc] %vm1284_vm1, %v1447_v23   ;;  %1454 = vst.msk [vmem:[#allocation0 + $0x16c] sm:$0x30] %vm1284_vm1, %v1447_v23   ;;  %v2414_v40 = vld [vmem:[#allocation0 + $0x98] sm:$0x3] }
 0x10b   :  { %1456 = vst.msk [vmem:[#allocation0 + $0x172] sm:$0xc0] %vm1284_vm1, %v1447_v23   ;;  %v1458_v26 = vld [vmem:[#allocation1 + $0x300] ss:$8 sm:$0xf]  }
 0x10c   :  { %3716 = vst [vmem:[%s5346_s1 + $0x1e] sm:$0x3] %v2390_v24  ;;  %1851 = vst.msk [vmem:[#allocation0 + $0xa0] sm:$0x3] %vm1765_vm2, %v1848_v25  }
 0x10d   :  { %1853 = vst.msk [vmem:[#allocation0 + $0xa6] sm:$0xc] %vm1765_vm2, %v1848_v25   ;;  %1855 = vst.msk [vmem:[#allocation0 + $0xac] sm:$0x30] %vm1765_vm2, %v1848_v25  }
 0x10e   :  { %1857 = vst.msk [vmem:[#allocation0 + $0xb2] sm:$0xc0] %vm1765_vm2, %v1848_v25   ;;  %v1460_v27 = vld [vmem:[#allocation1 + $0x300] ss:$8 sm:$0xf0]  }
 0x10f   :  { %v1473_v28 = vld [vmem:[#allocation1 + $0x340] ss:$8 sm:$0xf]   ;;  %v1462_v29 = vsel %vm1282_vm0, %v1460_v27, %v1458_v26  ;;  %1868 = vst.msk [vmem:[#allocation0 + $0xc0] sm:$0x3] %vm1765_vm2, %v1865_v32  }
 0x110   :  { %v1475_v30 = vld [vmem:[#allocation1 + $0x340] ss:$8 sm:$0xf0]   ;;  %1465 = vst.msk [vmem:[#allocation0 + $0x180] sm:$0x3] %vm1284_vm1, %v1462_v29  }
 0x111   :  { %v1488_v31 = vld [vmem:[#allocation1 + $0x380] ss:$8 sm:$0xf]   ;;  %1467 = vst.msk [vmem:[#allocation0 + $0x186] sm:$0xc] %vm1284_vm1, %v1462_v29   ;;  %v1477_v33 = vsel %vm1282_vm0, %v1475_v30, %v1473_v28 }
 0x112   :  { %1469 = vst.msk [vmem:[#allocation0 + $0x18c] sm:$0x30] %vm1284_vm1, %v1462_v29   ;;  %1471 = vst.msk [vmem:[#allocation0 + $0x192] sm:$0xc0] %vm1284_vm1, %v1462_v29  }
 0x113   :  { %v1490_v34 = vld [vmem:[#allocation1 + $0x380] ss:$8 sm:$0xf0]   ;;  %1870 = vst.msk [vmem:[#allocation0 + $0xc6] sm:$0xc] %vm1765_vm2, %v1865_v32  }
 0x114   :  { %v1503_v35 = vld [vmem:[#allocation1 + $0x3c0] ss:$8 sm:$0xf]   ;;  %1872 = vst.msk [vmem:[#allocation0 + $0xcc] sm:$0x30] %vm1765_vm2, %v1865_v32   ;;  %v1492_v39 = vsel %vm1282_vm0, %v1490_v34, %v1488_v31  ;;  %v1950_v31 = vpop.permute.xlu1 %1949  }
 0x115   :  { %1874 = vst.msk [vmem:[#allocation0 + $0xd2] sm:$0xc0] %vm1765_vm2, %v1865_v32   ;;  %3717 = vst [vmem:[%s5346_s1 + $0x20] sm:$0x3] %v2396_v36  ;;  %v2420_v49 = vld [vmem:[#allocation0 + $0xa0] sm:$0x3] }
 0x116   :  { %1480 = vst.msk [vmem:[#allocation0 + $0x1a0] sm:$0x3] %vm1284_vm1, %v1477_v33   ;;  %1482 = vst.msk [vmem:[#allocation0 + $0x1a6] sm:$0xc] %vm1284_vm1, %v1477_v33   ;;  %v2426_v50 = vld [vmem:[#allocation0 + $0xa8] sm:$0x3] }
 0x117   :  { %1484 = vst.msk [vmem:[#allocation0 + $0x1ac] sm:$0x30] %vm1284_vm1, %v1477_v33   ;;  %1486 = vst.msk [vmem:[#allocation0 + $0x1b2] sm:$0xc0] %vm1284_vm1, %v1477_v33   ;;  %v2432_v51 = vld [vmem:[#allocation0 + $0xb0] sm:$0x3] }
 0x118   :  { %3718 = vst [vmem:[%s5346_s1 + $0x22] sm:$0x3] %v2402_v37  ;;  %3719 = vst [vmem:[%s5346_s1 + $0x24] sm:$0x3] %v2408_v38  ;;  %v2438_v53 = vld [vmem:[#allocation0 + $0xb8] sm:$0x3] }
 0x119   :  { %1495 = vst.msk [vmem:[#allocation0 + $0x1c0] sm:$0x3] %vm1284_vm1, %v1492_v39   ;;  %1497 = vst.msk [vmem:[#allocation0 + $0x1c6] sm:$0xc] %vm1284_vm1, %v1492_v39   ;;  %v2444_v57 = vld [vmem:[#allocation0 + $0xc0] sm:$0x3] }
 0x11a   :  { %1499 = vst.msk [vmem:[#allocation0 + $0x1cc] sm:$0x30] %vm1284_vm1, %v1492_v39   ;;  %1501 = vst.msk [vmem:[#allocation0 + $0x1d2] sm:$0xc0] %vm1284_vm1, %v1492_v39   ;;  %v2450_v58 = vld [vmem:[#allocation0 + $0xc8] sm:$0x3] }
 0x11b   :  { %v1505_v41 = vld [vmem:[#allocation1 + $0x3c0] ss:$8 sm:$0xf0]   ;;  %3720 = vst [vmem:[%s5346_s1 + $0x26] sm:$0x3] %v2414_v40 }
 0x11c   :  { %v1507_v42 = vsel %vm1282_vm0, %v1505_v41, %v1503_v35  ;;  %v1518_v43 = vld [vmem:[#allocation1 + $0x400] ss:$8 sm:$0xf]   ;;  %1885 = vst.msk [vmem:[#allocation0 + $0xe0] sm:$0x3] %vm1765_vm2, %v1882_v45  }
 0x11d   :  { %v1520_v44 = vld [vmem:[#allocation1 + $0x400] ss:$8 sm:$0xf0]   ;;  %1510 = vst.msk [vmem:[#allocation0 + $0x1e0] sm:$0x3] %vm1284_vm1, %v1507_v42  }
 0x11e   :  { %1512 = vst.msk [vmem:[#allocation0 + $0x1e6] sm:$0xc] %vm1284_vm1, %v1507_v42   ;;  %1514 = vst.msk [vmem:[#allocation0 + $0x1ec] sm:$0x30] %vm1284_vm1, %v1507_v42   ;;  %v1522_v46 = vsel %vm1282_vm0, %v1520_v44, %v1518_v43  ;;  %v2456_v59 = vld [vmem:[#allocation0 + $0xd0] sm:$0x3] }
 0x11f   :  { %1516 = vst.msk [vmem:[#allocation0 + $0x1f2] sm:$0xc0] %vm1284_vm1, %v1507_v42   ;;  %v1533_v47 = vld [vmem:[#allocation1 + $0x440] ss:$8 sm:$0xf]  }
 0x120   :  { %v1535_v48 = vld [vmem:[#allocation1 + $0x440] ss:$8 sm:$0xf0]   ;;  %1887 = vst.msk [vmem:[#allocation0 + $0xe6] sm:$0xc] %vm1765_vm2, %v1882_v45  }
 0x121   :  { %1889 = vst.msk [vmem:[#allocation0 + $0xec] sm:$0x30] %vm1765_vm2, %v1882_v45   ;;  %1891 = vst.msk [vmem:[#allocation0 + $0xf2] sm:$0xc0] %vm1765_vm2, %v1882_v45   ;;  %v1537_v52 = vsel %vm1282_vm0, %v1535_v48, %v1533_v47  ;;  %v2462_v61 = vld [vmem:[#allocation0 + $0xd8] sm:$0x3]  ;;  %v1967_v48 = vpop.permute.xlu0 %1966  }
 0x122   :  { %1525 = vst.msk [vmem:[#allocation0 + $0x200] sm:$0x3] %vm1284_vm1, %v1522_v46   ;;  %1527 = vst.msk [vmem:[#allocation0 + $0x206] sm:$0xc] %vm1284_vm1, %v1522_v46  }
 0x123   :  { %1529 = vst.msk [vmem:[#allocation0 + $0x20c] sm:$0x30] %vm1284_vm1, %v1522_v46   ;;  %1531 = vst.msk [vmem:[#allocation0 + $0x212] sm:$0xc0] %vm1284_vm1, %v1522_v46   ;;  %v2468_v6 = vld [vmem:[#allocation0 + $0xe0] sm:$0x3] }
 0x124   :  { %3721 = vst [vmem:[%s5346_s1 + $0x28] sm:$0x3] %v2420_v49  ;;  %3722 = vst [vmem:[%s5346_s1 + $0x2a] sm:$0x3] %v2426_v50 }
 0x125   :  { %3723 = vst [vmem:[%s5346_s1 + $0x2c] sm:$0x3] %v2432_v51  ;;  %1540 = vst.msk [vmem:[#allocation0 + $0x220] sm:$0x3] %vm1284_vm1, %v1537_v52  }
 0x126   :  { %1542 = vst.msk [vmem:[#allocation0 + $0x226] sm:$0xc] %vm1284_vm1, %v1537_v52   ;;  %1544 = vst.msk [vmem:[#allocation0 + $0x22c] sm:$0x30] %vm1284_vm1, %v1537_v52  }
 0x127   :  { %1546 = vst.msk [vmem:[#allocation0 + $0x232] sm:$0xc0] %vm1284_vm1, %v1537_v52   ;;  %v1548_v54 = vld [vmem:[#allocation1 + $0x480] ss:$8 sm:$0xf]  }
 0x128   :  { %3724 = vst [vmem:[%s5346_s1 + $0x2e] sm:$0x3] %v2438_v53  ;;  %v1550_v55 = vld [vmem:[#allocation1 + $0x480] ss:$8 sm:$0xf0]  }
 0x129   :  { %v1563_v56 = vld [vmem:[#allocation1 + $0x4c0] ss:$8 sm:$0xf]   ;;  %v1552_v60 = vsel %vm1282_vm0, %v1550_v55, %v1548_v54  ;;  %3725 = vst [vmem:[%s5346_s1 + $0x30] sm:$0x3] %v2444_v57 }
 0x12a   :  { %3726 = vst [vmem:[%s5346_s1 + $0x32] sm:$0x3] %v2450_v58  ;;  %3727 = vst [vmem:[%s5346_s1 + $0x34] sm:$0x3] %v2456_v59  ;;  %v2474_v7 = vld [vmem:[#allocation0 + $0xe8] sm:$0x3] }
 0x12b   :  { %1555 = vst.msk [vmem:[#allocation0 + $0x240] sm:$0x3] %vm1284_vm1, %v1552_v60   ;;  %1557 = vst.msk [vmem:[#allocation0 + $0x246] sm:$0xc] %vm1284_vm1, %v1552_v60   ;;  %v2480_v8 = vld [vmem:[#allocation0 + $0xf0] sm:$0x3] }
 0x12c   :  { %1559 = vst.msk [vmem:[#allocation0 + $0x24c] sm:$0x30] %vm1284_vm1, %v1552_v60   ;;  %1561 = vst.msk [vmem:[#allocation0 + $0x252] sm:$0xc0] %vm1284_vm1, %v1552_v60   ;;  %v2486_v10 = vld [vmem:[#allocation0 + $0xf8] sm:$0x3] }
 0x12d   :  { %v1565_v63 = vld [vmem:[#allocation1 + $0x4c0] ss:$8 sm:$0xf0]   ;;  %3728 = vst [vmem:[%s5346_s1 + $0x36] sm:$0x3] %v2462_v61  ;;  %v1984_v61 = vpop.permute.xlu1 %1983  }
 0x12e   :  { %1902 = vst.msk [vmem:[#allocation0 + $0x100] sm:$0x3] %vm1765_vm2, %v1899_v62   ;;  %1904 = vst.msk [vmem:[#allocation0 + $0x106] sm:$0xc] %vm1765_vm2, %v1899_v62   ;;  %v1567_v0 = vsel %vm1282_vm0, %v1565_v63, %v1563_v56 }
 0x12f   :  { %1906 = vst.msk [vmem:[#allocation0 + $0x10c] sm:$0x30] %vm1765_vm2, %v1899_v62   ;;  %1908 = vst.msk [vmem:[#allocation0 + $0x112] sm:$0xc0] %vm1765_vm2, %v1899_v62   ;;  %v2001_v62 = vpop.permute.xlu0 %2000  }
 0x130   :  { %v1578_v1 = vld [vmem:[#allocation1 + $0x500] ss:$8 sm:$0xf]   ;;  %1570 = vst.msk [vmem:[#allocation0 + $0x260] sm:$0x3] %vm1284_vm1, %v1567_v0  }
 0x131   :  { %v1580_v2 = vld [vmem:[#allocation1 + $0x500] ss:$8 sm:$0xf0]   ;;  %1572 = vst.msk [vmem:[#allocation0 + $0x266] sm:$0xc] %vm1284_vm1, %v1567_v0  }
 0x132   :  { %1574 = vst.msk [vmem:[#allocation0 + $0x26c] sm:$0x30] %vm1284_vm1, %v1567_v0   ;;  %1576 = vst.msk [vmem:[#allocation0 + $0x272] sm:$0xc0] %vm1284_vm1, %v1567_v0   ;;  %v1582_v3 = vsel %vm1282_vm0, %v1580_v2, %v1578_v1 }
 0x133   :  { %v1593_v4 = vld [vmem:[#allocation1 + $0x540] ss:$8 sm:$0xf]   ;;  %1585 = vst.msk [vmem:[#allocation0 + $0x280] sm:$0x3] %vm1284_vm1, %v1582_v3  }
 0x134   :  { %v1595_v5 = vld [vmem:[#allocation1 + $0x540] ss:$8 sm:$0xf0]   ;;  %1587 = vst.msk [vmem:[#allocation0 + $0x286] sm:$0xc] %vm1284_vm1, %v1582_v3  }
 0x135   :  { %1589 = vst.msk [vmem:[#allocation0 + $0x28c] sm:$0x30] %vm1284_vm1, %v1582_v3   ;;  %1591 = vst.msk [vmem:[#allocation0 + $0x292] sm:$0xc0] %vm1284_vm1, %v1582_v3   ;;  %v1597_v9 = vsel %vm1282_vm0, %v1595_v5, %v1593_v4  ;;  %v2492_v22 = vld [vmem:[#allocation0 + $0x100] sm:$0x3]  ;;  %v2018_v3 = vpop.permute.xlu1 %2017  }
 0x136   :  { %3729 = vst [vmem:[%s5346_s1 + $0x38] sm:$0x3] %v2468_v6  ;;  %3730 = vst [vmem:[%s5346_s1 + $0x3a] sm:$0x3] %v2474_v7  ;;  %v2498_v23 = vld [vmem:[#allocation0 + $0x108] sm:$0x3] }
 0x137   :  { %3731 = vst [vmem:[%s5346_s1 + $0x3c] sm:$0x3] %v2480_v8  ;;  %1600 = vst.msk [vmem:[#allocation0 + $0x2a0] sm:$0x3] %vm1284_vm1, %v1597_v9   ;;  %v2504_v24 = vld [vmem:[#allocation0 + $0x110] sm:$0x3] }
 0x138   :  { %1602 = vst.msk [vmem:[#allocation0 + $0x2a6] sm:$0xc] %vm1284_vm1, %v1597_v9   ;;  %1604 = vst.msk [vmem:[#allocation0 + $0x2ac] sm:$0x30] %vm1284_vm1, %v1597_v9   ;;  %v2510_v26 = vld [vmem:[#allocation0 + $0x118] sm:$0x3] }
 0x139   :  { %1606 = vst.msk [vmem:[#allocation0 + $0x2b2] sm:$0xc0] %vm1284_vm1, %v1597_v9   ;;  %v1608_v12 = vld [vmem:[#allocation1 + $0x580] ss:$8 sm:$0xf]  }
 0x13a   :  { %3732 = vst [vmem:[%s5346_s1 + $0x3e] sm:$0x3] %v2486_v10  ;;  %1919 = vst.msk [vmem:[#allocation0 + $0x120] sm:$0x3] %vm1765_vm2, %v1916_v11  }
 0x13b   :  { %1921 = vst.msk [vmem:[#allocation0 + $0x126] sm:$0xc] %vm1765_vm2, %v1916_v11   ;;  %1923 = vst.msk [vmem:[#allocation0 + $0x12c] sm:$0x30] %vm1765_vm2, %v1916_v11  }
 0x13c   :  { %1925 = vst.msk [vmem:[#allocation0 + $0x132] sm:$0xc0] %vm1765_vm2, %v1916_v11   ;;  %v1610_v13 = vld [vmem:[#allocation1 + $0x580] ss:$8 sm:$0xf0]  }
 0x13d   :  { %v1623_v14 = vld [vmem:[#allocation1 + $0x5c0] ss:$8 sm:$0xf]   ;;  %v1612_v15 = vsel %vm1282_vm0, %v1610_v13, %v1608_v12  ;;  %1936 = vst.msk [vmem:[#allocation0 + $0x140] sm:$0x3] %vm1765_vm2, %v1933_v18   ;;  %v2035_v12 = vpop.permute.xlu0 %2034  }
 0x13e   :  { %v1625_v16 = vld [vmem:[#allocation1 + $0x5c0] ss:$8 sm:$0xf0]   ;;  %1615 = vst.msk [vmem:[#allocation0 + $0x2c0] sm:$0x3] %vm1284_vm1, %v1612_v15  }
 0x13f   :  { %v1638_v17 = vld [vmem:[#allocation1 + $0x600] ss:$8 sm:$0xf]   ;;  %1617 = vst.msk [vmem:[#allocation0 + $0x2c6] sm:$0xc] %vm1284_vm1, %v1612_v15   ;;  %v1627_v19 = vsel %vm1282_vm0, %v1625_v16, %v1623_v14 }
 0x140   :  { %1619 = vst.msk [vmem:[#allocation0 + $0x2cc] sm:$0x30] %vm1284_vm1, %v1612_v15   ;;  %1621 = vst.msk [vmem:[#allocation0 + $0x2d2] sm:$0xc0] %vm1284_vm1, %v1612_v15  }
 0x141   :  { %v1640_v20 = vld [vmem:[#allocation1 + $0x600] ss:$8 sm:$0xf0]   ;;  %1938 = vst.msk [vmem:[#allocation0 + $0x146] sm:$0xc] %vm1765_vm2, %v1933_v18  }
 0x142   :  { %v1653_v21 = vld [vmem:[#allocation1 + $0x640] ss:$8 sm:$0xf]   ;;  %1940 = vst.msk [vmem:[#allocation0 + $0x14c] sm:$0x30] %vm1765_vm2, %v1933_v18   ;;  %v1642_v25 = vsel %vm1282_vm0, %v1640_v20, %v1638_v17  ;;  %v2052_v17 = vpop.permute.xlu1 %2051  }
 0x143   :  { %1942 = vst.msk [vmem:[#allocation0 + $0x152] sm:$0xc0] %vm1765_vm2, %v1933_v18   ;;  %3733 = vst [vmem:[%s5346_s1 + $0x40] sm:$0x3] %v2492_v22  ;;  %v2516_v35 = vld [vmem:[#allocation0 + $0x120] sm:$0x3]  ;;  %v2069_v18 = vpop.permute.xlu0 %2068  }
 0x144   :  { %1630 = vst.msk [vmem:[#allocation0 + $0x2e0] sm:$0x3] %vm1284_vm1, %v1627_v19   ;;  %1632 = vst.msk [vmem:[#allocation0 + $0x2e6] sm:$0xc] %vm1284_vm1, %v1627_v19   ;;  %v2522_v36 = vld [vmem:[#allocation0 + $0x128] sm:$0x3] }
 0x145   :  { %1634 = vst.msk [vmem:[#allocation0 + $0x2ec] sm:$0x30] %vm1284_vm1, %v1627_v19   ;;  %1636 = vst.msk [vmem:[#allocation0 + $0x2f2] sm:$0xc0] %vm1284_vm1, %v1627_v19   ;;  %v2528_v37 = vld [vmem:[#allocation0 + $0x130] sm:$0x3] }
 0x146   :  { %3734 = vst [vmem:[%s5346_s1 + $0x42] sm:$0x3] %v2498_v23  ;;  %3735 = vst [vmem:[%s5346_s1 + $0x44] sm:$0x3] %v2504_v24  ;;  %v2534_v39 = vld [vmem:[#allocation0 + $0x138] sm:$0x3]  ;;  %v2086_v23 = vpop.permute.xlu1 %2085  }
 0x147   :  { %1645 = vst.msk [vmem:[#allocation0 + $0x300] sm:$0x3] %vm1284_vm1, %v1642_v25   ;;  %1647 = vst.msk [vmem:[#allocation0 + $0x306] sm:$0xc] %vm1284_vm1, %v1642_v25   ;;  %v2540_v43 = vld [vmem:[#allocation0 + $0x140] sm:$0x3] }
 0x148   :  { %1649 = vst.msk [vmem:[#allocation0 + $0x30c] sm:$0x30] %vm1284_vm1, %v1642_v25   ;;  %1651 = vst.msk [vmem:[#allocation0 + $0x312] sm:$0xc0] %vm1284_vm1, %v1642_v25   ;;  %v2546_v44 = vld [vmem:[#allocation0 + $0x148] sm:$0x3] }
 0x149   :  { %v1655_v27 = vld [vmem:[#allocation1 + $0x640] ss:$8 sm:$0xf0]   ;;  %3736 = vst [vmem:[%s5346_s1 + $0x46] sm:$0x3] %v2510_v26 }
 0x14a   :  { %v1657_v28 = vsel %vm1282_vm0, %v1655_v27, %v1653_v21  ;;  %v1668_v29 = vld [vmem:[#allocation1 + $0x680] ss:$8 sm:$0xf]   ;;  %1953 = vst.msk [vmem:[#allocation0 + $0x160] sm:$0x3] %vm1765_vm2, %v1950_v31  }
 0x14b   :  { %v1670_v30 = vld [vmem:[#allocation1 + $0x680] ss:$8 sm:$0xf0]   ;;  %1660 = vst.msk [vmem:[#allocation0 + $0x320] sm:$0x3] %vm1284_vm1, %v1657_v28  }
 0x14c   :  { %1662 = vst.msk [vmem:[#allocation0 + $0x326] sm:$0xc] %vm1284_vm1, %v1657_v28   ;;  %1664 = vst.msk [vmem:[#allocation0 + $0x32c] sm:$0x30] %vm1284_vm1, %v1657_v28   ;;  %v1672_v32 = vsel %vm1282_vm0, %v1670_v30, %v1668_v29  ;;  %v2552_v45 = vld [vmem:[#allocation0 + $0x150] sm:$0x3] }
 0x14d   :  { %1666 = vst.msk [vmem:[#allocation0 + $0x332] sm:$0xc0] %vm1284_vm1, %v1657_v28   ;;  %v1683_v33 = vld [vmem:[#allocation1 + $0x6c0] ss:$8 sm:$0xf]  }
 0x14e   :  { %v1685_v34 = vld [vmem:[#allocation1 + $0x6c0] ss:$8 sm:$0xf0]   ;;  %1955 = vst.msk [vmem:[#allocation0 + $0x166] sm:$0xc] %vm1765_vm2, %v1950_v31  }
 0x14f   :  { %1957 = vst.msk [vmem:[#allocation0 + $0x16c] sm:$0x30] %vm1765_vm2, %v1950_v31   ;;  %1959 = vst.msk [vmem:[#allocation0 + $0x172] sm:$0xc0] %vm1765_vm2, %v1950_v31   ;;  %v1687_v38 = vsel %vm1282_vm0, %v1685_v34, %v1683_v33  ;;  %v2558_v47 = vld [vmem:[#allocation0 + $0x158] sm:$0x3] }
 0x150   :  { %1675 = vst.msk [vmem:[#allocation0 + $0x340] sm:$0x3] %vm1284_vm1, %v1672_v32   ;;  %1677 = vst.msk [vmem:[#allocation0 + $0x346] sm:$0xc] %vm1284_vm1, %v1672_v32  }
 0x151   :  { %1679 = vst.msk [vmem:[#allocation0 + $0x34c] sm:$0x30] %vm1284_vm1, %v1672_v32   ;;  %1681 = vst.msk [vmem:[#allocation0 + $0x352] sm:$0xc0] %vm1284_vm1, %v1672_v32   ;;  %v2564_v56 = vld [vmem:[#allocation0 + $0x160] sm:$0x3]  ;;  %v2103_v32 = vpop.permute.xlu0 %2102  }
 0x152   :  { %3737 = vst [vmem:[%s5346_s1 + $0x48] sm:$0x3] %v2516_v35  ;;  %3738 = vst [vmem:[%s5346_s1 + $0x4a] sm:$0x3] %v2522_v36 }
 0x153   :  { %3739 = vst [vmem:[%s5346_s1 + $0x4c] sm:$0x3] %v2528_v37  ;;  %1690 = vst.msk [vmem:[#allocation0 + $0x360] sm:$0x3] %vm1284_vm1, %v1687_v38   ;;  %v2120_v37 = vpop.permute.xlu1 %2119  }
 0x154   :  { %1692 = vst.msk [vmem:[#allocation0 + $0x366] sm:$0xc] %vm1284_vm1, %v1687_v38   ;;  %1694 = vst.msk [vmem:[#allocation0 + $0x36c] sm:$0x30] %vm1284_vm1, %v1687_v38  }
 0x155   :  { %1696 = vst.msk [vmem:[#allocation0 + $0x372] sm:$0xc0] %vm1284_vm1, %v1687_v38   ;;  %v1698_v40 = vld [vmem:[#allocation1 + $0x700] ss:$8 sm:$0xf]   ;;  %v2137_v38 = vpop.permute.xlu0 %2136  }
 0x156   :  { %3740 = vst [vmem:[%s5346_s1 + $0x4e] sm:$0x3] %v2534_v39  ;;  %v1700_v41 = vld [vmem:[#allocation1 + $0x700] ss:$8 sm:$0xf0]  }
 0x157   :  { %v1713_v42 = vld [vmem:[#allocation1 + $0x740] ss:$8 sm:$0xf]   ;;  %v1702_v46 = vsel %vm1282_vm0, %v1700_v41, %v1698_v40  ;;  %3741 = vst [vmem:[%s5346_s1 + $0x50] sm:$0x3] %v2540_v43  ;;  %v2154_v43 = vpop.permute.xlu1 %2153  }
 0x158   :  { %3742 = vst [vmem:[%s5346_s1 + $0x52] sm:$0x3] %v2546_v44  ;;  %3743 = vst [vmem:[%s5346_s1 + $0x54] sm:$0x3] %v2552_v45  ;;  %v2570_v57 = vld [vmem:[#allocation0 + $0x168] sm:$0x3] }
 0x159   :  { %1705 = vst.msk [vmem:[#allocation0 + $0x380] sm:$0x3] %vm1284_vm1, %v1702_v46   ;;  %1707 = vst.msk [vmem:[#allocation0 + $0x386] sm:$0xc] %vm1284_vm1, %v1702_v46   ;;  %v2576_v58 = vld [vmem:[#allocation0 + $0x170] sm:$0x3] }
 0x15a   :  { %1709 = vst.msk [vmem:[#allocation0 + $0x38c] sm:$0x30] %vm1284_vm1, %v1702_v46   ;;  %1711 = vst.msk [vmem:[#allocation0 + $0x392] sm:$0xc0] %vm1284_vm1, %v1702_v46   ;;  %v2582_v60 = vld [vmem:[#allocation0 + $0x178] sm:$0x3] }
 0x15b   :  { %v1715_v49 = vld [vmem:[#allocation1 + $0x740] ss:$8 sm:$0xf0]   ;;  %3744 = vst [vmem:[%s5346_s1 + $0x56] sm:$0x3] %v2558_v47 }
 0x15c   :  { %1970 = vst.msk [vmem:[#allocation0 + $0x180] sm:$0x3] %vm1765_vm2, %v1967_v48   ;;  %1972 = vst.msk [vmem:[#allocation0 + $0x186] sm:$0xc] %vm1765_vm2, %v1967_v48   ;;  %v1717_v50 = vsel %vm1282_vm0, %v1715_v49, %v1713_v42 }
 0x15d   :  { %1974 = vst.msk [vmem:[#allocation0 + $0x18c] sm:$0x30] %vm1765_vm2, %v1967_v48   ;;  %1976 = vst.msk [vmem:[#allocation0 + $0x192] sm:$0xc0] %vm1765_vm2, %v1967_v48  }
 0x15e   :  { %v1728_v51 = vld [vmem:[#allocation1 + $0x780] ss:$8 sm:$0xf]   ;;  %1720 = vst.msk [vmem:[#allocation0 + $0x3a0] sm:$0x3] %vm1284_vm1, %v1717_v50  }
 0x15f   :  { %v1730_v52 = vld [vmem:[#allocation1 + $0x780] ss:$8 sm:$0xf0]   ;;  %1722 = vst.msk [vmem:[#allocation0 + $0x3a6] sm:$0xc] %vm1284_vm1, %v1717_v50  }
 0x160   :  { %1724 = vst.msk [vmem:[#allocation0 + $0x3ac] sm:$0x30] %vm1284_vm1, %v1717_v50   ;;  %1726 = vst.msk [vmem:[#allocation0 + $0x3b2] sm:$0xc0] %vm1284_vm1, %v1717_v50   ;;  %v1732_v53 = vsel %vm1282_vm0, %v1730_v52, %v1728_v51  ;;  %v2171_v52 = vpop.permute.xlu0 %2170  }
 0x161   :  { %v1743_v54 = vld [vmem:[#allocation1 + $0x7c0] ss:$8 sm:$0xf]   ;;  %1735 = vst.msk [vmem:[#allocation0 + $0x3c0] sm:$0x3] %vm1284_vm1, %v1732_v53  }
 0x162   :  { %v1745_v55 = vld [vmem:[#allocation1 + $0x7c0] ss:$8 sm:$0xf0]   ;;  %1737 = vst.msk [vmem:[#allocation0 + $0x3c6] sm:$0xc] %vm1284_vm1, %v1732_v53  }
 0x163   :  { %1739 = vst.msk [vmem:[#allocation0 + $0x3cc] sm:$0x30] %vm1284_vm1, %v1732_v53   ;;  %1741 = vst.msk [vmem:[#allocation0 + $0x3d2] sm:$0xc0] %vm1284_vm1, %v1732_v53   ;;  %v1747_v59 = vsel %vm1282_vm0, %v1745_v55, %v1743_v54  ;;  %v2588_v63 = vld [vmem:[#allocation0 + $0x180] sm:$0x3] }
 0x164   :  { %3745 = vst [vmem:[%s5346_s1 + $0x58] sm:$0x3] %v2564_v56  ;;  %3746 = vst [vmem:[%s5346_s1 + $0x5a] sm:$0x3] %v2570_v57  ;;  %v2594_v0 = vld [vmem:[#allocation0 + $0x188] sm:$0x3]  ;;  %v2188_v57 = vpop.permute.xlu1 %2187  }
 0x165   :  { %3747 = vst [vmem:[%s5346_s1 + $0x5c] sm:$0x3] %v2576_v58  ;;  %1750 = vst.msk [vmem:[#allocation0 + $0x3e0] sm:$0x3] %vm1284_vm1, %v1747_v59   ;;  %v2600_v1 = vld [vmem:[#allocation0 + $0x190] sm:$0x3]  ;;  %v2205_v58 = vpop.permute.xlu0 %2204  }
 0x166   :  { %1752 = vst.msk [vmem:[#allocation0 + $0x3e6] sm:$0xc] %vm1284_vm1, %v1747_v59   ;;  %1754 = vst.msk [vmem:[#allocation0 + $0x3ec] sm:$0x30] %vm1284_vm1, %v1747_v59   ;;  %v2606_v2 = vld [vmem:[#allocation0 + $0x198] sm:$0x3] }
 0x167   :  { %1756 = vst.msk [vmem:[#allocation0 + $0x3f2] sm:$0xc0] %vm1284_vm1, %v1747_v59   ;;  %3748 = vst [vmem:[%s5346_s1 + $0x5e] sm:$0x3] %v2582_v60 }
 0x168   :  { %1987 = vst.msk [vmem:[#allocation0 + $0x1a0] sm:$0x3] %vm1765_vm2, %v1984_v61   ;;  %1989 = vst.msk [vmem:[#allocation0 + $0x1a6] sm:$0xc] %vm1765_vm2, %v1984_v61  }
 0x169   :  { %1991 = vst.msk [vmem:[#allocation0 + $0x1ac] sm:$0x30] %vm1765_vm2, %v1984_v61   ;;  %1993 = vst.msk [vmem:[#allocation0 + $0x1b2] sm:$0xc0] %vm1765_vm2, %v1984_v61  }
 0x16a   :  { %2004 = vst.msk [vmem:[#allocation0 + $0x1c0] sm:$0x3] %vm1765_vm2, %v2001_v62   ;;  %2006 = vst.msk [vmem:[#allocation0 + $0x1c6] sm:$0xc] %vm1765_vm2, %v2001_v62  }
 0x16b   :  { %2008 = vst.msk [vmem:[#allocation0 + $0x1cc] sm:$0x30] %vm1765_vm2, %v2001_v62   ;;  %2010 = vst.msk [vmem:[#allocation0 + $0x1d2] sm:$0xc0] %vm1765_vm2, %v2001_v62  }
 0x16c   :  { %3749 = vst [vmem:[%s5346_s1 + $0x60] sm:$0x3] %v2588_v63  ;;  %3750 = vst [vmem:[%s5346_s1 + $0x62] sm:$0x3] %v2594_v0  ;;  %v2222_v63 = vpop.permute.xlu1 %2221  }
 0x16d   :  { %3751 = vst [vmem:[%s5346_s1 + $0x64] sm:$0x3] %v2600_v1  ;;  %3752 = vst [vmem:[%s5346_s1 + $0x66] sm:$0x3] %v2606_v2 }
 0x16e   :  { %2021 = vst.msk [vmem:[#allocation0 + $0x1e0] sm:$0x3] %vm1765_vm2, %v2018_v3   ;;  %2023 = vst.msk [vmem:[#allocation0 + $0x1e6] sm:$0xc] %vm1765_vm2, %v2018_v3  }
 0x16f   :  { %v2612_v4 = vld [vmem:[#allocation0 + $0x1a0] sm:$0x3]  ;;  %v2618_v5 = vld [vmem:[#allocation0 + $0x1a8] sm:$0x3]  ;;  %2025 = vst.msk [vmem:[#allocation0 + $0x1ec] sm:$0x30] %vm1765_vm2, %v2018_v3  }
 0x170   :  { %v2624_v6 = vld [vmem:[#allocation0 + $0x1b0] sm:$0x3]  ;;  %2027 = vst.msk [vmem:[#allocation0 + $0x1f2] sm:$0xc0] %vm1765_vm2, %v2018_v3   ;;  %3753 = vst [vmem:[%s5346_s1 + $0x68] sm:$0x3] %v2612_v4 }
 0x171   :  { %3754 = vst [vmem:[%s5346_s1 + $0x6a] sm:$0x3] %v2618_v5  ;;  %3755 = vst [vmem:[%s5346_s1 + $0x6c] sm:$0x3] %v2624_v6  ;;  %v2630_v7 = vld [vmem:[#allocation0 + $0x1b8] sm:$0x3] }
 0x172   :  { %3756 = vst [vmem:[%s5346_s1 + $0x6e] sm:$0x3] %v2630_v7  ;;  %v2636_v8 = vld [vmem:[#allocation0 + $0x1c0] sm:$0x3]  ;;  %v2642_v9 = vld [vmem:[#allocation0 + $0x1c8] sm:$0x3] }
 0x173   :  { %v2648_v10 = vld [vmem:[#allocation0 + $0x1d0] sm:$0x3]  ;;  %3757 = vst [vmem:[%s5346_s1 + $0x70] sm:$0x3] %v2636_v8  ;;  %3758 = vst [vmem:[%s5346_s1 + $0x72] sm:$0x3] %v2642_v9  ;;  %v2239_v8 = vpop.permute.xlu0 %2238  }
 0x174   :  { %3759 = vst [vmem:[%s5346_s1 + $0x74] sm:$0x3] %v2648_v10  ;;  %v2654_v11 = vld [vmem:[#allocation0 + $0x1d8] sm:$0x3]  ;;  %2038 = vst.msk [vmem:[#allocation0 + $0x200] sm:$0x3] %vm1765_vm2, %v2035_v12  }
 0x175   :  { %3760 = vst [vmem:[%s5346_s1 + $0x76] sm:$0x3] %v2654_v11  ;;  %2040 = vst.msk [vmem:[#allocation0 + $0x206] sm:$0xc] %vm1765_vm2, %v2035_v12   ;;  %v2660_v13 = vld [vmem:[#allocation0 + $0x1e0] sm:$0x3] }
 0x176   :  { %2042 = vst.msk [vmem:[#allocation0 + $0x20c] sm:$0x30] %vm1765_vm2, %v2035_v12   ;;  %2044 = vst.msk [vmem:[#allocation0 + $0x212] sm:$0xc0] %vm1765_vm2, %v2035_v12   ;;  %v2666_v14 = vld [vmem:[#allocation0 + $0x1e8] sm:$0x3] }
 0x177   :  { %v2672_v15 = vld [vmem:[#allocation0 + $0x1f0] sm:$0x3]  ;;  %3761 = vst [vmem:[%s5346_s1 + $0x78] sm:$0x3] %v2660_v13  ;;  %3762 = vst [vmem:[%s5346_s1 + $0x7a] sm:$0x3] %v2666_v14  ;;  %v2256_v13 = vpop.permute.xlu1 %2255   ;;  %v2273_v14 = vpop.permute.xlu0 %2272  }
 0x178   :  { %3763 = vst [vmem:[%s5346_s1 + $0x7c] sm:$0x3] %v2672_v15  ;;  %v2678_v16 = vld [vmem:[#allocation0 + $0x1f8] sm:$0x3]  ;;  %2055 = vst.msk [vmem:[#allocation0 + $0x220] sm:$0x3] %vm1765_vm2, %v2052_v17  }
 0x179   :  { %3764 = vst [vmem:[%s5346_s1 + $0x7e] sm:$0x3] %v2678_v16  ;;  %2057 = vst.msk [vmem:[#allocation0 + $0x226] sm:$0xc] %vm1765_vm2, %v2052_v17  }
 0x17a   :  { %2059 = vst.msk [vmem:[#allocation0 + $0x22c] sm:$0x30] %vm1765_vm2, %v2052_v17   ;;  %2061 = vst.msk [vmem:[#allocation0 + $0x232] sm:$0xc0] %vm1765_vm2, %v2052_v17  }
 0x17b   :  { %v2684_v19 = vld [vmem:[#allocation0 + $0x200] sm:$0x3]  ;;  %2072 = vst.msk [vmem:[#allocation0 + $0x240] sm:$0x3] %vm1765_vm2, %v2069_v18   ;;  %2074 = vst.msk [vmem:[#allocation0 + $0x246] sm:$0xc] %vm1765_vm2, %v2069_v18  }
 0x17c   :  { %v2690_v20 = vld [vmem:[#allocation0 + $0x208] sm:$0x3]  ;;  %2076 = vst.msk [vmem:[#allocation0 + $0x24c] sm:$0x30] %vm1765_vm2, %v2069_v18   ;;  %2078 = vst.msk [vmem:[#allocation0 + $0x252] sm:$0xc0] %vm1765_vm2, %v2069_v18  }
 0x17d   :  { %v2696_v21 = vld [vmem:[#allocation0 + $0x210] sm:$0x3]  ;;  %3765 = vst [vmem:[%s5346_s1 + $0x80] sm:$0x3] %v2684_v19  ;;  %3766 = vst [vmem:[%s5346_s1 + $0x82] sm:$0x3] %v2690_v20  ;;  %v2290_v19 = vpop.permute.xlu1 %2289  }
 0x17e   :  { %3767 = vst [vmem:[%s5346_s1 + $0x84] sm:$0x3] %v2696_v21  ;;  %v2702_v22 = vld [vmem:[#allocation0 + $0x218] sm:$0x3]  ;;  %2089 = vst.msk [vmem:[#allocation0 + $0x260] sm:$0x3] %vm1765_vm2, %v2086_v23  }
 0x17f   :  { %3768 = vst [vmem:[%s5346_s1 + $0x86] sm:$0x3] %v2702_v22  ;;  %v2708_v24 = vld [vmem:[#allocation0 + $0x220] sm:$0x3]  ;;  %2091 = vst.msk [vmem:[#allocation0 + $0x266] sm:$0xc] %vm1765_vm2, %v2086_v23  }
 0x180   :  { %v2714_v25 = vld [vmem:[#allocation0 + $0x228] sm:$0x3]  ;;  %2093 = vst.msk [vmem:[#allocation0 + $0x26c] sm:$0x30] %vm1765_vm2, %v2086_v23   ;;  %2095 = vst.msk [vmem:[#allocation0 + $0x272] sm:$0xc0] %vm1765_vm2, %v2086_v23  }
 0x181   :  { %v2720_v26 = vld [vmem:[#allocation0 + $0x230] sm:$0x3]  ;;  %3769 = vst [vmem:[%s5346_s1 + $0x88] sm:$0x3] %v2708_v24  ;;  %3770 = vst [vmem:[%s5346_s1 + $0x8a] sm:$0x3] %v2714_v25 }
 0x182   :  { %3771 = vst [vmem:[%s5346_s1 + $0x8c] sm:$0x3] %v2720_v26  ;;  %v2726_v27 = vld [vmem:[#allocation0 + $0x238] sm:$0x3]  ;;  %v2732_v28 = vld [vmem:[#allocation0 + $0x240] sm:$0x3] }
 0x183   :  { %3772 = vst [vmem:[%s5346_s1 + $0x8e] sm:$0x3] %v2726_v27  ;;  %v2738_v29 = vld [vmem:[#allocation0 + $0x248] sm:$0x3]  ;;  %v2744_v30 = vld [vmem:[#allocation0 + $0x250] sm:$0x3] }
 0x184   :  { %3773 = vst [vmem:[%s5346_s1 + $0x90] sm:$0x3] %v2732_v28  ;;  %3774 = vst [vmem:[%s5346_s1 + $0x92] sm:$0x3] %v2738_v29  ;;  %v2750_v31 = vld [vmem:[#allocation0 + $0x258] sm:$0x3] }
 0x185   :  { %3775 = vst [vmem:[%s5346_s1 + $0x94] sm:$0x3] %v2744_v30  ;;  %3776 = vst [vmem:[%s5346_s1 + $0x96] sm:$0x3] %v2750_v31  ;;  %v2756_v33 = vld [vmem:[#allocation0 + $0x260] sm:$0x3] }
 0x186   :  { %2106 = vst.msk [vmem:[#allocation0 + $0x280] sm:$0x3] %vm1765_vm2, %v2103_v32   ;;  %2108 = vst.msk [vmem:[#allocation0 + $0x286] sm:$0xc] %vm1765_vm2, %v2103_v32   ;;  %v2762_v34 = vld [vmem:[#allocation0 + $0x268] sm:$0x3] }
 0x187   :  { %2110 = vst.msk [vmem:[#allocation0 + $0x28c] sm:$0x30] %vm1765_vm2, %v2103_v32   ;;  %2112 = vst.msk [vmem:[#allocation0 + $0x292] sm:$0xc0] %vm1765_vm2, %v2103_v32   ;;  %v2768_v35 = vld [vmem:[#allocation0 + $0x270] sm:$0x3] }
 0x188   :  { %3777 = vst [vmem:[%s5346_s1 + $0x98] sm:$0x3] %v2756_v33  ;;  %3778 = vst [vmem:[%s5346_s1 + $0x9a] sm:$0x3] %v2762_v34  ;;  %v2774_v36 = vld [vmem:[#allocation0 + $0x278] sm:$0x3] }
 0x189   :  { %3779 = vst [vmem:[%s5346_s1 + $0x9c] sm:$0x3] %v2768_v35  ;;  %3780 = vst [vmem:[%s5346_s1 + $0x9e] sm:$0x3] %v2774_v36 }
 0x18a   :  { %2123 = vst.msk [vmem:[#allocation0 + $0x2a0] sm:$0x3] %vm1765_vm2, %v2120_v37   ;;  %2125 = vst.msk [vmem:[#allocation0 + $0x2a6] sm:$0xc] %vm1765_vm2, %v2120_v37  }
 0x18b   :  { %2127 = vst.msk [vmem:[#allocation0 + $0x2ac] sm:$0x30] %vm1765_vm2, %v2120_v37   ;;  %2129 = vst.msk [vmem:[#allocation0 + $0x2b2] sm:$0xc0] %vm1765_vm2, %v2120_v37  }
 0x18c   :  { %2140 = vst.msk [vmem:[#allocation0 + $0x2c0] sm:$0x3] %vm1765_vm2, %v2137_v38   ;;  %2142 = vst.msk [vmem:[#allocation0 + $0x2c6] sm:$0xc] %vm1765_vm2, %v2137_v38  }
 0x18d   :  { %v2780_v39 = vld [vmem:[#allocation0 + $0x280] sm:$0x3]  ;;  %v2786_v40 = vld [vmem:[#allocation0 + $0x288] sm:$0x3]  ;;  %2144 = vst.msk [vmem:[#allocation0 + $0x2cc] sm:$0x30] %vm1765_vm2, %v2137_v38  }
 0x18e   :  { %v2792_v41 = vld [vmem:[#allocation0 + $0x290] sm:$0x3]  ;;  %2146 = vst.msk [vmem:[#allocation0 + $0x2d2] sm:$0xc0] %vm1765_vm2, %v2137_v38   ;;  %3781 = vst [vmem:[%s5346_s1 + $0xa0] sm:$0x3] %v2780_v39 }
 0x18f   :  { %3782 = vst [vmem:[%s5346_s1 + $0xa2] sm:$0x3] %v2786_v40  ;;  %3783 = vst [vmem:[%s5346_s1 + $0xa4] sm:$0x3] %v2792_v41  ;;  %v2798_v42 = vld [vmem:[#allocation0 + $0x298] sm:$0x3] }
 0x190   :  { %3784 = vst [vmem:[%s5346_s1 + $0xa6] sm:$0x3] %v2798_v42  ;;  %2157 = vst.msk [vmem:[#allocation0 + $0x2e0] sm:$0x3] %vm1765_vm2, %v2154_v43  }
 0x191   :  { %v2804_v44 = vld [vmem:[#allocation0 + $0x2a0] sm:$0x3]  ;;  %v2810_v45 = vld [vmem:[#allocation0 + $0x2a8] sm:$0x3]  ;;  %2159 = vst.msk [vmem:[#allocation0 + $0x2e6] sm:$0xc] %vm1765_vm2, %v2154_v43  }
 0x192   :  { %v2816_v46 = vld [vmem:[#allocation0 + $0x2b0] sm:$0x3]  ;;  %2161 = vst.msk [vmem:[#allocation0 + $0x2ec] sm:$0x30] %vm1765_vm2, %v2154_v43   ;;  %2163 = vst.msk [vmem:[#allocation0 + $0x2f2] sm:$0xc0] %vm1765_vm2, %v2154_v43  }
 0x193   :  { %3785 = vst [vmem:[%s5346_s1 + $0xa8] sm:$0x3] %v2804_v44  ;;  %3786 = vst [vmem:[%s5346_s1 + $0xaa] sm:$0x3] %v2810_v45  ;;  %v2822_v47 = vld [vmem:[#allocation0 + $0x2b8] sm:$0x3] }
 0x194   :  { %3787 = vst [vmem:[%s5346_s1 + $0xac] sm:$0x3] %v2816_v46  ;;  %3788 = vst [vmem:[%s5346_s1 + $0xae] sm:$0x3] %v2822_v47  ;;  %v2828_v48 = vld [vmem:[#allocation0 + $0x2c0] sm:$0x3] }
 0x195   :  { %v2834_v49 = vld [vmem:[#allocation0 + $0x2c8] sm:$0x3]  ;;  %v2840_v50 = vld [vmem:[#allocation0 + $0x2d0] sm:$0x3]  ;;  %3789 = vst [vmem:[%s5346_s1 + $0xb0] sm:$0x3] %v2828_v48 }
 0x196   :  { %3790 = vst [vmem:[%s5346_s1 + $0xb2] sm:$0x3] %v2834_v49  ;;  %3791 = vst [vmem:[%s5346_s1 + $0xb4] sm:$0x3] %v2840_v50  ;;  %v2846_v51 = vld [vmem:[#allocation0 + $0x2d8] sm:$0x3] }
 0x197   :  { %3792 = vst [vmem:[%s5346_s1 + $0xb6] sm:$0x3] %v2846_v51  ;;  %2174 = vst.msk [vmem:[#allocation0 + $0x300] sm:$0x3] %vm1765_vm2, %v2171_v52   ;;  %v2852_v53 = vld [vmem:[#allocation0 + $0x2e0] sm:$0x3] }
 0x198   :  { %2176 = vst.msk [vmem:[#allocation0 + $0x306] sm:$0xc] %vm1765_vm2, %v2171_v52   ;;  %2178 = vst.msk [vmem:[#allocation0 + $0x30c] sm:$0x30] %vm1765_vm2, %v2171_v52   ;;  %v2858_v54 = vld [vmem:[#allocation0 + $0x2e8] sm:$0x3] }
 0x199   :  { %2180 = vst.msk [vmem:[#allocation0 + $0x312] sm:$0xc0] %vm1765_vm2, %v2171_v52   ;;  %v2864_v55 = vld [vmem:[#allocation0 + $0x2f0] sm:$0x3]  ;;  %3793 = vst [vmem:[%s5346_s1 + $0xb8] sm:$0x3] %v2852_v53 }
 0x19a   :  { %3794 = vst [vmem:[%s5346_s1 + $0xba] sm:$0x3] %v2858_v54  ;;  %3795 = vst [vmem:[%s5346_s1 + $0xbc] sm:$0x3] %v2864_v55  ;;  %v2870_v56 = vld [vmem:[#allocation0 + $0x2f8] sm:$0x3] }
 0x19b   :  { %3796 = vst [vmem:[%s5346_s1 + $0xbe] sm:$0x3] %v2870_v56  ;;  %2191 = vst.msk [vmem:[#allocation0 + $0x320] sm:$0x3] %vm1765_vm2, %v2188_v57  }
 0x19c   :  { %2193 = vst.msk [vmem:[#allocation0 + $0x326] sm:$0xc] %vm1765_vm2, %v2188_v57   ;;  %2195 = vst.msk [vmem:[#allocation0 + $0x32c] sm:$0x30] %vm1765_vm2, %v2188_v57  }
 0x19d   :  { %2197 = vst.msk [vmem:[#allocation0 + $0x332] sm:$0xc0] %vm1765_vm2, %v2188_v57   ;;  %2208 = vst.msk [vmem:[#allocation0 + $0x340] sm:$0x3] %vm1765_vm2, %v2205_v58  }
 0x19e   :  { %v2876_v59 = vld [vmem:[#allocation0 + $0x300] sm:$0x3]  ;;  %2210 = vst.msk [vmem:[#allocation0 + $0x346] sm:$0xc] %vm1765_vm2, %v2205_v58   ;;  %2212 = vst.msk [vmem:[#allocation0 + $0x34c] sm:$0x30] %vm1765_vm2, %v2205_v58  }
 0x19f   :  { %v2882_v60 = vld [vmem:[#allocation0 + $0x308] sm:$0x3]  ;;  %v2888_v61 = vld [vmem:[#allocation0 + $0x310] sm:$0x3]  ;;  %2214 = vst.msk [vmem:[#allocation0 + $0x352] sm:$0xc0] %vm1765_vm2, %v2205_v58  }
 0x1a0   :  { %3797 = vst [vmem:[%s5346_s1 + $0xc0] sm:$0x3] %v2876_v59  ;;  %3798 = vst [vmem:[%s5346_s1 + $0xc2] sm:$0x3] %v2882_v60  ;;  %v2894_v62 = vld [vmem:[#allocation0 + $0x318] sm:$0x3] }
 0x1a1   :  { %3799 = vst [vmem:[%s5346_s1 + $0xc4] sm:$0x3] %v2888_v61  ;;  %3800 = vst [vmem:[%s5346_s1 + $0xc6] sm:$0x3] %v2894_v62 }
 0x1a2   :  { %v2900_v0 = vld [vmem:[#allocation0 + $0x320] sm:$0x3]  ;;  %2225 = vst.msk [vmem:[#allocation0 + $0x360] sm:$0x3] %vm1765_vm2, %v2222_v63   ;;  %2227 = vst.msk [vmem:[#allocation0 + $0x366] sm:$0xc] %vm1765_vm2, %v2222_v63  }
 0x1a3   :  { %v2906_v1 = vld [vmem:[#allocation0 + $0x328] sm:$0x3]  ;;  %v2912_v2 = vld [vmem:[#allocation0 + $0x330] sm:$0x3]  ;;  %2229 = vst.msk [vmem:[#allocation0 + $0x36c] sm:$0x30] %vm1765_vm2, %v2222_v63  }
 0x1a4   :  { %2231 = vst.msk [vmem:[#allocation0 + $0x372] sm:$0xc0] %vm1765_vm2, %v2222_v63   ;;  %3801 = vst [vmem:[%s5346_s1 + $0xc8] sm:$0x3] %v2900_v0  ;;  %v2918_v3 = vld [vmem:[#allocation0 + $0x338] sm:$0x3] }
 0x1a5   :  { %3802 = vst [vmem:[%s5346_s1 + $0xca] sm:$0x3] %v2906_v1  ;;  %3803 = vst [vmem:[%s5346_s1 + $0xcc] sm:$0x3] %v2912_v2  ;;  %v2924_v4 = vld [vmem:[#allocation0 + $0x340] sm:$0x3] }
 0x1a6   :  { %3804 = vst [vmem:[%s5346_s1 + $0xce] sm:$0x3] %v2918_v3  ;;  %v2930_v5 = vld [vmem:[#allocation0 + $0x348] sm:$0x3]  ;;  %v2936_v6 = vld [vmem:[#allocation0 + $0x350] sm:$0x3] }
 0x1a7   :  { %3805 = vst [vmem:[%s5346_s1 + $0xd0] sm:$0x3] %v2924_v4  ;;  %3806 = vst [vmem:[%s5346_s1 + $0xd2] sm:$0x3] %v2930_v5  ;;  %v2942_v7 = vld [vmem:[#allocation0 + $0x358] sm:$0x3] }
 0x1a8   :  { %3807 = vst [vmem:[%s5346_s1 + $0xd4] sm:$0x3] %v2936_v6  ;;  %3808 = vst [vmem:[%s5346_s1 + $0xd6] sm:$0x3] %v2942_v7 }
 0x1a9   :  { %2242 = vst.msk [vmem:[#allocation0 + $0x380] sm:$0x3] %vm1765_vm2, %v2239_v8   ;;  %2244 = vst.msk [vmem:[#allocation0 + $0x386] sm:$0xc] %vm1765_vm2, %v2239_v8   ;;  %v2948_v9 = vld [vmem:[#allocation0 + $0x360] sm:$0x3] }
 0x1aa   :  { %2246 = vst.msk [vmem:[#allocation0 + $0x38c] sm:$0x30] %vm1765_vm2, %v2239_v8   ;;  %2248 = vst.msk [vmem:[#allocation0 + $0x392] sm:$0xc0] %vm1765_vm2, %v2239_v8   ;;  %v2954_v10 = vld [vmem:[#allocation0 + $0x368] sm:$0x3] }
 0x1ab   :  { %v2960_v11 = vld [vmem:[#allocation0 + $0x370] sm:$0x3]  ;;  %3809 = vst [vmem:[%s5346_s1 + $0xd8] sm:$0x3] %v2948_v9  ;;  %3810 = vst [vmem:[%s5346_s1 + $0xda] sm:$0x3] %v2954_v10 }
 0x1ac   :  { %3811 = vst [vmem:[%s5346_s1 + $0xdc] sm:$0x3] %v2960_v11  ;;  %v2966_v12 = vld [vmem:[#allocation0 + $0x378] sm:$0x3]  ;;  %2259 = vst.msk [vmem:[#allocation0 + $0x3a0] sm:$0x3] %vm1765_vm2, %v2256_v13  }
 0x1ad   :  { %3812 = vst [vmem:[%s5346_s1 + $0xde] sm:$0x3] %v2966_v12  ;;  %2261 = vst.msk [vmem:[#allocation0 + $0x3a6] sm:$0xc] %vm1765_vm2, %v2256_v13  }
 0x1ae   :  { %2263 = vst.msk [vmem:[#allocation0 + $0x3ac] sm:$0x30] %vm1765_vm2, %v2256_v13   ;;  %2265 = vst.msk [vmem:[#allocation0 + $0x3b2] sm:$0xc0] %vm1765_vm2, %v2256_v13  }
 0x1af   :  { %2276 = vst.msk [vmem:[#allocation0 + $0x3c0] sm:$0x3] %vm1765_vm2, %v2273_v14   ;;  %2278 = vst.msk [vmem:[#allocation0 + $0x3c6] sm:$0xc] %vm1765_vm2, %v2273_v14  }
 0x1b0   :  { %v2972_v15 = vld [vmem:[#allocation0 + $0x380] sm:$0x3]  ;;  %v2978_v16 = vld [vmem:[#allocation0 + $0x388] sm:$0x3]  ;;  %2280 = vst.msk [vmem:[#allocation0 + $0x3cc] sm:$0x30] %vm1765_vm2, %v2273_v14  }
 0x1b1   :  { %v2984_v17 = vld [vmem:[#allocation0 + $0x390] sm:$0x3]  ;;  %2282 = vst.msk [vmem:[#allocation0 + $0x3d2] sm:$0xc0] %vm1765_vm2, %v2273_v14   ;;  %3813 = vst [vmem:[%s5346_s1 + $0xe0] sm:$0x3] %v2972_v15 }
 0x1b2   :  { %3814 = vst [vmem:[%s5346_s1 + $0xe2] sm:$0x3] %v2978_v16  ;;  %3815 = vst [vmem:[%s5346_s1 + $0xe4] sm:$0x3] %v2984_v17  ;;  %v2990_v18 = vld [vmem:[#allocation0 + $0x398] sm:$0x3] }
 0x1b3   :  { %3816 = vst [vmem:[%s5346_s1 + $0xe6] sm:$0x3] %v2990_v18  ;;  %v2996_v20 = vld [vmem:[#allocation0 + $0x3a0] sm:$0x3]  ;;  %2293 = vst.msk [vmem:[#allocation0 + $0x3e0] sm:$0x3] %vm1765_vm2, %v2290_v19  }
 0x1b4   :  { %v3002_v21 = vld [vmem:[#allocation0 + $0x3a8] sm:$0x3]  ;;  %2295 = vst.msk [vmem:[#allocation0 + $0x3e6] sm:$0xc] %vm1765_vm2, %v2290_v19   ;;  %2297 = vst.msk [vmem:[#allocation0 + $0x3ec] sm:$0x30] %vm1765_vm2, %v2290_v19  }
 0x1b5   :  { %v3008_v22 = vld [vmem:[#allocation0 + $0x3b0] sm:$0x3]  ;;  %2299 = vst.msk [vmem:[#allocation0 + $0x3f2] sm:$0xc0] %vm1765_vm2, %v2290_v19   ;;  %3817 = vst [vmem:[%s5346_s1 + $0xe8] sm:$0x3] %v2996_v20 }
 0x1b6   :  { %3818 = vst [vmem:[%s5346_s1 + $0xea] sm:$0x3] %v3002_v21  ;;  %3819 = vst [vmem:[%s5346_s1 + $0xec] sm:$0x3] %v3008_v22  ;;  %v3014_v23 = vld [vmem:[#allocation0 + $0x3b8] sm:$0x3] }
 0x1b7   :  { %3820 = vst [vmem:[%s5346_s1 + $0xee] sm:$0x3] %v3014_v23  ;;  %v3020_v24 = vld [vmem:[#allocation0 + $0x3c0] sm:$0x3]  ;;  %v3026_v25 = vld [vmem:[#allocation0 + $0x3c8] sm:$0x3] }
 0x1b8   :  { %v3032_v26 = vld [vmem:[#allocation0 + $0x3d0] sm:$0x3]  ;;  %3821 = vst [vmem:[%s5346_s1 + $0xf0] sm:$0x3] %v3020_v24  ;;  %3822 = vst [vmem:[%s5346_s1 + $0xf2] sm:$0x3] %v3026_v25 }
 0x1b9   :  { %3823 = vst [vmem:[%s5346_s1 + $0xf4] sm:$0x3] %v3032_v26  ;;  %v3038_v27 = vld [vmem:[#allocation0 + $0x3d8] sm:$0x3] }
 0x1ba   :  { %3824 = vst [vmem:[%s5346_s1 + $0xf6] sm:$0x3] %v3038_v27  ;;  %v3044_v28 = vld [vmem:[#allocation0 + $0x3e0] sm:$0x3] }
 0x1bb   :  { %v3050_v29 = vld [vmem:[#allocation0 + $0x3e8] sm:$0x3]  ;;  %v3056_v30 = vld [vmem:[#allocation0 + $0x3f0] sm:$0x3]  ;;  %3825 = vst [vmem:[%s5346_s1 + $0xf8] sm:$0x3] %v3044_v28 }
 0x1bc   :  { %3826 = vst [vmem:[%s5346_s1 + $0xfa] sm:$0x3] %v3050_v29  ;;  %3827 = vst [vmem:[%s5346_s1 + $0xfc] sm:$0x3] %v3056_v30  ;;  %v3062_v31 = vld [vmem:[#allocation0 + $0x3f8] sm:$0x3] }
 0x1bd   :  { %3828 = vst [vmem:[%s5346_s1 + $0xfe] sm:$0x3] %v3062_v31 }

// kernel: squeeze.20
= control target key start
LH: loop header
LB: loop body
LE: loop exit
PB: predicated region body
PF: predicated region fallthrough
CT: control target
= control target key end

     0   :  { %vm35_vm0 = vcmask 1043458   ;;  %vm40_vm1 = vcmask 1045508   ;;  %vm45_vm2 = vcmask 1047558   ;;  %s75_s6 = smov 3  ;;  %s78_s7 = smov 12  ;;  %vm4_vm3 = vcmask 1047556   ;;  %s738_s0 = inlined_call_operand.vmem [shape: f32[2,1,4,16,16], index: 0, kind: input, shape index: {}]   ;;  %s739_s1 = inlined_call_operand.vmem [shape: f32[8,256], index: 1, kind: output, shape index: {}]  }
   0x1   :  { %v362_v0 = vld [vmem:[%s738_s0 + $0x6] ss:$16 sm:%s75_s6]   ;;  %s83_s12 = smov 48  ;;  %s88_s13 = smov 192  ;;  %vm6_vm4 = vcmask 130048   ;;  %vm49_vm5 = vcmask 1048448  }
   0x2   :  { %v363_v1 = vld [vmem:[%s738_s0 + $0x6] ss:$16 sm:%s78_s7]   ;;  %s30_s18 = smov 3  ;;  %s33_s21 = smov 12  ;;  %vm94_vm6 = vcmask 917248   ;;  %vm139_vm7 = vcmask 786048  }
   0x3   :  { %v81_v2 = vsel %vm35_vm0, %v363_v1, %v362_v0  ;;  %v364_v3 = vld [vmem:[%s738_s0 + $0x6] ss:$16 sm:%s83_s12]   ;;  %v353_v6 = vld [vmem:[%s738_s0 + $0x7] ss:$16 sm:%s30_s18]   ;;  %s38_s22 = smov 48  ;;  %s43_s27 = smov 192 }
   0x4   :  { %v365_v4 = vld [vmem:[%s738_s0 + $0x6] ss:$16 sm:%s88_s13]   ;;  %v86_v5 = vsel %vm40_vm1, %v364_v3, %v81_v2  ;;  %v354_v8 = vld [vmem:[%s738_s0 + $0x7] ss:$16 sm:%s33_s21]   ;;  %s423_s28 = smov 96   ;;  %s97_s2 = smov 3 }
   0x5   :  { %v91_v7 = vsel %vm45_vm2, %v365_v4, %v86_v5  ;;  %v355_v9 = vld [vmem:[%s738_s0 + $0x7] ss:$16 sm:%s38_s22]   ;;  %v36_v10 = vsel %vm35_vm0, %v354_v8, %v353_v6  ;;  %s100_s3 = smov 12  ;;  %v366_v13 = vld [vmem:[%s738_s0 + $0xe] ss:$16 sm:%s97_s2]   ;;  %s105_s8 = smov 48 }
   0x6   :  { %92 = vrot.lane.b32.xlu1 %v91_v7, %s423_s28  ;;  %v356_v11 = vld [vmem:[%s738_s0 + $0x7] ss:$16 sm:%s43_s27]   ;;  %v41_v12 = vsel %vm40_vm1, %v355_v9, %v36_v10  ;;  %s110_s9 = smov 192  ;;  %s52_s14 = smov 3  ;;  %vm184_vm8 = vcmask 654848   ;;  %vm229_vm9 = vcmask 523648  }
   0x7   :  { %v367_v14 = vld [vmem:[%s738_s0 + $0xe] ss:$16 sm:%s100_s3]   ;;  %v46_v15 = vsel %vm45_vm2, %v356_v11, %v41_v12  ;;  %s55_s15 = smov 12  ;;  %s424_s16 = smov 112   ;;  %v357_v20 = vld [vmem:[%s738_s0 + $0xf] ss:$16 sm:%s52_s14]  }
   0x8   :  { %v103_v16 = vsel %vm35_vm0, %v367_v14, %v366_v13  ;;  %v368_v17 = vld [vmem:[%s738_s0 + $0xe] ss:$16 sm:%s105_s8]   ;;  %47 = vrot.lane.b32.xlu0 %v46_v15, %s424_s16  ;;  %s60_s19 = smov 48  ;;  %s65_s20 = smov 192  ;;  %vm274_vm10 = vcmask 392448   ;;  %vm319_vm11 = vcmask 261248  }
   0x9   :  { %v369_v18 = vld [vmem:[%s738_s0 + $0xe] ss:$16 sm:%s110_s9]   ;;  %v108_v19 = vsel %vm40_vm1, %v368_v17, %v103_v16  ;;  %v358_v22 = vld [vmem:[%s738_s0 + $0xf] ss:$16 sm:%s55_s15]   ;;  %s142_s25 = smov 3  ;;  %s150_s29 = smov 48 }
   0xa   :  { %v113_v21 = vsel %vm45_vm2, %v369_v18, %v108_v19  ;;  %v359_v23 = vld [vmem:[%s738_s0 + $0xf] ss:$16 sm:%s60_s19]   ;;  %v58_v24 = vsel %vm35_vm0, %v358_v22, %v357_v20  ;;  %v375_v27 = vld [vmem:[%s738_s0 + $0xd] ss:$16 sm:%s142_s25]   ;;  %s155_s5 = smov 192  ;;  %s120_s6 = smov 3 }
   0xb   :  { %114 = vrot.lane.b32.xlu1 %v113_v21, %s423_s28  ;;  %v360_v25 = vld [vmem:[%s738_s0 + $0xf] ss:$16 sm:%s65_s20]   ;;  %s145_s28 = smov 12  ;;  %v63_v26 = vsel %vm40_vm1, %v359_v23, %v58_v24  ;;  %s123_s11 = smov 12 }
   0xc   :  { %v376_v28 = vld [vmem:[%s738_s0 + $0xd] ss:$16 sm:%s145_s28]   ;;  %v68_v29 = vsel %vm45_vm2, %v360_v25, %v63_v26  ;;  %s128_s12 = smov 48  ;;  %v371_v34 = vld [vmem:[%s738_s0 + $0x5] ss:$16 sm:%s120_s6]   ;;  %s133_s15 = smov 192 }
   0xd   :  { %v148_v30 = vsel %vm35_vm0, %v376_v28, %v375_v27  ;;  %v377_v31 = vld [vmem:[%s738_s0 + $0xd] ss:$16 sm:%s150_s29]   ;;  %69 = vrot.lane.b32.xlu0 %v68_v29, %s424_s16  ;;  %s187_s20 = smov 3  ;;  %s190_s21 = smov 12 }
   0xe   :  { %v378_v32 = vld [vmem:[%s738_s0 + $0xd] ss:$16 sm:%s155_s5]   ;;  %v153_v33 = vsel %vm40_vm1, %v377_v31, %v148_v30  ;;  %v372_v36 = vld [vmem:[%s738_s0 + $0x5] ss:$16 sm:%s123_s11]   ;;  %s425_s22 = smov 80   ;;  %s195_s25 = smov 48 }
   0xf   :  { %v158_v35 = vsel %vm45_vm2, %v378_v32, %v153_v33  ;;  %v373_v37 = vld [vmem:[%s738_s0 + $0x5] ss:$16 sm:%s128_s12]   ;;  %v126_v38 = vsel %vm35_vm0, %v372_v36, %v371_v34  ;;  %s200_s26 = smov 192  ;;  %v384_v41 = vld [vmem:[%s738_s0 + $0xc] ss:$16 sm:%s187_s20]   ;;  %s165_s2 = smov 3 }
  0x10   :  { %159 = vrot.lane.b32.xlu1 %v158_v35, %s425_s22  ;;  %v374_v39 = vld [vmem:[%s738_s0 + $0x5] ss:$16 sm:%s133_s15]   ;;  %v131_v40 = vsel %vm40_vm1, %v373_v37, %v126_v38  ;;  %s168_s3 = smov 12  ;;  %s173_s8 = smov 48 }
  0x11   :  { %v385_v42 = vld [vmem:[%s738_s0 + $0xc] ss:$16 sm:%s190_s21]   ;;  %v136_v43 = vsel %vm45_vm2, %v374_v39, %v131_v40  ;;  %s178_s9 = smov 192  ;;  %v380_v48 = vld [vmem:[%s738_s0 + $0x4] ss:$16 sm:%s165_s2]   ;;  %s232_s12 = smov 3 }
  0x12   :  { %v193_v44 = vsel %vm35_vm0, %v385_v42, %v384_v41  ;;  %v386_v45 = vld [vmem:[%s738_s0 + $0xc] ss:$16 sm:%s195_s25]   ;;  %137 = vrot.lane.b32.xlu0 %v136_v43, %s425_s22  ;;  %s235_s17 = smov 12  ;;  %s240_s18 = smov 48 }
  0x13   :  { %v387_v46 = vld [vmem:[%s738_s0 + $0xc] ss:$16 sm:%s200_s26]   ;;  %v198_v47 = vsel %vm40_vm1, %v386_v45, %v193_v44  ;;  %v381_v50 = vld [vmem:[%s738_s0 + $0x4] ss:$16 sm:%s168_s3]   ;;  %s426_s19 = smov 64   ;;  %s245_s22 = smov 192 }
  0x14   :  { %v203_v49 = vsel %vm45_vm2, %v387_v46, %v198_v47  ;;  %v382_v51 = vld [vmem:[%s738_s0 + $0x4] ss:$16 sm:%s173_s8]   ;;  %v171_v52 = vsel %vm35_vm0, %v381_v50, %v380_v48  ;;  %s210_s23 = smov 3  ;;  %v393_v55 = vld [vmem:[%s738_s0 + $0xb] ss:$16 sm:%s232_s12]   ;;  %s213_s28 = smov 12 }
  0x15   :  { %204 = vrot.lane.b32.xlu1 %v203_v49, %s426_s19  ;;  %v383_v53 = vld [vmem:[%s738_s0 + $0x4] ss:$16 sm:%s178_s9]   ;;  %v176_v54 = vsel %vm40_vm1, %v382_v51, %v171_v52  ;;  %s218_s29 = smov 48  ;;  %s223_s5 = smov 192 }
  0x16   :  { %v394_v56 = vld [vmem:[%s738_s0 + $0xb] ss:$16 sm:%s235_s17]   ;;  %v181_v57 = vsel %vm45_vm2, %v383_v53, %v176_v54  ;;  %v389_v62 = vld [vmem:[%s738_s0 + $0x3] ss:$16 sm:%s210_s23]   ;;  %s277_s8 = smov 3  ;;  %s280_s9 = smov 12 }
  0x17   :  { %v238_v58 = vsel %vm35_vm0, %v394_v56, %v393_v55  ;;  %v395_v59 = vld [vmem:[%s738_s0 + $0xb] ss:$16 sm:%s240_s18]   ;;  %182 = vrot.lane.b32.xlu0 %v181_v57, %s426_s19  ;;  %s285_s14 = smov 48  ;;  %s290_s15 = smov 192 }
  0x18   :  { %v396_v60 = vld [vmem:[%s738_s0 + $0xb] ss:$16 sm:%s245_s22]   ;;  %v243_v61 = vsel %vm40_vm1, %v395_v59, %v238_v58  ;;  %v390_v0 = vld [vmem:[%s738_s0 + $0x3] ss:$16 sm:%s213_s28]   ;;  %s427_s16 = smov 48   ;;  %s255_s19 = smov 3 }
  0x19   :  { %v248_v63 = vsel %vm45_vm2, %v396_v60, %v243_v61  ;;  %v391_v1 = vld [vmem:[%s738_s0 + $0x3] ss:$16 sm:%s218_s29]   ;;  %v216_v2 = vsel %vm35_vm0, %v390_v0, %v389_v62  ;;  %v402_v5 = vld [vmem:[%s738_s0 + $0xa] ss:$16 sm:%s277_s8]   ;;  %s258_s24 = smov 12  ;;  %s263_s25 = smov 48 }
  0x1a   :  { %249 = vrot.lane.b32.xlu1 %v248_v63, %s427_s16  ;;  %v392_v3 = vld [vmem:[%s738_s0 + $0x3] ss:$16 sm:%s223_s5]   ;;  %v221_v4 = vsel %vm40_vm1, %v391_v1, %v216_v2  ;;  %s268_s30 = smov 192  ;;  %s322_s4 = smov 3 }
  0x1b   :  { %v403_v6 = vld [vmem:[%s738_s0 + $0xa] ss:$16 sm:%s280_s9]   ;;  %v226_v7 = vsel %vm45_vm2, %v392_v3, %v221_v4  ;;  %v398_v12 = vld [vmem:[%s738_s0 + $0x2] ss:$16 sm:%s255_s19]   ;;  %s325_s5 = smov 12  ;;  %s330_s10 = smov 48 }
  0x1c   :  { %v283_v8 = vsel %vm35_vm0, %v403_v6, %v402_v5  ;;  %v404_v9 = vld [vmem:[%s738_s0 + $0xa] ss:$16 sm:%s285_s14]   ;;  %227 = vrot.lane.b32.xlu0 %v226_v7, %s427_s16  ;;  %s335_s11 = smov 192  ;;  %s428_s12 = smov 32  }
  0x1d   :  { %v405_v10 = vld [vmem:[%s738_s0 + $0xa] ss:$16 sm:%s290_s15]   ;;  %v288_v11 = vsel %vm40_vm1, %v404_v9, %v283_v8  ;;  %v399_v14 = vld [vmem:[%s738_s0 + $0x2] ss:$16 sm:%s258_s24]   ;;  %s300_s15 = smov 3  ;;  %s303_s20 = smov 12 }
  0x1e   :  { %v293_v13 = vsel %vm45_vm2, %v405_v10, %v288_v11  ;;  %v400_v15 = vld [vmem:[%s738_s0 + $0x2] ss:$16 sm:%s263_s25]   ;;  %v261_v16 = vsel %vm35_vm0, %v399_v14, %v398_v12  ;;  %v411_v19 = vld [vmem:[%s738_s0 + $0x9] ss:$16 sm:%s322_s4]   ;;  %s308_s21 = smov 48  ;;  %s313_s26 = smov 192 }
  0x1f   :  { %294 = vrot.lane.b32.xlu1 %v293_v13, %s428_s12  ;;  %v401_v17 = vld [vmem:[%s738_s0 + $0x2] ss:$16 sm:%s268_s30]   ;;  %v266_v18 = vsel %vm40_vm1, %v400_v15, %v261_v16  ;;  %v2_v27 = vld [vmem:[%s738_s0] ss:$8 sm:$0xf]   ;;  %s429_s6 = smov 16  }
  0x20   :  { %v412_v20 = vld [vmem:[%s738_s0 + $0x9] ss:$16 sm:%s325_s5]   ;;  %v271_v21 = vsel %vm45_vm2, %v401_v17, %v266_v18  ;;  %v407_v26 = vld [vmem:[%s738_s0 + $0x1] ss:$16 sm:%s300_s15]  }
  0x21   :  { %v328_v22 = vsel %vm35_vm0, %v412_v20, %v411_v19  ;;  %v413_v23 = vld [vmem:[%s738_s0 + $0x9] ss:$16 sm:%s330_s10]   ;;  %272 = vrot.lane.b32.xlu0 %v271_v21, %s428_s12  ;;  %v3_v33 = vld [vmem:[%s738_s0] ss:$8 sm:$0xf0]  }
  0x22   :  { %v414_v24 = vld [vmem:[%s738_s0 + $0x9] ss:$16 sm:%s335_s11]   ;;  %v333_v25 = vsel %vm40_vm1, %v413_v23, %v328_v22  ;;  %v408_v29 = vld [vmem:[%s738_s0 + $0x1] ss:$16 sm:%s303_s20]   ;;  %v5_v35 = vsel %vm4_vm3, %v3_v33, %v2_v27 }
  0x23   :  { %v338_v28 = vsel %vm45_vm2, %v414_v24, %v333_v25  ;;  %v409_v30 = vld [vmem:[%s738_s0 + $0x1] ss:$16 sm:%s308_s21]   ;;  %v306_v31 = vsel %vm35_vm0, %v408_v29, %v407_v26  ;;  %v347_v36 = vld [vmem:[%s738_s0 + $0x40] ss:$8 sm:$0xf]  }
  0x24   :  { %339 = vrot.lane.b32.xlu1 %v338_v28, %s429_s6  ;;  %v410_v32 = vld [vmem:[%s738_s0 + $0x1] ss:$16 sm:%s313_s26]   ;;  %v311_v34 = vsel %vm40_vm1, %v409_v30, %v306_v31  ;;  %v348_v37 = vld [vmem:[%s738_s0 + $0x40] ss:$8 sm:$0xf0]  }
  0x25   :  { %v316_v38 = vsel %vm45_vm2, %v410_v32, %v311_v34  ;;  %7 = vst.msk [vmem:[%s739_s1] ss:$8 sm:$0x3] %vm6_vm4, %v5_v35   ;;  %344 = vst.msk [vmem:[%s739_s1 - $0xf] ss:$8 sm:$0xc] %vm6_vm4, %v5_v35   ;;  %v19_v39 = vsel %vm4_vm3, %v348_v37, %v347_v36 }
  0x26   :  { %345 = vst.msk [vmem:[%s739_s1 - $0x1e] ss:$8 sm:$0x30] %vm6_vm4, %v5_v35   ;;  %346 = vst.msk [vmem:[%s739_s1 - $0x2d] ss:$8 sm:$0xc0] %vm6_vm4, %v5_v35   ;;  %317 = vrot.lane.b32.xlu0 %v316_v38, %s429_s6 }
  0x27   :  { %349 = vst.msk [vmem:[%s739_s1 + $0x4] ss:$8 sm:$0x3] %vm6_vm4, %v19_v39   ;;  %350 = vst.msk [vmem:[%s739_s1 - $0xb] ss:$8 sm:$0xc] %vm6_vm4, %v19_v39  }
  0x28   :  { %351 = vst.msk [vmem:[%s739_s1 - $0x1a] ss:$8 sm:$0x30] %vm6_vm4, %v19_v39   ;;  %352 = vst.msk [vmem:[%s739_s1 - $0x29] ss:$8 sm:$0xc0] %vm6_vm4, %v19_v39  }
  0x78   :  { %v93_v40 = vpop.permute.xlu1 %92  }
  0x7a   :  { %v48_v41 = vpop.permute.xlu0 %47  }
  0x7b   :  { %50 = vst.msk [vmem:[%s739_s1] sm:$0xff] %vm49_vm5, %v48_v41  }
  0x7c   :  { %95 = vst.msk [vmem:[%s739_s1] sm:$0xff] %vm94_vm6, %v93_v40  }
  0x7d   :  { %v115_v42 = vpop.permute.xlu1 %114  }
  0x7f   :  { %v70_v43 = vpop.permute.xlu0 %69  }
  0x80   :  { %361 = vst.msk [vmem:[%s739_s1 + $0x8] sm:$0xff] %vm49_vm5, %v70_v43  }
  0x81   :  { %370 = vst.msk [vmem:[%s739_s1 + $0x8] sm:$0xff] %vm94_vm6, %v115_v42  }
  0x82   :  { %v160_v44 = vpop.permute.xlu1 %159  }
  0x83   :  { %379 = vst.msk [vmem:[%s739_s1 + $0x8] sm:$0xff] %vm139_vm7, %v160_v44  }
  0x84   :  { %v138_v45 = vpop.permute.xlu0 %137  }
  0x85   :  { %140 = vst.msk [vmem:[%s739_s1] sm:$0xff] %vm139_vm7, %v138_v45  }
  0x87   :  { %v205_v46 = vpop.permute.xlu1 %204  }
  0x88   :  { %388 = vst.msk [vmem:[%s739_s1 + $0x8] sm:$0xff] %vm184_vm8, %v205_v46  }
  0x89   :  { %v183_v47 = vpop.permute.xlu0 %182  }
  0x8a   :  { %185 = vst.msk [vmem:[%s739_s1] sm:$0xff] %vm184_vm8, %v183_v47  }
  0x8c   :  { %v250_v48 = vpop.permute.xlu1 %249  }
  0x8d   :  { %397 = vst.msk [vmem:[%s739_s1 + $0x8] sm:$0xff] %vm229_vm9, %v250_v48  }
  0x8e   :  { %v228_v49 = vpop.permute.xlu0 %227  }
  0x8f   :  { %230 = vst.msk [vmem:[%s739_s1] sm:$0xff] %vm229_vm9, %v228_v49  }
  0x91   :  { %v295_v50 = vpop.permute.xlu1 %294  }
  0x92   :  { %406 = vst.msk [vmem:[%s739_s1 + $0x8] sm:$0xff] %vm274_vm10, %v295_v50  }
  0x93   :  { %v273_v51 = vpop.permute.xlu0 %272  }
  0x94   :  { %275 = vst.msk [vmem:[%s739_s1] sm:$0xff] %vm274_vm10, %v273_v51  }
  0x96   :  { %v340_v52 = vpop.permute.xlu1 %339  }
  0x97   :  { %415 = vst.msk [vmem:[%s739_s1 + $0x8] sm:$0xff] %vm319_vm11, %v340_v52  }
  0x98   :  { %v318_v53 = vpop.permute.xlu0 %317  }
  0x99   :  { %320 = vst.msk [vmem:[%s739_s1] sm:$0xff] %vm319_vm11, %v318_v53  }

// kernel: smp_encoder_forward.3
= control target key start
LH: loop header
LB: loop body
LE: loop exit
PB: predicated region body
PF: predicated region fallthrough
CT: control target
= control target key end

     0   :  { %8 = vsyncpa [#allocation3], 0  ;;  %s959_s0 = inlined_call_operand.vmem [shape: f32[8,256], index: 0, kind: input, shape index: {}]   ;;  %s960_s1 = inlined_call_operand.vmem [shape: f32[3], index: 1, kind: input, shape index: {}]   ;;  %s961_s2 = inlined_call_operand.vmem [shape: f32[3], index: 2, kind: input, shape index: {}]   ;;  %s962_s3 = inlined_call_operand.vmem [shape: f32[8,3,256], index: 3, kind: output, shape index: {}]  }
   0x1   :  { %9 = vsyncpa [#allocation5], 0  ;;  %s797_s12 = smov 0   ;;  %s799_s13 = smov 0  }
   0x2   :  { %s801_s14 = smov 0   ;;  %s803_s15 = smov 0  }
   0x3   :  { %s805_s16 = smov 0  }
   0x4 LB: > { %s603_s17 = sadd.s32 4294967295, %s772_s16   ;;  %s24_s18 = sadd.s32 1, %s768_s15  ;;  %s772_s16 = sphi %s805_s16, %s15_s16   ;;  %s768_s15 = sphi %s803_s15, %s976_s15   ;;  %s764_s14 = sphi %s801_s14, %s975_s14   ;;  %s760_s13 = sphi %s799_s13, %s974_s13   ;;  %s756_s12 = sphi %s797_s12, %s973_s12  }
   0x5   : > { %p25_p0 = scmp.ge.s32.totalorder %s24_s18, 2  ;;  %s106_s19 = sadd.s32 1, %s760_s13 }
   0x6   : > { %p116_p1 = scmp.ne.s32.totalorder %s760_s13, %s756_s12  ;;  %p117_p2 = scmp.eq.s32.totalorder %s603_s17, 1 }
   0x7   : > { %s978_s18 = smov (%p25_p0, %s24_s18), 0  ;;  %p605_p4 = scmp.ge.s32.totalorder %s772_s16, 1 }
   0x8   : > { %p829_p3 = por %p117_p2, %p116_p1  ;;  %s102_s21 = ssub.s32 %s768_s15, %s978_s18 }
   0x9   : > { %p130_p5 = scmp.lt.s32.totalorder %s772_s16, 3  ;;  %p104_p6 = scmp.eq.s32.totalorder %s102_s21, 0 }
   0xa   : > { %s966_s20 = scalar_select %p829_p3, 1, 0 }
   0xb   : > { %p837_p7 = pnand %p605_p4, %p130_p5  ;;  %p841_p8 = scmp.eq.s32.totalorder %s603_s17, 0 }
   0xc   : > { %s846_s24 = scalar_select %p104_p6, %s760_s13, %s106_s19  }
   0xd   : > { %s967_s22 = scalar_select %p837_p7, 1, 0 }
   0xe   : > { %s968_s23 = scalar_select %p841_p8, 1, 0 }
   0xf   : > { %p642_p9 = pneg %p837_p7  ;;  %s143_s27 = sshll.u32 %s960_s1, 4  ;;  %s144_s27 = int_to_ptr.vmem [resolvable:$true] %s143_s27 }
  0x10   : > { %s154_s4 = sshll.u32 %s961_s2, 4  ;;  %s696_s5 = scalar_lea.vmem %s144_s27, 16  ;;  %s155_s4 = int_to_ptr.vmem [resolvable:$true] %s154_s4 }
  0x11   : > { %p855_p10 = pnand %p841_p8, %p642_p9  ;;  %p697_p11 = scmp.ne.s32.totalorder %s144_s27, %s696_s5 }
  0x12   : > { %p704_p1 = scmp.lt.s32.totalorder %s144_s27, %s144_s27  ;;  %p705_p2 = scmp.lt.s32.totalorder %s696_s5, %s696_s5 }
  0x13   : > { %p698_p12 = pneg %p855_p10 }
  0x14   : > { %p706_p4 = por %p705_p2, %p704_p1 }
  0x15   : > { %p699_p13 = pnand %p698_p12, %p697_p11 }
  0x17   : > { %p700_p0 = pneg %p699_p13 }
  0x19   : > { %p707_p5 = pnand %p706_p4, %p700_p0 }
  0x1b   : > { %710 = shalt.err (!%p707_p5)
}
  0x1c   : > { %s774_s6 = smov [#allocation2]   ;;  %s711_s7 = scalar_lea.vmem %s155_s4, 16 }
  0x1d   : > { %645 = dma.vmem_to_smem (!%p855_p10), %s144_s27, 16, %s774_s6, [#allocation3]  }
  0x1e   : > { %p712_p6 = scmp.ne.s32.totalorder %s155_s4, %s711_s7  ;;  %p719_p8 = scmp.lt.s32.totalorder %s155_s4, %s155_s4 }
  0x1f   : > { %p720_p7 = scmp.lt.s32.totalorder %s711_s7, %s711_s7 }
  0x20   : > { %p714_p9 = pnand %p712_p6, %p698_p12 }
  0x21   : > { %p721_p11 = por %p720_p7, %p719_p8 }
  0x22   : > { %p715_p3 = pneg %p714_p9 }
  0x24   : > { %p722_p13 = pnand %p721_p11, %p715_p3 }
  0x26   : > { %725 = shalt.err (!%p722_p13)
}
  0x27   : > { %s775_s8 = smov [#allocation4]   ;;  %p970_p0 = scmp.ne.s32.totalorder %s967_s22, 0 }
  0x28   : > { %648 = dma.vmem_to_smem (!%p855_p10), %s155_s4, 16, %s775_s8, [#allocation5]  }
  0x29   : > { %178 = sbr.rel (%p970_p0) target bundleno = 89 (0x59), region = 32  ;;  %p971_p1 = scmp.ne.s32.totalorder (!%p970_p0), %s968_s23, 0 }
  0x30   : > { %747 = dma.done.wait (%p971_p1), [#allocation3], 16  }
  0x31   : > { %749 = vsyncadd (%p971_p1), [#allocation3], 4294967280 }
  0x32   : > { %751 = dma.done.wait (%p971_p1), [#allocation5], 16  }
  0x33   : > { %753 = vsyncadd (%p971_p1), [#allocation5], 4294967280 }
  0x34   : > { %188 = sfence }
  0x35   : > { %p211_p3 = scmp.lt.s32.totalorder %s764_s14, 1  ;;  %v230_v0 = vlaneseq  ;;  %s219_s9 = sld [smem:[#allocation2]]  ;;  %v776_v1 = vmov 1966171168  }
  0x36   : > { %v228_v2 = vunpack.c.l.s4 %v776_v1  ;;  %s206_s10 = sand.u32 1, %s756_s12   ;;  %s222_s11 = sld [smem:[#allocation4]] }
  0x37   : > { %s212_s17 = scalar_select %p211_p3, %s764_s14, 1  ;;  %v231_v4 = vshrl.u32 %v230_v0, 7 }
  0x38   : > { %v229_v3 = vunpack.c.0.s8 %v228_v2  ;;  %s618_s19 = sld [smem:[#allocation2 + $0x1]]  ;;  %s624_s25 = sld [smem:[#allocation2 + $0x2]] }
  0x39   : > { %s619_s21 = sld [smem:[#allocation4 + $0x1]]  ;;  %s613_s22 = sshll.u32 %s212_s17, 3 }
  0x3a   : > { %s216_s27 = scalar_lea.vmem %s959_s0, %s613_s22  ;;  %s625_s28 = sld [smem:[#allocation4 + $0x2]]  ;;  %v884_v9 = vsub.s32 %v229_v3, %v231_v4 }
  0x3b   : > { %v218_v5 = vld [vmem:[%s216_s27] sm:$0xff]  ;;  %v220_v6 = vstv %s219_s9  ;;  %s612_s29 = sshll.u32 %s206_s10, 5  ;;  %p972_p7 = scmp.ne.s32.totalorder %s966_s20, 0 }
  0x3c   : > { %v221_v7 = vsub.f32 %v218_v5, %v220_v6  ;;  %v223_v8 = vstv %s222_s11  ;;  %s887_s12 = scalar_lea.vmem [#allocation6], %s612_s29  ;;  %s631_s30 = sshll.u32 (%p972_p7), %s764_s14, 2 }
  0x3d   : > { %s446_s6 = scalar_lea.vmem (%p972_p7), %s962_s3, %s631_s30 }
  0x3e   : > { %v224_v10 = vmul.f32 %v223_v8, %v221_v7  ;;  %v292_v11 = vstv %s618_s19  ;;  %v364_v14 = vstv %s624_s25 }
  0x3f   : > { %v295_v12 = vstv %s619_s21  ;;  %v293_v13 = vsub.f32 %v218_v5, %v292_v11  ;;  %v365_v17 = vsub.f32 %v218_v5, %v364_v14 }
  0x40   : > { %v233_v15 = vrot.slane %v224_v10, %v884_v9  ;;  %v226_v16 = vcombine.high %v224_v10, %v224_v10  ;;  %v367_v18 = vstv %s625_s28 }
  0x41   : > { %v296_v19 = vmul.f32 %v295_v12, %v293_v13  ;;  %v368_v23 = vmul.f32 %v367_v18, %v365_v17 }
  0x42   : > { %614 = vst.sshfl [vmem:[%s887_s12] sm:$0x1 pattern:$0x73625140] %v233_v15  ;;  %v241_v20 = vcombine.high %v233_v15, %v233_v15  ;;  %v249_v21 = vrot.slane %v233_v15, %v884_v9  ;;  %v240_v22 = vrot.slane %v226_v16, %v884_v9 }
  0x43   : > { %v305_v24 = vrot.slane %v296_v19, %v884_v9  ;;  %v298_v25 = vcombine.high %v296_v19, %v296_v19  ;;  %v377_v33 = vrot.slane %v368_v23, %v884_v9  ;;  %v370_v37 = vcombine.high %v368_v23, %v368_v23 }
  0x44   : > { %615 = vst.sshfl [vmem:[%s887_s12 + $0x4] sm:$0x1 pattern:$0x73625140] %v241_v20  ;;  %v271_v26 = vcombine.high %v249_v21, %v249_v21  ;;  %v263_v27 = vrot.slane %v241_v20, %v884_v9  ;;  %v242_v28 = vcombine.high %v240_v22, %v240_v22  ;;  %v256_v29 = vrot.slane %v240_v22, %v884_v9 }
  0x45   : > { %616 = vst.sshfl [vmem:[%s887_s12 + $0x10] sm:$0x1 pattern:$0x73625140] %v240_v22  ;;  %v313_v30 = vcombine.high %v305_v24, %v305_v24  ;;  %v321_v31 = vrot.slane %v305_v24, %v884_v9  ;;  %v312_v32 = vrot.slane %v298_v25, %v884_v9  ;;  %v385_v43 = vcombine.high %v377_v33, %v377_v33 }
  0x46   : > { %620 = vst.sshfl [vmem:[%s887_s12 + $0x1] sm:$0x1 pattern:$0x73625140] %v305_v24  ;;  %285 = vst [vmem:[%s887_s12 + $0x8] sm:$0x1] %v271_v26  ;;  %v273_v34 = vcombine.high %v263_v27, %v263_v27  ;;  %v272_v35 = vcombine.high %v256_v29, %v256_v29  ;;  %v270_v36 = vrot.slane %v242_v28, %v884_v9 }
  0x47   : > { %617 = vst.sshfl [vmem:[%s887_s12 + $0x14] sm:$0x1 pattern:$0x73625140] %v242_v28  ;;  %v343_v38 = vcombine.high %v321_v31, %v321_v31  ;;  %v335_v39 = vrot.slane %v313_v30, %v884_v9  ;;  %v314_v40 = vcombine.high %v312_v32, %v312_v32  ;;  %v328_v41 = vrot.slane %v312_v32, %v884_v9 }
  0x48   : > { %621 = vst.sshfl [vmem:[%s887_s12 + $0x5] sm:$0x1 pattern:$0x73625140] %v313_v30  ;;  %286 = vst [vmem:[%s887_s12 + $0xc] sm:$0x1] %v273_v34  ;;  %v274_v42 = vcombine.high %v270_v36, %v270_v36  ;;  %v393_v44 = vrot.slane %v377_v33, %v884_v9  ;;  %v384_v45 = vrot.slane %v370_v37, %v884_v9 }
  0x49   : > { %622 = vst.sshfl [vmem:[%s887_s12 + $0x11] sm:$0x1 pattern:$0x73625140] %v312_v32  ;;  %289 = vst [vmem:[%s887_s12 + $0x18] sm:$0x1] %v272_v35  ;;  %v345_v46 = vcombine.high %v335_v39, %v335_v39  ;;  %v344_v47 = vcombine.high %v328_v41, %v328_v41  ;;  %v342_v48 = vrot.slane %v314_v40, %v884_v9 }
  0x4a   : > { %626 = vst.sshfl [vmem:[%s887_s12 + $0x2] sm:$0x1 pattern:$0x73625140] %v377_v33  ;;  %357 = vst [vmem:[%s887_s12 + $0x9] sm:$0x1] %v343_v38  ;;  %v415_v49 = vcombine.high %v393_v44, %v393_v44  ;;  %v407_v50 = vrot.slane %v385_v43, %v884_v9  ;;  %v386_v51 = vcombine.high %v384_v45, %v384_v45 }
  0x4b   : > { %623 = vst.sshfl [vmem:[%s887_s12 + $0x15] sm:$0x1 pattern:$0x73625140] %v314_v40  ;;  %290 = vst [vmem:[%s887_s12 + $0x1c] sm:$0x1] %v274_v42  ;;  %v400_v52 = vrot.slane %v384_v45, %v884_v9  ;;  %v346_v53 = vcombine.high %v342_v48, %v342_v48 }
  0x4c   : > { %627 = vst.sshfl [vmem:[%s887_s12 + $0x6] sm:$0x1 pattern:$0x73625140] %v385_v43  ;;  %358 = vst [vmem:[%s887_s12 + $0xd] sm:$0x1] %v345_v46  ;;  %v417_v54 = vcombine.high %v407_v50, %v407_v50  ;;  %v414_v56 = vrot.slane %v386_v51, %v884_v9 }
  0x4d   : > { %628 = vst.sshfl [vmem:[%s887_s12 + $0x12] sm:$0x1 pattern:$0x73625140] %v384_v45  ;;  %361 = vst [vmem:[%s887_s12 + $0x19] sm:$0x1] %v344_v47  ;;  %v416_v55 = vcombine.high %v400_v52, %v400_v52 }
  0x4e   : > { %429 = vst [vmem:[%s887_s12 + $0xa] sm:$0x1] %v415_v49  ;;  %629 = vst.sshfl [vmem:[%s887_s12 + $0x16] sm:$0x1 pattern:$0x73625140] %v386_v51  ;;  %v418_v57 = vcombine.high %v414_v56, %v414_v56 }
  0x4f   : > { %362 = vst [vmem:[%s887_s12 + $0x1d] sm:$0x1] %v346_v53  ;;  %430 = vst [vmem:[%s887_s12 + $0xe] sm:$0x1] %v417_v54  ;;  %441 = sbr.rel (!%p972_p7) target bundleno = 89 (0x59), region = 44 }
  0x50   : > { %433 = vst [vmem:[%s887_s12 + $0x1a] sm:$0x1] %v416_v55  ;;  %434 = vst [vmem:[%s887_s12 + $0x1e] sm:$0x1] %v418_v57 }
  0x51   : > { %v462_v58 = vld [vmem:[%s887_s12] sm:$0xf] (%p972_p7) }
  0x52   : > { %463 = vst [vmem:[%s446_s6] sm:$0xf] (%p972_p7), %v462_v58 }
  0x53   : > { %v464_v59 = vld [vmem:[%s887_s12 + $0x4] sm:$0xf] (%p972_p7) }
  0x54   : > { %v470_v62 = vld [vmem:[%s887_s12 + $0x10] sm:$0xf] (%p972_p7)  ;;  %465 = vst [vmem:[%s446_s6 + $0x8] sm:$0xf] (%p972_p7), %v464_v59 }
  0x55   : > { %v466_v60 = vld [vmem:[%s887_s12 + $0x8] sm:$0xf] (%p972_p7)  ;;  %471 = vst [vmem:[%s446_s6 + $0x20] sm:$0xf] (%p972_p7), %v470_v62  ;;  %v472_v63 = vld [vmem:[%s887_s12 + $0x14] sm:$0xf] (%p972_p7) }
  0x56   : > { %v468_v61 = vld [vmem:[%s887_s12 + $0xc] sm:$0xf]  ;;  %467 = vst [vmem:[%s446_s6 + $0x10] sm:$0xf] %v466_v60  ;;  %473 = vst [vmem:[%s446_s6 + $0x28] sm:$0xf] %v472_v63 }
  0x57   : > { %469 = vst [vmem:[%s446_s6 + $0x18] sm:$0xf] %v468_v61  ;;  %v474_v0 = vld [vmem:[%s887_s12 + $0x18] sm:$0xf]  ;;  %v476_v1 = vld [vmem:[%s887_s12 + $0x1c] sm:$0xf] }
  0x58   : > { %475 = vst [vmem:[%s446_s6 + $0x30] sm:$0xf] %v474_v0  ;;  %477 = vst [vmem:[%s446_s6 + $0x38] sm:$0xf] %v476_v1 }
  0x59 PF: > { %s15_s16 = sadd.s32 1, %s772_s16   ;;  %s973_s12 = smov %s760_s13 }
  0x5a   : > { %p12_p8 = scmp.ge.s32.totalorder %s15_s16, 4   ;;  %s974_s13 = smov %s846_s24 }
  0x5b   : > { %s975_s14 = smov %s768_s15  ;;  %s976_s15 = smov %s978_s18 }
  0x5c   :  { %14 = sbr.rel (!%p12_p8) target bundleno = 4 (0x4), region = 112 }
  0x63   :  { %526 = vsyncpa [#allocation3], 1 }
  0x64   :  { %528 = vsyncpa [#allocation3 + $0x1], 1 }
  0x65   :  { %529 = vsyncpa [#allocation5], 1 }

// kernel: smp_encoder_forward.4
= control target key start
LH: loop header
LB: loop body
LE: loop exit
PB: predicated region body
PF: predicated region fallthrough
CT: control target
= control target key end

     0   :  { %s4261_s21 = smov 0   ;;  %s5894_s0 = inlined_call_operand.vmem [shape: f32[8,4,8,8], index: 0, kind: input, shape index: {}]   ;;  %s5895_s1 = inlined_call_operand.vmem [shape: bf16[4,128,32], index: 1, kind: input, shape index: {}]   ;;  %s5896_s2 = inlined_call_operand.vmem [shape: f32[1,32], index: 2, kind: input, shape index: {}]   ;;  %s5897_s3 = inlined_call_operand.vmem [shape: f32[1,32], index: 3, kind: input, shape index: {}]   ;;  %s5898_s4 = inlined_call_operand.vmem [shape: f32[1,32], index: 4, kind: input, shape index: {}]   ;;  %s5899_s5 = inlined_call_operand.vmem [shape: f32[512,32], index: 5, kind: output, shape index: {0}]   ;;  %s5900_s6 = inlined_call_operand.vmem [shape: bf16[512,32], index: 6, kind: output, shape index: {1}]  }
   0x1 LB: > { %s3602_s22 = sadd.s32 4294967295, %s4220_s21   ;;  %p3606_p0 = scmp.ge.s32.totalorder %s4220_s21, 1  ;;  %s4220_s21 = sphi %s4261_s21, %s17_s21  }
   0x2   : > { %p217_p1 = scmp.lt.s32.totalorder %s4220_s21, 3 }
   0x4   : > { %p218_p2 = pnand %p3606_p0, %p217_p1 }
   0x6   : > { %221 = sbr.rel (%p218_p2) target bundleno = 880 (0x370), region = 40 }
   0xd   : > { %s3607_s23 = sshll.u32 %s3602_s22, 2  ;;  %v350_v0 = vlaneseq  ;;  %s4223_s20 = smov 32   ;;  %vm653_vm0 = vcmask 261120   ;;  %vm1121_vm1 = vcmask 523520   ;;  %vm1589_vm2 = vcmask 785920  }
   0xe   : > { %p254_p3 = scmp.lt.s32.totalorder %s3607_s23, 7  ;;  %s4224_s8 = smov 64   ;;  %vm2056_vm3 = vcmask 1048320   ;;  %vm3479_vm4 = vcmask 257024  }
   0xf   : > { %v351_v1 = vshrl.u32 %v350_v0, 7  ;;  %s4225_s17 = smov 96  }
  0x10   : > { %s5942_s23 = smov (!%p254_p3, %s3607_s23), 7 }
  0x11   : > { %v4271_v2 = vsub.s32 2, %v351_v1  ;;  %v4273_v3 = vsub.s32 0, %v351_v1  ;;  %s3749_s24 = sshll.u32 %s5942_s23, 5  ;;  %v4275_v4 = vsub.s32 3, %v351_v1  ;;  %v4277_v5 = vsub.s32 1, %v351_v1 }
  0x12   : > { %s4282_s27 = scalar_lea.vmem %s5894_s0, %s3749_s24  ;;  %v4288_v10 = vsub.s32 4, %v351_v1  ;;  %v4303_v24 = vsub.s32 5, %v351_v1  ;;  %v4307_v27 = vsub.s32 6, %v351_v1  ;;  %v4311_v30 = vsub.s32 7, %v351_v1 }
  0x13   : > { %v3620_v6 = vld [vmem:[%s4282_s27 + $0x10] sm:$0xff]  ;;  %v3626_v9 = vld [vmem:[%s4282_s27 + $0x8] sm:$0xff]  ;;  %v1622_v15 = vld [vmem:[%s4282_s27] sm:$0xff] }
  0x14   : > { %v708_v7 = vrot.slane %v3620_v6, %v4271_v2  ;;  %v694_v8 = vrot.slane %v3620_v6, %v4273_v3  ;;  %v715_v11 = vrot.slane %v3620_v6, %v4275_v4  ;;  %v701_v12 = vrot.slane %v3620_v6, %v4277_v5  ;;  %v3621_v37 = vld [vmem:[%s4282_s27 + $0x30] sm:$0xff]  ;;  %v3627_v42 = vld [vmem:[%s4282_s27 + $0x28] sm:$0xff]  ;;  %v1623_v47 = vld [vmem:[%s4282_s27 + $0x20] sm:$0xff] }
  0x15   : > { %v1169_v13 = vrot.slane %v3626_v9, %v4277_v5  ;;  %v1162_v14 = vrot.slane %v3626_v9, %v4273_v3  ;;  %v1183_v16 = vrot.slane %v3626_v9, %v4275_v4  ;;  %v1176_v17 = vrot.slane %v3626_v9, %v4271_v2  ;;  %v4347_v0 = vld [vmem:[%s4282_s27 + $0x50] sm:$0xff] }
  0x16   : > { %710 = vbcast.lane.b32.xlu1 %v708_v7, 256  ;;  %696 = vbcast.lane.b32.xlu0 %v694_v8, 256  ;;  %v1629_v18 = vrot.slane %v1622_v15, %v4273_v3  ;;  %v1190_v19 = vrot.slane %v3626_v9, %v4288_v10  ;;  %v1643_v20 = vrot.slane %v1622_v15, %v4271_v2 }
  0x17   : > { %v1636_v21 = vrot.slane %v1622_v15, %v4277_v5  ;;  %v1657_v22 = vrot.slane %v1622_v15, %v4288_v10  ;;  %v1650_v23 = vrot.slane %v1622_v15, %v4275_v4  ;;  %v729_v25 = vrot.slane %v3620_v6, %v4303_v24 }
  0x18   : > { %v722_v26 = vrot.slane %v3620_v6, %v4288_v10  ;;  %v1197_v28 = vrot.slane %v3626_v9, %v4303_v24  ;;  %v736_v29 = vrot.slane %v3620_v6, %v4307_v27  ;;  %v1211_v31 = vrot.slane %v3626_v9, %v4311_v30 }
  0x19   : > { %v1204_v32 = vrot.slane %v3626_v9, %v4307_v27  ;;  %v1671_v33 = vrot.slane %v1622_v15, %v4307_v27  ;;  %v1664_v34 = vrot.slane %v1622_v15, %v4303_v24  ;;  %v1678_v35 = vrot.slane %v1622_v15, %v4311_v30  ;;  %v3628_v9 = vld [vmem:[%s4282_s27 + $0x48] sm:$0xff]  ;;  %v1624_v15 = vld [vmem:[%s4282_s27 + $0x40] sm:$0xff] }
  0x1a   : > { %717 = vbcast.lane.b32.xlu1 %v715_v11, 256  ;;  %703 = vbcast.lane.b32.xlu0 %v701_v12, 256  ;;  %v743_v36 = vrot.slane %v3620_v6, %v4311_v30  ;;  %v757_v38 = vrot.slane %v3621_v37, %v4277_v5  ;;  %v750_v39 = vrot.slane %v3621_v37, %v4273_v3 }
  0x1b   : > { %v771_v40 = vrot.slane %v3621_v37, %v4275_v4  ;;  %v764_v41 = vrot.slane %v3621_v37, %v4271_v2  ;;  %v1225_v43 = vrot.slane %v3627_v42, %v4277_v5  ;;  %v1218_v44 = vrot.slane %v3627_v42, %v4273_v3 }
  0x1c   : > { %v1239_v45 = vrot.slane %v3627_v42, %v4275_v4  ;;  %v1232_v46 = vrot.slane %v3627_v42, %v4271_v2  ;;  %v1685_v48 = vrot.slane %v1623_v47, %v4273_v3  ;;  %v1246_v49 = vrot.slane %v3627_v42, %v4288_v10 }
  0x1d   : > { %v1699_v50 = vrot.slane %v1623_v47, %v4271_v2  ;;  %v1692_v51 = vrot.slane %v1623_v47, %v4277_v5  ;;  %v1713_v52 = vrot.slane %v1623_v47, %v4288_v10  ;;  %v1706_v53 = vrot.slane %v1623_v47, %v4275_v4 }
  0x1e   : > { %1171 = vbcast.lane.b32.xlu1 %v1169_v13, 256  ;;  %1164 = vbcast.lane.b32.xlu0 %v1162_v14, 256  ;;  %v785_v54 = vrot.slane %v3621_v37, %v4303_v24  ;;  %v778_v55 = vrot.slane %v3621_v37, %v4288_v10  ;;  %v1253_v56 = vrot.slane %v3627_v42, %v4303_v24 }
  0x1f   : > { %v792_v57 = vrot.slane %v3621_v37, %v4307_v27  ;;  %v1267_v58 = vrot.slane %v3627_v42, %v4311_v30  ;;  %v1260_v59 = vrot.slane %v3627_v42, %v4307_v27  ;;  %v1727_v60 = vrot.slane %v1623_v47, %v4307_v27 }
  0x20   : > { %v1720_v61 = vrot.slane %v1623_v47, %v4303_v24  ;;  %v1734_v62 = vrot.slane %v1623_v47, %v4311_v30  ;;  %v799_v63 = vrot.slane %v3621_v37, %v4311_v30  ;;  %v813_v1 = vrot.slane %v4347_v0, %v4277_v5  ;;  %v4408_v47 = vld [vmem:[%s4282_s27 + $0x70] sm:$0xff] }
  0x21   : > { %v806_v6 = vrot.slane %v4347_v0, %v4273_v3  ;;  %v827_v7 = vrot.slane %v4347_v0, %v4275_v4  ;;  %v820_v8 = vrot.slane %v4347_v0, %v4271_v2  ;;  %v1281_v11 = vrot.slane %v3628_v9, %v4277_v5 }
  0x22   : > { %1185 = vbcast.lane.b32.xlu1 %v1183_v16, 256  ;;  %1178 = vbcast.lane.b32.xlu0 %v1176_v17, 256  ;;  %v1274_v12 = vrot.slane %v3628_v9, %v4273_v3  ;;  %v1295_v13 = vrot.slane %v3628_v9, %v4275_v4  ;;  %v1288_v14 = vrot.slane %v3628_v9, %v4271_v2 }
  0x23   : > { %v1741_v16 = vrot.slane %v1624_v15, %v4273_v3  ;;  %v1302_v17 = vrot.slane %v3628_v9, %v4288_v10  ;;  %v1323_v37 = vrot.slane %v3628_v9, %v4311_v30  ;;  %v1776_v42 = vrot.slane %v1624_v15, %v4303_v24 }
  0x26   : > { %1631 = vbcast.lane.b32.xlu1 %v1629_v18, 256  ;;  %1192 = vbcast.lane.b32.xlu0 %v1190_v19, 256  ;;  %v1755_v18 = vrot.slane %v1624_v15, %v4271_v2  ;;  %v1748_v19 = vrot.slane %v1624_v15, %v4277_v5 }
  0x2a   : > { %1645 = vbcast.lane.b32.xlu1 %v1643_v20, 256  ;;  %1638 = vbcast.lane.b32.xlu0 %v1636_v21, 256 }
  0x2e   : > { %1659 = vbcast.lane.b32.xlu1 %v1657_v22, 256  ;;  %1652 = vbcast.lane.b32.xlu0 %v1650_v23, 256  ;;  %v1769_v22 = vrot.slane %v1624_v15, %v4288_v10  ;;  %v1762_v23 = vrot.slane %v1624_v15, %v4275_v4 }
  0x32   : > { %731 = vbcast.lane.b32.xlu1 %v729_v25, 256  ;;  %724 = vbcast.lane.b32.xlu0 %v722_v26, 256 }
  0x36   : > { %1199 = vbcast.lane.b32.xlu1 %v1197_v28, 256  ;;  %738 = vbcast.lane.b32.xlu0 %v736_v29, 256  ;;  %v841_v28 = vrot.slane %v4347_v0, %v4303_v24  ;;  %v834_v29 = vrot.slane %v4347_v0, %v4288_v10 }
  0x3a   : > { %1213 = vbcast.lane.b32.xlu1 %v1211_v31, 256  ;;  %1206 = vbcast.lane.b32.xlu0 %v1204_v32, 256 }
  0x3e   : > { %1673 = vbcast.lane.b32.xlu1 %v1671_v33, 256  ;;  %1666 = vbcast.lane.b32.xlu0 %v1664_v34, 256  ;;  %v1309_v33 = vrot.slane %v3628_v9, %v4303_v24  ;;  %v848_v34 = vrot.slane %v4347_v0, %v4307_v27 }
  0x42   : > { %1680 = vbcast.lane.b32.xlu1 %v1678_v35, 256  ;;  %745 = vbcast.lane.b32.xlu0 %v743_v36, 256 }
  0x46   : > { %759 = vbcast.lane.b32.xlu1 %v757_v38, 256  ;;  %752 = vbcast.lane.b32.xlu0 %v750_v39, 256  ;;  %v1316_v38 = vrot.slane %v3628_v9, %v4307_v27 }
  0x4a   : > { %773 = vbcast.lane.b32.xlu1 %v771_v40, 256  ;;  %766 = vbcast.lane.b32.xlu0 %v764_v41, 256  ;;  %v1783_v41 = vrot.slane %v1624_v15, %v4307_v27 }
  0x4e   : > { %1227 = vbcast.lane.b32.xlu1 %v1225_v43, 256  ;;  %1220 = vbcast.lane.b32.xlu0 %v1218_v44, 256 }
  0x52   : > { %1241 = vbcast.lane.b32.xlu1 %v1239_v45, 256  ;;  %1234 = vbcast.lane.b32.xlu0 %v1232_v46, 256  ;;  %v1790_v45 = vrot.slane %v1624_v15, %v4311_v30  ;;  %v855_v46 = vrot.slane %v4347_v0, %v4311_v30 }
  0x56   : > { %1687 = vbcast.lane.b32.xlu1 %v1685_v48, 256  ;;  %1248 = vbcast.lane.b32.xlu0 %v1246_v49, 256 }
  0x5a   : > { %1701 = vbcast.lane.b32.xlu1 %v1699_v50, 256  ;;  %1694 = vbcast.lane.b32.xlu0 %v1692_v51, 256  ;;  %v869_v50 = vrot.slane %v4408_v47, %v4277_v5  ;;  %v862_v51 = vrot.slane %v4408_v47, %v4273_v3 }
  0x5e   : > { %1715 = vbcast.lane.b32.xlu1 %v1713_v52, 256  ;;  %1708 = vbcast.lane.b32.xlu0 %v1706_v53, 256 }
  0x62   : > { %787 = vbcast.lane.b32.xlu1 %v785_v54, 256  ;;  %780 = vbcast.lane.b32.xlu0 %v778_v55, 256  ;;  %v883_v54 = vrot.slane %v4408_v47, %v4275_v4  ;;  %v876_v55 = vrot.slane %v4408_v47, %v4271_v2 }
  0x66   : > { %1255 = vbcast.lane.b32.xlu1 %v1253_v56, 256  ;;  %794 = vbcast.lane.b32.xlu0 %v792_v57, 256  ;;  %v4427_v56 = vld [vmem:[%s4282_s27 + $0x68] sm:$0xff] }
  0x67   : > { %v1344_v0 = vrot.slane %v4427_v56, %v4271_v2  ;;  %v1358_v9 = vrot.slane %v4427_v56, %v4288_v10 }
  0x6a   : > { %1269 = vbcast.lane.b32.xlu1 %v1267_v58, 256  ;;  %1262 = vbcast.lane.b32.xlu0 %v1260_v59, 256  ;;  %v1337_v59 = vrot.slane %v4427_v56, %v4277_v5 }
  0x6e   : > { %1729 = vbcast.lane.b32.xlu1 %v1727_v60, 256  ;;  %1722 = vbcast.lane.b32.xlu0 %v1720_v61, 256  ;;  %v1330_v60 = vrot.slane %v4427_v56, %v4273_v3 }
  0x72   : > { %1736 = vbcast.lane.b32.xlu1 %v1734_v62, 256  ;;  %801 = vbcast.lane.b32.xlu0 %v799_v63, 256  ;;  %v1351_v63 = vrot.slane %v4427_v56, %v4275_v4 }
  0x76   : > { %815 = vbcast.lane.b32.xlu1 %v813_v1, 256  ;;  %808 = vbcast.lane.b32.xlu0 %v806_v6, 256  ;;  %v4446_v1 = vld [vmem:[%s4282_s27 + $0x60] sm:$0xff] }
  0x7a   : > { %829 = vbcast.lane.b32.xlu1 %v827_v7, 256  ;;  %822 = vbcast.lane.b32.xlu0 %v820_v8, 256  ;;  %v1797_v8 = vrot.slane %v4446_v1, %v4273_v3 }
  0x7e   : > { %1283 = vbcast.lane.b32.xlu1 %v1281_v11, 256  ;;  %1276 = vbcast.lane.b32.xlu0 %v1274_v12, 256 }
  0x82   : > { %1297 = vbcast.lane.b32.xlu1 %v1295_v13, 256  ;;  %1290 = vbcast.lane.b32.xlu0 %v1288_v14, 256  ;;  %v1811_v13 = vrot.slane %v4446_v1, %v4271_v2  ;;  %v1804_v14 = vrot.slane %v4446_v1, %v4277_v5 }
  0x86   : > { %1743 = vbcast.lane.b32.xlu1 %v1741_v16, 256  ;;  %1304 = vbcast.lane.b32.xlu0 %v1302_v17, 256  ;;  %v1825_v17 = vrot.slane %v4446_v1, %v4288_v10 }
  0x88   : > { %v4367_v20 = vpop.permute.xlu1 %710  ;;  %v4369_v21 = vpop.permute.xlu0 %696 }
  0x8a   : > { %1757 = vbcast.lane.b32.xlu1 %v1755_v18, 256  ;;  %1750 = vbcast.lane.b32.xlu0 %v1748_v19, 256  ;;  %v1818_v18 = vrot.slane %v4446_v1, %v4275_v4 }
  0x8c   : > { %v4373_v25 = vpop.permute.xlu1 %717  ;;  %v4375_v26 = vpop.permute.xlu0 %703 }
  0x8e   : > { %1771 = vbcast.lane.b32.xlu1 %v1769_v22, 256  ;;  %1764 = vbcast.lane.b32.xlu0 %v1762_v23, 256  ;;  %v4222_v23 = vmov 0.0  }
  0x8f   : > { %277 = vst [vmem:[#allocation2 + $0x20] sm:$0xff] %v4222_v23  ;;  %278 = vst [vmem:[#allocation2 + $0x28] sm:$0x1] %v4222_v23 }
  0x90   : > { %v4381_v31 = vpop.permute.xlu1 %1171  ;;  %v4383_v32 = vpop.permute.xlu0 %1164  ;;  %273 = vst [vmem:[#allocation2] sm:$0xff] %v4222_v23  ;;  %274 = vst [vmem:[#allocation2 + $0x8] sm:$0x1] %v4222_v23 }
  0x91   : > { %275 = vst [vmem:[#allocation2 + $0x10] sm:$0xff] %v4222_v23  ;;  %276 = vst [vmem:[#allocation2 + $0x18] sm:$0x1] %v4222_v23 }
  0x92   : > { %843 = vbcast.lane.b32.xlu1 %v841_v28, 256  ;;  %836 = vbcast.lane.b32.xlu0 %v834_v29, 256  ;;  %279 = vst [vmem:[#allocation2 + $0x30] sm:$0xff] %v4222_v23  ;;  %280 = vst [vmem:[#allocation2 + $0x38] sm:$0x1] %v4222_v23  ;;  %v897_v28 = vrot.slane %v4408_v47, %v4303_v24  ;;  %v890_v29 = vrot.slane %v4408_v47, %v4288_v10 }
  0x93   : > { %281 = vst [vmem:[#allocation2 + $0x40] sm:$0xff] %v4222_v23  ;;  %282 = vst [vmem:[#allocation2 + $0x48] sm:$0x1] %v4222_v23 }
  0x94   : > { %v4388_v35 = vpop.permute.xlu1 %1185  ;;  %v4390_v36 = vpop.permute.xlu0 %1178  ;;  %283 = vst [vmem:[#allocation2 + $0x50] sm:$0xff] %v4222_v23  ;;  %284 = vst [vmem:[#allocation2 + $0x58] sm:$0x1] %v4222_v23 }
  0x95   : > { %285 = vst [vmem:[#allocation2 + $0x60] sm:$0xff] %v4222_v23  ;;  %286 = vst [vmem:[#allocation2 + $0x68] sm:$0x1] %v4222_v23 }
  0x96   : > { %1311 = vbcast.lane.b32.xlu1 %v1309_v33, 256  ;;  %850 = vbcast.lane.b32.xlu0 %v848_v34, 256  ;;  %287 = vst [vmem:[#allocation2 + $0x70] sm:$0xff] %v4222_v23  ;;  %288 = vst [vmem:[#allocation2 + $0x78] sm:$0x1] %v4222_v23  ;;  %v4559_v33 = vld [vmem:[%s4282_s27 + $0x18] sm:$0xff] }
  0x97   : > { %289 = vst [vmem:[#allocation2 + $0x80] sm:$0xff] %v4222_v23  ;;  %290 = vst [vmem:[#allocation2 + $0x88] sm:$0x1] %v4222_v23 }
  0x98   : > { %v4394_v39 = vpop.permute.xlu1 %1631  ;;  %v4396_v40 = vpop.permute.xlu0 %1192  ;;  %291 = vst [vmem:[#allocation2 + $0x90] sm:$0xff] %v4222_v23  ;;  %292 = vst [vmem:[#allocation2 + $0x98] sm:$0x1] %v4222_v23 }
  0x99   : > { %293 = vst [vmem:[#allocation2 + $0xa0] sm:$0xff] %v4222_v23  ;;  %294 = vst [vmem:[#allocation2 + $0xa8] sm:$0x1] %v4222_v23 }
  0x9a   : > { %1325 = vbcast.lane.b32.xlu1 %v1323_v37, 256  ;;  %1318 = vbcast.lane.b32.xlu0 %v1316_v38, 256  ;;  %295 = vst [vmem:[#allocation2 + $0xb0] sm:$0xff] %v4222_v23  ;;  %296 = vst [vmem:[#allocation2 + $0xb8] sm:$0x1] %v4222_v23  ;;  %v360_v38 = vrot.slane %v4559_v33, %v4277_v5 }
  0x9b   : > { %297 = vst [vmem:[#allocation2 + $0xc0] sm:$0xff] %v4222_v23  ;;  %298 = vst [vmem:[#allocation2 + $0xc8] sm:$0x1] %v4222_v23 }
  0x9c   : > { %v4400_v43 = vpop.permute.xlu1 %1645  ;;  %v4402_v44 = vpop.permute.xlu0 %1638  ;;  %299 = vst [vmem:[#allocation2 + $0xd0] sm:$0xff] %v4222_v23  ;;  %300 = vst [vmem:[#allocation2 + $0xd8] sm:$0x1] %v4222_v23 }
  0x9d   : > { %301 = vst [vmem:[#allocation2 + $0xe0] sm:$0xff] %v4222_v23  ;;  %302 = vst [vmem:[#allocation2 + $0xe8] sm:$0x1] %v4222_v23 }
  0x9e   : > { %1785 = vbcast.lane.b32.xlu1 %v1783_v41, 256  ;;  %1778 = vbcast.lane.b32.xlu0 %v1776_v42, 256  ;;  %303 = vst [vmem:[#allocation2 + $0xf0] sm:$0xff] %v4222_v23  ;;  %304 = vst [vmem:[#allocation2 + $0xf8] sm:$0x1] %v4222_v23  ;;  %v353_v41 = vrot.slane %v4559_v33, %v4273_v3 }
  0x9f   : > { %305 = vst [vmem:[#allocation2 + $0x100] sm:$0xff] %v4222_v23  ;;  %306 = vst [vmem:[#allocation2 + $0x108] sm:$0x1] %v4222_v23 }
  0xa0   : > { %v4410_v48 = vpop.permute.xlu1 %1659  ;;  %v4412_v49 = vpop.permute.xlu0 %1652  ;;  %307 = vst [vmem:[#allocation2 + $0x110] sm:$0xff] %v4222_v23  ;;  %308 = vst [vmem:[#allocation2 + $0x118] sm:$0x1] %v4222_v23 }
  0xa1   : > { %309 = vst [vmem:[#allocation2 + $0x120] sm:$0xff] %v4222_v23  ;;  %310 = vst [vmem:[#allocation2 + $0x128] sm:$0x1] %v4222_v23 }
  0xa2   : > { %1792 = vbcast.lane.b32.xlu1 %v1790_v45, 256  ;;  %857 = vbcast.lane.b32.xlu0 %v855_v46, 256  ;;  %311 = vst [vmem:[#allocation2 + $0x130] sm:$0xff] %v4222_v23  ;;  %312 = vst [vmem:[#allocation2 + $0x138] sm:$0x1] %v4222_v23  ;;  %v1365_v46 = vrot.slane %v4427_v56, %v4303_v24 }
  0xa3   : > { %313 = vst [vmem:[#allocation2 + $0x140] sm:$0xff] %v4222_v23  ;;  %314 = vst [vmem:[#allocation2 + $0x148] sm:$0x1] %v4222_v23 }
  0xa4   : > { %v4418_v52 = vpop.permute.xlu1 %731  ;;  %v4420_v53 = vpop.permute.xlu0 %724  ;;  %315 = vst [vmem:[#allocation2 + $0x150] sm:$0xff] %v4222_v23  ;;  %316 = vst [vmem:[#allocation2 + $0x158] sm:$0x1] %v4222_v23 }
  0xa5   : > { %317 = vst [vmem:[#allocation2 + $0x160] sm:$0xff] %v4222_v23  ;;  %318 = vst [vmem:[#allocation2 + $0x168] sm:$0x1] %v4222_v23 }
  0xa6   : > { %871 = vbcast.lane.b32.xlu1 %v869_v50, 256  ;;  %864 = vbcast.lane.b32.xlu0 %v862_v51, 256  ;;  %319 = vst [vmem:[#allocation2 + $0x170] sm:$0xff] %v4222_v23  ;;  %320 = vst [vmem:[#allocation2 + $0x178] sm:$0x1] %v4222_v23  ;;  %v904_v50 = vrot.slane %v4408_v47, %v4307_v27 }
  0xa7   : > { %321 = vst [vmem:[#allocation2 + $0x180] sm:$0xff] %v4222_v23  ;;  %322 = vst [vmem:[#allocation2 + $0x188] sm:$0x1] %v4222_v23 }
  0xa8   : > { %v4429_v57 = vpop.permute.xlu1 %1199  ;;  %v4431_v58 = vpop.permute.xlu0 %738  ;;  %323 = vst [vmem:[#allocation2 + $0x190] sm:$0xff] %v4222_v23  ;;  %324 = vst [vmem:[#allocation2 + $0x198] sm:$0x1] %v4222_v23 }
  0xa9   : > { %325 = vst [vmem:[#allocation2 + $0x1a0] sm:$0xff] %v4222_v23  ;;  %326 = vst [vmem:[#allocation2 + $0x1a8] sm:$0x1] %v4222_v23 }
  0xaa   : > { %885 = vbcast.lane.b32.xlu1 %v883_v54, 256  ;;  %878 = vbcast.lane.b32.xlu0 %v876_v55, 256  ;;  %327 = vst [vmem:[#allocation2 + $0x1b0] sm:$0xff] %v4222_v23  ;;  %328 = vst [vmem:[#allocation2 + $0x1b8] sm:$0x1] %v4222_v23  ;;  %v367_v55 = vrot.slane %v4559_v33, %v4271_v2 }
  0xab   : > { %329 = vst [vmem:[#allocation2 + $0x1c0] sm:$0xff] %v4222_v23  ;;  %330 = vst [vmem:[#allocation2 + $0x1c8] sm:$0x1] %v4222_v23 }
  0xac   : > { %v4437_v61 = vpop.permute.xlu1 %1213  ;;  %v4439_v62 = vpop.permute.xlu0 %1206  ;;  %331 = vst [vmem:[#allocation2 + $0x1d0] sm:$0xff] %v4222_v23  ;;  %332 = vst [vmem:[#allocation2 + $0x1d8] sm:$0x1] %v4222_v23 }
  0xad   : > { %333 = vst [vmem:[#allocation2 + $0x1e0] sm:$0xff] %v4222_v23  ;;  %334 = vst [vmem:[#allocation2 + $0x1e8] sm:$0x1] %v4222_v23 }
  0xae   : > { %1339 = vbcast.lane.b32.xlu1 %v1337_v59, 256  ;;  %1332 = vbcast.lane.b32.xlu0 %v1330_v60, 256  ;;  %335 = vst [vmem:[#allocation2 + $0x1f0] sm:$0xff] %v4222_v23  ;;  %336 = vst [vmem:[#allocation2 + $0x1f8] sm:$0x1] %v4222_v23  ;;  %v1372_v59 = vrot.slane %v4427_v56, %v4307_v27 }
  0xaf   : > { %337 = vst [vmem:[#allocation2 + $0x200] sm:$0xff] %v4222_v23  ;;  %338 = vst [vmem:[#allocation2 + $0x208] sm:$0x1] %v4222_v23 }
  0xb0   : > { %v4448_v6 = vpop.permute.xlu1 %1673  ;;  %v4450_v7 = vpop.permute.xlu0 %1666  ;;  %339 = vst [vmem:[#allocation2 + $0x210] sm:$0xff] %v4222_v23  ;;  %340 = vst [vmem:[#allocation2 + $0x218] sm:$0x1] %v4222_v23 }
  0xb1   : > { %341 = vst [vmem:[#allocation2 + $0x220] sm:$0xff] %v4222_v23  ;;  %342 = vst [vmem:[#allocation2 + $0x228] sm:$0x1] %v4222_v23 }
  0xb2   : > { %1353 = vbcast.lane.b32.xlu1 %v1351_v63, 256  ;;  %1346 = vbcast.lane.b32.xlu0 %v1344_v0, 256  ;;  %343 = vst [vmem:[#allocation2 + $0x230] sm:$0xff] %v4222_v23  ;;  %344 = vst [vmem:[#allocation2 + $0x238] sm:$0x1] %v4222_v23  ;;  %v1379_v0 = vrot.slane %v4427_v56, %v4311_v30 }
  0xb3   : > { %v4608_v56 = vld [vmem:[%s5897_s3] ss:$0 sm:$0xff] }
  0xb4   : > { %v4456_v11 = vpop.permute.xlu1 %1680  ;;  %v4458_v12 = vpop.permute.xlu0 %745 }
  0xb6   : > { %1799 = vbcast.lane.b32.xlu1 %v1797_v8, 256  ;;  %1360 = vbcast.lane.b32.xlu0 %v1358_v9, 256  ;;  %v374_v8 = vrot.slane %v4559_v33, %v4275_v4 }
  0xb8   : > { %v4464_v15 = vpop.permute.xlu1 %759  ;;  %v4466_v16 = vpop.permute.xlu0 %752 }
  0xba   : > { %1813 = vbcast.lane.b32.xlu1 %v1811_v13, 256  ;;  %1806 = vbcast.lane.b32.xlu0 %v1804_v14, 256  ;;  %v1839_v14 = vrot.slane %v4446_v1, %v4307_v27 }
  0xbc   : > { %v4472_v19 = vpop.permute.xlu1 %773  ;;  %v4474_v22 = vpop.permute.xlu0 %766 }
  0xbe   : > { %1827 = vbcast.lane.b32.xlu1 %v1825_v17, 256  ;;  %1820 = vbcast.lane.b32.xlu0 %v1818_v18, 256  ;;  %v1832_v17 = vrot.slane %v4446_v1, %v4303_v24 }
  0xc0   : > { %v4561_v34 = vpop.permute.xlu1 %1227  ;;  %v4563_v37 = vpop.permute.xlu0 %1220 }
  0xc2   : > { %899 = vbcast.lane.b32.xlu1 %v897_v28, 256  ;;  %892 = vbcast.lane.b32.xlu0 %v890_v29, 256  ;;  %v4178_v28 = vld [vmem:[%s5895_s1 + $0x40] sm:$0xff]  }
  0xc3   : > { %v4179_v29 = vld [vmem:[%s5895_s1 + $0x80] sm:$0xff]   ;;  %3878 = vmatprep.subr.bf16.mxu1 %v4178_v28 }
  0xc4   : > { %v4569_v42 = vpop.permute.xlu1 %1241  ;;  %v4571_v45 = vpop.permute.xlu0 %1234  ;;  %3974 = vmatprep.subr.bf16.mxu0 %v4179_v29  ;;  %3879 = vmatpush3.bf16.msra.mxu1 %v4178_v28 }
  0xc5   : > { %3975 = vmatpush3.bf16.msra.mxu0 %v4179_v29  ;;  %v4182_v29 = vld [vmem:[%s5895_s1 + $0x50] sm:$0xff]  }
  0xc6   : > { %362 = vbcast.lane.b32.xlu1 %v360_v38, 256  ;;  %355 = vbcast.lane.b32.xlu0 %v353_v41, 256  ;;  %v1846_v38 = vrot.slane %v4446_v1, %v4311_v30  ;;  %v911_v41 = vrot.slane %v4408_v47, %v4311_v30  ;;  %v4631_v1 = vld [vmem:[%s5898_s4] ss:$0 sm:$0xff]  ;;  %v4180_v47 = vld [vmem:[%s5895_s1 + $0x48] sm:$0xff]  }
  0xc7   : > { %3880 = vmatprep.subr.bf16.mxu1 %v4180_v47 }
  0xc8   : > { %v4577_v51 = vpop.permute.xlu1 %1687  ;;  %v4579_v54 = vpop.permute.xlu0 %1248  ;;  %3881 = vmatpush3.bf16.msra.mxu1 %v4180_v47 }
  0xc9   : > { %3882 = vmatprep.subr.bf16.mxu1 %v4182_v29 }
  0xca   : > { %1367 = vbcast.lane.b32.xlu1 %v1365_v46, 256  ;;  %906 = vbcast.lane.b32.xlu0 %v904_v50, 256  ;;  %v922_v46 = vmul.f32 %v4608_v56, %v4369_v21  ;;  %v923_v50 = vmul.f32 %v4608_v56, %v4375_v26  ;;  %v4181_v21 = vld [vmem:[%s5895_s1 + $0x88] sm:$0xff]   ;;  %v924_v26 = vmul.f32 %v4608_v56, %v4367_v20  ;;  %v4183_v20 = vld [vmem:[%s5895_s1 + $0x90] sm:$0xff]  }
  0xcb   : > { %3976 = vmatprep.subr.bf16.mxu0 %v4181_v21 }
  0xcc   : > { %v4585_v60 = vpop.permute.xlu1 %1701  ;;  %v4587_v63 = vpop.permute.xlu0 %1694  ;;  %3977 = vmatpush3.bf16.msra.mxu0 %v4181_v21  ;;  %3883 = vmatpush3.bf16.msra.mxu1 %v4182_v29  ;;  %v4184_v21 = vld [vmem:[%s5895_s1 + $0x58] sm:$0xff]  }
  0xcd   : > { %3978 = vmatprep.subr.bf16.mxu0 %v4183_v20  ;;  %3884 = vmatprep.subr.bf16.mxu1 %v4184_v21 }
  0xce   : > { %369 = vbcast.lane.b32.xlu1 %v367_v55, 256  ;;  %1374 = vbcast.lane.b32.xlu0 %v1372_v59, 256 }
  0xd0   : > { %v4593_v9 = vpop.permute.xlu1 %1715  ;;  %v4595_v13 = vpop.permute.xlu0 %1708  ;;  %3979 = vmatpush3.bf16.msra.mxu0 %v4183_v20  ;;  %3885 = vmatpush3.bf16.msra.mxu1 %v4184_v21  ;;  %v4186_v20 = vld [vmem:[%s5895_s1 + $0x60] sm:$0xff]  }
  0xd1   : > { %3886 = vmatprep.subr.bf16.mxu1 %v4186_v20 }
  0xd2   : > { %1381 = vbcast.lane.b32.xlu1 %v1379_v0, 256  ;;  %376 = vbcast.lane.b32.xlu0 %v374_v8, 256  ;;  %v961_v0 = vsub.f32 %v922_v46, %v4631_v1  ;;  %v925_v8 = vmul.f32 %v4608_v56, %v4373_v25  ;;  %v1391_v25 = vmul.f32 %v4608_v56, %v4381_v31  ;;  %v4185_v31 = vld [vmem:[%s5895_s1 + $0x98] sm:$0xff]  }
  0xd3   : > { %v1390_v46 = vmul.f32 %v4608_v56, %v4383_v32  ;;  %3980 = vmatprep.subr.bf16.mxu0 %v4185_v31 }
  0xd4   : > { %v4601_v18 = vpop.permute.xlu1 %787  ;;  %v4603_v23 = vpop.permute.xlu0 %780  ;;  %v1430_v32 = vsub.f32 %v1391_v25, %v4631_v1  ;;  %3981 = vmatpush3.bf16.msra.mxu0 %v4185_v31  ;;  %v4187_v25 = vld [vmem:[%s5895_s1 + $0xa0] sm:$0xff]   ;;  %3887 = vmatpush3.bf16.msra.mxu1 %v4186_v20  ;;  %v4188_v31 = vld [vmem:[%s5895_s1 + $0x68] sm:$0xff]  }
  0xd5   : > { %3982 = vmatprep.subr.bf16.mxu0 %v4187_v25  ;;  %3888 = vmatprep.subr.bf16.mxu1 %v4188_v31 }
  0xd6   : > { %1841 = vbcast.lane.b32.xlu1 %v1839_v14, 256  ;;  %1834 = vbcast.lane.b32.xlu0 %v1832_v17, 256  ;;  %v962_v14 = vsub.f32 %v923_v50, %v4631_v1 }
  0xd8   : > { %v4624_v55 = vpop.permute.xlu1 %1255  ;;  %v4626_v59 = vpop.permute.xlu0 %794  ;;  %3983 = vmatpush3.bf16.msra.mxu0 %v4187_v25  ;;  %3889 = vmatpush3.bf16.msra.mxu1 %v4188_v31  ;;  %v4190_v25 = vld [vmem:[%s5895_s1 + $0x70] sm:$0xff]   ;;  %v4193_v31 = vld [vmem:[%s5895_s1 + $0xb8] sm:$0xff]  }
  0xd9   : > { %3890 = vmatprep.subr.bf16.mxu1 %v4190_v25 }
  0xda   : > { %1848 = vbcast.lane.b32.xlu1 %v1846_v38, 256  ;;  %913 = vbcast.lane.b32.xlu0 %v911_v41, 256  ;;  %v963_v38 = vsub.f32 %v924_v26, %v4631_v1  ;;  %v964_v41 = vsub.f32 %v925_v8, %v4631_v1  ;;  %v1429_v26 = vsub.f32 %v1390_v46, %v4631_v1 }
  0xdb   : > { %v1392_v8 = vmul.f32 %v4608_v56, %v4390_v36 }
  0xdc   : > { %v4645_v17 = vpop.permute.xlu1 %1269  ;;  %v4647_v28 = vpop.permute.xlu0 %1262  ;;  %3891 = vmatpush3.bf16.msra.mxu1 %v4190_v25 }
  0xde   : > { %1027 = vrot.lane.b32.xlu1 %v962_v14, %s4223_s20  ;;  %1025 = vrot.lane.b32.xlu0 %v961_v0, %s4223_s20  ;;  %v1393_v0 = vmul.f32 %v4608_v56, %v4388_v35  ;;  %v1857_v35 = vmul.f32 %v4608_v56, %v4394_v39  ;;  %v4189_v39 = vld [vmem:[%s5895_s1 + $0xa8] sm:$0xff]  }
  0xdf   : > { %3984 = vmatprep.subr.bf16.mxu0 %v4189_v39 }
  0xe0   : > { %v4663_v50 = vpop.permute.xlu1 %1729  ;;  %v4665_v47 = vpop.permute.xlu0 %1722  ;;  %v1432_v36 = vsub.f32 %v1393_v0, %v4631_v1  ;;  %v1858_v0 = vmul.f32 %v4608_v56, %v4402_v44  ;;  %3985 = vmatpush3.bf16.msra.mxu0 %v4189_v39  ;;  %v388_v39 = vrot.slane %v4559_v33, %v4303_v24 }
  0xe2   : > { %1031 = vrot.lane.b32.xlu1 %v964_v41, %s4223_s20  ;;  %1029 = vrot.lane.b32.xlu0 %v963_v38, %s4223_s20  ;;  %v1431_v38 = vsub.f32 %v1392_v8, %v4631_v1  ;;  %v1394_v41 = vmul.f32 %v4608_v56, %v4396_v40  ;;  %v1896_v40 = vsub.f32 %v1857_v35, %v4631_v1  ;;  %v4191_v35 = vld [vmem:[%s5895_s1 + $0xb0] sm:$0xff]  }
  0xe3   : > { %3986 = vmatprep.subr.bf16.mxu0 %v4191_v35  ;;  %v1897_v44 = vsub.f32 %v1858_v0, %v4631_v1 }
  0xe4   : > { %v4681_v14 = vpop.permute.xlu1 %1736  ;;  %v4683_v29 = vpop.permute.xlu0 %801  ;;  %3987 = vmatpush3.bf16.msra.mxu0 %v4191_v35 }
  0xe5   : > { %3988 = vmatprep.subr.bf16.mxu0 %v4193_v31 }
  0xe6   : > { %1495 = vrot.lane.b32.xlu1 %v1430_v32, %s4224_s8  ;;  %1493 = vrot.lane.b32.xlu0 %v1429_v26, %s4224_s8  ;;  %v1433_v32 = vsub.f32 %v1394_v41, %v4631_v1  ;;  %v1859_v26 = vmul.f32 %v4608_v56, %v4400_v43  ;;  %v4192_v41 = vld [vmem:[%s5895_s1 + $0x78] sm:$0xff]  }
  0xe7   : > { %3892 = vmatprep.subr.bf16.mxu1 %v4192_v41 }
  0xe8   : > { %v4699_v46 = vpop.permute.xlu1 %815  ;;  %v4701_v21 = vpop.permute.xlu0 %808  ;;  %v1898_v43 = vsub.f32 %v1859_v26, %v4631_v1  ;;  %v1860_v26 = vmul.f32 %v4608_v56, %v4412_v49  ;;  %3893 = vmatpush3.bf16.msra.mxu1 %v4192_v41  ;;  %3989 = vmatpush3.bf16.msra.mxu0 %v4193_v31  ;;  %v395_v49 = vrot.slane %v4559_v33, %v4307_v27 }
  0xe9   : > { %v927_v41 = vmul.f32 %v4608_v56, %v4418_v52  ;;  %v926_v31 = vmul.f32 %v4608_v56, %v4420_v53 }
  0xea   : > { %1499 = vrot.lane.b32.xlu1 %v1432_v36, %s4224_s8  ;;  %1497 = vrot.lane.b32.xlu0 %v1431_v38, %s4224_s8 }
  0xec   : > { %v4717_v8 = vpop.permute.xlu1 %829  ;;  %v4719_v20 = vpop.permute.xlu0 %822 }
  0xee   : > { %1960 = vrot.lane.b32.xlu1 %v1896_v40, %s4225_s17  ;;  %1501 = vrot.lane.b32.xlu0 %v1433_v32, %s4224_s8  ;;  %v381_v40 = vrot.slane %v4559_v33, %v4288_v10  ;;  %v1861_v32 = vmul.f32 %v4608_v56, %v4410_v48  ;;  %v402_v48 = vrot.slane %v4559_v33, %v4311_v30 }
  0xef   : > { %v928_v33 = vmul.f32 %v4608_v56, %v4431_v58 }
  0xf0   : > { %v4731_v36 = vpop.permute.xlu1 %1283  ;;  %v4733_v38 = vpop.permute.xlu0 %1276  ;;  %v1900_v35 = vsub.f32 %v1861_v32, %v4631_v1  ;;  %v966_v32 = vsub.f32 %v927_v41, %v4631_v1 }
  0xf1   : > { %5903 = vst [vmem:[#allocation3_spill] sm:$0xff] %v4733_v38 }
  0xf2   : > { %1964 = vrot.lane.b32.xlu1 %v1898_v43, %s4225_s17  ;;  %1962 = vrot.lane.b32.xlu0 %v1897_v44, %s4225_s17  ;;  %v1899_v43 = vsub.f32 %v1860_v26, %v4631_v1  ;;  %v965_v26 = vsub.f32 %v926_v31, %v4631_v1 }
  0xf4   : > { %v4751_v0 = vpop.permute.xlu1 %1297  ;;  %v4753_v25 = vpop.permute.xlu0 %1290 }
  0xf6   : > { %390 = vbcast.lane.b32.xlu1 %v388_v39, 256  ;;  %383 = vbcast.lane.b32.xlu0 %v381_v40, 256 }
  0xf8   : > { %v4757_v44 = vpop.permute.xlu1 %1743  ;;  %v4759_v38 = vpop.permute.xlu0 %1304 }
  0xfa   : > { %1968 = vrot.lane.b32.xlu1 %v1900_v35, %s4225_s17  ;;  %1966 = vrot.lane.b32.xlu0 %v1899_v43, %s4225_s17  ;;  %v1395_v35 = vmul.f32 %v4608_v56, %v4429_v57  ;;  %v1396_v57 = vmul.f32 %v4608_v56, %v4439_v62 }
  0xfc   : > { %v4771_v39 = vpop.permute.xlu1 %1757  ;;  %v4773_v40 = vpop.permute.xlu0 %1750  ;;  %v1434_v53 = vsub.f32 %v1395_v35, %v4631_v1 }
  0xfe   : > { %404 = vbcast.lane.b32.xlu1 %v402_v48, 256  ;;  %397 = vbcast.lane.b32.xlu0 %v395_v49, 256  ;;  %v967_v48 = vsub.f32 %v928_v33, %v4631_v1  ;;  %v1397_v49 = vmul.f32 %v4608_v56, %v4437_v61  ;;  %v1862_v61 = vmul.f32 %v4608_v56, %v4450_v7  ;;  %v4812_v33 = vld [vmem:[%s4282_s27 + $0x38] sm:$0xff] }
  0xff   : > { %v416_v7 = vrot.slane %v4812_v33, %v4277_v5 }
 0x100   : > { %v4781_v52 = vpop.permute.xlu1 %1771  ;;  %v4783_v43 = vpop.permute.xlu0 %1764  ;;  %v1436_v31 = vsub.f32 %v1397_v49, %v4631_v1 }
 0x102   : > { %1035 = vrot.lane.b32.xlu1 %v966_v32, %s4223_s20  ;;  %1033 = vrot.lane.b32.xlu0 %v965_v26, %s4223_s20  ;;  %v1435_v32 = vsub.f32 %v1396_v57, %v4631_v1  ;;  %v1863_v26 = vmul.f32 %v4608_v56, %v4448_v6  ;;  %v409_v57 = vrot.slane %v4812_v33, %v4273_v3 }
 0x104   : > { %v4793_v58 = vpop.permute.xlu1 %843  ;;  %v4795_v41 = vpop.permute.xlu0 %836 }
 0x106   : > { %1503 = vrot.lane.b32.xlu1 %v1434_v53, %s4224_s8  ;;  %1037 = vrot.lane.b32.xlu0 %v967_v48, %s4223_s20  ;;  %v1902_v53 = vsub.f32 %v1863_v26, %v4631_v1  ;;  %v1901_v48 = vsub.f32 %v1862_v61, %v4631_v1 }
 0x108   : > { %v4805_v35 = vpop.permute.xlu1 %1311  ;;  %v4807_v62 = vpop.permute.xlu0 %850 }
 0x10a   : > { %1507 = vrot.lane.b32.xlu1 %v1436_v31, %s4224_s8  ;;  %1505 = vrot.lane.b32.xlu0 %v1435_v32, %s4224_s8  ;;  %v1864_v31 = vmul.f32 %v4608_v56, %v4456_v11  ;;  %v929_v32 = vmul.f32 %v4608_v56, %v4458_v12  ;;  %v430_v11 = vrot.slane %v4812_v33, %v4275_v4 }
 0x10b   : > { %v423_v12 = vrot.slane %v4812_v33, %v4271_v2 }
 0x10c   : > { %v4816_v49 = vpop.permute.xlu1 %1325  ;;  %v4818_v6 = vpop.permute.xlu0 %1318 }
 0x10d   : > { %5904 = vst [vmem:[#allocation4_spill] sm:$0xff] %v4816_v49  ;;  %5905 = vst [vmem:[#allocation5_spill] sm:$0xff] %v4818_v6 }
 0x10e   : > { %1972 = vrot.lane.b32.xlu1 %v1902_v53, %s4225_s17  ;;  %1970 = vrot.lane.b32.xlu0 %v1901_v48, %s4225_s17  ;;  %v1903_v53 = vsub.f32 %v1864_v31, %v4631_v1  ;;  %v968_v48 = vsub.f32 %v929_v32, %v4631_v1 }
 0x110   : > { %v4830_v26 = vpop.permute.xlu1 %1785  ;;  %v4832_v61 = vpop.permute.xlu0 %1778 }
 0x111   : > { %5906 = vst [vmem:[#allocation6_spill] sm:$0xff] %v4832_v61 }
 0x112   : > { %418 = vbcast.lane.b32.xlu1 %v416_v7, 256  ;;  %411 = vbcast.lane.b32.xlu0 %v409_v57, 256  ;;  %v931_v7 = vmul.f32 %v4608_v56, %v4464_v15  ;;  %v930_v57 = vmul.f32 %v4608_v56, %v4466_v16 }
 0x114   : > { %v4836_v6 = vpop.permute.xlu1 %1792  ;;  %v4838_v49 = vpop.permute.xlu0 %857 }
 0x115   : > { %5907 = vst [vmem:[#allocation7_spill] sm:$0xff] %v4836_v6  ;;  %5908 = vst [vmem:[#allocation8_spill] sm:$0xff] %v4838_v49  ;;  %v933_v49 = vmul.f32 %v4608_v56, %v4472_v19  ;;  %v932_v6 = vmul.f32 %v4608_v56, %v4474_v22  ;;  %v1398_v19 = vmul.f32 %v4608_v56, %v4563_v37 }
 0x116   : > { %1974 = vrot.lane.b32.xlu1 %v1903_v53, %s4225_s17  ;;  %1039 = vrot.lane.b32.xlu0 %v968_v48, %s4223_s20  ;;  %v970_v53 = vsub.f32 %v931_v7, %v4631_v1  ;;  %v969_v48 = vsub.f32 %v930_v57, %v4631_v1 }
 0x117   : > { %v972_v16 = vsub.f32 %v933_v49, %v4631_v1  ;;  %v1437_v49 = vsub.f32 %v1398_v19, %v4631_v1 }
 0x118   : > { %v4850_v31 = vpop.permute.xlu1 %871  ;;  %v4852_v32 = vpop.permute.xlu0 %864 }
 0x11a   : > { %432 = vbcast.lane.b32.xlu1 %v430_v11, 256  ;;  %425 = vbcast.lane.b32.xlu0 %v423_v12, 256  ;;  %v971_v11 = vsub.f32 %v932_v6, %v4631_v1  ;;  %v1399_v12 = vmul.f32 %v4608_v56, %v4561_v34  ;;  %v1401_v6 = vmul.f32 %v4608_v56, %v4569_v42 }
 0x11b   : > { %v1400_v34 = vmul.f32 %v4608_v56, %v4571_v45  ;;  %v1402_v42 = vmul.f32 %v4608_v56, %v4579_v54 }
 0x11c   : > { %v4860_v15 = vpop.permute.xlu1 %885  ;;  %v4862_v61 = vpop.permute.xlu0 %878  ;;  %v1438_v57 = vsub.f32 %v1399_v12, %v4631_v1 }
 0x11e   : > { %1043 = vrot.lane.b32.xlu1 %v970_v53, %s4223_s20  ;;  %1041 = vrot.lane.b32.xlu0 %v969_v48, %s4223_s20  ;;  %v1440_v48 = vsub.f32 %v1401_v6, %v4631_v1 }
 0x120   : > { %v4872_v7 = vpop.permute.xlu1 %1339  ;;  %v4874_v22 = vpop.permute.xlu0 %1332 }
 0x122   : > { %1047 = vrot.lane.b32.xlu1 %v972_v16, %s4223_s20  ;;  %1045 = vrot.lane.b32.xlu0 %v971_v11, %s4223_s20  ;;  %v1439_v16 = vsub.f32 %v1400_v34, %v4631_v1  ;;  %v1865_v11 = vmul.f32 %v4608_v56, %v4577_v51  ;;  %v1866_v51 = vmul.f32 %v4608_v56, %v4587_v63 }
 0x123   : > { %v437_v63 = vrot.slane %v4812_v33, %v4288_v10 }
 0x124   : > { %v4884_v53 = vpop.permute.xlu1 %1353  ;;  %v4886_v37 = vpop.permute.xlu0 %1346  ;;  %v1904_v19 = vsub.f32 %v1865_v11, %v4631_v1 }
 0x126   : > { %1511 = vrot.lane.b32.xlu1 %v1438_v57, %s4224_s8  ;;  %1509 = vrot.lane.b32.xlu0 %v1437_v49, %s4224_s8  ;;  %v1441_v57 = vsub.f32 %v1402_v42, %v4631_v1  ;;  %v1867_v49 = vmul.f32 %v4608_v56, %v4585_v60  ;;  %v444_v60 = vrot.slane %v4812_v33, %v4303_v24 }
 0x127   : > { %v1869_v42 = vmul.f32 %v4608_v56, %v4593_v9  ;;  %v458_v9 = vrot.slane %v4812_v33, %v4311_v30 }
 0x128   : > { %v4896_v12 = vpop.permute.xlu1 %1799  ;;  %v4898_v45 = vpop.permute.xlu0 %1360  ;;  %v1906_v34 = vsub.f32 %v1867_v49, %v4631_v1 }
 0x12a   : > { %1515 = vrot.lane.b32.xlu1 %v1440_v48, %s4224_s8  ;;  %1513 = vrot.lane.b32.xlu0 %v1439_v16, %s4224_s8  ;;  %v1905_v48 = vsub.f32 %v1866_v51, %v4631_v1  ;;  %v1908_v51 = vsub.f32 %v1869_v42, %v4631_v1  ;;  %v935_v42 = vmul.f32 %v4608_v56, %v4601_v18 }
 0x12b   : > { %v1403_v18 = vmul.f32 %v4608_v56, %v4624_v55  ;;  %v1405_v55 = vmul.f32 %v4608_v56, %v4645_v17 }
 0x12c   : > { %v4908_v6 = vpop.permute.xlu1 %1813  ;;  %v4910_v54 = vpop.permute.xlu0 %1806 }
 0x12d   : > { %5909 = vst [vmem:[#allocation9_spill] sm:$0xff] %v4910_v54 }
 0x12e   : > { %1976 = vrot.lane.b32.xlu1 %v1904_v19, %s4225_s17  ;;  %1517 = vrot.lane.b32.xlu0 %v1441_v57, %s4224_s8  ;;  %v1868_v19 = vmul.f32 %v4608_v56, %v4595_v13  ;;  %v451_v13 = vrot.slane %v4812_v33, %v4307_v27  ;;  %v974_v33 = vsub.f32 %v935_v42, %v4631_v1 }
 0x130   : > { %v4916_v16 = vpop.permute.xlu1 %1827  ;;  %v4918_v11 = vpop.permute.xlu0 %1820 }
 0x131   : > { %5910 = vst [vmem:[#allocation10_spill] sm:$0xff] %v4916_v16  ;;  %5911 = vst [vmem:[#allocation11_spill] sm:$0xff] %v4918_v11 }
 0x132   : > { %1980 = vrot.lane.b32.xlu1 %v1906_v34, %s4225_s17  ;;  %1978 = vrot.lane.b32.xlu0 %v1905_v48, %s4225_s17  ;;  %v1907_v34 = vsub.f32 %v1868_v19, %v4631_v1 }
 0x134   : > { %v4930_v57 = vpop.permute.xlu1 %899  ;;  %v4932_v49 = vpop.permute.xlu0 %892 }
 0x136   : > { %446 = vbcast.lane.b32.xlu1 %v444_v60, 256  ;;  %439 = vbcast.lane.b32.xlu0 %v437_v63, 256 }
 0x138   : > { %v363_v48 = vpop.permute.xlu1 %362  ;;  %v356_v11 = vpop.permute.xlu0 %355 }
 0x139   : > { %v582_v16 = vmul.f32 %v4608_v56, %v363_v48  ;;  %v581_v54 = vmul.f32 %v4608_v56, %v356_v11  ;;  %v934_v11 = vmul.f32 %v4608_v56, %v4603_v23  ;;  %v936_v23 = vmul.f32 %v4608_v56, %v4626_v59 }
 0x13a   : > { %1984 = vrot.lane.b32.xlu1 %v1908_v51, %s4225_s17  ;;  %1982 = vrot.lane.b32.xlu0 %v1907_v34, %s4225_s17  ;;  %v1404_v59 = vmul.f32 %v4608_v56, %v4647_v28  ;;  %v1871_v28 = vmul.f32 %v4608_v56, %v4663_v50 }
 0x13b   : > { %v621_v60 = vsub.f32 %v582_v16, %v4631_v1  ;;  %v620_v63 = vsub.f32 %v581_v54, %v4631_v1  ;;  %v973_v54 = vsub.f32 %v934_v11, %v4631_v1 }
 0x13c   : > { %v4950_v19 = vpop.permute.xlu1 %1367  ;;  %v4952_v51 = vpop.permute.xlu0 %906  ;;  %v1443_v17 = vsub.f32 %v1404_v59, %v4631_v1  ;;  %v1872_v59 = vmul.f32 %v4608_v56, %v4681_v14 }
 0x13d   : > { %655 = vst.msk [vmem:[#allocation2 + $0x21] sm:$0xff] %vm653_vm0, %v621_v60  ;;  %654 = vst.msk [vmem:[#allocation2 + $0x11] sm:$0xff] %vm653_vm0, %v620_v63  ;;  %v975_v60 = vsub.f32 %v936_v23, %v4631_v1 }
 0x13e   : > { %460 = vbcast.lane.b32.xlu1 %v458_v9, 256  ;;  %453 = vbcast.lane.b32.xlu0 %v451_v13, 256  ;;  %v1442_v13 = vsub.f32 %v1403_v18, %v4631_v1  ;;  %v1870_v18 = vmul.f32 %v4608_v56, %v4665_v47 }
 0x140   : > { %v370_v16 = vpop.permute.xlu1 %369  ;;  %v4962_v34 = vpop.permute.xlu0 %1374 }
 0x141   : > { %v583_v48 = vmul.f32 %v4608_v56, %v370_v16 }
 0x142   : > { %1051 = vrot.lane.b32.xlu1 %v974_v33, %s4223_s20  ;;  %1049 = vrot.lane.b32.xlu0 %v973_v54, %s4223_s20  ;;  %v1444_v54 = vsub.f32 %v1405_v55, %v4631_v1 }
 0x143   : > { %v622_v9 = vsub.f32 %v583_v48, %v4631_v1  ;;  %v4995_v48 = vld [vmem:[%s4282_s27 + $0x58] sm:$0xff] }
 0x144   : > { %v4974_v63 = vpop.permute.xlu1 %1381  ;;  %v377_v42 = vpop.permute.xlu0 %376  ;;  %v472_v47 = vrot.slane %v4995_v48, %v4277_v5  ;;  %v465_v55 = vrot.slane %v4995_v48, %v4273_v3  ;;  %v486_v14 = vrot.slane %v4995_v48, %v4275_v4 }
 0x145   : > { %v584_v11 = vmul.f32 %v4608_v56, %v377_v42  ;;  %656 = vst.msk [vmem:[#allocation2 + $0x31] sm:$0xff] %vm653_vm0, %v622_v9  ;;  %v1910_v9 = vsub.f32 %v1871_v28, %v4631_v1  ;;  %v937_v42 = vmul.f32 %v4608_v56, %v4683_v29  ;;  %v479_v29 = vrot.slane %v4995_v48, %v4271_v2 }
 0x146   : > { %1519 = vrot.lane.b32.xlu1 %v1442_v13, %s4224_s8  ;;  %1053 = vrot.lane.b32.xlu0 %v975_v60, %s4223_s20  ;;  %v1909_v13 = vsub.f32 %v1870_v18, %v4631_v1 }
 0x147   : > { %v623_v33 = vsub.f32 %v584_v11, %v4631_v1 }
 0x148   : > { %v4987_v23 = vpop.permute.xlu1 %1841  ;;  %v4989_v16 = vpop.permute.xlu0 %1834 }
 0x149   : > { %657 = vst.msk [vmem:[#allocation2 + $0x41] sm:$0xff] %vm653_vm0, %v623_v33 }
 0x14a   : > { %1523 = vrot.lane.b32.xlu1 %v1444_v54, %s4224_s8  ;;  %1521 = vrot.lane.b32.xlu0 %v1443_v17, %s4224_s8  ;;  %v1911_v54 = vsub.f32 %v1872_v59, %v4631_v1  ;;  %v976_v17 = vsub.f32 %v937_v42, %v4631_v1 }
 0x14c   : > { %v4999_v50 = vpop.permute.xlu1 %1848  ;;  %v5001_v60 = vpop.permute.xlu0 %913 }
 0x14e   : > { %1988 = vrot.lane.b32.xlu1 %v1910_v9, %s4225_s17  ;;  %1986 = vrot.lane.b32.xlu0 %v1909_v13, %s4225_s17  ;;  %v939_v9 = vmul.f32 %v4608_v56, %v4699_v46  ;;  %v938_v13 = vmul.f32 %v4608_v56, %v4701_v21  ;;  %v940_v46 = vmul.f32 %v4608_v56, %v4719_v20 }
 0x150   : > { %v1028_v11 = vpop.permute.xlu1 %1027  ;;  %v1026_v33 = vpop.permute.xlu0 %1025  ;;  %v978_v59 = vsub.f32 %v939_v9, %v4631_v1  ;;  %v977_v42 = vsub.f32 %v938_v13, %v4631_v1  ;;  %v1408_v13 = vmul.f32 %v4608_v56, %v4753_v25  ;;  %v1410_v25 = vmul.f32 %v4608_v56, %v4759_v38 }
 0x151   : > { %1123 = vst.msk [vmem:[#allocation2 + $0x20] sm:$0xff] %vm1121_vm1, %v1028_v11  ;;  %1122 = vst.msk [vmem:[#allocation2 + $0x10] sm:$0xff] %vm1121_vm1, %v1026_v33  ;;  %v941_v11 = vmul.f32 %v4608_v56, %v4717_v8  ;;  %v1407_v8 = vmul.f32 %v4608_v56, %v4731_v36  ;;  %v1409_v36 = vmul.f32 %v4608_v56, %v4751_v0 }
 0x152   : > { %474 = vbcast.lane.b32.xlu1 %v472_v47, 256  ;;  %467 = vbcast.lane.b32.xlu0 %v465_v55, 256  ;;  %v1873_v0 = vmul.f32 %v4608_v56, %v4757_v44  ;;  %v1875_v38 = vmul.f32 %v4608_v56, %v4771_v39 }
 0x154   : > { %v1032_v28 = vpop.permute.xlu1 %1031  ;;  %v1030_v18 = vpop.permute.xlu0 %1029  ;;  %v1912_v44 = vsub.f32 %v1873_v0, %v4631_v1  ;;  %v1914_v39 = vsub.f32 %v1875_v38, %v4631_v1 }
 0x155   : > { %1125 = vst.msk [vmem:[#allocation2 + $0x40] sm:$0xff] %vm1121_vm1, %v1032_v28  ;;  %1124 = vst.msk [vmem:[#allocation2 + $0x30] sm:$0xff] %vm1121_vm1, %v1030_v18  ;;  %v5912_v28 = vld [vmem:[#allocation3_spill] sm:$0xff] }
 0x156   : > { %1990 = vrot.lane.b32.xlu1 %v1911_v54, %s4225_s17  ;;  %1055 = vrot.lane.b32.xlu0 %v976_v17, %s4223_s20  ;;  %v980_v54 = vsub.f32 %v941_v11, %v4631_v1  ;;  %v979_v17 = vsub.f32 %v940_v46, %v4631_v1  ;;  %v1406_v20 = vmul.f32 %v4608_v56, %v5912_v28 }
 0x157   : > { %v1449_v28 = vsub.f32 %v1410_v25, %v4631_v1  ;;  %v500_v25 = vrot.slane %v4995_v48, %v4303_v24 }
 0x158   : > { %v1496_v47 = vpop.permute.xlu1 %1495  ;;  %v1494_v55 = vpop.permute.xlu0 %1493  ;;  %v1445_v9 = vsub.f32 %v1406_v20, %v4631_v1  ;;  %v1874_v20 = vmul.f32 %v4608_v56, %v4773_v40 }
 0x159   : > { %1591 = vst.msk [vmem:[#allocation2 + $0x11] sm:$0xff] %vm1589_vm2, %v1496_v47  ;;  %1590 = vst.msk [vmem:[#allocation2 + $0x1] sm:$0xff] %vm1589_vm2, %v1494_v55 }
 0x15a   : > { %488 = vbcast.lane.b32.xlu1 %v486_v14, 256  ;;  %481 = vbcast.lane.b32.xlu0 %v479_v29, 256  ;;  %v1446_v29 = vsub.f32 %v1407_v8, %v4631_v1  ;;  %v1913_v40 = vsub.f32 %v1874_v20, %v4631_v1 }
 0x15c   : > { %v1500_v33 = vpop.permute.xlu1 %1499  ;;  %v1498_v21 = vpop.permute.xlu0 %1497 }
 0x15d   : > { %1593 = vst.msk [vmem:[#allocation2 + $0x31] sm:$0xff] %vm1589_vm2, %v1500_v33  ;;  %1592 = vst.msk [vmem:[#allocation2 + $0x21] sm:$0xff] %vm1589_vm2, %v1498_v21 }
 0x15e   : > { %1059 = vrot.lane.b32.xlu1 %v978_v59, %s4223_s20  ;;  %1057 = vrot.lane.b32.xlu0 %v977_v42, %s4223_s20  ;;  %v1448_v59 = vsub.f32 %v1409_v36, %v4631_v1  ;;  %v1447_v42 = vsub.f32 %v1408_v13, %v4631_v1 }
 0x160   : > { %v1961_v18 = vpop.permute.xlu1 %1960  ;;  %v1502_v14 = vpop.permute.xlu0 %1501 }
 0x161   : > { %2057 = vst.msk [vmem:[#allocation2] sm:$0xff] %vm2056_vm3, %v1961_v18 }
 0x162   : > { %1594 = vst.msk [vmem:[#allocation2 + $0x41] sm:$0xff] %vm1589_vm2, %v1502_v14  ;;  %1063 = vrot.lane.b32.xlu1 %v980_v54, %s4223_s20  ;;  %1061 = vrot.lane.b32.xlu0 %v979_v17, %s4223_s20 }
 0x164   : > { %v1965_v47 = vpop.permute.xlu1 %1964  ;;  %v1963_v55 = vpop.permute.xlu0 %1962 }
 0x165   : > { %2059 = vst.msk [vmem:[#allocation2 + $0x20] sm:$0xff] %vm2056_vm3, %v1965_v47  ;;  %2058 = vst.msk [vmem:[#allocation2 + $0x10] sm:$0xff] %vm2056_vm3, %v1963_v55 }
 0x166   : > { %1527 = vrot.lane.b32.xlu1 %v1446_v29, %s4224_s8  ;;  %1525 = vrot.lane.b32.xlu0 %v1445_v9, %s4224_s8 }
 0x168   : > { %v391_v11 = vpop.permute.xlu1 %390  ;;  %v384_v46 = vpop.permute.xlu0 %383  ;;  %v2153_v8 = vld [vmem:[#allocation2 + $0x1] sm:$0xff] }
 0x169   : > { %v586_v33 = vmul.f32 %v4608_v56, %v391_v11  ;;  %v585_v21 = vmul.f32 %v4608_v56, %v384_v46  ;;  %v493_v11 = vrot.slane %v4995_v48, %v4288_v10 }
 0x16a   : > { %1531 = vrot.lane.b32.xlu1 %v1448_v59, %s4224_s8  ;;  %1529 = vrot.lane.b32.xlu0 %v1447_v42, %s4224_s8 }
 0x16b   : > { %v625_v54 = vsub.f32 %v586_v33, %v4631_v1  ;;  %v624_v17 = vsub.f32 %v585_v21, %v4631_v1 }
 0x16c   : > { %v1969_v18 = vpop.permute.xlu1 %1968  ;;  %v1967_v14 = vpop.permute.xlu0 %1966  ;;  %v2154_v29 = vld [vmem:[#allocation2 + $0x11] sm:$0xff]  ;;  %v2637_v36 = vld [vmem:[#allocation2 + $0x20] sm:$0xff] }
 0x16d   : > { %v2636_v9 = vld [vmem:[#allocation2 + $0x10] sm:$0xff]  ;;  %659 = vst.msk [vmem:[#allocation2 + $0x61] sm:$0xff] %vm653_vm0, %v625_v54  ;;  %658 = vst.msk [vmem:[#allocation2 + $0x51] sm:$0xff] %vm653_vm0, %v624_v17  ;;  %v2185_v13 = vpack.c.bf16 %v2154_v29, %v2153_v8  ;;  %v2155_v21 = vld [vmem:[#allocation2 + $0x21] sm:$0xff]  ;;  %v1877_v54 = vmul.f32 %v4608_v56, %v4781_v52  ;;  %v1876_v17 = vmul.f32 %v4608_v56, %v4783_v43 }
 0x16e   : > { %2061 = vst.msk [vmem:[#allocation2 + $0x40] sm:$0xff] %vm2056_vm3, %v1969_v18  ;;  %2060 = vst.msk [vmem:[#allocation2 + $0x30] sm:$0xff] %vm2056_vm3, %v1967_v14  ;;  %v2668_v47 = vpack.c.bf16 %v2637_v36, %v2636_v9  ;;  %1992 = vrot.lane.b32.xlu1 %v1912_v44, %s4225_s17  ;;  %1533 = vrot.lane.b32.xlu0 %v1449_v28, %s4224_s8  ;;  %v514_v36 = vrot.slane %v4995_v48, %v4311_v30 }
 0x16f   : > { %3894 = vmatprep.mubr.bf16.mxu1 %v2185_v13  ;;  %v1916_v52 = vsub.f32 %v1877_v54, %v4631_v1  ;;  %v1915_v43 = vsub.f32 %v1876_v17, %v4631_v1  ;;  %v507_v13 = vrot.slane %v4995_v48, %v4307_v27  ;;  %v1411_v48 = vmul.f32 %v4608_v56, %v4805_v35 }
 0x170   : > { %3990 = vmatprep.mubr.bf16.mxu0 %v2668_v47  ;;  %v405_v55 = vpop.permute.xlu1 %404  ;;  %v398_v59 = vpop.permute.xlu0 %397  ;;  %v943_v47 = vmul.f32 %v4608_v56, %v4793_v58  ;;  %v944_v58 = vmul.f32 %v4608_v56, %v4807_v62 }
 0x171   : > { %v588_v42 = vmul.f32 %v4608_v56, %v405_v55  ;;  %v587_v0 = vmul.f32 %v4608_v56, %v398_v59 }
 0x172   : > { %1996 = vrot.lane.b32.xlu1 %v1914_v39, %s4225_s17  ;;  %1994 = vrot.lane.b32.xlu0 %v1913_v40, %s4225_s17  ;;  %v942_v39 = vmul.f32 %v4608_v56, %v4795_v41  ;;  %v982_v59 = vsub.f32 %v943_v47, %v4631_v1 }
 0x173   : > { %v627_v46 = vsub.f32 %v588_v42, %v4631_v1  ;;  %v626_v33 = vsub.f32 %v587_v0, %v4631_v1 }
 0x174   : > { %v1036_v8 = vpop.permute.xlu1 %1035  ;;  %v1034_v44 = vpop.permute.xlu0 %1033  ;;  %v981_v42 = vsub.f32 %v942_v39, %v4631_v1 }
 0x175   : > { %v2156_v28 = vld [vmem:[#allocation2 + $0x31] sm:$0xff]  ;;  %v2639_v20 = vld [vmem:[#allocation2 + $0x40] sm:$0xff]  ;;  %661 = vst.msk [vmem:[#allocation2 + $0x81] sm:$0xff] %vm653_vm0, %v627_v46  ;;  %660 = vst.msk [vmem:[#allocation2 + $0x71] sm:$0xff] %vm653_vm0, %v626_v33 }
 0x176   : > { %v2638_v38 = vld [vmem:[#allocation2 + $0x30] sm:$0xff]  ;;  %1127 = vst.msk [vmem:[#allocation2 + $0x60] sm:$0xff] %vm1121_vm1, %v1036_v8  ;;  %1126 = vst.msk [vmem:[#allocation2 + $0x50] sm:$0xff] %vm1121_vm1, %v1034_v44  ;;  %v2186_v18 = vpack.c.bf16 %v2156_v28, %v2155_v21  ;;  %502 = vbcast.lane.b32.xlu1 %v500_v25, 256  ;;  %495 = vbcast.lane.b32.xlu0 %v493_v11, 256  ;;  %v1450_v25 = vsub.f32 %v1411_v48, %v4631_v1  ;;  %v5913_v46 = vld [vmem:[#allocation4_spill] sm:$0xff] }
 0x177   : > { %v2669_v14 = vpack.c.bf16 %v2639_v20, %v2638_v38  ;;  %v983_v11 = vsub.f32 %v944_v58, %v4631_v1  ;;  %v1413_v35 = vmul.f32 %v4608_v56, %v5913_v46  ;;  %v5914_v33 = vld [vmem:[#allocation5_spill] sm:$0xff]  ;;  %v2157_v38 = vld [vmem:[#allocation2 + $0x41] sm:$0xff] }
 0x178   : > { %3895 = vmatmul.mubr.bf16.vlgmr.msra.gmra.mrb[0].mxu1 %v2186_v18  ;;  %v1504_v29 = vpop.permute.xlu1 %1503  ;;  %v1038_v9 = vpop.permute.xlu0 %1037  ;;  %v1412_v62 = vmul.f32 %v4608_v56, %v5914_v33 }
 0x179   : > { %3991 = vmatmul.mubr.bf16.vlgmr.msra.gmra.mrb[0].mxu0 %v2669_v14  ;;  %1595 = vst.msk [vmem:[#allocation2 + $0x51] sm:$0xff] %vm1589_vm2, %v1504_v29  ;;  %v1452_v20 = vsub.f32 %v1413_v35, %v4631_v1  ;;  %v1879_v14 = vmul.f32 %v4608_v56, %v4830_v26 }
 0x17a   : > { %1128 = vst.msk [vmem:[#allocation2 + $0x70] sm:$0xff] %vm1121_vm1, %v1038_v9  ;;  %2000 = vrot.lane.b32.xlu1 %v1916_v52, %s4225_s17  ;;  %1998 = vrot.lane.b32.xlu0 %v1915_v43, %s4225_s17  ;;  %v1451_v18 = vsub.f32 %v1412_v62, %v4631_v1  ;;  %v5915_v52 = vld [vmem:[#allocation6_spill] sm:$0xff]  ;;  %v5916_v62 = vld [vmem:[#allocation7_spill] sm:$0xff] }
 0x17b   : > { %v1878_v43 = vmul.f32 %v4608_v56, %v5915_v52 }
 0x17c   : > { %v1508_v40 = vpop.permute.xlu1 %1507  ;;  %v1506_v55 = vpop.permute.xlu0 %1505 }
 0x17d   : > { %1597 = vst.msk [vmem:[#allocation2 + $0x71] sm:$0xff] %vm1589_vm2, %v1508_v40  ;;  %1596 = vst.msk [vmem:[#allocation2 + $0x61] sm:$0xff] %vm1589_vm2, %v1506_v55  ;;  %v1917_v48 = vsub.f32 %v1878_v43, %v4631_v1  ;;  %v2093_v55 = vld [vmem:[#allocation2 + $0x40] sm:$0xff] }
 0x17e   : > { %516 = vbcast.lane.b32.xlu1 %v514_v36, 256  ;;  %509 = vbcast.lane.b32.xlu0 %v507_v13, 256 }
 0x180   : > { %v1973_v0 = vpop.permute.xlu1 %1972  ;;  %v1971_v41 = vpop.permute.xlu0 %1970 }
 0x181   : > { %2063 = vst.msk [vmem:[#allocation2 + $0x60] sm:$0xff] %vm2056_vm3, %v1973_v0  ;;  %2062 = vst.msk [vmem:[#allocation2 + $0x50] sm:$0xff] %vm2056_vm3, %v1971_v41 }
 0x182   : > { %1067 = vrot.lane.b32.xlu1 %v982_v59, %s4223_s20  ;;  %1065 = vrot.lane.b32.xlu0 %v981_v42, %s4223_s20  ;;  %v5166_v59 = vld [vmem:[%s4282_s27 + $0x78] sm:$0xff]  ;;  %v1918_v42 = vsub.f32 %v1879_v14, %v4631_v1 }
 0x183   : > { %v521_v46 = vrot.slane %v5166_v59, %v4273_v3 }
 0x184   : > { %v419_v21 = vpop.permute.xlu1 %418  ;;  %v412_v54 = vpop.permute.xlu0 %411 }
 0x185   : > { %v590_v17 = vmul.f32 %v4608_v56, %v419_v21  ;;  %v589_v8 = vmul.f32 %v4608_v56, %v412_v54  ;;  %v1880_v21 = vmul.f32 %v4608_v56, %v5916_v62  ;;  %v5917_v54 = vld [vmem:[#allocation8_spill] sm:$0xff] }
 0x186   : > { %1535 = vrot.lane.b32.xlu1 %v1450_v25, %s4224_s8  ;;  %1069 = vrot.lane.b32.xlu0 %v983_v11, %s4223_s20  ;;  %v528_v11 = vrot.slane %v5166_v59, %v4277_v5 }
 0x187   : > { %v629_v44 = vsub.f32 %v590_v17, %v4631_v1  ;;  %v628_v28 = vsub.f32 %v589_v8, %v4631_v1  ;;  %v945_v17 = vmul.f32 %v4608_v56, %v5917_v54 }
 0x188   : > { %v1975_v29 = vpop.permute.xlu1 %1974  ;;  %v1040_v9 = vpop.permute.xlu0 %1039  ;;  %v5149_v36 = vld [vmem:[#allocation2 + $0x51] sm:$0xff]  ;;  %v5151_v47 = vld [vmem:[#allocation2 + $0x60] sm:$0xff] }
 0x189   : > { %v2640_v13 = vld [vmem:[#allocation2 + $0x50] sm:$0xff]  ;;  %663 = vst.msk [vmem:[#allocation2 + $0xb1] sm:$0xff] %vm653_vm0, %v629_v44  ;;  %662 = vst.msk [vmem:[#allocation2 + $0xa1] sm:$0xff] %vm653_vm0, %v628_v28  ;;  %v2187_v26 = vpack.c.bf16 %v5149_v36, %v2157_v38  ;;  %v5159_v40 = vld [vmem:[#allocation2 + $0x61] sm:$0xff]  ;;  %v984_v14 = vsub.f32 %v945_v17, %v4631_v1 }
 0x18a   : > { %2064 = vst.msk [vmem:[#allocation2 + $0x70] sm:$0xff] %vm2056_vm3, %v1975_v29  ;;  %v2670_v39 = vpack.c.bf16 %v5151_v47, %v2640_v13  ;;  %1539 = vrot.lane.b32.xlu1 %v1452_v20, %s4224_s8  ;;  %1537 = vrot.lane.b32.xlu0 %v1451_v18, %s4224_s8  ;;  %v1919_v18 = vsub.f32 %v1880_v21, %v4631_v1  ;;  %v4194_v29 = vld [vmem:[%s5895_s1] sm:$0xff]  }
 0x18b   : > { %1129 = vst.msk [vmem:[#allocation2 + $0x80] sm:$0xff] %vm1121_vm1, %v1040_v9  ;;  %3898 = vmatprep.mubr.bf16.mxu1 %v2187_v26  ;;  %v4195_v9 = vld [vmem:[%s5895_s1 + $0xc0] sm:$0xff]   ;;  %v535_v13 = vrot.slane %v5166_v59, %v4271_v2  ;;  %3926 = vmatprep.subr.bf16.mxu1 %v4194_v29 }
 0x18c   : > { %3994 = vmatprep.mubr.bf16.mxu0 %v2670_v39  ;;  %v433_v58 = vpop.permute.xlu1 %432  ;;  %v426_v0 = vpop.permute.xlu0 %425  ;;  %4022 = vmatprep.subr.bf16.mxu0 %v4195_v9  ;;  %v5216_v26 = vld [vmem:[%s5897_s3] ss:$0 sm:$0xff] }
 0x18d   : > { %v592_v41 = vmul.f32 %v4608_v56, %v433_v58  ;;  %v591_v25 = vmul.f32 %v4608_v56, %v426_v0  ;;  %v947_v39 = vmul.f32 %v5216_v26, %v4850_v31  ;;  %3927 = vmatpush3.bf16.msra.mxu1 %v4194_v29  ;;  %4023 = vmatpush3.bf16.msra.mxu0 %v4195_v9 }
 0x18e   : > { %2004 = vrot.lane.b32.xlu1 %v1918_v42, %s4225_s17  ;;  %2002 = vrot.lane.b32.xlu0 %v1917_v48, %s4225_s17  ;;  %v946_v42 = vmul.f32 %v5216_v26, %v4852_v32  ;;  %v949_v2 = vmul.f32 %v5216_v26, %v4860_v15  ;;  %v948_v0 = vmul.f32 %v5216_v26, %v4862_v61  ;;  %v4196_v15 = vld [vmem:[%s5895_s1 + $0x8] sm:$0xff]  }
 0x18f   : > { %v631_v35 = vsub.f32 %v592_v41, %v4631_v1  ;;  %v630_v33 = vsub.f32 %v591_v25, %v4631_v1  ;;  %v542_v1 = vrot.slane %v5166_v59, %v4275_v4  ;;  %v5229_v4 = vld [vmem:[%s5898_s4] ss:$0 sm:$0xff]  ;;  %3928 = vmatprep.subr.bf16.mxu1 %v4196_v15  ;;  %v1417_v54 = vmul.f32 %v5216_v26, %v4884_v53  ;;  %v4199_v53 = vld [vmem:[%s5895_s1 + $0xd0] sm:$0xff]  }
 0x190   : > { %v1044_v8 = vpop.permute.xlu1 %1043  ;;  %v1042_v44 = vpop.permute.xlu0 %1041  ;;  %v986_v31 = vsub.f32 %v947_v39, %v5229_v4  ;;  %v985_v32 = vsub.f32 %v946_v42, %v5229_v4  ;;  %v988_v61 = vsub.f32 %v949_v2, %v5229_v4  ;;  %v1883_v39 = vmul.f32 %v5216_v26, %v4908_v6  ;;  %v5918_v42 = vld [vmem:[#allocation9_spill] sm:$0xff] }
 0x191   : > { %v5184_v28 = vld [vmem:[#allocation2 + $0x71] sm:$0xff]  ;;  %665 = vst.msk [vmem:[#allocation2 + $0xd1] sm:$0xff] %vm653_vm0, %v631_v35  ;;  %664 = vst.msk [vmem:[#allocation2 + $0xc1] sm:$0xff] %vm653_vm0, %v630_v33  ;;  %v1415_v35 = vmul.f32 %v5216_v26, %v4872_v7  ;;  %v1414_v33 = vmul.f32 %v5216_v26, %v4874_v22  ;;  %3929 = vmatpush3.bf16.msra.mxu1 %v4196_v15  ;;  %v1416_v22 = vmul.f32 %v5216_v26, %v4886_v37 }
 0x192   : > { %v5186_v38 = vld [vmem:[#allocation2 + $0x70] sm:$0xff]  ;;  %v2643_v5 = vld [vmem:[#allocation2 + $0x80] sm:$0xff]  ;;  %1131 = vst.msk [vmem:[#allocation2 + $0xb0] sm:$0xff] %vm1121_vm1, %v1044_v8  ;;  %1130 = vst.msk [vmem:[#allocation2 + $0xa0] sm:$0xff] %vm1121_vm1, %v1042_v44  ;;  %v2188_v3 = vpack.c.bf16 %v5184_v28, %v5159_v40  ;;  %530 = vbcast.lane.b32.xlu1 %v528_v11, 256  ;;  %523 = vbcast.lane.b32.xlu0 %v521_v46, 256  ;;  %v987_v46 = vsub.f32 %v948_v0, %v5229_v4 }
 0x193   : > { %v2671_v56 = vpack.c.bf16 %v2643_v5, %v5186_v38  ;;  %v4197_v11 = vld [vmem:[%s5895_s1 + $0xc8] sm:$0xff]   ;;  %v1454_v7 = vsub.f32 %v1415_v35, %v5229_v4  ;;  %v1453_v17 = vsub.f32 %v1414_v33, %v5229_v4  ;;  %v4198_v5 = vld [vmem:[%s5895_s1 + $0x10] sm:$0xff]   ;;  %v1456_v37 = vsub.f32 %v1417_v54, %v5229_v4  ;;  %v4200_v15 = vld [vmem:[%s5895_s1 + $0x18] sm:$0xff]  }
 0x194   : > { %3899 = vmatmul.mubr.bf16.gmra.mrb[4].mxu1 %v2188_v3  ;;  %v1048_v52 = vpop.permute.xlu1 %1047  ;;  %v1046_v43 = vpop.permute.xlu0 %1045  ;;  %4024 = vmatprep.subr.bf16.mxu0 %v4197_v11  ;;  %v1455_v3 = vsub.f32 %v1416_v22, %v5229_v4 }
 0x195   : > { %3995 = vmatmul.mubr.bf16.gmra.mrb[4].mxu0 %v2671_v56  ;;  %1133 = vst.msk [vmem:[#allocation2 + $0xd0] sm:$0xff] %vm1121_vm1, %v1048_v52  ;;  %1132 = vst.msk [vmem:[#allocation2 + $0xc0] sm:$0xff] %vm1121_vm1, %v1046_v43  ;;  %3930 = vmatprep.subr.bf16.mxu1 %v4198_v5  ;;  %v1881_v56 = vmul.f32 %v5216_v26, %v4896_v12 }
 0x196   : > { %2006 = vrot.lane.b32.xlu1 %v1919_v18, %s4225_s17  ;;  %1071 = vrot.lane.b32.xlu0 %v984_v14, %s4223_s20  ;;  %v1418_v18 = vmul.f32 %v5216_v26, %v4898_v45 }
 0x197   : > { %4025 = vmatpush3.bf16.msra.mxu0 %v4197_v11  ;;  %3931 = vmatpush3.bf16.msra.mxu1 %v4198_v5  ;;  %v4201_v11 = vld [vmem:[%s5895_s1 + $0xd8] sm:$0xff]  }
 0x198   : > { %v1512_v48 = vpop.permute.xlu1 %1511  ;;  %v1510_v58 = vpop.permute.xlu0 %1509  ;;  %4026 = vmatprep.subr.bf16.mxu0 %v4199_v53  ;;  %v1457_v45 = vsub.f32 %v1418_v18, %v5229_v4  ;;  %3932 = vmatprep.subr.bf16.mxu1 %v4200_v15 }
 0x199   : > { %1599 = vst.msk [vmem:[#allocation2 + $0xa1] sm:$0xff] %vm1589_vm2, %v1512_v48  ;;  %1598 = vst.msk [vmem:[#allocation2 + $0x91] sm:$0xff] %vm1589_vm2, %v1510_v58  ;;  %v1882_v48 = vmul.f32 %v5216_v26, %v5918_v42 }
 0x19a   : > { %544 = vbcast.lane.b32.xlu1 %v542_v1, 256  ;;  %537 = vbcast.lane.b32.xlu0 %v535_v13, 256  ;;  %v1920_v13 = vsub.f32 %v1881_v56, %v5229_v4 }
 0x19b   : > { %4027 = vmatpush3.bf16.msra.mxu0 %v4199_v53  ;;  %v1921_v35 = vsub.f32 %v1882_v48, %v5229_v4  ;;  %3933 = vmatpush3.bf16.msra.mxu1 %v4200_v15  ;;  %v5920_v53 = vld [vmem:[#allocation11_spill] sm:$0xff]  ;;  %v570_v48 = vrot.slane %v5166_v59, %v4311_v30 }
 0x19c   : > { %v1516_v41 = vpop.permute.xlu1 %1515  ;;  %v1514_v25 = vpop.permute.xlu0 %1513  ;;  %4028 = vmatprep.subr.bf16.mxu0 %v4201_v11 }
 0x19d   : > { %1601 = vst.msk [vmem:[#allocation2 + $0xc1] sm:$0xff] %vm1589_vm2, %v1516_v41  ;;  %1600 = vst.msk [vmem:[#allocation2 + $0xb1] sm:$0xff] %vm1589_vm2, %v1514_v25 }
 0x19e   : > { %1075 = vrot.lane.b32.xlu1 %v986_v31, %s4223_s20  ;;  %1073 = vrot.lane.b32.xlu0 %v985_v32, %s4223_s20 }
 0x19f   : > { %4029 = vmatpush3.bf16.msra.mxu0 %v4201_v11  ;;  %v4204_v11 = vld [vmem:[%s5895_s1 + $0x28] sm:$0xff]  }
 0x1a0   : > { %v1977_v62 = vpop.permute.xlu1 %1976  ;;  %v1518_v21 = vpop.permute.xlu0 %1517 }
 0x1a1   : > { %2065 = vst.msk [vmem:[#allocation2 + $0x90] sm:$0xff] %vm2056_vm3, %v1977_v62 }
 0x1a2   : > { %1602 = vst.msk [vmem:[#allocation2 + $0xd1] sm:$0xff] %vm1589_vm2, %v1518_v21  ;;  %1079 = vrot.lane.b32.xlu1 %v988_v61, %s4223_s20  ;;  %1077 = vrot.lane.b32.xlu0 %v987_v46, %s4223_s20  ;;  %v1922_v46 = vsub.f32 %v1883_v39, %v5229_v4  ;;  %v4212_v61 = vld [vmem:[#allocation2 + $0x41] sm:$0xff] }
 0x1a4   : > { %v1981_v8 = vpop.permute.xlu1 %1980  ;;  %v1979_v44 = vpop.permute.xlu0 %1978 }
 0x1a5   : > { %2067 = vst.msk [vmem:[#allocation2 + $0xb0] sm:$0xff] %vm2056_vm3, %v1981_v8  ;;  %2066 = vst.msk [vmem:[#allocation2 + $0xa0] sm:$0xff] %vm2056_vm3, %v1979_v44  ;;  %v5919_v44 = vld [vmem:[#allocation10_spill] sm:$0xff] }
 0x1a6   : > { %1543 = vrot.lane.b32.xlu1 %v1454_v7, %s4224_s8  ;;  %1541 = vrot.lane.b32.xlu0 %v1453_v17, %s4224_s8  ;;  %v556_v7 = vrot.slane %v5166_v59, %v4303_v24  ;;  %v549_v17 = vrot.slane %v5166_v59, %v4288_v10  ;;  %v1885_v5 = vmul.f32 %v5216_v26, %v5919_v44 }
 0x1a8   : > { %v447_v14 = vpop.permute.xlu1 %446  ;;  %v440_v52 = vpop.permute.xlu0 %439  ;;  %v2161_v12 = vld [vmem:[#allocation2 + $0x91] sm:$0xff] }
 0x1a9   : > { %v594_v43 = vmul.f32 %v5216_v26, %v447_v14  ;;  %v593_v29 = vmul.f32 %v5216_v26, %v440_v52 }
 0x1aa   : > { %1547 = vrot.lane.b32.xlu1 %v1456_v37, %s4224_s8  ;;  %1545 = vrot.lane.b32.xlu0 %v1455_v3, %s4224_s8  ;;  %v1884_v37 = vmul.f32 %v5216_v26, %v5920_v53  ;;  %v1887_v53 = vmul.f32 %v5216_v26, %v4987_v23 }
 0x1ab   : > { %v633_v9 = vsub.f32 %v594_v43, %v5229_v4  ;;  %v632_v1 = vsub.f32 %v593_v29, %v5229_v4  ;;  %v4202_v29 = vld [vmem:[%s5895_s1 + $0x20] sm:$0xff]  }
 0x1ac   : > { %v1985_v58 = vpop.permute.xlu1 %1984  ;;  %v1983_v2 = vpop.permute.xlu0 %1982  ;;  %v5289_v31 = vld [vmem:[#allocation2 + $0xa1] sm:$0xff]  ;;  %v5293_v0 = vld [vmem:[#allocation2 + $0xb0] sm:$0xff]  ;;  %3934 = vmatprep.subr.bf16.mxu1 %v4202_v29 }
 0x1ad   : > { %v5291_v32 = vld [vmem:[#allocation2 + $0xa0] sm:$0xff]  ;;  %667 = vst.msk [vmem:[#allocation2 + $0xf1] sm:$0xff] %vm653_vm0, %v633_v9  ;;  %666 = vst.msk [vmem:[#allocation2 + $0xe1] sm:$0xff] %vm653_vm0, %v632_v1  ;;  %v2189_v6 = vpack.c.bf16 %v5289_v31, %v2161_v12  ;;  %v5302_v25 = vld [vmem:[#allocation2 + $0xb1] sm:$0xff]  ;;  %3935 = vmatpush3.bf16.msra.mxu1 %v4202_v29 }
 0x1ae   : > { %2069 = vst.msk [vmem:[#allocation2 + $0xd0] sm:$0xff] %vm2056_vm3, %v1985_v58  ;;  %2068 = vst.msk [vmem:[#allocation2 + $0xc0] sm:$0xff] %vm2056_vm3, %v1983_v2  ;;  %v2672_v41 = vpack.c.bf16 %v5293_v0, %v5291_v32  ;;  %2008 = vrot.lane.b32.xlu1 %v1920_v13, %s4225_s17  ;;  %1549 = vrot.lane.b32.xlu0 %v1457_v45, %s4224_s8  ;;  %v4203_v9 = vld [vmem:[%s5895_s1 + $0xe0] sm:$0xff]   ;;  %v1924_v13 = vsub.f32 %v1885_v5, %v5229_v4 }
 0x1af   : > { %3902 = vmatprep.mubr.bf16.mxu1 %v2189_v6  ;;  %v1923_v45 = vsub.f32 %v1884_v37, %v5229_v4  ;;  %4030 = vmatprep.subr.bf16.mxu0 %v4203_v9  ;;  %v563_v58 = vrot.slane %v5166_v59, %v4307_v27  ;;  %v951_v2 = vmul.f32 %v5216_v26, %v4930_v57  ;;  %v4205_v27 = vld [vmem:[%s5895_s1 + $0xe8] sm:$0xff]   ;;  %v2091_v12 = vld [vmem:[#allocation2 + $0x20] sm:$0xff] }
 0x1b0   : > { %3998 = vmatprep.mubr.bf16.mxu0 %v2672_v41  ;;  %v461_v33 = vpop.permute.xlu1 %460  ;;  %v454_v62 = vpop.permute.xlu0 %453  ;;  %4031 = vmatpush3.bf16.msra.mxu0 %v4203_v9  ;;  %v950_v6 = vmul.f32 %v5216_v26, %v4932_v49  ;;  %v1419_v49 = vmul.f32 %v5216_v26, %v4950_v19  ;;  %v952_v59 = vmul.f32 %v5216_v26, %v4952_v51 }
 0x1b1   : > { %v596_v21 = vmul.f32 %v5216_v26, %v461_v33  ;;  %v595_v54 = vmul.f32 %v5216_v26, %v454_v62  ;;  %v990_v30 = vsub.f32 %v951_v2, %v5229_v4  ;;  %3936 = vmatprep.subr.bf16.mxu1 %v4204_v11  ;;  %4032 = vmatprep.subr.bf16.mxu0 %v4205_v27 }
 0x1b2   : > { %2012 = vrot.lane.b32.xlu1 %v1922_v46, %s4225_s17  ;;  %2010 = vrot.lane.b32.xlu0 %v1921_v35, %s4225_s17  ;;  %v989_v57 = vsub.f32 %v950_v6, %v5229_v4  ;;  %v1420_v33 = vmul.f32 %v5216_v26, %v4962_v34  ;;  %v1458_v19 = vsub.f32 %v1419_v49, %v5229_v4  ;;  %v4207_v34 = vld [vmem:[%s5895_s1 + $0xf0] sm:$0xff]  }
 0x1b3   : > { %v635_v22 = vsub.f32 %v596_v21, %v5229_v4  ;;  %v634_v8 = vsub.f32 %v595_v54, %v5229_v4  ;;  %3937 = vmatpush3.bf16.msra.mxu1 %v4204_v11  ;;  %v991_v62 = vsub.f32 %v952_v59, %v5229_v4  ;;  %v1421_v51 = vmul.f32 %v5216_v26, %v4974_v63 }
 0x1b4   : > { %v1052_v3 = vpop.permute.xlu1 %1051  ;;  %v1050_v56 = vpop.permute.xlu0 %1049  ;;  %4033 = vmatpush3.bf16.msra.mxu0 %v4205_v27  ;;  %v1459_v63 = vsub.f32 %v1420_v33, %v5229_v4  ;;  %v1886_v37 = vmul.f32 %v5216_v26, %v4989_v16  ;;  %v1888_v2 = vmul.f32 %v5216_v26, %v4999_v50  ;;  %v953_v6 = vmul.f32 %v5216_v26, %v5001_v60 }
 0x1b5   : > { %v5330_v18 = vld [vmem:[#allocation2 + $0xc1] sm:$0xff]  ;;  %v5334_v24 = vld [vmem:[#allocation2 + $0xd0] sm:$0xff]  ;;  %669 = vst.msk [vmem:[#allocation2 + $0x111] sm:$0xff] %vm653_vm0, %v635_v22  ;;  %668 = vst.msk [vmem:[#allocation2 + $0x101] sm:$0xff] %vm653_vm0, %v634_v8  ;;  %4034 = vmatprep.subr.bf16.mxu0 %v4207_v34  ;;  %v1460_v5 = vsub.f32 %v1421_v51, %v5229_v4 }
 0x1b6   : > { %v5332_v14 = vld [vmem:[#allocation2 + $0xc0] sm:$0xff]  ;;  %1135 = vst.msk [vmem:[#allocation2 + $0xf0] sm:$0xff] %vm1121_vm1, %v1052_v3  ;;  %1134 = vst.msk [vmem:[#allocation2 + $0xe0] sm:$0xff] %vm1121_vm1, %v1050_v56  ;;  %v2190_v10 = vpack.c.bf16 %v5330_v18, %v5302_v25  ;;  %v5344_v43 = vld [vmem:[#allocation2 + $0xd1] sm:$0xff]  ;;  %558 = vbcast.lane.b32.xlu1 %v556_v7, 256  ;;  %551 = vbcast.lane.b32.xlu0 %v549_v17, 256  ;;  %v1927_v50 = vsub.f32 %v1888_v2, %v5229_v4 }
 0x1b7   : > { %v2673_v52 = vpack.c.bf16 %v5334_v24, %v5332_v14  ;;  %v4206_v22 = vld [vmem:[%s5895_s1 + $0x30] sm:$0xff]   ;;  %v992_v60 = vsub.f32 %v953_v6, %v5229_v4 }
 0x1b8   : > { %3903 = vmatmul.mubr.bf16.gmra.mrb[8].mxu1 %v2190_v10  ;;  %v1520_v39 = vpop.permute.xlu1 %1519  ;;  %v1054_v42 = vpop.permute.xlu0 %1053  ;;  %3938 = vmatprep.subr.bf16.mxu1 %v4206_v22 }
 0x1b9   : > { %3999 = vmatmul.mubr.bf16.gmra.mrb[8].mxu0 %v2673_v52  ;;  %1603 = vst.msk [vmem:[#allocation2 + $0xe1] sm:$0xff] %vm1589_vm2, %v1520_v39  ;;  %3939 = vmatpush3.bf16.msra.mxu1 %v4206_v22  ;;  %v4208_v39 = vld [vmem:[%s5895_s1 + $0x38] sm:$0xff]  }
 0x1ba   : > { %1136 = vst.msk [vmem:[#allocation2 + $0x100] sm:$0xff] %vm1121_vm1, %v1054_v42  ;;  %2016 = vrot.lane.b32.xlu1 %v1924_v13, %s4225_s17  ;;  %2014 = vrot.lane.b32.xlu0 %v1923_v45, %s4225_s17  ;;  %v4209_v42 = vld [vmem:[%s5895_s1 + $0xf8] sm:$0xff]   ;;  %v2092_v45 = vld [vmem:[#allocation2 + $0x30] sm:$0xff] }
 0x1bb   : > { %4035 = vmatpush3.bf16.msra.mxu0 %v4207_v34  ;;  %3940 = vmatprep.subr.bf16.mxu1 %v4208_v39  ;;  %v2944_v13 = vld [vmem:[#allocation2 + $0x31] sm:$0xff]  ;;  %v2122_v1 = vpack.c.bf16 %v2092_v45, %v2091_v12  ;;  %v5924_v12 = vpack.c.bf16 %v5186_v38, %v5151_v47 }
 0x1bc   : > { %v1524_v41 = vpop.permute.xlu1 %1523  ;;  %v1522_v15 = vpop.permute.xlu0 %1521  ;;  %4036 = vmatprep.subr.bf16.mxu0 %v4209_v42  ;;  %v2975_v20 = vpack.c.bf16 %v4212_v61, %v2944_v13 }
 0x1bd   : > { %1605 = vst.msk [vmem:[#allocation2 + $0x101] sm:$0xff] %vm1589_vm2, %v1524_v41  ;;  %1604 = vst.msk [vmem:[#allocation2 + $0xf1] sm:$0xff] %vm1589_vm2, %v1522_v15  ;;  %3941 = vmatpush3.bf16.msra.mxu1 %v4208_v39 }
 0x1be   : > { %572 = vbcast.lane.b32.xlu1 %v570_v48, 256  ;;  %565 = vbcast.lane.b32.xlu0 %v563_v58, 256  ;;  %v1926_v48 = vsub.f32 %v1887_v53, %v5229_v4  ;;  %v1925_v58 = vsub.f32 %v1886_v37, %v5229_v4 }
 0x1bf   : > { %4037 = vmatpush3.bf16.msra.mxu0 %v4209_v42 }
 0x1c0   : > { %v1989_v46 = vpop.permute.xlu1 %1988  ;;  %v1987_v35 = vpop.permute.xlu0 %1986 }
 0x1c1   : > { %2071 = vst.msk [vmem:[#allocation2 + $0xf0] sm:$0xff] %vm2056_vm3, %v1989_v46  ;;  %2070 = vst.msk [vmem:[#allocation2 + $0xe0] sm:$0xff] %vm2056_vm3, %v1987_v35 }
 0x1c2   : > { %1083 = vrot.lane.b32.xlu1 %v990_v30, %s4223_s20  ;;  %1081 = vrot.lane.b32.xlu0 %v989_v57, %s4223_s20 }
 0x1c4   : > { %v475_v21 = vpop.permute.xlu1 %474  ;;  %v468_v54 = vpop.permute.xlu0 %467 }
 0x1c5   : > { %v598_v7 = vmul.f32 %v5216_v26, %v475_v21  ;;  %v597_v17 = vmul.f32 %v5216_v26, %v468_v54 }
 0x1c6   : > { %1551 = vrot.lane.b32.xlu1 %v1458_v19, %s4224_s8  ;;  %1085 = vrot.lane.b32.xlu0 %v991_v62, %s4223_s20 }
 0x1c7   : > { %v637_v8 = vsub.f32 %v598_v7, %v5229_v4  ;;  %v636_v44 = vsub.f32 %v597_v17, %v5229_v4 }
 0x1c8   : > { %v1991_v3 = vpop.permute.xlu1 %1990  ;;  %v1056_v56 = vpop.permute.xlu0 %1055  ;;  %v5412_v10 = vld [vmem:[#allocation2 + $0xe1] sm:$0xff]  ;;  %v5416_v29 = vld [vmem:[#allocation2 + $0xf0] sm:$0xff] }
 0x1c9   : > { %v5414_v52 = vld [vmem:[#allocation2 + $0xe0] sm:$0xff]  ;;  %671 = vst.msk [vmem:[#allocation2 + $0x141] sm:$0xff] %vm653_vm0, %v637_v8  ;;  %670 = vst.msk [vmem:[#allocation2 + $0x131] sm:$0xff] %vm653_vm0, %v636_v44  ;;  %v2191_v23 = vpack.c.bf16 %v5412_v10, %v5344_v43  ;;  %v5426_v9 = vld [vmem:[#allocation2 + $0xf1] sm:$0xff] }
 0x1ca   : > { %2072 = vst.msk [vmem:[#allocation2 + $0x100] sm:$0xff] %vm2056_vm3, %v1991_v3  ;;  %v2674_v16 = vpack.c.bf16 %v5416_v29, %v5414_v52  ;;  %1555 = vrot.lane.b32.xlu1 %v1460_v5, %s4224_s8  ;;  %1553 = vrot.lane.b32.xlu0 %v1459_v63, %s4224_s8  ;;  %v5929_v47 = vpack.c.bf16 %v5426_v9, %v5412_v10 }
 0x1cb   : > { %1137 = vst.msk [vmem:[#allocation2 + $0x110] sm:$0xff] %vm1121_vm1, %v1056_v56  ;;  %3906 = vmatprep.mubr.bf16.mxu1 %v2191_v23 }
 0x1cc   : > { %4002 = vmatprep.mubr.bf16.mxu0 %v2674_v16  ;;  %v489_v41 = vpop.permute.xlu1 %488  ;;  %v482_v15 = vpop.permute.xlu0 %481 }
 0x1cd   : > { %v600_v11 = vmul.f32 %v5216_v26, %v489_v41  ;;  %v599_v27 = vmul.f32 %v5216_v26, %v482_v15 }
 0x1ce   : > { %2020 = vrot.lane.b32.xlu1 %v1926_v48, %s4225_s17  ;;  %2018 = vrot.lane.b32.xlu0 %v1925_v58, %s4225_s17 }
 0x1cf   : > { %v639_v30 = vsub.f32 %v600_v11, %v5229_v4  ;;  %v638_v57 = vsub.f32 %v599_v27, %v5229_v4  ;;  %v2089_v27 = vld [vmem:[#allocation2] sm:$0xff] }
 0x1d0   : > { %v1060_v49 = vpop.permute.xlu1 %1059  ;;  %v1058_v59 = vpop.permute.xlu0 %1057 }
 0x1d1   : > { %v5454_v46 = vld [vmem:[#allocation2 + $0x101] sm:$0xff]  ;;  %673 = vst.msk [vmem:[#allocation2 + $0x161] sm:$0xff] %vm653_vm0, %v639_v30  ;;  %672 = vst.msk [vmem:[#allocation2 + $0x151] sm:$0xff] %vm653_vm0, %v638_v57 }
 0x1d2   : > { %v5456_v35 = vld [vmem:[#allocation2 + $0x100] sm:$0xff]  ;;  %v2651_v33 = vld [vmem:[#allocation2 + $0x110] sm:$0xff]  ;;  %1139 = vst.msk [vmem:[#allocation2 + $0x140] sm:$0xff] %vm1121_vm1, %v1060_v49  ;;  %1138 = vst.msk [vmem:[#allocation2 + $0x130] sm:$0xff] %vm1121_vm1, %v1058_v59  ;;  %v2192_v19 = vpack.c.bf16 %v5454_v46, %v5426_v9  ;;  %2022 = vrot.lane.b32.xlu1 %v1927_v50, %s4225_s17  ;;  %1087 = vrot.lane.b32.xlu0 %v992_v60, %s4223_s20  ;;  %s3610_s20 = sshll.u32 %s3602_s22, 5 }
 0x1d3   : > { %v2675_v62 = vpack.c.bf16 %v2651_v33, %v5456_v35  ;;  %v2957_v38 = vld [vmem:[#allocation2 + $0x111] sm:$0xff]  ;;  %p261_p4 = scmp.lt.s32.totalorder %s3610_s20, 63 }
 0x1d4   : > { %3907 = vmatmul.mubr.bf16.gmra.mrb[12].mxu1 %v2192_v19  ;;  %v1064_v21 = vpop.permute.xlu1 %1063  ;;  %v1062_v54 = vpop.permute.xlu0 %1061 }
 0x1d5   : > { %4003 = vmatmul.mubr.bf16.gmra.mrb[12].mxu0 %v2675_v62  ;;  %1141 = vst.msk [vmem:[#allocation2 + $0x160] sm:$0xff] %vm1121_vm1, %v1064_v21  ;;  %1140 = vst.msk [vmem:[#allocation2 + $0x150] sm:$0xff] %vm1121_vm1, %v1062_v54  ;;  %s5944_s20 = smov (!%p261_p4, %s3610_s20), 63 }
 0x1d6   : > { %s3611_s23 = sshll.u32 %s5944_s20, 3  ;;  %s3613_s24 = sshll.u32 %s5944_s20, 2 }
 0x1d7   : > { %s5725_s25 = scalar_lea.vmem %s5899_s5, %s3611_s23  ;;  %s5732_s29 = scalar_lea.vmem %s5900_s6, %s3613_s24 }
 0x1d8   : > { %v1528_v7 = vpop.permute.xlu1 %1527  ;;  %v1526_v17 = vpop.permute.xlu0 %1525 }
 0x1d9   : > { %1607 = vst.msk [vmem:[#allocation2 + $0x131] sm:$0xff] %vm1589_vm2, %v1528_v7  ;;  %1606 = vst.msk [vmem:[#allocation2 + $0x121] sm:$0xff] %vm1589_vm2, %v1526_v17 }
 0x1dc   : > { %v1532_v22 = vpop.permute.xlu1 %1531  ;;  %v1530_v34 = vpop.permute.xlu0 %1529 }
 0x1dd   : > { %1609 = vst.msk [vmem:[#allocation2 + $0x151] sm:$0xff] %vm1589_vm2, %v1532_v22  ;;  %1608 = vst.msk [vmem:[#allocation2 + $0x141] sm:$0xff] %vm1589_vm2, %v1530_v34 }
 0x1e0   : > { %v1993_v63 = vpop.permute.xlu1 %1992  ;;  %v1534_v8 = vpop.permute.xlu0 %1533 }
 0x1e1   : > { %2073 = vst.msk [vmem:[#allocation2 + $0x120] sm:$0xff] %vm2056_vm3, %v1993_v63 }
 0x1e2   : > { %1610 = vst.msk [vmem:[#allocation2 + $0x161] sm:$0xff] %vm1589_vm2, %v1534_v8 }
 0x1e4   : > { %v1997_v44 = vpop.permute.xlu1 %1996  ;;  %v1995_v5 = vpop.permute.xlu0 %1994 }
 0x1e5   : > { %2075 = vst.msk [vmem:[#allocation2 + $0x140] sm:$0xff] %vm2056_vm3, %v1997_v44  ;;  %2074 = vst.msk [vmem:[#allocation2 + $0x130] sm:$0xff] %vm2056_vm3, %v1995_v5 }
 0x1e8   : > { %v503_v53 = vpop.permute.xlu1 %502  ;;  %v496_v37 = vpop.permute.xlu0 %495  ;;  %v2169_v39 = vld [vmem:[#allocation2 + $0x121] sm:$0xff] }
 0x1e9   : > { %v602_v3 = vmul.f32 %v5216_v26, %v503_v53  ;;  %v601_v56 = vmul.f32 %v5216_v26, %v496_v37 }
 0x1eb   : > { %v641_v23 = vsub.f32 %v602_v3, %v5229_v4  ;;  %v640_v16 = vsub.f32 %v601_v56, %v5229_v4 }
 0x1ec   : > { %v2001_v42 = vpop.permute.xlu1 %2000  ;;  %v1999_v48 = vpop.permute.xlu0 %1998  ;;  %v5483_v58 = vld [vmem:[#allocation2 + $0x131] sm:$0xff]  ;;  %v5487_v6 = vld [vmem:[#allocation2 + $0x140] sm:$0xff] }
 0x1ed   : > { %v5485_v2 = vld [vmem:[#allocation2 + $0x130] sm:$0xff]  ;;  %675 = vst.msk [vmem:[#allocation2 + $0x181] sm:$0xff] %vm653_vm0, %v641_v23  ;;  %674 = vst.msk [vmem:[#allocation2 + $0x171] sm:$0xff] %vm653_vm0, %v640_v16  ;;  %v2193_v41 = vpack.c.bf16 %v5483_v58, %v2169_v39  ;;  %v5496_v11 = vld [vmem:[#allocation2 + $0x141] sm:$0xff] }
 0x1ee   : > { %2077 = vst.msk [vmem:[#allocation2 + $0x160] sm:$0xff] %vm2056_vm3, %v2001_v42  ;;  %2076 = vst.msk [vmem:[#allocation2 + $0x150] sm:$0xff] %vm2056_vm3, %v1999_v48  ;;  %v2676_v15 = vpack.c.bf16 %v5487_v6, %v5485_v2 }
 0x1ef   : > { %3910 = vmatprep.mubr.bf16.mxu1 %v2193_v41 }
 0x1f0   : > { %4006 = vmatprep.mubr.bf16.mxu0 %v2676_v15  ;;  %v517_v30 = vpop.permute.xlu1 %516  ;;  %v510_v57 = vpop.permute.xlu0 %509 }
 0x1f1   : > { %v604_v50 = vmul.f32 %v5216_v26, %v517_v30  ;;  %v603_v60 = vmul.f32 %v5216_v26, %v510_v57 }
 0x1f3   : > { %v643_v49 = vsub.f32 %v604_v50, %v5229_v4  ;;  %v642_v59 = vsub.f32 %v603_v60, %v5229_v4 }
 0x1f4   : > { %v1068_v33 = vpop.permute.xlu1 %1067  ;;  %v1066_v19 = vpop.permute.xlu0 %1065 }
 0x1f5   : > { %v5504_v62 = vld [vmem:[#allocation2 + $0x151] sm:$0xff]  ;;  %v5508_v54 = vld [vmem:[#allocation2 + $0x160] sm:$0xff]  ;;  %677 = vst.msk [vmem:[#allocation2 + $0x1a1] sm:$0xff] %vm653_vm0, %v643_v49  ;;  %676 = vst.msk [vmem:[#allocation2 + $0x191] sm:$0xff] %vm653_vm0, %v642_v59 }
 0x1f6   : > { %v5506_v21 = vld [vmem:[#allocation2 + $0x150] sm:$0xff]  ;;  %1143 = vst.msk [vmem:[#allocation2 + $0x180] sm:$0xff] %vm1121_vm1, %v1068_v33  ;;  %1142 = vst.msk [vmem:[#allocation2 + $0x170] sm:$0xff] %vm1121_vm1, %v1066_v19  ;;  %v2194_v7 = vpack.c.bf16 %v5504_v62, %v5496_v11  ;;  %v5518_v22 = vld [vmem:[#allocation2 + $0x161] sm:$0xff] }
 0x1f7   : > { %v2677_v17 = vpack.c.bf16 %v5508_v54, %v5506_v21  ;;  %v5932_v61 = vpack.c.bf16 %v5506_v21, %v5487_v6 }
 0x1f8   : > { %3911 = vmatmul.mubr.bf16.gmra.mrb[16].mxu1 %v2194_v7  ;;  %v1536_v8 = vpop.permute.xlu1 %1535  ;;  %v1070_v44 = vpop.permute.xlu0 %1069 }
 0x1f9   : > { %4007 = vmatmul.mubr.bf16.gmra.mrb[16].mxu0 %v2677_v17  ;;  %1611 = vst.msk [vmem:[#allocation2 + $0x171] sm:$0xff] %vm1589_vm2, %v1536_v8 }
 0x1fa   : > { %1144 = vst.msk [vmem:[#allocation2 + $0x190] sm:$0xff] %vm1121_vm1, %v1070_v44 }
 0x1fc   : > { %v1540_v5 = vpop.permute.xlu1 %1539  ;;  %v1538_v53 = vpop.permute.xlu0 %1537 }
 0x1fd   : > { %1613 = vst.msk [vmem:[#allocation2 + $0x191] sm:$0xff] %vm1589_vm2, %v1540_v5  ;;  %1612 = vst.msk [vmem:[#allocation2 + $0x181] sm:$0xff] %vm1589_vm2, %v1538_v53 }
 0x200   : > { %v2005_v37 = vpop.permute.xlu1 %2004  ;;  %v2003_v3 = vpop.permute.xlu0 %2002 }
 0x201   : > { %2079 = vst.msk [vmem:[#allocation2 + $0x180] sm:$0xff] %vm2056_vm3, %v2005_v37  ;;  %2078 = vst.msk [vmem:[#allocation2 + $0x170] sm:$0xff] %vm2056_vm3, %v2003_v3 }
 0x204   : > { %v531_v56 = vpop.permute.xlu1 %530  ;;  %v524_v23 = vpop.permute.xlu0 %523 }
 0x205   : > { %v606_v16 = vmul.f32 %v5216_v26, %v531_v56  ;;  %v605_v39 = vmul.f32 %v5216_v26, %v524_v23 }
 0x207   : > { %v645_v42 = vsub.f32 %v606_v16, %v5229_v4  ;;  %v644_v48 = vsub.f32 %v605_v39, %v5229_v4 }
 0x208   : > { %v2007_v41 = vpop.permute.xlu1 %2006  ;;  %v1072_v15 = vpop.permute.xlu0 %1071  ;;  %v5534_v30 = vld [vmem:[#allocation2 + $0x171] sm:$0xff]  ;;  %v5538_v50 = vld [vmem:[#allocation2 + $0x180] sm:$0xff] }
 0x209   : > { %v5536_v57 = vld [vmem:[#allocation2 + $0x170] sm:$0xff]  ;;  %679 = vst.msk [vmem:[#allocation2 + $0x1d1] sm:$0xff] %vm653_vm0, %v645_v42  ;;  %678 = vst.msk [vmem:[#allocation2 + $0x1c1] sm:$0xff] %vm653_vm0, %v644_v48  ;;  %v2195_v60 = vpack.c.bf16 %v5534_v30, %v5518_v22  ;;  %v5548_v59 = vld [vmem:[#allocation2 + $0x181] sm:$0xff] }
 0x20a   : > { %2080 = vst.msk [vmem:[#allocation2 + $0x190] sm:$0xff] %vm2056_vm3, %v2007_v41  ;;  %v2678_v49 = vpack.c.bf16 %v5538_v50, %v5536_v57 }
 0x20b   : > { %1145 = vst.msk [vmem:[#allocation2 + $0x1a0] sm:$0xff] %vm1121_vm1, %v1072_v15  ;;  %3914 = vmatprep.mubr.bf16.mxu1 %v2195_v60 }
 0x20c   : > { %4010 = vmatprep.mubr.bf16.mxu0 %v2678_v49  ;;  %v545_v7 = vpop.permute.xlu1 %544  ;;  %v538_v17 = vpop.permute.xlu0 %537 }
 0x20d   : > { %v608_v8 = vmul.f32 %v5216_v26, %v545_v7  ;;  %v607_v44 = vmul.f32 %v5216_v26, %v538_v17 }
 0x20f   : > { %v647_v5 = vsub.f32 %v608_v8, %v5229_v4  ;;  %v646_v53 = vsub.f32 %v607_v44, %v5229_v4 }
 0x210   : > { %v1076_v37 = vpop.permute.xlu1 %1075  ;;  %v1074_v3 = vpop.permute.xlu0 %1073 }
 0x211   : > { %v5558_v56 = vld [vmem:[#allocation2 + $0x191] sm:$0xff]  ;;  %681 = vst.msk [vmem:[#allocation2 + $0x1f1] sm:$0xff] %vm653_vm0, %v647_v5  ;;  %680 = vst.msk [vmem:[#allocation2 + $0x1e1] sm:$0xff] %vm653_vm0, %v646_v53 }
 0x212   : > { %v5560_v23 = vld [vmem:[#allocation2 + $0x190] sm:$0xff]  ;;  %v2659_v16 = vld [vmem:[#allocation2 + $0x1a0] sm:$0xff]  ;;  %1147 = vst.msk [vmem:[#allocation2 + $0x1d0] sm:$0xff] %vm1121_vm1, %v1076_v37  ;;  %1146 = vst.msk [vmem:[#allocation2 + $0x1c0] sm:$0xff] %vm1121_vm1, %v1074_v3  ;;  %v2196_v39 = vpack.c.bf16 %v5558_v56, %v5548_v59 }
 0x213   : > { %v2679_v42 = vpack.c.bf16 %v2659_v16, %v5560_v23 }
 0x214   : > { %3915 = vmatmul.mubr.bf16.gmra.mrb[20].mxu1 %v2196_v39  ;;  %v1080_v41 = vpop.permute.xlu1 %1079  ;;  %v1078_v15 = vpop.permute.xlu0 %1077 }
 0x215   : > { %4011 = vmatmul.mubr.bf16.gmra.mrb[20].mxu0 %v2679_v42  ;;  %1149 = vst.msk [vmem:[#allocation2 + $0x1f0] sm:$0xff] %vm1121_vm1, %v1080_v41  ;;  %1148 = vst.msk [vmem:[#allocation2 + $0x1e0] sm:$0xff] %vm1121_vm1, %v1078_v15 }
 0x218   : > { %v1544_v60 = vpop.permute.xlu1 %1543  ;;  %v1542_v49 = vpop.permute.xlu0 %1541 }
 0x219   : > { %1615 = vst.msk [vmem:[#allocation2 + $0x1c1] sm:$0xff] %vm1589_vm2, %v1544_v60  ;;  %1614 = vst.msk [vmem:[#allocation2 + $0x1b1] sm:$0xff] %vm1589_vm2, %v1542_v49 }
 0x21c   : > { %v1548_v7 = vpop.permute.xlu1 %1547  ;;  %v1546_v17 = vpop.permute.xlu0 %1545 }
 0x21d   : > { %1617 = vst.msk [vmem:[#allocation2 + $0x1e1] sm:$0xff] %vm1589_vm2, %v1548_v7  ;;  %1616 = vst.msk [vmem:[#allocation2 + $0x1d1] sm:$0xff] %vm1589_vm2, %v1546_v17 }
 0x220   : > { %v2009_v8 = vpop.permute.xlu1 %2008  ;;  %v1550_v44 = vpop.permute.xlu0 %1549 }
 0x221   : > { %2081 = vst.msk [vmem:[#allocation2 + $0x1b0] sm:$0xff] %vm2056_vm3, %v2009_v8 }
 0x222   : > { %1618 = vst.msk [vmem:[#allocation2 + $0x1f1] sm:$0xff] %vm1589_vm2, %v1550_v44 }
 0x224   : > { %v2013_v5 = vpop.permute.xlu1 %2012  ;;  %v2011_v53 = vpop.permute.xlu0 %2010 }
 0x225   : > { %2083 = vst.msk [vmem:[#allocation2 + $0x1d0] sm:$0xff] %vm2056_vm3, %v2013_v5  ;;  %2082 = vst.msk [vmem:[#allocation2 + $0x1c0] sm:$0xff] %vm2056_vm3, %v2011_v53 }
 0x228   : > { %v559_v37 = vpop.permute.xlu1 %558  ;;  %v552_v3 = vpop.permute.xlu0 %551  ;;  %v2177_v15 = vld [vmem:[#allocation2 + $0x1b1] sm:$0xff] }
 0x229   : > { %v610_v16 = vmul.f32 %v5216_v26, %v559_v37  ;;  %v609_v39 = vmul.f32 %v5216_v26, %v552_v3  ;;  %v2113_v10 = vld [vmem:[#allocation2 + $0x1b0] sm:$0xff] }
 0x22b   : > { %v649_v42 = vsub.f32 %v610_v16, %v5229_v4  ;;  %v648_v41 = vsub.f32 %v609_v39, %v5229_v4 }
 0x22c   : > { %v2017_v60 = vpop.permute.xlu1 %2016  ;;  %v2015_v49 = vpop.permute.xlu0 %2014  ;;  %v5585_v7 = vld [vmem:[#allocation2 + $0x1c1] sm:$0xff]  ;;  %v5589_v8 = vld [vmem:[#allocation2 + $0x1d0] sm:$0xff] }
 0x22d   : > { %v5587_v17 = vld [vmem:[#allocation2 + $0x1c0] sm:$0xff]  ;;  %5921 = vst [vmem:[#allocation3_spill] sm:$0xff] %v5589_v8  ;;  %683 = vst.msk [vmem:[#allocation2 + $0x211] sm:$0xff] %vm653_vm0, %v649_v42  ;;  %v2197_v44 = vpack.c.bf16 %v5585_v7, %v2177_v15  ;;  %v5598_v53 = vld [vmem:[#allocation2 + $0x1d1] sm:$0xff] }
 0x22e   : > { %682 = vst.msk [vmem:[#allocation2 + $0x201] sm:$0xff] %vm653_vm0, %v648_v41  ;;  %v2680_v5 = vpack.c.bf16 %v5589_v8, %v5587_v17  ;;  %v5937_v9 = vpack.c.bf16 %v5598_v53, %v5585_v7 }
 0x22f   : > { %2085 = vst.msk [vmem:[#allocation2 + $0x1f0] sm:$0xff] %vm2056_vm3, %v2017_v60  ;;  %2084 = vst.msk [vmem:[#allocation2 + $0x1e0] sm:$0xff] %vm2056_vm3, %v2015_v49  ;;  %3918 = vmatprep.mubr.bf16.mxu1 %v2197_v44 }
 0x230   : > { %4014 = vmatprep.mubr.bf16.mxu0 %v2680_v5  ;;  %v573_v3 = vpop.permute.xlu1 %572  ;;  %v566_v16 = vpop.permute.xlu0 %565 }
 0x231   : > { %v612_v39 = vmul.f32 %v5216_v26, %v573_v3  ;;  %v611_v42 = vmul.f32 %v5216_v26, %v566_v16 }
 0x233   : > { %v651_v41 = vsub.f32 %v612_v39, %v5229_v4  ;;  %v650_v15 = vsub.f32 %v611_v42, %v5229_v4 }
 0x234   : > { %v1084_v60 = vpop.permute.xlu1 %1083  ;;  %v1082_v49 = vpop.permute.xlu0 %1081 }
 0x235   : > { %685 = vst.msk [vmem:[#allocation2 + $0x231] sm:$0xff] %vm653_vm0, %v651_v41  ;;  %684 = vst.msk [vmem:[#allocation2 + $0x221] sm:$0xff] %vm653_vm0, %v650_v15 }
 0x236   : > { %v5606_v48 = vld [vmem:[#allocation2 + $0x1e1] sm:$0xff]  ;;  %v5610_v33 = vld [vmem:[#allocation2 + $0x1f0] sm:$0xff]  ;;  %1151 = vst.msk [vmem:[#allocation2 + $0x210] sm:$0xff] %vm1121_vm1, %v1084_v60  ;;  %1150 = vst.msk [vmem:[#allocation2 + $0x200] sm:$0xff] %vm1121_vm1, %v1082_v49 }
 0x237   : > { %v5608_v19 = vld [vmem:[#allocation2 + $0x1e0] sm:$0xff]  ;;  %v2198_v26 = vpack.c.bf16 %v5606_v48, %v5598_v53  ;;  %v5630_v49 = vld [vmem:[#allocation2 + $0x1f1] sm:$0xff] }
 0x238   : > { %v2681_v4 = vpack.c.bf16 %v5610_v33, %v5608_v19  ;;  %v1552_v5 = vpop.permute.xlu1 %1551  ;;  %v1086_v3 = vpop.permute.xlu0 %1085  ;;  %v2987_v13 = vpack.c.bf16 %v5630_v49, %v5606_v48 }
 0x239   : > { %3919 = vmatmul.mubr.bf16.gmra.mrb[24].mxu1 %v2198_v26  ;;  %1619 = vst.msk [vmem:[#allocation2 + $0x201] sm:$0xff] %vm1589_vm2, %v1552_v5 }
 0x23a   : > { %4015 = vmatmul.mubr.bf16.gmra.mrb[24].mxu0 %v2681_v4  ;;  %1152 = vst.msk [vmem:[#allocation2 + $0x220] sm:$0xff] %vm1121_vm1, %v1086_v3 }
 0x23c   : > { %v1556_v16 = vpop.permute.xlu1 %1555  ;;  %v1554_v39 = vpop.permute.xlu0 %1553 }
 0x23d   : > { %1621 = vst.msk [vmem:[#allocation2 + $0x221] sm:$0xff] %vm1589_vm2, %v1556_v16  ;;  %1620 = vst.msk [vmem:[#allocation2 + $0x211] sm:$0xff] %vm1589_vm2, %v1554_v39  ;;  %v2090_v39 = vld [vmem:[#allocation2 + $0x10] sm:$0xff] }
 0x240   : > { %v2021_v42 = vpop.permute.xlu1 %2020  ;;  %v2019_v41 = vpop.permute.xlu0 %2018 }
 0x241   : > { %2087 = vst.msk [vmem:[#allocation2 + $0x210] sm:$0xff] %vm2056_vm3, %v2021_v42  ;;  %2086 = vst.msk [vmem:[#allocation2 + $0x200] sm:$0xff] %vm2056_vm3, %v2019_v41  ;;  %v2942_v41 = vld [vmem:[#allocation2 + $0x11] sm:$0xff] }
 0x244   : > { %v2023_v15 = vpop.permute.xlu1 %2022  ;;  %v1088_v60 = vpop.permute.xlu0 %1087 }
 0x245   : > { %2088 = vst.msk [vmem:[#allocation2 + $0x220] sm:$0xff] %vm2056_vm3, %v2023_v15  ;;  %v2943_v15 = vld [vmem:[#allocation2 + $0x21] sm:$0xff] }
 0x246   : > { %1153 = vst.msk [vmem:[#allocation2 + $0x230] sm:$0xff] %vm1121_vm1, %v1088_v60 }
 0x248   : > { %v5632_v26 = vld [vmem:[#allocation2 + $0x201] sm:$0xff]  ;;  %v5636_v5 = vld [vmem:[#allocation2 + $0x210] sm:$0xff] }
 0x249   : > { %v5634_v4 = vld [vmem:[#allocation2 + $0x200] sm:$0xff]  ;;  %v2199_v3 = vpack.c.bf16 %v5632_v26, %v5630_v49  ;;  %v5642_v42 = vld [vmem:[#allocation2 + $0x211] sm:$0xff] }
 0x24a   : > { %v2682_v16 = vpack.c.bf16 %v5636_v5, %v5634_v4  ;;  %v2135_v45 = vpack.c.bf16 %v5634_v4, %v5610_v33 }
 0x24b   : > { %3922 = vmatprep.mubr.bf16.mxu1 %v2199_v3  ;;  %v2121_v3 = vpack.c.bf16 %v2090_v39, %v2089_v27  ;;  %v5923_v27 = vpack.c.bf16 %v5159_v40, %v5149_v36  ;;  %v5926_v36 = vpack.c.bf16 %v5332_v14, %v5293_v0  ;;  %v5927_v40 = vpack.c.bf16 %v5344_v43, %v5330_v18  ;;  %v2965_v43 = vld [vmem:[#allocation2 + $0x1a1] sm:$0xff] }
 0x24c   : > { %4018 = vmatprep.mubr.bf16.mxu0 %v2682_v16  ;;  %v5644_v60 = vld [vmem:[#allocation2 + $0x221] sm:$0xff]  ;;  %v2974_v16 = vpack.c.bf16 %v2943_v15, %v2942_v41  ;;  %v5930_v0 = vpack.c.bf16 %v5456_v35, %v5416_v29  ;;  %v5933_v18 = vpack.c.bf16 %v5518_v22, %v5504_v62  ;;  %v5934_v14 = vpack.c.bf16 %v5536_v57, %v5508_v54  ;;  %v5719_v54 = vld [vmem:[%s5896_s2] ss:$0 sm:$0xff] }
 0x24d   : > { %5922 = vst [vmem:[#allocation4_spill] sm:$0xff] %v5644_v60  ;;  %v5646_v44 = vld [vmem:[#allocation2 + $0x220] sm:$0xff]  ;;  %v2667_v37 = vld [vmem:[#allocation2 + $0x230] sm:$0xff]  ;;  %v2200_v63 = vpack.c.bf16 %v5644_v60, %v5642_v42  ;;  %v5936_v29 = vpack.c.bf16 %v5560_v23, %v5538_v50 }
 0x24e   : > { %v2683_v34 = vpack.c.bf16 %v2667_v37, %v5646_v44  ;;  %v2136_v51 = vpack.c.bf16 %v5646_v44, %v5636_v5  ;;  %v4213_v60 = vld [vmem:[#allocation2 + $0x50] sm:$0xff]  ;;  %v5938_v35 = vld [vmem:[#allocation3_spill] sm:$0xff] }
 0x24f   : > { %3923 = vmatmul.mubr.bf16.gmra.mrb[28].mxu1 %v2200_v63  ;;  %v2123_v8 = vpack.c.bf16 %v4213_v60, %v2093_v55  ;;  %v2949_v63 = vld [vmem:[#allocation2 + $0x81] sm:$0xff]  ;;  %v2097_v37 = vld [vmem:[#allocation2 + $0x90] sm:$0xff]  ;;  %v5925_v55 = vpack.c.bf16 %v5302_v25, %v5289_v31  ;;  %v5931_v25 = vpack.c.bf16 %v5496_v11, %v5483_v58  ;;  %v5939_v58 = vpack.c.bf16 %v5608_v19, %v5938_v35 }
 0x250   : > { %4019 = vmatmul.mubr.bf16.gmra.mrb[28].mxu0 %v2683_v34  ;;  %3942 = vmatprep.mubr.bf16.mxu1 %v2121_v3  ;;  %v2977_v34 = vpack.c.bf16 %v2949_v63, %v5184_v28  ;;  %v2125_v44 = vpack.c.bf16 %v5291_v32, %v2097_v37  ;;  %v5928_v28 = vpack.c.bf16 %v5414_v52, %v5334_v24  ;;  %v2105_v31 = vld [vmem:[#allocation2 + $0x120] sm:$0xff] }
 0x251   : > { %4038 = vmatprep.mubr.bf16.mxu0 %v2974_v16  ;;  %v2129_v32 = vpack.c.bf16 %v5485_v2, %v2105_v31  ;;  %v5935_v24 = vpack.c.bf16 %v5548_v59, %v5534_v30  ;;  %v2133_v52 = vpack.c.bf16 %v5587_v17, %v2113_v10  ;;  %v2973_v2 = vld [vmem:[#allocation2 + $0x231] sm:$0xff] }
 0x254   : > { %v5940_v6 = vld [vmem:[#allocation4_spill] sm:$0xff] }
 0x255   : > { %v2989_v11 = vpack.c.bf16 %v2973_v2, %v5940_v6 }
 0x257   : > { %3943 = vmatmul.mubr.bf16.vlgmr.msra.gmra.mrb[0].mxu1 %v2122_v1  ;;  %v2985_v1 = vpack.c.bf16 %v2965_v43, %v5558_v56 }
 0x258   : > { %4039 = vmatmul.mubr.bf16.vlgmr.msra.gmra.mrb[0].mxu0 %v2975_v20  ;;  %3946 = vmatprep.mubr.bf16.mxu1 %v2123_v8  ;;  %v2981_v20 = vpack.c.bf16 %v2957_v38, %v5454_v46  ;;  %v2988_v46 = vpack.c.bf16 %v5642_v42, %v5632_v26 }
 0x259   : > { %4042 = vmatprep.mubr.bf16.mxu0 %v5923_v27 }
 0x25f   : > { %3947 = vmatmul.mubr.bf16.gmra.mrb[4].mxu1 %v5924_v12 }
 0x260   : > { %4043 = vmatmul.mubr.bf16.gmra.mrb[4].mxu0 %v2977_v34  ;;  %3950 = vmatprep.mubr.bf16.mxu1 %v2125_v44 }
 0x261   : > { %4046 = vmatprep.mubr.bf16.mxu0 %v5925_v55 }
 0x267   : > { %3951 = vmatmul.mubr.bf16.gmra.mrb[8].mxu1 %v5926_v36 }
 0x268   : > { %4047 = vmatmul.mubr.bf16.gmra.mrb[8].mxu0 %v5927_v40  ;;  %3954 = vmatprep.mubr.bf16.mxu1 %v5928_v28 }
 0x269   : > { %4050 = vmatprep.mubr.bf16.mxu0 %v5929_v47 }
 0x26f   : > { %3955 = vmatmul.mubr.bf16.gmra.mrb[12].mxu1 %v5930_v0 }
 0x270   : > { %4051 = vmatmul.mubr.bf16.gmra.mrb[12].mxu0 %v2981_v20  ;;  %3958 = vmatprep.mubr.bf16.mxu1 %v2129_v32 }
 0x271   : > { %4054 = vmatprep.mubr.bf16.mxu0 %v5931_v25 }
 0x277   : > { %3959 = vmatmul.mubr.bf16.gmra.mrb[16].mxu1 %v5932_v61 }
 0x278   : > { %4055 = vmatmul.mubr.bf16.gmra.mrb[16].mxu0 %v5933_v18  ;;  %3962 = vmatprep.mubr.bf16.mxu1 %v5934_v14 }
 0x279   : > { %4058 = vmatprep.mubr.bf16.mxu0 %v5935_v24 }
 0x27f   : > { %3963 = vmatmul.mubr.bf16.gmra.mrb[20].mxu1 %v5936_v29 }
 0x280   : > { %4059 = vmatmul.mubr.bf16.gmra.mrb[20].mxu0 %v2985_v1  ;;  %3966 = vmatprep.mubr.bf16.mxu1 %v2133_v52 }
 0x281   : > { %4062 = vmatprep.mubr.bf16.mxu0 %v5937_v9 }
 0x287   : > { %3967 = vmatmul.mubr.bf16.gmra.mrb[24].mxu1 %v5939_v58 }
 0x288   : > { %4063 = vmatmul.mubr.bf16.gmra.mrb[24].mxu0 %v2987_v13  ;;  %3970 = vmatprep.mubr.bf16.mxu1 %v2135_v45 }
 0x289   : > { %4066 = vmatprep.mubr.bf16.mxu0 %v2988_v46 }
 0x28f   : > { %3971 = vmatmul.mubr.bf16.gmra.mrb[28].mxu1 %v2136_v51 }
 0x290   : > { %4067 = vmatmul.mubr.bf16.gmra.mrb[28].mxu0 %v2989_v11 }
 0x32a   : > { %v3944_v62 = vpop.f32.mrb[0].mxu1 }
 0x32b   : > { %v4040_v21 = vpop.f32.mrb[0].mxu0  ;;  %v2509_v30 = vpop.f32.mrb[1].mxu1 }
 0x32c   : > { %v4070_v22 = vadd.f32 %v4040_v21, %v3944_v62  ;;  %v3089_v57 = vpop.f32.mrb[1].mxu0  ;;  %v3945_v59 = vpop.f32.mrb[2].mxu1 }
 0x32d   : > { %v4071_v50 = vadd.f32 %v3089_v57, %v2509_v30  ;;  %v4041_v33 = vpop.f32.mrb[2].mxu0  ;;  %v2512_v56 = vpop.f32.mrb[3].mxu1 }
 0x32e   : > { %v3257_v51 = vadd.f32 %v4070_v22, %v5719_v54  ;;  %v4072_v19 = vadd.f32 %v4041_v33, %v3945_v59  ;;  %v3092_v23 = vpop.f32.mrb[3].mxu0 }
 0x32f   : > { %v3255_v48 = vadd.f32 %v4071_v50, %v5719_v54  ;;  %v4073_v7 = vadd.f32 %v3092_v23, %v2512_v56 }
 0x330   : > { %v3289_v17 = vmax.f32 %v3257_v51, 0.0  ;;  %v3258_v8 = vadd.f32 %v4072_v19, %v5719_v54 }
 0x331   : > { %v3287_v53 = vmax.f32 %v3255_v48, 0.0  ;;  %v3256_v49 = vadd.f32 %v4073_v7, %v5719_v54 }
 0x332   : > { %3321 = vst.msk [vmem:[%s5725_s25 + $0x10] sm:$0xff] %vm653_vm0, %v3289_v17  ;;  %v3752_v26 = vpack.c.bf16 %v3289_v17, %v3289_v17  ;;  %v3290_v4 = vmax.f32 %v3258_v8, 0.0  ;;  %v3948_v42 = vpop.f32.mrb[4].mxu1 }
 0x333   : > { %3319 = vst.msk [vmem:[%s5725_s25] sm:$0xff] %vm653_vm0, %v3287_v53  ;;  %v3750_v5 = vpack.c.bf16 %v3287_v53, %v3287_v53  ;;  %v3288_v39 = vmax.f32 %v3256_v49, 0.0  ;;  %v4044_v41 = vpop.f32.mrb[4].mxu0  ;;  %v2525_v3 = vpop.f32.mrb[5].mxu1 }
 0x334   : > { %3482 = vst.msk [vmem:[%s5732_s29 + $0x8] sm:$0xf] %vm3479_vm4, %v3752_v26  ;;  %v3753_v15 = vpack.c.bf16 %v3290_v4, %v3290_v4  ;;  %v4074_v60 = vadd.f32 %v4044_v41, %v3948_v42  ;;  %v3105_v16 = vpop.f32.mrb[5].mxu0  ;;  %v3949_v34 = vpop.f32.mrb[6].mxu1 }
 0x335   : > { %3322 = vst.msk [vmem:[%s5725_s25 + $0x18] sm:$0xff] %vm653_vm0, %v3290_v4  ;;  %3320 = vst.msk [vmem:[%s5725_s25 + $0x8] sm:$0xff] %vm653_vm0, %v3288_v39  ;;  %v3751_v27 = vpack.c.bf16 %v3288_v39, %v3288_v39  ;;  %v4075_v63 = vadd.f32 %v3105_v16, %v2525_v3  ;;  %v4045_v37 = vpop.f32.mrb[6].mxu0  ;;  %v2528_v55 = vpop.f32.mrb[7].mxu1 }
 0x336   : > { %3480 = vst.msk [vmem:[%s5732_s29] sm:$0xf] %vm3479_vm4, %v3750_v5  ;;  %3483 = vst.msk [vmem:[%s5732_s29 + $0xc] sm:$0xf] %vm3479_vm4, %v3753_v15  ;;  %v3261_v44 = vadd.f32 %v4074_v60, %v5719_v54  ;;  %v4076_v12 = vadd.f32 %v4045_v37, %v3949_v34  ;;  %v3108_v36 = vpop.f32.mrb[7].mxu0 }
 0x337   : > { %3481 = vst.msk [vmem:[%s5732_s29 + $0x4] sm:$0xf] %vm3479_vm4, %v3751_v27  ;;  %v3259_v40 = vadd.f32 %v4075_v63, %v5719_v54  ;;  %v4077_v28 = vadd.f32 %v3108_v36, %v2528_v55 }
 0x338   : > { %v3293_v47 = vmax.f32 %v3261_v44, 0.0  ;;  %v3262_v38 = vadd.f32 %v4076_v12, %v5719_v54 }
 0x339   : > { %v3291_v20 = vmax.f32 %v3259_v40, 0.0  ;;  %v3260_v31 = vadd.f32 %v4077_v28, %v5719_v54 }
 0x33a   : > { %3325 = vst.msk [vmem:[%s5725_s25 + $0x30] sm:$0xff] %vm653_vm0, %v3293_v47  ;;  %v3756_v32 = vpack.c.bf16 %v3293_v47, %v3293_v47  ;;  %v3294_v0 = vmax.f32 %v3262_v38, 0.0  ;;  %v3952_v18 = vpop.f32.mrb[8].mxu1 }
 0x33b   : > { %3323 = vst.msk [vmem:[%s5725_s25 + $0x20] sm:$0xff] %vm653_vm0, %v3291_v20  ;;  %v3754_v25 = vpack.c.bf16 %v3291_v20, %v3291_v20  ;;  %v3292_v61 = vmax.f32 %v3260_v31, 0.0  ;;  %v4048_v14 = vpop.f32.mrb[8].mxu0  ;;  %v2541_v1 = vpop.f32.mrb[9].mxu1 }
 0x33c   : > { %3486 = vst.msk [vmem:[%s5732_s29 + $0x18] sm:$0xf] %vm3479_vm4, %v3756_v32  ;;  %v3757_v24 = vpack.c.bf16 %v3294_v0, %v3294_v0  ;;  %v4078_v43 = vadd.f32 %v4048_v14, %v3952_v18  ;;  %v3121_v10 = vpop.f32.mrb[9].mxu0  ;;  %v3953_v9 = vpop.f32.mrb[10].mxu1 }
 0x33d   : > { %3326 = vst.msk [vmem:[%s5725_s25 + $0x38] sm:$0xff] %vm653_vm0, %v3294_v0  ;;  %3324 = vst.msk [vmem:[%s5725_s25 + $0x28] sm:$0xff] %vm653_vm0, %v3292_v61  ;;  %v3755_v52 = vpack.c.bf16 %v3292_v61, %v3292_v61  ;;  %v4079_v29 = vadd.f32 %v3121_v10, %v2541_v1  ;;  %v4049_v13 = vpop.f32.mrb[10].mxu0  ;;  %v2544_v35 = vpop.f32.mrb[11].mxu1 }
 0x33e   : > { %3484 = vst.msk [vmem:[%s5732_s29 + $0x10] sm:$0xf] %vm3479_vm4, %v3754_v25  ;;  %3487 = vst.msk [vmem:[%s5732_s29 + $0x1c] sm:$0xf] %vm3479_vm4, %v3757_v24  ;;  %v3265_v45 = vadd.f32 %v4078_v43, %v5719_v54  ;;  %v4080_v46 = vadd.f32 %v4049_v13, %v3953_v9  ;;  %v3124_v58 = vpop.f32.mrb[11].mxu0 }
 0x33f   : > { %3485 = vst.msk [vmem:[%s5732_s29 + $0x14] sm:$0xf] %vm3479_vm4, %v3755_v52  ;;  %v3263_v2 = vadd.f32 %v4079_v29, %v5719_v54  ;;  %v4081_v6 = vadd.f32 %v3124_v58, %v2544_v35 }
 0x340   : > { %v3297_v11 = vmax.f32 %v3265_v45, 0.0  ;;  %v3266_v62 = vadd.f32 %v4080_v46, %v5719_v54 }
 0x341   : > { %v3295_v21 = vmax.f32 %v3263_v2, 0.0  ;;  %v3264_v22 = vadd.f32 %v4081_v6, %v5719_v54 }
 0x342   : > { %3329 = vst.msk [vmem:[%s5725_s25 + $0x50] sm:$0xff] %vm653_vm0, %v3297_v11  ;;  %v3760_v30 = vpack.c.bf16 %v3297_v11, %v3297_v11  ;;  %v3298_v57 = vmax.f32 %v3266_v62, 0.0  ;;  %v3956_v33 = vpop.f32.mrb[12].mxu1 }
 0x343   : > { %3327 = vst.msk [vmem:[%s5725_s25 + $0x40] sm:$0xff] %vm653_vm0, %v3295_v21  ;;  %v3758_v50 = vpack.c.bf16 %v3295_v21, %v3295_v21  ;;  %v3296_v59 = vmax.f32 %v3264_v22, 0.0  ;;  %v4052_v51 = vpop.f32.mrb[12].mxu0  ;;  %v2557_v23 = vpop.f32.mrb[13].mxu1 }
 0x344   : > { %3490 = vst.msk [vmem:[%s5732_s29 + $0x28] sm:$0xf] %vm3479_vm4, %v3760_v30  ;;  %v3761_v19 = vpack.c.bf16 %v3298_v57, %v3298_v57  ;;  %v4082_v56 = vadd.f32 %v4052_v51, %v3956_v33  ;;  %v3137_v48 = vpop.f32.mrb[13].mxu0  ;;  %v3957_v8 = vpop.f32.mrb[14].mxu1 }
 0x345   : > { %3330 = vst.msk [vmem:[%s5725_s25 + $0x58] sm:$0xff] %vm653_vm0, %v3298_v57  ;;  %3328 = vst.msk [vmem:[%s5725_s25 + $0x48] sm:$0xff] %vm653_vm0, %v3296_v59  ;;  %v3759_v7 = vpack.c.bf16 %v3296_v59, %v3296_v59  ;;  %v4083_v17 = vadd.f32 %v3137_v48, %v2557_v23  ;;  %v4053_v53 = vpop.f32.mrb[14].mxu0  ;;  %v2560_v4 = vpop.f32.mrb[15].mxu1 }
 0x346   : > { %3488 = vst.msk [vmem:[%s5732_s29 + $0x20] sm:$0xf] %vm3479_vm4, %v3758_v50  ;;  %3491 = vst.msk [vmem:[%s5732_s29 + $0x2c] sm:$0xf] %vm3479_vm4, %v3761_v19  ;;  %v3269_v49 = vadd.f32 %v4082_v56, %v5719_v54  ;;  %v4084_v26 = vadd.f32 %v4053_v53, %v3957_v8  ;;  %v3140_v5 = vpop.f32.mrb[15].mxu0 }
 0x347   : > { %3489 = vst.msk [vmem:[%s5732_s29 + $0x24] sm:$0xf] %vm3479_vm4, %v3759_v7  ;;  %v3267_v39 = vadd.f32 %v4083_v17, %v5719_v54  ;;  %v4085_v42 = vadd.f32 %v3140_v5, %v2560_v4 }
 0x348   : > { %v3301_v41 = vmax.f32 %v3269_v49, 0.0  ;;  %v3270_v15 = vadd.f32 %v4084_v26, %v5719_v54 }
 0x349   : > { %v3299_v60 = vmax.f32 %v3267_v39, 0.0  ;;  %v3268_v3 = vadd.f32 %v4085_v42, %v5719_v54 }
 0x34a   : > { %3333 = vst.msk [vmem:[%s5725_s25 + $0x70] sm:$0xff] %vm653_vm0, %v3301_v41  ;;  %v3764_v16 = vpack.c.bf16 %v3301_v41, %v3301_v41  ;;  %v3302_v27 = vmax.f32 %v3270_v15, 0.0  ;;  %v3960_v37 = vpop.f32.mrb[16].mxu1 }
 0x34b   : > { %3331 = vst.msk [vmem:[%s5725_s25 + $0x60] sm:$0xff] %vm653_vm0, %v3299_v60  ;;  %v3762_v63 = vpack.c.bf16 %v3299_v60, %v3299_v60  ;;  %v3300_v34 = vmax.f32 %v3268_v3, 0.0  ;;  %v4056_v44 = vpop.f32.mrb[16].mxu0  ;;  %v2573_v36 = vpop.f32.mrb[17].mxu1 }
 0x34c   : > { %3494 = vst.msk [vmem:[%s5732_s29 + $0x38] sm:$0xf] %vm3479_vm4, %v3764_v16  ;;  %v3765_v12 = vpack.c.bf16 %v3302_v27, %v3302_v27  ;;  %v4086_v55 = vadd.f32 %v4056_v44, %v3960_v37  ;;  %v3153_v40 = vpop.f32.mrb[17].mxu0  ;;  %v3961_v38 = vpop.f32.mrb[18].mxu1 }
 0x34d   : > { %3334 = vst.msk [vmem:[%s5725_s25 + $0x78] sm:$0xff] %vm653_vm0, %v3302_v27  ;;  %3332 = vst.msk [vmem:[%s5725_s25 + $0x68] sm:$0xff] %vm653_vm0, %v3300_v34  ;;  %v3763_v28 = vpack.c.bf16 %v3300_v34, %v3300_v34  ;;  %v4087_v47 = vadd.f32 %v3153_v40, %v2573_v36  ;;  %v4057_v20 = vpop.f32.mrb[18].mxu0  ;;  %v2576_v0 = vpop.f32.mrb[19].mxu1 }
 0x34e   : > { %3492 = vst.msk [vmem:[%s5732_s29 + $0x30] sm:$0xf] %vm3479_vm4, %v3762_v63  ;;  %3495 = vst.msk [vmem:[%s5732_s29 + $0x3c] sm:$0xf] %vm3479_vm4, %v3765_v12  ;;  %v3273_v31 = vadd.f32 %v4086_v55, %v5719_v54  ;;  %v4088_v32 = vadd.f32 %v4057_v20, %v3961_v38  ;;  %v3156_v25 = vpop.f32.mrb[19].mxu0 }
 0x34f   : > { %3493 = vst.msk [vmem:[%s5732_s29 + $0x34] sm:$0xf] %vm3479_vm4, %v3763_v28  ;;  %v3271_v61 = vadd.f32 %v4087_v47, %v5719_v54  ;;  %v4089_v18 = vadd.f32 %v3156_v25, %v2576_v0 }
 0x350   : > { %v3305_v14 = vmax.f32 %v3273_v31, 0.0  ;;  %v3274_v24 = vadd.f32 %v4088_v32, %v5719_v54 }
 0x351   : > { %v3303_v43 = vmax.f32 %v3271_v61, 0.0  ;;  %v3272_v1 = vadd.f32 %v4089_v18, %v5719_v54 }
 0x352   : > { %3337 = vst.msk [vmem:[%s5725_s25 + $0x90] sm:$0xff] %vm653_vm0, %v3305_v14  ;;  %v3768_v10 = vpack.c.bf16 %v3305_v14, %v3305_v14  ;;  %v3306_v52 = vmax.f32 %v3274_v24, 0.0  ;;  %v3964_v13 = vpop.f32.mrb[20].mxu1 }
 0x353   : > { %3335 = vst.msk [vmem:[%s5725_s25 + $0x80] sm:$0xff] %vm653_vm0, %v3303_v43  ;;  %v3766_v29 = vpack.c.bf16 %v3303_v43, %v3303_v43  ;;  %v3304_v9 = vmax.f32 %v3272_v1, 0.0  ;;  %v4060_v45 = vpop.f32.mrb[20].mxu0  ;;  %v2589_v58 = vpop.f32.mrb[21].mxu1 }
 0x354   : > { %3498 = vst.msk [vmem:[%s5732_s29 + $0x48] sm:$0xf] %vm3479_vm4, %v3768_v10  ;;  %v3769_v46 = vpack.c.bf16 %v3306_v52, %v3306_v52  ;;  %v4090_v35 = vadd.f32 %v4060_v45, %v3964_v13  ;;  %v3169_v2 = vpop.f32.mrb[21].mxu0  ;;  %v3965_v62 = vpop.f32.mrb[22].mxu1 }
 0x355   : > { %3338 = vst.msk [vmem:[%s5725_s25 + $0x98] sm:$0xff] %vm653_vm0, %v3306_v52  ;;  %3336 = vst.msk [vmem:[%s5725_s25 + $0x88] sm:$0xff] %vm653_vm0, %v3304_v9  ;;  %v3767_v6 = vpack.c.bf16 %v3304_v9, %v3304_v9  ;;  %v4091_v11 = vadd.f32 %v3169_v2, %v2589_v58  ;;  %v4061_v21 = vpop.f32.mrb[22].mxu0  ;;  %v2592_v57 = vpop.f32.mrb[23].mxu1 }
 0x356   : > { %3496 = vst.msk [vmem:[%s5732_s29 + $0x40] sm:$0xf] %vm3479_vm4, %v3766_v29  ;;  %3499 = vst.msk [vmem:[%s5732_s29 + $0x4c] sm:$0xf] %vm3479_vm4, %v3769_v46  ;;  %v3277_v22 = vadd.f32 %v4090_v35, %v5719_v54  ;;  %v4092_v30 = vadd.f32 %v4061_v21, %v3965_v62  ;;  %v3172_v50 = vpop.f32.mrb[23].mxu0 }
 0x357   : > { %3497 = vst.msk [vmem:[%s5732_s29 + $0x44] sm:$0xf] %vm3479_vm4, %v3767_v6  ;;  %v3275_v59 = vadd.f32 %v4091_v11, %v5719_v54  ;;  %v4093_v33 = vadd.f32 %v3172_v50, %v2592_v57 }
 0x358   : > { %v3309_v51 = vmax.f32 %v3277_v22, 0.0  ;;  %v3278_v19 = vadd.f32 %v4092_v30, %v5719_v54 }
 0x359   : > { %v3307_v56 = vmax.f32 %v3275_v59, 0.0  ;;  %v3276_v23 = vadd.f32 %v4093_v33, %v5719_v54 }
 0x35a   : > { %3341 = vst.msk [vmem:[%s5725_s25 + $0xb0] sm:$0xff] %vm653_vm0, %v3309_v51  ;;  %v3772_v48 = vpack.c.bf16 %v3309_v51, %v3309_v51  ;;  %v3310_v7 = vmax.f32 %v3278_v19, 0.0  ;;  %v3968_v53 = vpop.f32.mrb[24].mxu1 }
 0x35b   : > { %3339 = vst.msk [vmem:[%s5725_s25 + $0xa0] sm:$0xff] %vm653_vm0, %v3307_v56  ;;  %v3770_v17 = vpack.c.bf16 %v3307_v56, %v3307_v56  ;;  %v3308_v8 = vmax.f32 %v3276_v23, 0.0  ;;  %v4064_v49 = vpop.f32.mrb[24].mxu0  ;;  %v2605_v5 = vpop.f32.mrb[25].mxu1 }
 0x35c   : > { %3502 = vst.msk [vmem:[%s5732_s29 + $0x58] sm:$0xf] %vm3479_vm4, %v3772_v48  ;;  %v3773_v26 = vpack.c.bf16 %v3310_v7, %v3310_v7  ;;  %v4094_v4 = vadd.f32 %v4064_v49, %v3968_v53  ;;  %v3185_v39 = vpop.f32.mrb[25].mxu0  ;;  %v3969_v15 = vpop.f32.mrb[26].mxu1 }
 0x35d   : > { %3342 = vst.msk [vmem:[%s5725_s25 + $0xb8] sm:$0xff] %vm653_vm0, %v3310_v7  ;;  %3340 = vst.msk [vmem:[%s5725_s25 + $0xa8] sm:$0xff] %vm653_vm0, %v3308_v8  ;;  %v3771_v42 = vpack.c.bf16 %v3308_v8, %v3308_v8  ;;  %v4095_v41 = vadd.f32 %v3185_v39, %v2605_v5  ;;  %v4065_v60 = vpop.f32.mrb[26].mxu0  ;;  %v2608_v27 = vpop.f32.mrb[27].mxu1 }
 0x35e   : > { %3500 = vst.msk [vmem:[%s5732_s29 + $0x50] sm:$0xf] %vm3479_vm4, %v3770_v17  ;;  %3503 = vst.msk [vmem:[%s5732_s29 + $0x5c] sm:$0xf] %vm3479_vm4, %v3773_v26  ;;  %v3281_v3 = vadd.f32 %v4094_v4, %v5719_v54  ;;  %v4096_v16 = vadd.f32 %v4065_v60, %v3969_v15  ;;  %v3188_v63 = vpop.f32.mrb[27].mxu0 }
 0x35f   : > { %3501 = vst.msk [vmem:[%s5732_s29 + $0x54] sm:$0xf] %vm3479_vm4, %v3771_v42  ;;  %v3279_v34 = vadd.f32 %v4095_v41, %v5719_v54  ;;  %v4097_v37 = vadd.f32 %v3188_v63, %v2608_v27 }
 0x360   : > { %v3313_v44 = vmax.f32 %v3281_v3, 0.0  ;;  %v3282_v12 = vadd.f32 %v4096_v16, %v5719_v54 }
 0x361   : > { %v3311_v55 = vmax.f32 %v3279_v34, 0.0  ;;  %v3280_v36 = vadd.f32 %v4097_v37, %v5719_v54 }
 0x362   : > { %3345 = vst.msk [vmem:[%s5725_s25 + $0xd0] sm:$0xff] %vm653_vm0, %v3313_v44  ;;  %v3776_v40 = vpack.c.bf16 %v3313_v44, %v3313_v44  ;;  %v3314_v28 = vmax.f32 %v3282_v12, 0.0  ;;  %v3972_v20 = vpop.f32.mrb[28].mxu1 }
 0x363   : > { %3343 = vst.msk [vmem:[%s5725_s25 + $0xc0] sm:$0xff] %vm653_vm0, %v3311_v55  ;;  %v3774_v47 = vpack.c.bf16 %v3311_v55, %v3311_v55  ;;  %v3312_v38 = vmax.f32 %v3280_v36, 0.0  ;;  %v4068_v31 = vpop.f32.mrb[28].mxu0  ;;  %v2621_v25 = vpop.f32.mrb[29].mxu1 }
 0x364   : > { %3506 = vst.msk [vmem:[%s5732_s29 + $0x68] sm:$0xf] %vm3479_vm4, %v3776_v40  ;;  %v3777_v32 = vpack.c.bf16 %v3314_v28, %v3314_v28  ;;  %v4098_v0 = vadd.f32 %v4068_v31, %v3972_v20  ;;  %v3201_v61 = vpop.f32.mrb[29].mxu0  ;;  %v3973_v24 = vpop.f32.mrb[30].mxu1 }
 0x365   : > { %3346 = vst.msk [vmem:[%s5725_s25 + $0xd8] sm:$0xff] %vm653_vm0, %v3314_v28  ;;  %3344 = vst.msk [vmem:[%s5725_s25 + $0xc8] sm:$0xff] %vm653_vm0, %v3312_v38  ;;  %v3775_v18 = vpack.c.bf16 %v3312_v38, %v3312_v38  ;;  %v4099_v14 = vadd.f32 %v3201_v61, %v2621_v25  ;;  %v4069_v43 = vpop.f32.mrb[30].mxu0  ;;  %v2624_v52 = vpop.f32.mrb[31].mxu1 }
 0x366   : > { %3504 = vst.msk [vmem:[%s5732_s29 + $0x60] sm:$0xf] %vm3479_vm4, %v3774_v47  ;;  %3507 = vst.msk [vmem:[%s5732_s29 + $0x6c] sm:$0xf] %vm3479_vm4, %v3777_v32  ;;  %v3285_v1 = vadd.f32 %v4098_v0, %v5719_v54  ;;  %v4100_v10 = vadd.f32 %v4069_v43, %v3973_v24  ;;  %v3204_v29 = vpop.f32.mrb[31].mxu0 }
 0x367   : > { %3505 = vst.msk [vmem:[%s5732_s29 + $0x64] sm:$0xf] %vm3479_vm4, %v3775_v18  ;;  %v3283_v9 = vadd.f32 %v4099_v14, %v5719_v54  ;;  %v4101_v13 = vadd.f32 %v3204_v29, %v2624_v52 }
 0x368   : > { %v3317_v45 = vmax.f32 %v3285_v1, 0.0  ;;  %v3286_v46 = vadd.f32 %v4100_v10, %v5719_v54 }
 0x369   : > { %v3315_v35 = vmax.f32 %v3283_v9, 0.0  ;;  %v3284_v58 = vadd.f32 %v4101_v13, %v5719_v54 }
 0x36a   : > { %3349 = vst.msk [vmem:[%s5725_s25 + $0xf0] sm:$0xff] %vm653_vm0, %v3317_v45  ;;  %v3780_v2 = vpack.c.bf16 %v3317_v45, %v3317_v45  ;;  %v3318_v6 = vmax.f32 %v3286_v46, 0.0 }
 0x36b   : > { %3347 = vst.msk [vmem:[%s5725_s25 + $0xe0] sm:$0xff] %vm653_vm0, %v3315_v35  ;;  %v3778_v11 = vpack.c.bf16 %v3315_v35, %v3315_v35  ;;  %v3316_v62 = vmax.f32 %v3284_v58, 0.0 }
 0x36c   : > { %3510 = vst.msk [vmem:[%s5732_s29 + $0x78] sm:$0xf] %vm3479_vm4, %v3780_v2  ;;  %v3781_v21 = vpack.c.bf16 %v3318_v6, %v3318_v6 }
 0x36d   : > { %3350 = vst.msk [vmem:[%s5725_s25 + $0xf8] sm:$0xff] %vm653_vm0, %v3318_v6  ;;  %3348 = vst.msk [vmem:[%s5725_s25 + $0xe8] sm:$0xff] %vm653_vm0, %v3316_v62  ;;  %v3779_v22 = vpack.c.bf16 %v3316_v62, %v3316_v62 }
 0x36e   : > { %3508 = vst.msk [vmem:[%s5732_s29 + $0x70] sm:$0xf] %vm3479_vm4, %v3778_v11  ;;  %3511 = vst.msk [vmem:[%s5732_s29 + $0x7c] sm:$0xf] %vm3479_vm4, %v3781_v21 }
 0x36f   : > { %3509 = vst.msk [vmem:[%s5732_s29 + $0x74] sm:$0xf] %vm3479_vm4, %v3779_v22 }
 0x370 PF: > { %s17_s21 = sadd.s32 1, %s4220_s21  }
 0x371   : > { %p14_p5 = scmp.ge.s32.totalorder %s17_s21, 4  }
 0x373   :  { %16 = sbr.rel (!%p14_p5) target bundleno = 1 (0x1), region = 89 }

// kernel: smp_encoder_forward.5
= control target key start
LH: loop header
LB: loop body
LE: loop exit
PB: predicated region body
PF: predicated region fallthrough
CT: control target
= control target key end

     0   :  { %8 = vsyncpa [#allocation4], 0  ;;  %s2487_s0 = inlined_call_operand.vmem [shape: bf16[8,4,4,4,32], index: 0, kind: input, shape index: {}]   ;;  %s2488_s1 = inlined_call_operand.vmem [shape: bf16[4,128,32], index: 1, kind: input, shape index: {}]   ;;  %s2489_s2 = inlined_call_operand.vmem [shape: f32[1,32], index: 2, kind: input, shape index: {}]   ;;  %s2490_s3 = inlined_call_operand.hbm [shape: f32[128,32], index: 3, kind: output, shape index: {}]  }
   0x1   :  { %10 = vsyncpa [#allocation4 + $0x1], 0  ;;  %s2071_s12 = smov 0   ;;  %s2073_s13 = smov 0  }
   0x2   :  { %s2075_s14 = smov 0   ;;  %s2077_s15 = smov 0  }
   0x3 LB: > { %s2092_s16 = sadd.s32 4294967295, %s2042_s15   ;;  %s1439_s17 = sadd.s32 4294967294, %s2042_s15   ;;  %s2042_s15 = sphi %s2077_s15, %s2497_s15   ;;  %s2038_s14 = sphi %s2075_s14, %s2496_s14   ;;  %s2034_s13 = sphi %s2073_s13, %s2495_s13   ;;  %s2030_s12 = sphi %s2071_s12, %s2494_s12  }
   0x4   : > { %s2096_s18 = sadd.s32 1, %s2042_s15   ;;  %s91_s19 = sadd.s32 1, %s2038_s14 }
   0x5   : > { %s88_s20 = ssub.s32 %s2042_s15, %s2096_s18  ;;  %p101_p0 = scmp.ne.s32.totalorder %s2038_s14, %s2034_s13 }
   0x6   : > { %p89_p1 = scmp.eq.s32.totalorder %s88_s20, 0  ;;  %p102_p2 = scmp.eq.s32.totalorder %s2092_s16, 1 }
   0x7   : > { %p107_p3 = scmp.ne.s32.totalorder %s2034_s13, %s2030_s12  ;;  %p108_p4 = scmp.eq.s32.totalorder %s1439_s17, 1 }
   0x8   : > { %s2107_s21 = scalar_select %p89_p1, %s2038_s14, %s91_s19  }
   0x9   : > { %p2109_p5 = por %p102_p2, %p101_p0  ;;  %p2113_p6 = por %p108_p4, %p107_p3 }
   0xa   : > { %p1442_p7 = scmp.ge.s32.totalorder %s2042_s15, 1  ;;  %p142_p8 = scmp.lt.s32.totalorder %s2042_s15, 3 }
   0xc   : > { %p143_p9 = pnand %p1442_p7, %p142_p8 }
   0xd   : > { %s1444_s24 = sshll.u32 (!%p143_p9), %s2092_s16, 2  ;;  %v1916_v0 = vld [vmem:[%s2488_s1 + $0x40] sm:$0xff] (!%p143_p9)   ;;  %v2044_v1 = vmov (!%p143_p9), 0.0   ;;  %v1918_v3 = vld [vmem:[%s2488_s1 + $0x48] sm:$0xff] (!%p143_p9)   ;;  %s2045_s11 = smov (!%p143_p9), 32   ;;  %vm230_vm0 = vcmask (!%p143_p9), 257024  }
   0xe   : > { %146 = sbr.rel (%p143_p9) target bundleno = 455 (0x1c7), region = 32  ;;  %p2123_p10 = scmp.lt.s32.totalorder (!%p143_p9), %s1444_s24, 7  ;;  %183 = vst [vmem:[#allocation2 + $0x38] sm:$0x1f] (!%p143_p9), %v2044_v1  ;;  %184 = vst [vmem:[#allocation2 + $0x40] sm:$0x1f] (!%p143_p9), %v2044_v1  ;;  %1631 = vmatprep.subr.bf16.mxu1 (!%p143_p9), %v1916_v0 }
   0xf   : > { %176 = vst [vmem:[#allocation2] sm:$0x1f] (!%p143_p9), %v2044_v1  ;;  %177 = vst [vmem:[#allocation2 + $0x8] sm:$0x1f] (!%p143_p9), %v2044_v1  ;;  %v1917_v2 = vld [vmem:[%s2488_s1 + $0x80] sm:$0xff] (!%p143_p9)   ;;  %1632 = vmatpush3.bf16.msra.mxu1 (!%p143_p9), %v1916_v0  ;;  %v1919_v4 = vld [vmem:[%s2488_s1 + $0x88] sm:$0xff] (!%p143_p9)  }
  0x10   : > { %178 = vst [vmem:[#allocation2 + $0x10] sm:$0x1f] (!%p143_p9), %v2044_v1  ;;  %179 = vst [vmem:[#allocation2 + $0x18] sm:$0x1f] (!%p143_p9), %v2044_v1  ;;  %1679 = vmatprep.subr.bf16.mxu0 (!%p143_p9), %v1917_v2  ;;  %1633 = vmatprep.subr.bf16.mxu1 (!%p143_p9), %v1918_v3  ;;  %s2046_s17 = smov (!%p143_p9), 64   ;;  %s2047_s30 = smov (!%p143_p9), 96  }
  0x11   : > { %180 = vst [vmem:[#allocation2 + $0x20] sm:$0x1f] (!%p143_p9), %v2044_v1  ;;  %181 = vst [vmem:[#allocation2 + $0x28] sm:$0x1f] (!%p143_p9), %v2044_v1  ;;  %1680 = vmatpush3.bf16.msra.mxu0 (!%p143_p9), %v1917_v2  ;;  %vm344_vm1 = vcmask (!%p143_p9), 519424   ;;  %vm458_vm2 = vcmask (!%p143_p9), 781824  }
  0x12   : > { %182 = vst [vmem:[#allocation2 + $0x30] sm:$0x1f] (!%p143_p9), %v2044_v1  ;;  %185 = vst [vmem:[#allocation2 + $0x48] sm:$0x1f] (!%p143_p9), %v2044_v1  ;;  %1681 = vmatprep.subr.bf16.mxu0 (!%p143_p9), %v1919_v4  ;;  %vm571_vm3 = vcmask (!%p143_p9), 1044224   ;;  %s164_s28 = sand.u32 (!%p143_p9), 1, %s2034_s13  }
  0x13   : > { %186 = vst [vmem:[#allocation2 + $0x50] sm:$0x1f] (!%p143_p9), %v2044_v1  ;;  %187 = vst [vmem:[#allocation2 + $0x58] sm:$0x1f] (!%p143_p9), %v2044_v1  ;;  %1634 = vmatpush3.bf16.msra.mxu1 (!%p143_p9), %v1918_v3  ;;  %vm1354_vm4 = vcmask (!%p143_p9), 261120   ;;  %s1582_s7 = sshll.u32 (!%p143_p9), %s2092_s16, 10 }
  0x14   : > { %188 = vst [vmem:[#allocation2 + $0x60] sm:$0x1f] (!%p143_p9), %v2044_v1  ;;  %189 = vst [vmem:[#allocation2 + $0x68] sm:$0x1f] (!%p143_p9), %v2044_v1  ;;  %s2446_s16 = scalar_lea.sflag (!%p143_p9), [#allocation4], %s164_s28  ;;  %s2048_s9 = smov (!%p143_p9), [#allocation3]  }
  0x15   : > { %190 = vst [vmem:[#allocation2 + $0x70] sm:$0x1f] %v2044_v1  ;;  %191 = vst [vmem:[#allocation2 + $0x78] sm:$0x1f] %v2044_v1  ;;  %s2499_s24 = smov (!%p2123_p10, %s1444_s24), 7  ;;  %1682 = vmatpush3.bf16.msra.mxu0 %v1919_v4  ;;  %s1984_s19 = sshll.u32 %s2048_s9, 4  ;;  %s1985_s19 = int_to_ptr.vmem [resolvable:$false] %s1984_s19 }
  0x16   : > { %192 = vst [vmem:[#allocation2 + $0x80] sm:$0x1f] %v2044_v1  ;;  %193 = vst [vmem:[#allocation2 + $0x88] sm:$0x1f] %v2044_v1  ;;  %s1581_s5 = sshll.u32 %s2499_s24, 5  ;;  %s1986_s20 = scalar_lea.vmem %s1985_s19, 2048 }
  0x17   : > { %194 = vst [vmem:[#allocation2 + $0x90] sm:$0x1f] %v2044_v1  ;;  %195 = vst [vmem:[#allocation2 + $0x98] sm:$0x1f] %v2044_v1  ;;  %s2141_s10 = scalar_lea.vmem %s2487_s0, %s1581_s5  ;;  %s1443_s5 = sshll.u32 %s164_s28, 6 }
  0x18   : > { %v1468_v5 = vld [vmem:[%s2141_s10 + $0x32] sm:$0x3]  ;;  %v1469_v6 = vld [vmem:[%s2141_s10 + $0x34] sm:$0x3]  ;;  %v1463_v7 = vld [vmem:[%s2141_s10 + $0x10] sm:$0x3] }
  0x19   : > { %v269_v8 = vunpack.c.l.bf16 %v1468_v5  ;;  %v270_v9 = vunpack.c.l.bf16 %v1469_v6  ;;  %v1464_v10 = vld [vmem:[%s2141_s10 + $0x12] sm:$0x3]  ;;  %v264_v11 = vunpack.c.l.bf16 %v1463_v7  ;;  %v1479_v12 = vld [vmem:[%s2141_s10 + $0x8] sm:$0x3]  ;;  %v1480_v13 = vld [vmem:[%s2141_s10 + $0xa] sm:$0x3] }
  0x1a   : > { %v265_v14 = vunpack.c.l.bf16 %v1464_v10  ;;  %v378_v15 = vunpack.c.l.bf16 %v1479_v12  ;;  %v379_v16 = vunpack.c.l.bf16 %v1480_v13  ;;  %v1465_v17 = vld [vmem:[%s2141_s10 + $0x14] sm:$0x3]  ;;  %v1467_v18 = vld [vmem:[%s2141_s10 + $0x30] sm:$0x3]  ;;  %v1466_v19 = vld [vmem:[%s2141_s10 + $0x16] sm:$0x3] }
  0x1b   : > { %v1806_v20 = vpack.i.bf16 %v270_v9, %v269_v8  ;;  %v266_v21 = vunpack.c.l.bf16 %v1465_v17  ;;  %v268_v22 = vunpack.c.l.bf16 %v1467_v18  ;;  %v1470_v23 = vld [vmem:[%s2141_s10 + $0x36] sm:$0x3]  ;;  %v1481_v24 = vld [vmem:[%s2141_s10 + $0xc] sm:$0x3]  ;;  %v1482_v25 = vld [vmem:[%s2141_s10 + $0xe] sm:$0x3]  ;;  %v267_v28 = vunpack.c.l.bf16 %v1466_v19 }
  0x1c   : > { %v1796_v26 = vpack.i.bf16 %v265_v14, %v264_v11  ;;  %v1811_v27 = vpack.i.bf16 %v379_v16, %v378_v15  ;;  %v271_v29 = vunpack.c.l.bf16 %v1470_v23  ;;  %v380_v31 = vunpack.c.l.bf16 %v1481_v24  ;;  %v1485_v33 = vld [vmem:[%s2141_s10 + $0x2c] sm:$0x3]  ;;  %v1486_v34 = vld [vmem:[%s2141_s10 + $0x2e] sm:$0x3]  ;;  %v1483_v35 = vld [vmem:[%s2141_s10 + $0x28] sm:$0x3] }
  0x1d   : > { %1807 = vrot.lane.b32.xlu1 %v1806_v20, %s2045_s11  ;;  %v1801_v30 = vpack.i.bf16 %v268_v22, %v266_v21  ;;  %v381_v32 = vunpack.c.l.bf16 %v1482_v25  ;;  %v1484_v36 = vld [vmem:[%s2141_s10 + $0x2a] sm:$0x3]  ;;  %v384_v38 = vunpack.c.l.bf16 %v1485_v33  ;;  %v385_v39 = vunpack.c.l.bf16 %v1486_v34  ;;  %v477_v43 = vld [vmem:[%s2141_s10 + $0x4] sm:$0x3]  ;;  %v478_v44 = vld [vmem:[%s2141_s10 + $0x6] sm:$0x3] }
  0x1e   : > { %1797 = vrot.lane.b32.xlu0 %v1796_v26, %s2045_s11  ;;  %v1821_v37 = vpack.i.bf16 %v271_v29, %v267_v28  ;;  %v382_v41 = vunpack.c.l.bf16 %v1483_v35  ;;  %v383_v42 = vunpack.c.l.bf16 %v1484_v36  ;;  %v475_v45 = vld [vmem:[%s2141_s10] sm:$0x3]  ;;  %v476_v46 = vld [vmem:[%s2141_s10 + $0x2] sm:$0x3]  ;;  %v493_v48 = vunpack.c.l.bf16 %v477_v43  ;;  %v481_v53 = vld [vmem:[%s2141_s10 + $0x24] sm:$0x3] }
  0x1f   : > { %v1816_v40 = vpack.i.bf16 %v381_v32, %v380_v31  ;;  %v1831_v47 = vpack.i.bf16 %v385_v39, %v384_v38  ;;  %v494_v49 = vunpack.c.l.bf16 %v478_v44  ;;  %v491_v51 = vunpack.c.l.bf16 %v475_v45  ;;  %v482_v54 = vld [vmem:[%s2141_s10 + $0x26] sm:$0x3]  ;;  %v479_v55 = vld [vmem:[%s2141_s10 + $0x20] sm:$0x3]  ;;  %v480_v56 = vld [vmem:[%s2141_s10 + $0x22] sm:$0x3] }
  0x20   : > { %v1826_v50 = vpack.i.bf16 %v383_v42, %v382_v41  ;;  %v492_v52 = vunpack.c.l.bf16 %v476_v46  ;;  %v2174_v57 = vld [vmem:[%s2141_s10 + $0x54] sm:$0x3]  ;;  %v2177_v58 = vld [vmem:[%s2141_s10 + $0x70] sm:$0x3]  ;;  %v1452_v59 = vld [vmem:[%s2141_s10 + $0x3a] sm:$0x3]  ;;  %v497_v63 = vunpack.c.l.bf16 %v481_v53  ;;  %v498_v0 = vunpack.c.l.bf16 %v482_v54 }
  0x21   : > { %1812 = vrot.lane.b32.xlu1 %v1811_v27, %s2046_s17  ;;  %v1453_v60 = vld [vmem:[%s2141_s10 + $0x3c] sm:$0x3]  ;;  %v1447_v61 = vld [vmem:[%s2141_s10 + $0x18] sm:$0x3]  ;;  %v1841_v62 = vpack.i.bf16 %v494_v49, %v493_v48  ;;  %v2184_v1 = vld [vmem:[%s2141_s10 + $0x50] sm:$0x3]  ;;  %v495_v7 = vunpack.c.l.bf16 %v479_v55  ;;  %v496_v8 = vunpack.c.l.bf16 %v480_v56  ;;  %v218_v9 = vunpack.c.l.bf16 %v1452_v59 }
  0x22   : > { %1802 = vrot.lane.b32.xlu0 %v1801_v30, %s2045_s11  ;;  %v2187_v2 = vld [vmem:[%s2141_s10 + $0x52] sm:$0x3]  ;;  %v1448_v3 = vld [vmem:[%s2141_s10 + $0x1a] sm:$0x3]  ;;  %v1449_v4 = vld [vmem:[%s2141_s10 + $0x1c] sm:$0x3]  ;;  %v1836_v6 = vpack.i.bf16 %v492_v52, %v491_v51  ;;  %v219_v14 = vunpack.c.l.bf16 %v1453_v60  ;;  %v213_v15 = vunpack.c.l.bf16 %v1447_v61  ;;  %v274_v18 = vunpack.c.l.bf16 %v2174_v57 }
  0x23   : > { %v1451_v5 = vld [vmem:[%s2141_s10 + $0x38] sm:$0x3]  ;;  %v1450_v10 = vld [vmem:[%s2141_s10 + $0x1e] sm:$0x3]  ;;  %v1920_v12 = vld [vmem:[%s2488_s1 + $0x50] sm:$0xff]   ;;  %v214_v20 = vunpack.c.l.bf16 %v1448_v3  ;;  %v215_v21 = vunpack.c.l.bf16 %v1449_v4  ;;  %v1851_v24 = vpack.i.bf16 %v498_v0, %v497_v63  ;;  %v276_v25 = vunpack.c.l.bf16 %v2177_v58  ;;  %s2417_s6 = scalar_lea.vmem [#allocation3], %s1443_s5 }
  0x24   : > { %v1454_v11 = vld [vmem:[%s2141_s10 + $0x3e] sm:$0x3]  ;;  %v2199_v13 = vld [vmem:[%s2141_s10 + $0x48] sm:$0x3]  ;;  %v1921_v16 = vld [vmem:[%s2488_s1 + $0x90] sm:$0xff]   ;;  %v217_v22 = vunpack.c.l.bf16 %v1451_v5  ;;  %1635 = vmatprep.subr.bf16.mxu1 %v1920_v12  ;;  %v216_v27 = vunpack.c.l.bf16 %v1450_v10  ;;  %v1846_v29 = vpack.i.bf16 %v496_v8, %v495_v7  ;;  %v272_v30 = vunpack.c.l.bf16 %v2184_v1  ;;  %s1377_s8 = sshll.u32 %s2417_s6, 4  ;;  %s2436_s8 = int_to_ptr.vmem [resolvable:$true] %s1377_s8 }
  0x25   : > { %1822 = vrot.lane.b32.xlu1 %v1821_v37, %s2045_s11  ;;  %v1922_v17 = vld [vmem:[%s2488_s1 + $0x58] sm:$0xff]   ;;  %v2209_v19 = vld [vmem:[%s2141_s10 + $0x4a] sm:$0x3]  ;;  %236 = vst.msk [vmem:[#allocation2 + $0x39] sm:$0xf] %vm230_vm0, %v218_v9  ;;  %v220_v28 = vunpack.c.l.bf16 %v1454_v11  ;;  %1683 = vmatprep.subr.bf16.mxu0 %v1921_v16  ;;  %v273_v31 = vunpack.c.l.bf16 %v2187_v2  ;;  %v1924_v34 = vld [vmem:[%s2488_s1 + $0x60] sm:$0xff]   ;;  %v386_v35 = vunpack.c.l.bf16 %v2199_v13  ;;  %v1861_v38 = vpack.i.bf16 %v276_v25, %v274_v18  ;;  %p1987_p0 = scmp.lt.s32.totalorder %s2436_s8, %s1985_s19 }
  0x26   : > { %1817 = vrot.lane.b32.xlu0 %v1816_v40, %s2046_s17  ;;  %v1923_v23 = vld [vmem:[%s2488_s1 + $0x98] sm:$0xff]   ;;  %v2218_v26 = vld [vmem:[%s2141_s10 + $0x72] sm:$0x3]  ;;  %237 = vst.msk [vmem:[#allocation2 + $0x41] sm:$0xf] %vm230_vm0, %v219_v14  ;;  %1636 = vmatpush3.bf16.msra.mxu1 %v1920_v12  ;;  %v1925_v37 = vld [vmem:[%s2488_s1 + $0xa0] sm:$0xff]   ;;  %v387_v39 = vunpack.c.l.bf16 %v2209_v19 }
  0x27   : > { %231 = vst.msk [vmem:[#allocation2 + $0x9] sm:$0xf] %vm230_vm0, %v213_v15  ;;  %v1477_v32 = vld [vmem:[%s2141_s10 + $0x74] sm:$0x3]  ;;  %232 = vst.msk [vmem:[#allocation2 + $0x11] sm:$0xf] %vm230_vm0, %v214_v20  ;;  %1684 = vmatpush3.bf16.msra.mxu0 %v1921_v16  ;;  %1637 = vmatprep.subr.bf16.mxu1 %v1922_v17  ;;  %v277_v40 = vunpack.c.l.bf16 %v2218_v26 }
  0x28   : > { %233 = vst.msk [vmem:[#allocation2 + $0x19] sm:$0xf] %vm230_vm0, %v215_v21  ;;  %235 = vst.msk [vmem:[#allocation2 + $0x31] sm:$0xf] %vm230_vm0, %v217_v22  ;;  %v2230_v33 = vld [vmem:[%s2141_s10 + $0x56] sm:$0x3]  ;;  %1685 = vmatprep.subr.bf16.mxu0 %v1923_v23  ;;  %v278_v41 = vunpack.c.l.bf16 %v1477_v32  ;;  %v1871_v60 = vpack.i.bf16 %v387_v39, %v386_v35 }
  0x29   : > { %1832 = vrot.lane.b32.xlu1 %v1831_v47, %s2046_s17  ;;  %234 = vst.msk [vmem:[#allocation2 + $0x21] sm:$0xf] %vm230_vm0, %v216_v27  ;;  %238 = vst.msk [vmem:[#allocation2 + $0x49] sm:$0xf] %vm230_vm0, %v220_v28  ;;  %v1478_v36 = vld [vmem:[%s2141_s10 + $0x76] sm:$0x3]  ;;  %v1856_v47 = vpack.i.bf16 %v273_v31, %v272_v30  ;;  %v275_v54 = vunpack.c.l.bf16 %v2230_v33 }
  0x2a   : > { %1827 = vrot.lane.b32.xlu0 %v1826_v50, %s2046_s17  ;;  %v1489_v42 = vld [vmem:[%s2141_s10 + $0x4c] sm:$0x3]  ;;  %v1490_v43 = vld [vmem:[%s2141_s10 + $0x4e] sm:$0x3]  ;;  %v1457_v44 = vld [vmem:[%s2141_s10 + $0x5c] sm:$0x3]  ;;  %1638 = vmatpush3.bf16.msra.mxu1 %v1922_v17  ;;  %v279_v61 = vunpack.c.l.bf16 %v1478_v36  ;;  %v1866_v2 = vpack.i.bf16 %v278_v41, %v277_v40 }
  0x2b   : > { %v1459_v45 = vld [vmem:[%s2141_s10 + $0x78] sm:$0x3]  ;;  %v223_v48 = vunpack.c.l.bf16 %v1457_v44  ;;  %v1456_v50 = vld [vmem:[%s2141_s10 + $0x5a] sm:$0x3]  ;;  %1686 = vmatpush3.bf16.msra.mxu0 %v1923_v23  ;;  %1639 = vmatprep.subr.bf16.mxu1 %v1924_v34  ;;  %v1926_v52 = vld [vmem:[%s2488_s1 + $0x68] sm:$0xff]   ;;  %v388_v3 = vunpack.c.l.bf16 %v1489_v42  ;;  %v389_v4 = vunpack.c.l.bf16 %v1490_v43 }
  0x2c   : > { %v1455_v46 = vld [vmem:[%s2141_s10 + $0x58] sm:$0x3]  ;;  %v225_v49 = vunpack.c.l.bf16 %v1459_v45  ;;  %v222_v53 = vunpack.c.l.bf16 %v1456_v50  ;;  %v1493_v55 = vld [vmem:[%s2141_s10 + $0x6c] sm:$0x3]  ;;  %v1494_v56 = vld [vmem:[%s2141_s10 + $0x6e] sm:$0x3]  ;;  %1687 = vmatprep.subr.bf16.mxu0 %v1925_v37  ;;  %v1881_v13 = vpack.i.bf16 %v279_v61, %v275_v54 }
  0x2d   : > { %1842 = vrot.lane.b32.xlu1 %v1841_v62, %s2047_s30  ;;  %v221_v51 = vunpack.c.l.bf16 %v1455_v46  ;;  %v1927_v57 = vld [vmem:[%s2488_s1 + $0xa8] sm:$0xff]   ;;  %241 = vst.msk [vmem:[#allocation2 + $0x69] sm:$0xf] %vm230_vm0, %v223_v48  ;;  %v1460_v58 = vld [vmem:[%s2141_s10 + $0x7a] sm:$0x3]  ;;  %v1928_v5 = vld [vmem:[%s2488_s1 + $0x70] sm:$0xff]   ;;  %v392_v14 = vunpack.c.l.bf16 %v1493_v55  ;;  %v393_v15 = vunpack.c.l.bf16 %v1494_v56  ;;  %v1876_v17 = vpack.i.bf16 %v389_v4, %v388_v3 }
  0x2e   : > { %1837 = vrot.lane.b32.xlu0 %v1836_v6, %s2047_s30  ;;  %243 = vst.msk [vmem:[#allocation2 + $0x81] sm:$0xf] %vm230_vm0, %v225_v49  ;;  %v1461_v59 = vld [vmem:[%s2141_s10 + $0x7c] sm:$0x3]  ;;  %v1491_v62 = vld [vmem:[%s2141_s10 + $0x68] sm:$0x3]  ;;  %v226_v0 = vunpack.c.l.bf16 %v1460_v58  ;;  %1640 = vmatpush3.bf16.msra.mxu1 %v1924_v34 }
  0x2f   : > { %239 = vst.msk [vmem:[#allocation2 + $0x59] sm:$0xf] %vm230_vm0, %v221_v51  ;;  %v1492_v63 = vld [vmem:[%s2141_s10 + $0x6a] sm:$0x3]  ;;  %240 = vst.msk [vmem:[#allocation2 + $0x61] sm:$0xf] %vm230_vm0, %v222_v53  ;;  %v227_v1 = vunpack.c.l.bf16 %v1461_v59  ;;  %1688 = vmatpush3.bf16.msra.mxu0 %v1925_v37  ;;  %1641 = vmatprep.subr.bf16.mxu1 %v1926_v52  ;;  %v390_v18 = vunpack.c.l.bf16 %v1491_v62  ;;  %v1891_v25 = vpack.i.bf16 %v393_v15, %v392_v14 }
  0x30   : > { %244 = vst.msk [vmem:[#allocation2 + $0x89] sm:$0xf] %vm230_vm0, %v226_v0  ;;  %v1458_v6 = vld [vmem:[%s2141_s10 + $0x5e] sm:$0x3]  ;;  %v485_v8 = vld [vmem:[%s2141_s10 + $0x44] sm:$0x3]  ;;  %1689 = vmatprep.subr.bf16.mxu0 %v1927_v57  ;;  %v391_v19 = vunpack.c.l.bf16 %v1492_v63 }
  0x31   : > { %1852 = vrot.lane.b32.xlu1 %v1851_v24, %s2047_s30  ;;  %245 = vst.msk [vmem:[#allocation2 + $0x91] sm:$0xf] %vm230_vm0, %v227_v1  ;;  %v1462_v7 = vld [vmem:[%s2141_s10 + $0x7e] sm:$0x3]  ;;  %v486_v9 = vld [vmem:[%s2141_s10 + $0x46] sm:$0x3]  ;;  %v224_v11 = vunpack.c.l.bf16 %v1458_v6  ;;  %v501_v26 = vunpack.c.l.bf16 %v485_v8 }
  0x32   : > { %1847 = vrot.lane.b32.xlu0 %v1846_v29, %s2047_s30  ;;  %v1929_v10 = vld [vmem:[%s2488_s1 + $0xb0] sm:$0xff]   ;;  %v228_v12 = vunpack.c.l.bf16 %v1462_v7  ;;  %v483_v16 = vld [vmem:[%s2141_s10 + $0x40] sm:$0x3]  ;;  %v484_v20 = vld [vmem:[%s2141_s10 + $0x42] sm:$0x3]  ;;  %1642 = vmatpush3.bf16.msra.mxu1 %v1926_v52  ;;  %v502_v27 = vunpack.c.l.bf16 %v486_v9  ;;  %v1886_v30 = vpack.i.bf16 %v391_v19, %v390_v18 }
  0x33   : > { %242 = vst.msk [vmem:[#allocation2 + $0x71] sm:$0xf] %vm230_vm0, %v224_v11  ;;  %1690 = vmatpush3.bf16.msra.mxu0 %v1927_v57  ;;  %1643 = vmatprep.subr.bf16.mxu1 %v1928_v5  ;;  %v1930_v21 = vld [vmem:[%s2488_s1 + $0x78] sm:$0xff]   ;;  %v489_v22 = vld [vmem:[%s2141_s10 + $0x64] sm:$0x3]  ;;  %v499_v31 = vunpack.c.l.bf16 %v483_v16  ;;  %v500_v32 = vunpack.c.l.bf16 %v484_v20 }
  0x34   : > { %246 = vst.msk [vmem:[#allocation2 + $0x99] sm:$0xf] %vm230_vm0, %v228_v12  ;;  %v490_v23 = vld [vmem:[%s2141_s10 + $0x66] sm:$0x3]  ;;  %1691 = vmatprep.subr.bf16.mxu0 %v1929_v10  ;;  %v1933_v24 = vld [vmem:[%s2488_s1 + $0xb8] sm:$0xff]   ;;  %v1901_v35 = vpack.i.bf16 %v502_v27, %v501_v26  ;;  %v505_v36 = vunpack.c.l.bf16 %v489_v22 }
  0x35   : > { %1862 = vrot.lane.b32.xlu1 %v1861_v38, %s2045_s11  ;;  %v487_v28 = vld [vmem:[%s2141_s10 + $0x60] sm:$0x3]  ;;  %v488_v29 = vld [vmem:[%s2141_s10 + $0x62] sm:$0x3]  ;;  %v506_v37 = vunpack.c.l.bf16 %v490_v23  ;;  %v1896_v38 = vpack.i.bf16 %v500_v32, %v499_v31 }
  0x36   : > { %1857 = vrot.lane.b32.xlu0 %v1856_v47, %s2045_s11  ;;  %1644 = vmatpush3.bf16.msra.mxu1 %v1928_v5  ;;  %v2304_v33 = vld [vmem:[%s2488_s1] sm:$0xff]   ;;  %v503_v39 = vunpack.c.l.bf16 %v487_v28  ;;  %v504_v40 = vunpack.c.l.bf16 %v488_v29 }
  0x37   : > { %1692 = vmatpush3.bf16.msra.mxu0 %v1929_v10  ;;  %1645 = vmatprep.subr.bf16.mxu1 %v1930_v21  ;;  %v2309_v34 = vld [vmem:[%s2488_s1 + $0xc0] sm:$0xff]   ;;  %v1911_v41 = vpack.i.bf16 %v506_v37, %v505_v36  ;;  %v1942_v37 = vld [vmem:[%s2488_s1 + $0x8] sm:$0xff]  }
  0x38   : > { %1693 = vmatprep.subr.bf16.mxu0 %v1933_v24  ;;  %v1906_v42 = vpack.i.bf16 %v504_v40, %v503_v39 }
  0x39   : > { %1872 = vrot.lane.b32.xlu1 %v1871_v60, %s2046_s17 }
  0x3a   : > { %1867 = vrot.lane.b32.xlu0 %v1866_v2, %s2045_s11  ;;  %1646 = vmatpush3.bf16.msra.mxu1 %v1930_v21 }
  0x3b   : > { %1694 = vmatpush3.bf16.msra.mxu0 %v1933_v24  ;;  %1655 = vmatprep.subr.bf16.mxu1 %v2304_v33 }
  0x3c   : > { %1703 = vmatprep.subr.bf16.mxu0 %v2309_v34 }
  0x3d   : > { %1882 = vrot.lane.b32.xlu1 %v1881_v13, %s2045_s11 }
  0x3e   : > { %1877 = vrot.lane.b32.xlu0 %v1876_v17, %s2046_s17 }
  0x41   : > { %1892 = vrot.lane.b32.xlu1 %v1891_v25, %s2046_s17 }
  0x42   : > { %1887 = vrot.lane.b32.xlu0 %v1886_v30, %s2046_s17  ;;  %s2434_s17 = scalar_lea.hbm %s2490_s3, %s1582_s7 }
  0x45   : > { %1902 = vrot.lane.b32.xlu1 %v1901_v35, %s2047_s30 }
  0x46   : > { %1897 = vrot.lane.b32.xlu0 %v1896_v38, %s2047_s30 }
  0x49   : > { %1912 = vrot.lane.b32.xlu1 %v1911_v41, %s2047_s30 }
  0x4a   : > { %1907 = vrot.lane.b32.xlu0 %v1906_v42, %s2047_s30  ;;  %s1980_s30 = scalar_lea.vmem %s2436_s8, 1024 }
  0x4b   : > { %p1981_p11 = scmp.ne.s32.totalorder %s2436_s8, %s1980_s30  ;;  %p1988_p1 = scmp.lt.s32.totalorder %s1986_s20, %s1980_s30 }
  0x4d   : > { %p1982_p12 = pnand %p1981_p11, %p2109_p5  ;;  %p1989_p2 = por %p1988_p1, %p1987_p0 }
  0x4f   : > { %p1983_p13 = pneg %p1982_p12 }
  0x51   : > { %p1990_p3 = pnand %p1989_p2, %p1983_p13 }
  0x8f   : > { %v1808_v43 = vpop.permute.xlu1 %1807 }
  0x90   : > { %v1810_v44 = vunpack.i.h.bf16 %v1808_v43  ;;  %v1809_v45 = vunpack.i.l.bf16 %v1808_v43  ;;  %v1798_v46 = vpop.permute.xlu0 %1797 }
  0x91   : > { %v1800_v47 = vunpack.i.h.bf16 %v1798_v46  ;;  %v1799_v48 = vunpack.i.l.bf16 %v1798_v46 }
  0x92   : > { %350 = vst.msk [vmem:[#allocation2 + $0x38] sm:$0xf] %vm344_vm1, %v1809_v45  ;;  %351 = vst.msk [vmem:[#allocation2 + $0x40] sm:$0xf] %vm344_vm1, %v1810_v44 }
  0x93   : > { %345 = vst.msk [vmem:[#allocation2 + $0x8] sm:$0xf] %vm344_vm1, %v1799_v48  ;;  %346 = vst.msk [vmem:[#allocation2 + $0x10] sm:$0xf] %vm344_vm1, %v1800_v47  ;;  %v1813_v49 = vpop.permute.xlu1 %1812  ;;  %v1943_v48 = vld [vmem:[%s2488_s1 + $0xc8] sm:$0xff]  }
  0x94   : > { %v1815_v50 = vunpack.i.h.bf16 %v1813_v49  ;;  %v1814_v51 = vunpack.i.l.bf16 %v1813_v49  ;;  %v1803_v52 = vpop.permute.xlu0 %1802 }
  0x95   : > { %v1805_v53 = vunpack.i.h.bf16 %v1803_v52  ;;  %v1804_v54 = vunpack.i.l.bf16 %v1803_v52 }
  0x96   : > { %459 = vst.msk [vmem:[#allocation2 + $0x1] sm:$0xf] %vm458_vm2, %v1814_v51  ;;  %460 = vst.msk [vmem:[#allocation2 + $0x9] sm:$0xf] %vm458_vm2, %v1815_v50  ;;  %v1944_v50 = vld [vmem:[%s2488_s1 + $0x10] sm:$0xff]  }
  0x97   : > { %347 = vst.msk [vmem:[#allocation2 + $0x18] sm:$0xf] %vm344_vm1, %v1804_v54  ;;  %349 = vst.msk [vmem:[#allocation2 + $0x30] sm:$0xf] %vm344_vm1, %v1805_v53  ;;  %v1823_v55 = vpop.permute.xlu1 %1822 }
  0x98   : > { %v1825_v56 = vunpack.i.h.bf16 %v1823_v55  ;;  %v1824_v57 = vunpack.i.l.bf16 %v1823_v55  ;;  %v1818_v58 = vpop.permute.xlu0 %1817 }
  0x99   : > { %v1820_v59 = vunpack.i.h.bf16 %v1818_v58  ;;  %v1819_v60 = vunpack.i.l.bf16 %v1818_v58 }
  0x9a   : > { %348 = vst.msk [vmem:[#allocation2 + $0x20] sm:$0xf] %vm344_vm1, %v1824_v57  ;;  %352 = vst.msk [vmem:[#allocation2 + $0x48] sm:$0xf] %vm344_vm1, %v1825_v56  ;;  %v1945_v56 = vld [vmem:[%s2488_s1 + $0xd0] sm:$0xff]  }
  0x9b   : > { %461 = vst.msk [vmem:[#allocation2 + $0x11] sm:$0xf] %vm458_vm2, %v1819_v60  ;;  %462 = vst.msk [vmem:[#allocation2 + $0x19] sm:$0xf] %vm458_vm2, %v1820_v59  ;;  %v1833_v61 = vpop.permute.xlu1 %1832 }
  0x9c   : > { %v1835_v62 = vunpack.i.h.bf16 %v1833_v61  ;;  %v1834_v63 = vunpack.i.l.bf16 %v1833_v61  ;;  %v1828_v0 = vpop.permute.xlu0 %1827 }
  0x9d   : > { %v1830_v1 = vunpack.i.h.bf16 %v1828_v0  ;;  %v1829_v2 = vunpack.i.l.bf16 %v1828_v0 }
  0x9e   : > { %465 = vst.msk [vmem:[#allocation2 + $0x39] sm:$0xf] %vm458_vm2, %v1834_v63  ;;  %466 = vst.msk [vmem:[#allocation2 + $0x41] sm:$0xf] %vm458_vm2, %v1835_v62  ;;  %v1947_v62 = vld [vmem:[%s2488_s1 + $0xd8] sm:$0xff]  }
  0x9f   : > { %463 = vst.msk [vmem:[#allocation2 + $0x29] sm:$0xf] %vm458_vm2, %v1829_v2  ;;  %464 = vst.msk [vmem:[#allocation2 + $0x31] sm:$0xf] %vm458_vm2, %v1830_v1  ;;  %v1843_v3 = vpop.permute.xlu1 %1842 }
  0xa0   : > { %v1845_v4 = vunpack.i.h.bf16 %v1843_v3  ;;  %v1844_v5 = vunpack.i.l.bf16 %v1843_v3  ;;  %v1838_v6 = vpop.permute.xlu0 %1837  ;;  %v1948_v3 = vld [vmem:[%s2488_s1 + $0x20] sm:$0xff]  }
  0xa1   : > { %v1840_v7 = vunpack.i.h.bf16 %v1838_v6  ;;  %v1839_v8 = vunpack.i.l.bf16 %v1838_v6  ;;  %v1949_v6 = vld [vmem:[%s2488_s1 + $0xe0] sm:$0xff]  }
  0xa2   : > { %574 = vst.msk [vmem:[#allocation2 + $0x10] sm:$0xf] %vm571_vm3, %v1844_v5  ;;  %575 = vst.msk [vmem:[#allocation2 + $0x18] sm:$0xf] %vm571_vm3, %v1845_v4 }
  0xa3   : > { %572 = vst.msk [vmem:[#allocation2] sm:$0xf] %vm571_vm3, %v1839_v8  ;;  %573 = vst.msk [vmem:[#allocation2 + $0x8] sm:$0xf] %vm571_vm3, %v1840_v7  ;;  %v1853_v9 = vpop.permute.xlu1 %1852  ;;  %v1952_v7 = vld [vmem:[%s2488_s1 + $0x28] sm:$0xff]  }
  0xa4   : > { %v1855_v10 = vunpack.i.h.bf16 %v1853_v9  ;;  %v1854_v11 = vunpack.i.l.bf16 %v1853_v9  ;;  %v1848_v12 = vpop.permute.xlu0 %1847  ;;  %v1955_v8 = vld [vmem:[%s2488_s1 + $0xe8] sm:$0xff]  }
  0xa5   : > { %v1850_v13 = vunpack.i.h.bf16 %v1848_v12  ;;  %v1849_v14 = vunpack.i.l.bf16 %v1848_v12 }
  0xa6   : > { %578 = vst.msk [vmem:[#allocation2 + $0x38] sm:$0xf] %vm571_vm3, %v1854_v11  ;;  %579 = vst.msk [vmem:[#allocation2 + $0x40] sm:$0xf] %vm571_vm3, %v1855_v10  ;;  %v1958_v11 = vld [vmem:[%s2488_s1 + $0x30] sm:$0xff]  }
  0xa7   : > { %576 = vst.msk [vmem:[#allocation2 + $0x28] sm:$0xf] %vm571_vm3, %v1849_v14  ;;  %577 = vst.msk [vmem:[#allocation2 + $0x30] sm:$0xf] %vm571_vm3, %v1850_v13  ;;  %v1863_v15 = vpop.permute.xlu1 %1862 }
  0xa8   : > { %v1865_v16 = vunpack.i.h.bf16 %v1863_v15  ;;  %v1864_v17 = vunpack.i.l.bf16 %v1863_v15  ;;  %v1858_v18 = vpop.permute.xlu0 %1857 }
  0xa9   : > { %v1860_v19 = vunpack.i.h.bf16 %v1858_v18  ;;  %v1859_v20 = vunpack.i.l.bf16 %v1858_v18  ;;  %v1932_v21 = vld [vmem:[#allocation2 + $0x11] ss:$8 sps:$4 sm:$0xff]  }
  0xaa   : > { %355 = vst.msk [vmem:[#allocation2 + $0x68] sm:$0xf] %vm344_vm1, %v1864_v17  ;;  %357 = vst.msk [vmem:[#allocation2 + $0x80] sm:$0xf] %vm344_vm1, %v1865_v16  ;;  %v1931_v22 = vld [vmem:[#allocation2 + $0x1] ss:$8 sps:$4 sm:$0xff]  }
  0xab   : > { %353 = vst.msk [vmem:[#allocation2 + $0x58] sm:$0xf] %vm344_vm1, %v1859_v20  ;;  %354 = vst.msk [vmem:[#allocation2 + $0x60] sm:$0xf] %vm344_vm1, %v1860_v19  ;;  %v1873_v23 = vpop.permute.xlu1 %1872  ;;  %v704_v27 = vpack.c.bf16 %v1932_v21, %v1931_v22  ;;  %v1934_v28 = vld [vmem:[#allocation2 + $0x8] ss:$8 sps:$4 sm:$0xff]  }
  0xac   : > { %v1875_v24 = vunpack.i.h.bf16 %v1873_v23  ;;  %v1874_v25 = vunpack.i.l.bf16 %v1873_v23  ;;  %v1868_v26 = vpop.permute.xlu0 %1867  ;;  %v1935_v29 = vld [vmem:[#allocation2 + $0x18] ss:$8 sps:$4 sm:$0xff]   ;;  %v1961_v17 = vld [vmem:[%s2488_s1 + $0xf0] sm:$0xff]  }
  0xad   : > { %v1870_v30 = vunpack.i.h.bf16 %v1868_v26  ;;  %v1869_v31 = vunpack.i.l.bf16 %v1868_v26  ;;  %v1937_v32 = vld [vmem:[#allocation2 + $0x39] ss:$8 sps:$4 sm:$0xff]   ;;  %1647 = vmatprep.mubr.bf16.mxu1 %v704_v27  ;;  %v999_v35 = vpack.c.bf16 %v1935_v29, %v1934_v28  ;;  %v1964_v19 = vld [vmem:[#allocation2 + $0x9] ss:$8 sps:$4 sm:$0xff]  }
  0xae   : > { %467 = vst.msk [vmem:[#allocation2 + $0x51] sm:$0xf] %vm458_vm2, %v1874_v25  ;;  %468 = vst.msk [vmem:[#allocation2 + $0x59] sm:$0xf] %vm458_vm2, %v1875_v24  ;;  %v1936_v36 = vld [vmem:[#allocation2 + $0x29] ss:$8 sps:$4 sm:$0xff]  }
  0xaf   : > { %358 = vst.msk [vmem:[#allocation2 + $0x88] sm:$0xf] %vm344_vm1, %v1869_v31  ;;  %359 = vst.msk [vmem:[#allocation2 + $0x90] sm:$0xf] %vm344_vm1, %v1870_v30  ;;  %v1883_v38 = vpop.permute.xlu1 %1882  ;;  %1695 = vmatprep.mubr.bf16.mxu0 %v999_v35  ;;  %v705_v42 = vpack.c.bf16 %v1937_v32, %v1936_v36  ;;  %v1939_v43 = vld [vmem:[#allocation2 + $0x30] ss:$8 sps:$4 sm:$0xff]  }
  0xb0   : > { %v1885_v39 = vunpack.i.h.bf16 %v1883_v38  ;;  %v1884_v40 = vunpack.i.l.bf16 %v1883_v38  ;;  %v1878_v41 = vpop.permute.xlu0 %1877  ;;  %v1940_v44 = vld [vmem:[#allocation2 + $0x40] ss:$8 sps:$4 sm:$0xff]   ;;  %v1963_v13 = vld [vmem:[#allocation2 + $0x10] ss:$8 sps:$4 sm:$0xff]  }
  0xb1   : > { %v1880_v45 = vunpack.i.h.bf16 %v1878_v41  ;;  %v1879_v46 = vunpack.i.l.bf16 %v1878_v41  ;;  %1648 = vmatmul.mubr.bf16.vlgmr.msra.gmra.mrb[0].mxu1 %v705_v42  ;;  %v1000_v47 = vpack.c.bf16 %v1940_v44, %v1939_v43  ;;  %v1962_v12 = vld [vmem:[#allocation2] ss:$8 sps:$4 sm:$0xff]   ;;  %v1966_v23 = vld [vmem:[%s2488_s1 + $0x38] sm:$0xff]  }
  0xb2   : > { %356 = vst.msk [vmem:[#allocation2 + $0x70] sm:$0xf] %vm344_vm1, %v1884_v40  ;;  %360 = vst.msk [vmem:[#allocation2 + $0x98] sm:$0xf] %vm344_vm1, %v1885_v39  ;;  %1656 = vmatpush3.bf16.msra.mxu1 %v2304_v33  ;;  %v1965_v20 = vld [vmem:[#allocation2 + $0x19] ss:$8 sps:$4 sm:$0xff]   ;;  %v636_v27 = vpack.c.bf16 %v1963_v13, %v1962_v12 }
  0xb3   : > { %469 = vst.msk [vmem:[#allocation2 + $0x61] sm:$0xf] %vm458_vm2, %v1879_v46  ;;  %470 = vst.msk [vmem:[#allocation2 + $0x69] sm:$0xf] %vm458_vm2, %v1880_v45  ;;  %v1893_v49 = vpop.permute.xlu1 %1892  ;;  %1696 = vmatmul.mubr.bf16.vlgmr.msra.gmra.mrb[0].mxu0 %v1000_v47  ;;  %1657 = vmatprep.subr.bf16.mxu1 %v1942_v37  ;;  %v1967_v29 = vld [vmem:[%s2488_s1 + $0xf8] sm:$0xff]   ;;  %v1189_v30 = vpack.c.bf16 %v1965_v20, %v1964_v19 }
  0xb4   : > { %v1895_v51 = vunpack.i.h.bf16 %v1893_v49  ;;  %v1894_v52 = vunpack.i.l.bf16 %v1893_v49  ;;  %v1888_v53 = vpop.permute.xlu0 %1887  ;;  %1704 = vmatpush3.bf16.msra.mxu0 %v2309_v34  ;;  %v1946_v34 = vld [vmem:[%s2488_s1 + $0x18] sm:$0xff]   ;;  %v1968_v31 = vld [vmem:[#allocation2 + $0x28] ss:$8 sps:$4 sm:$0xff]  }
  0xb5   : > { %v1890_v54 = vunpack.i.h.bf16 %v1888_v53  ;;  %v1889_v55 = vunpack.i.l.bf16 %v1888_v53  ;;  %1705 = vmatprep.subr.bf16.mxu0 %v1943_v48  ;;  %v1969_v32 = vld [vmem:[#allocation2 + $0x38] ss:$8 sps:$4 sm:$0xff]  }
  0xb6   : > { %473 = vst.msk [vmem:[#allocation2 + $0x89] sm:$0xf] %vm458_vm2, %v1894_v52  ;;  %474 = vst.msk [vmem:[#allocation2 + $0x91] sm:$0xf] %vm458_vm2, %v1895_v51  ;;  %1658 = vmatpush3.bf16.msra.mxu1 %v1942_v37  ;;  %v1970_v35 = vld [vmem:[#allocation2 + $0x31] ss:$8 sps:$4 sm:$0xff]   ;;  %v637_v41 = vpack.c.bf16 %v1969_v32, %v1968_v31 }
  0xb7   : > { %471 = vst.msk [vmem:[#allocation2 + $0x79] sm:$0xf] %vm458_vm2, %v1889_v55  ;;  %472 = vst.msk [vmem:[#allocation2 + $0x81] sm:$0xf] %vm458_vm2, %v1890_v54  ;;  %v1903_v33 = vpop.permute.xlu1 %1902  ;;  %1659 = vmatprep.subr.bf16.mxu1 %v1944_v50  ;;  %v1971_v36 = vld [vmem:[#allocation2 + $0x41] ss:$8 sps:$4 sm:$0xff]  }
  0xb8   : > { %v1905_v57 = vunpack.i.h.bf16 %v1903_v33  ;;  %v1904_v58 = vunpack.i.l.bf16 %v1903_v33  ;;  %v1898_v59 = vpop.permute.xlu0 %1897  ;;  %1706 = vmatpush3.bf16.msra.mxu0 %v1943_v48  ;;  %v1190_v43 = vpack.c.bf16 %v1971_v36, %v1970_v35  ;;  %v1575_v54 = vld [vmem:[%s2489_s2] ss:$0 sm:$0xff] }
  0xb9   : > { %v1900_v60 = vunpack.i.h.bf16 %v1898_v59  ;;  %v1899_v61 = vunpack.i.l.bf16 %v1898_v59  ;;  %1707 = vmatprep.subr.bf16.mxu0 %v1945_v56 }
  0xba   : > { %582 = vst.msk [vmem:[#allocation2 + $0x60] sm:$0xf] %vm571_vm3, %v1904_v58  ;;  %583 = vst.msk [vmem:[#allocation2 + $0x68] sm:$0xf] %vm571_vm3, %v1905_v57  ;;  %1660 = vmatpush3.bf16.msra.mxu1 %v1944_v50 }
  0xbb   : > { %580 = vst.msk [vmem:[#allocation2 + $0x50] sm:$0xf] %vm571_vm3, %v1899_v61  ;;  %581 = vst.msk [vmem:[#allocation2 + $0x58] sm:$0xf] %vm571_vm3, %v1900_v60  ;;  %v1913_v63 = vpop.permute.xlu1 %1912  ;;  %1661 = vmatprep.subr.bf16.mxu1 %v1946_v34 }
  0xbc   : > { %v1915_v0 = vunpack.i.h.bf16 %v1913_v63  ;;  %v1914_v1 = vunpack.i.l.bf16 %v1913_v63  ;;  %v1908_v2 = vpop.permute.xlu0 %1907  ;;  %1708 = vmatpush3.bf16.msra.mxu0 %v1945_v56 }
  0xbd   : > { %v1910_v4 = vunpack.i.h.bf16 %v1908_v2  ;;  %v1909_v5 = vunpack.i.l.bf16 %v1908_v2  ;;  %1709 = vmatprep.subr.bf16.mxu0 %v1947_v62 }
  0xbe   : > { %586 = vst.msk [vmem:[#allocation2 + $0x88] sm:$0xf] %vm571_vm3, %v1914_v1  ;;  %587 = vst.msk [vmem:[#allocation2 + $0x90] sm:$0xf] %vm571_vm3, %v1915_v0  ;;  %1662 = vmatpush3.bf16.msra.mxu1 %v1946_v34 }
  0xbf   : > { %584 = vst.msk [vmem:[#allocation2 + $0x78] sm:$0xf] %vm571_vm3, %v1909_v5  ;;  %585 = vst.msk [vmem:[#allocation2 + $0x80] sm:$0xf] %vm571_vm3, %v1910_v4  ;;  %1663 = vmatprep.subr.bf16.mxu1 %v1948_v3 }
  0xc0   : > { %1710 = vmatpush3.bf16.msra.mxu0 %v1947_v62 }
  0xc1   : > { %v1951_v9 = vld [vmem:[#allocation2 + $0x61] ss:$8 sps:$4 sm:$0xff]   ;;  %1711 = vmatprep.subr.bf16.mxu0 %v1949_v6 }
  0xc2   : > { %v1950_v10 = vld [vmem:[#allocation2 + $0x51] ss:$8 sps:$4 sm:$0xff]   ;;  %1664 = vmatpush3.bf16.msra.mxu1 %v1948_v3  ;;  %v1973_v38 = vld [vmem:[#allocation2 + $0x60] ss:$8 sps:$4 sm:$0xff]  }
  0xc3   : > { %v706_v14 = vpack.c.bf16 %v1951_v9, %v1950_v10  ;;  %1665 = vmatprep.subr.bf16.mxu1 %v1952_v7  ;;  %v1953_v15 = vld [vmem:[#allocation2 + $0x58] ss:$8 sps:$4 sm:$0xff]   ;;  %v1954_v16 = vld [vmem:[#allocation2 + $0x68] ss:$8 sps:$4 sm:$0xff]  }
  0xc4   : > { %1712 = vmatpush3.bf16.msra.mxu0 %v1949_v6  ;;  %v1001_v21 = vpack.c.bf16 %v1954_v16, %v1953_v15  ;;  %v1972_v37 = vld [vmem:[#allocation2 + $0x50] ss:$8 sps:$4 sm:$0xff]  }
  0xc5   : > { %v1957_v18 = vld [vmem:[#allocation2 + $0x89] ss:$8 sps:$4 sm:$0xff]   ;;  %1651 = vmatprep.mubr.bf16.mxu1 %v706_v14  ;;  %1713 = vmatprep.subr.bf16.mxu0 %v1955_v8  ;;  %v1974_v39 = vld [vmem:[#allocation2 + $0x59] ss:$8 sps:$4 sm:$0xff]   ;;  %v638_v42 = vpack.c.bf16 %v1973_v38, %v1972_v37 }
  0xc6   : > { %v1956_v22 = vld [vmem:[#allocation2 + $0x79] ss:$8 sps:$4 sm:$0xff]   ;;  %1666 = vmatpush3.bf16.msra.mxu1 %v1952_v7  ;;  %1699 = vmatprep.mubr.bf16.mxu0 %v1001_v21  ;;  %v1975_v40 = vld [vmem:[#allocation2 + $0x69] ss:$8 sps:$4 sm:$0xff]  }
  0xc7   : > { %v707_v24 = vpack.c.bf16 %v1957_v18, %v1956_v22  ;;  %1667 = vmatprep.subr.bf16.mxu1 %v1958_v11  ;;  %v1959_v25 = vld [vmem:[#allocation2 + $0x80] ss:$8 sps:$4 sm:$0xff]   ;;  %v1960_v26 = vld [vmem:[#allocation2 + $0x90] ss:$8 sps:$4 sm:$0xff]   ;;  %v1191_v44 = vpack.c.bf16 %v1975_v40, %v1974_v39 }
  0xc8   : > { %1714 = vmatpush3.bf16.msra.mxu0 %v1955_v8  ;;  %v1002_v28 = vpack.c.bf16 %v1960_v26, %v1959_v25  ;;  %v1976_v45 = vld [vmem:[#allocation2 + $0x78] ss:$8 sps:$4 sm:$0xff]   ;;  %v1977_v46 = vld [vmem:[#allocation2 + $0x88] ss:$8 sps:$4 sm:$0xff]  }
  0xc9   : > { %1652 = vmatmul.mubr.bf16.gmra.mrb[4].mxu1 %v707_v24  ;;  %1715 = vmatprep.subr.bf16.mxu0 %v1961_v17  ;;  %v1978_v47 = vld [vmem:[#allocation2 + $0x81] ss:$8 sps:$4 sm:$0xff]   ;;  %v1979_v48 = vld [vmem:[#allocation2 + $0x91] ss:$8 sps:$4 sm:$0xff]   ;;  %v639_v49 = vpack.c.bf16 %v1977_v46, %v1976_v45 }
  0xca   : > { %1668 = vmatpush3.bf16.msra.mxu1 %v1958_v11  ;;  %1671 = vmatprep.mubr.bf16.mxu1 %v636_v27  ;;  %v1192_v50 = vpack.c.bf16 %v1979_v48, %v1978_v47 }
  0xcb   : > { %1700 = vmatmul.mubr.bf16.gmra.mrb[4].mxu0 %v1002_v28  ;;  %1669 = vmatprep.subr.bf16.mxu1 %v1966_v23 }
  0xcc   : > { %1716 = vmatpush3.bf16.msra.mxu0 %v1961_v17  ;;  %1719 = vmatprep.mubr.bf16.mxu0 %v1189_v30 }
  0xcd   : > { %1717 = vmatprep.subr.bf16.mxu0 %v1967_v29 }
  0xce   : > { %1670 = vmatpush3.bf16.msra.mxu1 %v1966_v23 }
  0xd0   : > { %1718 = vmatpush3.bf16.msra.mxu0 %v1967_v29 }
  0xd1   : > { %1672 = vmatmul.mubr.bf16.vlgmr.msra.gmra.mrb[0].mxu1 %v637_v41 }
  0xd2   : > { %1675 = vmatprep.mubr.bf16.mxu1 %v638_v42 }
  0xd3   : > { %1720 = vmatmul.mubr.bf16.vlgmr.msra.gmra.mrb[0].mxu0 %v1190_v43 }
  0xd4   : > { %1723 = vmatprep.mubr.bf16.mxu0 %v1191_v44 }
  0xd9   : > { %1676 = vmatmul.mubr.bf16.gmra.mrb[4].mxu1 %v639_v49 }
  0xdb   : > { %1724 = vmatmul.mubr.bf16.gmra.mrb[4].mxu0 %v1192_v50 }
 0x1a4   : > { %v1673_v51 = vpop.f32.mrb[0].mxu1 }
 0x1a5   : > { %v920_v52 = vpop.f32.mrb[1].mxu1 }
 0x1a6   : > { %v1721_v53 = vpop.f32.mrb[0].mxu0  ;;  %v1674_v55 = vpop.f32.mrb[2].mxu1 }
 0x1a7   : > { %v1727_v56 = vadd.f32 %v1721_v53, %v1673_v51  ;;  %v1292_v33 = vpop.f32.mrb[1].mxu0  ;;  %v923_v57 = vpop.f32.mrb[3].mxu1 }
 0x1a8   : > { %v1728_v58 = vadd.f32 %v1292_v33, %v920_v52  ;;  %v1722_v59 = vpop.f32.mrb[2].mxu0 }
 0x1a9   : > { %v1340_v34 = vadd.f32 %v1727_v56, %v1575_v54  ;;  %v1729_v60 = vadd.f32 %v1722_v59, %v1674_v55  ;;  %v1295_v61 = vpop.f32.mrb[3].mxu0 }
 0x1aa   : > { %v1338_v62 = vadd.f32 %v1728_v58, %v1575_v54  ;;  %v1730_v63 = vadd.f32 %v1295_v61, %v923_v57 }
 0x1ab   : > { %v1348_v0 = vmax.f32 %v1340_v34, 0.0  ;;  %v1341_v1 = vadd.f32 %v1729_v60, %v1575_v54 }
 0x1ac   : > { %v1346_v2 = vmax.f32 %v1338_v62, 0.0  ;;  %v1339_v3 = vadd.f32 %v1730_v63, %v1575_v54  ;;  %v1677_v4 = vpop.f32.mrb[4].mxu1 }
 0x1ad   : > { %1357 = vst.msk [vmem:[%s2417_s6 + $0x10] sm:$0xff] %vm1354_vm4, %v1348_v0  ;;  %v1349_v5 = vmax.f32 %v1341_v1, 0.0  ;;  %v936_v6 = vpop.f32.mrb[5].mxu1 }
 0x1ae   : > { %1355 = vst.msk [vmem:[%s2417_s6] sm:$0xff] %vm1354_vm4, %v1346_v2  ;;  %v1347_v7 = vmax.f32 %v1339_v3, 0.0  ;;  %v1725_v8 = vpop.f32.mrb[4].mxu0  ;;  %v1678_v9 = vpop.f32.mrb[6].mxu1 }
 0x1af   : > { %1358 = vst.msk [vmem:[%s2417_s6 + $0x18] sm:$0xff] %vm1354_vm4, %v1349_v5  ;;  %v1731_v10 = vadd.f32 %v1725_v8, %v1677_v4  ;;  %v1308_v11 = vpop.f32.mrb[5].mxu0  ;;  %v939_v12 = vpop.f32.mrb[7].mxu1 }
 0x1b0   : > { %1356 = vst.msk [vmem:[%s2417_s6 + $0x8] sm:$0xff] %vm1354_vm4, %v1347_v7  ;;  %v1732_v13 = vadd.f32 %v1308_v11, %v936_v6  ;;  %v1726_v14 = vpop.f32.mrb[6].mxu0 }
 0x1b1   : > { %v1344_v15 = vadd.f32 %v1731_v10, %v1575_v54  ;;  %v1733_v16 = vadd.f32 %v1726_v14, %v1678_v9  ;;  %v1311_v17 = vpop.f32.mrb[7].mxu0 }
 0x1b2   : > { %v1342_v18 = vadd.f32 %v1732_v13, %v1575_v54  ;;  %v1734_v19 = vadd.f32 %v1311_v17, %v939_v12 }
 0x1b3   : > { %v1352_v20 = vmax.f32 %v1344_v15, 0.0  ;;  %v1345_v21 = vadd.f32 %v1733_v16, %v1575_v54 }
 0x1b4   : > { %v1350_v22 = vmax.f32 %v1342_v18, 0.0  ;;  %v1343_v23 = vadd.f32 %v1734_v19, %v1575_v54 }
 0x1b5   : > { %1361 = vst.msk [vmem:[%s2417_s6 + $0x30] sm:$0xff] %vm1354_vm4, %v1352_v20  ;;  %v1353_v24 = vmax.f32 %v1345_v21, 0.0 }
 0x1b6   : > { %1359 = vst.msk [vmem:[%s2417_s6 + $0x20] sm:$0xff] %vm1354_vm4, %v1350_v22  ;;  %v1351_v25 = vmax.f32 %v1343_v23, 0.0 }
 0x1b7   : > { %1362 = vst.msk [vmem:[%s2417_s6 + $0x38] sm:$0xff] %vm1354_vm4, %v1353_v24 }
 0x1b8   : > { %1360 = vst.msk [vmem:[%s2417_s6 + $0x28] sm:$0xff] %vm1354_vm4, %v1351_v25 }
 0x1b9   : > { %1993 = shalt.err (!%p1990_p3)
}
 0x1ba   : > { %s1994_s24 = scalar_lea.hbm %s2434_s17, 1024  ;;  %s1998_s27 = scalar_lea.hbm %s2490_s3, 2048 }
 0x1bb   : > { %p1995_p4 = scmp.ne.s32.totalorder %s2434_s17, %s1994_s24  ;;  %p1999_p9 = scmp.lt.u32.totalorder %s2434_s17, %s2490_s3 }
 0x1bc   : > { %p2000_p10 = scmp.lt.u32.totalorder %s1998_s27, %s1994_s24  ;;  %p2002_p12 = scmp.lt.u32.totalorder %s1994_s24, %s2434_s17 }
 0x1bd   : > { %p1996_p7 = pnand %p1995_p4, %p2109_p5 }
 0x1be   : > { %p2001_p11 = por %p2000_p10, %p1999_p9 }
 0x1bf   : > { %p1997_p8 = pneg %p1996_p7 }
 0x1c0   : > { %p2003_p13 = por %p2002_p12, %p2001_p11 }
 0x1c2   : > { %p2004_p0 = pnand %p2003_p13, %p1997_p8 }
 0x1c4   : > { %2007 = shalt.err (!%p2004_p0)
}
 0x1c5   : > { %s2049_s4 = smov 128   ;;  %s2050_s5 = smov 8  }
 0x1c6   : > { %1751 = dma.vmem_to_hbm [thread:$0]  (%p2109_p5), %s2436_s8, 1024, %s2434_s17, %s2446_s16, %s2049_s4, %s2049_s4, %s2050_s5  }
 0x1c7 PF: > { %p1757_p1 = scmp.ge.s32.totalorder %s2042_s15, 2  ;;  %s1392_s6 = sand.u32 1, %s2030_s12  }
 0x1c8   : > { %s1393_s7 = scalar_lea.sflag [#allocation4], %s1392_s6 }
 0x1c9   : > { %p1754_p2 = pnand %p1757_p1, %p2113_p6 }
 0x1cb   : > { %2025 = dma.done.wait (!%p1754_p2), %s1393_s7, 1024  }
 0x1cc   : > { %2027 = vsyncadd (!%p1754_p2), %s1393_s7, 4294966272  ;;  %p13_p3 = scmp.ge.s32.totalorder %s2096_s18, 4   ;;  %s2494_s12 = smov %s2034_s13 }
 0x1cd   : > { %s2495_s13 = smov %s2038_s14  ;;  %s2496_s14 = smov %s2107_s21 }
 0x1ce   : > { %s2497_s15 = smov %s2096_s18  ;;  %15 = sbr.rel (!%p13_p3) target bundleno = 3 (0x3), region = 74 }
 0x1d5   :  { %1398 = vsyncpa [#allocation4], 1 }
 0x1d6   :  { %1400 = vsyncpa [#allocation4 + $0x1], 1 }

</bundles_post_ra>
